<compile_context>
chip_gen: v7x
topology: tpu7x:2x2x1
jax: 0.10.0
libtpu: 0.0.40
codegen_flags: <defaults>
</compile_context>

<pallas_src>
import jax
import jax.numpy as jnp
import numpy as np
from jax import lax
from jax.experimental import pallas as pl
from jax.experimental.pallas import tpu as pltpu

# ----- model config (from Net2.__init__ / forward) -----
CHANNELS = 16
KERNELS = [2, 4, 8, 16, 32, 64]
NUM_GROUPS = len(KERNELS)
TOTAL_CH = CHANNELS * NUM_GROUPS        # 96
KMAX = max(KERNELS)                     # 64
SEQ = 512                               # forward hard-codes reshape to (B, 1, 512)
HIDDEN = 32
CLASSES = 2

# ----- kernel tiling config -----
TB = 128                                # samples per grid step (lanes of every block)
VROWS = 16                              # position phase: t = 16*m + v, v in [0,16)
ITERS = SEQ // VROWS                    # 32 coarse position steps per sample
K_TAPS = 80                             # contraction length (>= (VROWS-1) + KMAX = 79)
CH_PAD = 128                            # channels padded 96 -> 128 (lane-dense)
M_ROWS = VROWS * CH_PAD                 # 2048 rows of the shift-absorbed weights
P_ROWS = (ITERS - 1) * VROWS + K_TAPS   # 576 padded input rows (= SEQ + 64)
OUT_ROWS = 8                            # output rows (classes padded 2 -> 8)
MASK_START = (SEQ - KMAX + 1) // VROWS  # 28: first step that can reach an invalid t
NEG = -1e30


def net2_kernel(x_ref, w3_ref, limit_ref, cbias_ref, wfc_ref, bfc_ref, out_ref):
    tb = out_ref.shape[1]

    def conv_step(m):
        # All 6 Conv1d layers, 16 consecutive output positions, all TB samples:
        # one bf16 MXU matmul against the shift-absorbed weights.  The RHS is a
        # sublane-aligned slice of the raw input tile -- no window materialization.
        start = pl.multiple_of(m * VROWS, VROWS)
        s = x_ref[pl.ds(start, K_TAPS), :]                        # (80, TB) bf16
        return jnp.dot(w3_ref[...], s,
                       preferred_element_type=jnp.float32)        # (2048, TB) f32

    def phase_max(o):
        # max over the 16 position phases -> (128, TB); pure VPU vreg maxes.
        r = o[0:CH_PAD, :]
        for v in range(1, VROWS):
            r = jnp.maximum(r, o[v * CH_PAD:(v + 1) * CH_PAD, :])
        return r

    def body_fast(m, acc):                                        # every position valid
        return jnp.maximum(acc, phase_max(conv_step(m)))

    def body_masked(m, acc):                                      # tail: mask invalid t
        o = conv_step(m)
        o = jnp.where(limit_ref[...] >= m * VROWS, o, NEG)        # (2048,1) valid-length
        return jnp.maximum(acc, phase_max(o))

    acc0 = jnp.full((CH_PAD, tb), NEG, jnp.float32)
    acc = lax.fori_loop(0, MASK_START, body_fast, acc0)
    acc = lax.fori_loop(MASK_START, ITERS, body_masked, acc)

    # Bias + ReLU commuted past the max-pool (both monotone, >=449 valid positions
    # per channel).  Dropout is identity in eval mode.  fc1/fc2 pre-folded into
    # wfc/bfc; fc matmul reads the pooled value from registers; lane-dense store.
    h = jnp.maximum(acc + cbias_ref[...], 0.0)                    # (128, TB)
    out_ref[...] = (jnp.dot(wfc_ref[...], h,
                            preferred_element_type=jnp.float32) + bfc_ref[...])


@jax.jit
def net2_forward(x, params):
    wc, bc, w1, b1, w2, b2 = params
    B = x.shape[0]
    x = jnp.reshape(x, (B, SEQ)).astype(jnp.float32)

    # Raw input only: pad batch to a multiple of TB, transpose to (positions,
    # batch), pad positions to 576 rows, cast bf16 (~1.1 KiB/sample of HBM read).
    B_pad = ((B + TB - 1) // TB) * TB
    xp = jnp.pad(x, ((0, B_pad - B), (0, 0)))                     # (B_pad, 512)
    xt = jnp.pad(xp.T.astype(jnp.bfloat16),
                 ((0, P_ROWS - SEQ), (0, 0)))                     # (576, B_pad)

    # Shift-absorbed conv weights: W3[v*128 + c, d] = wc[c, d - v] (0 elsewhere).
    wc_pad = jnp.zeros((CH_PAD, KMAX), jnp.float32).at[:TOTAL_CH].set(wc)
    w3 = jnp.zeros((VROWS, CH_PAD, K_TAPS), jnp.float32)
    for v in range(VROWS):
        w3 = w3.at[v, :, v:v + KMAX].set(wc_pad)
    w3 = w3.reshape(M_ROWS, K_TAPS).astype(jnp.bfloat16)

    # Per-row valid-length: position t = 16*m + v is valid iff 16*m <= 512 - k - v.
    ks = np.ones((CH_PAD,), np.int32)                             # padded chans: never masked
    for g, k in enumerate(KERNELS):
        ks[g * CHANNELS:(g + 1) * CHANNELS] = k
    limit = SEQ - ks[None, :] - np.arange(VROWS, dtype=np.int32)[:, None]
    limit = jnp.asarray(limit.reshape(M_ROWS, 1), dtype=jnp.int32)

    cbias = jnp.zeros((CH_PAD, 1), jnp.float32).at[:TOTAL_CH].set(bc)

    # Fold fc1/fc2 exactly (no nonlinearity between them); pad classes 2 -> 8 rows.
    wfc = jnp.zeros((OUT_ROWS, CH_PAD), jnp.float32).at[:CLASSES, :TOTAL_CH].set((w1 @ w2).T)
    bfc = jnp.zeros((OUT_ROWS, 1), jnp.float32).at[:CLASSES, 0].set((b1 @ w2 + b2)[0])

    n_tiles = B_pad // TB
    flops = n_tiles * 2 * (ITERS * M_ROWS * K_TAPS * TB + OUT_ROWS * CH_PAD * TB)
    bytes_accessed = (xt.size * 2 + w3.size * 2 + limit.size * 4 + cbias.size * 4
                      + wfc.size * 4 + bfc.size * 4 + OUT_ROWS * B_pad * 4)

    out = pl.pallas_call(
        net2_kernel,
        out_shape=jax.ShapeDtypeStruct((OUT_ROWS, B_pad), jnp.float32),
        grid_spec=pltpu.PrefetchScalarGridSpec(
            num_scalar_prefetch=0,
            grid=(n_tiles,),
            in_specs=[
                pl.BlockSpec((P_ROWS, TB), lambda i: (0, i)),        # streamed raw x tile
                pl.BlockSpec((M_ROWS, K_TAPS), lambda i: (0, 0)),    # resident conv weights
                pl.BlockSpec((M_ROWS, 1), lambda i: (0, 0)),         # resident valid-lengths
                pl.BlockSpec((CH_PAD, 1), lambda i: (0, 0)),         # resident conv bias
                pl.BlockSpec((OUT_ROWS, CH_PAD), lambda i: (0, 0)),  # resident folded fc W
                pl.BlockSpec((OUT_ROWS, 1), lambda i: (0, 0)),       # resident folded fc b
            ],
            out_specs=pl.BlockSpec((OUT_ROWS, TB), lambda i: (0, i)),
        ),
        compiler_params=pltpu.CompilerParams(dimension_semantics=("parallel",)),
        cost_estimate=pl.CostEstimate(flops=flops, transcendentals=0,
                                      bytes_accessed=bytes_accessed),
    )(xt, w3, limit, cbias, wfc, bfc)
    return out[:CLASSES, :B].T                                    # (B, 2)


def init_params(key):
    """Deterministic PyTorch-style (uniform +-1/sqrt(fan_in)) init for all layers."""
    keys = jax.random.split(key, 2 * NUM_GROUPS + 4)
    wc = jnp.zeros((TOTAL_CH, KMAX), jnp.float32)
    bc = jnp.zeros((TOTAL_CH, 1), jnp.float32)
    for g, k in enumerate(KERNELS):
        bound = 1.0 / np.sqrt(1 * k)
        w_g = jax.random.uniform(keys[2 * g], (CHANNELS, k), jnp.float32, -bound, bound)
        b_g = jax.random.uniform(keys[2 * g + 1], (CHANNELS,), jnp.float32, -bound, bound)
        wc = wc.at[g * CHANNELS:(g + 1) * CHANNELS, :k].set(w_g)
        bc = bc.at[g * CHANNELS:(g + 1) * CHANNELS, 0].set(b_g)
    b = 1.0 / np.sqrt(TOTAL_CH)
    w1 = jax.random.uniform(keys[-4], (TOTAL_CH, HIDDEN), jnp.float32, -b, b)
    b1 = jax.random.uniform(keys[-3], (1, HIDDEN), jnp.float32, -b, b)
    b = 1.0 / np.sqrt(HIDDEN)
    w2 = jax.random.uniform(keys[-2], (HIDDEN, CLASSES), jnp.float32, -b, b)
    b2 = jax.random.uniform(keys[-1], (1, CLASSES), jnp.float32, -b, b)
    return (wc, bc, w1, b1, w2, b2)


def net2_reference(x, params):
    """Pure-JAX f32 reference mirroring the PyTorch forward (eval mode)."""
    wc, bc, w1, b1, w2, b2 = params
    x = jnp.reshape(x, (x.shape[0], SEQ)).astype(jnp.float32)
    feats = []
    for g, k in enumerate(KERNELS):
        w_g = wc[g * CHANNELS:(g + 1) * CHANNELS, :k]              # (16, k)
        b_g = bc[g * CHANNELS:(g + 1) * CHANNELS, 0]               # (16,)
        l_out = SEQ - k + 1
        windows = jnp.stack([x[:, j:j + l_out] for j in range(k)], axis=-1)  # (B, l_out, k)
        conv = jnp.einsum('blk,ck->bcl', windows, w_g) + b_g[None, :, None]
        conv = jax.nn.relu(conv)
        feats.append(jnp.max(conv, axis=-1))                       # (B, 16)
    pooled = jnp.concatenate(feats, axis=1)                        # (B, 96)
    h = pooled @ w1 + b1
    return h @ w2 + b2


if __name__ == "__main__":
    key = jax.random.PRNGKey(0)
    pkey, xkey = jax.random.split(key)
    params = init_params(pkey)
    x = jax.random.normal(xkey, (2, SEQ), jnp.float32)             # torch reshapes to (B, 1, 512)

    logits = jax.block_until_ready(net2_forward(x, params))
    ref = net2_reference(x, params)
    # Conv matmul uses bf16 MXU inputs (f32 accumulation) -> bf16-level tolerance vs f32 ref.
    np.testing.assert_allclose(np.asarray(logits), np.asarray(ref), rtol=2e-2, atol=2e-2)
    print("KERNEL_OK")
</pallas_src>

<mosaic_0001>
module attributes {stable_mosaic.version = 11 : i64} {
  func.func @net2_kernel(%arg0: i32, %arg1: memref<576x128xbf16, #tpu.memory_space<vmem>>, %arg2: memref<2048x80xbf16, #tpu.memory_space<vmem>>, %arg3: memref<2048x1xi32, #tpu.memory_space<vmem>>, %arg4: memref<128x1xf32, #tpu.memory_space<vmem>>, %arg5: memref<8x128xf32, #tpu.memory_space<vmem>>, %arg6: memref<8x1xf32, #tpu.memory_space<vmem>>, %arg7: memref<8x128xf32, #tpu.memory_space<vmem>>) attributes {dimension_semantics = [#tpu.dimension_semantics<parallel>], iteration_bounds = array<i64: 1>, scalar_prefetch = 0 : i64, scratch_operands = 0 : i64, tpu.core_type = #tpu.core_type<tc>, window_params = [{transform_indices = @transform_0, window_bounds = array<i64: 576, 128>}, {pipeline_mode = #tpu.pipeline_mode<synchronous>, transform_indices = @transform_1, window_bounds = array<i64: 2048, 80>}, {pipeline_mode = #tpu.pipeline_mode<synchronous>, transform_indices = @transform_2, window_bounds = array<i64: 2048, 1>}, {pipeline_mode = #tpu.pipeline_mode<synchronous>, transform_indices = @transform_3, window_bounds = array<i64: 128, 1>}, {pipeline_mode = #tpu.pipeline_mode<synchronous>, transform_indices = @transform_4, window_bounds = array<i64: 8, 128>}, {pipeline_mode = #tpu.pipeline_mode<synchronous>, transform_indices = @transform_5, window_bounds = array<i64: 8, 1>}, {transform_indices = @transform_6, window_bounds = array<i64: 8, 128>}]} {
    %cst = arith.constant -1.000000e+30 : f32
    %0 = vector.broadcast %cst : f32 to vector<128x128xf32>
    %c0_i32 = arith.constant 0 : i32
    %c28_i32 = arith.constant 28 : i32
    %1 = arith.addi %c0_i32, %c28_i32 : i32
    %c1_i32 = arith.constant 1 : i32
    %2 = scf.for %arg8 = %c0_i32 to %1 step %c1_i32 iter_args(%arg9 = %0) -> (vector<128x128xf32>)  : i32 {
      %c16_i32 = arith.constant 16 : i32
      %16 = arith.muli %arg8, %c16_i32 : i32
      %17 = tpu.assume_multiple %16, 16 : i32
      %18 = arith.index_cast %17 : i32 to index
      %c0_13 = arith.constant 0 : index
      %19 = vector.load %arg1[%18, %c0_13] : memref<576x128xbf16, #tpu.memory_space<vmem>>, vector<80x128xbf16>
      %c0_14 = arith.constant 0 : index
      %c0_15 = arith.constant 0 : index
      %20 = vector.load %arg2[%c0_14, %c0_15] : memref<2048x80xbf16, #tpu.memory_space<vmem>>, vector<2048x80xbf16>
      %cst_16 = arith.constant dense<0.000000e+00> : vector<2048x128xf32>
      %21 = tpu.matmul %20, %19, %cst_16 {dimension_numbers = #tpu.dot_dimension_numbers<[1], [0], [0], [1], [0, 0, 1, 1], [], []>} : vector<2048x80xbf16>, vector<80x128xbf16>, vector<2048x128xf32> -> vector<2048x128xf32>
      %22 = vector.extract_strided_slice %21 {offsets = [0, 0], sizes = [128, 128], strides = [1, 1]} : vector<2048x128xf32> to vector<128x128xf32>
      %23 = vector.extract_strided_slice %21 {offsets = [128, 0], sizes = [128, 128], strides = [1, 1]} : vector<2048x128xf32> to vector<128x128xf32>
      %24 = arith.maximumf %22, %23 : vector<128x128xf32>
      %25 = vector.extract_strided_slice %21 {offsets = [256, 0], sizes = [128, 128], strides = [1, 1]} : vector<2048x128xf32> to vector<128x128xf32>
      %26 = arith.maximumf %24, %25 : vector<128x128xf32>
      %27 = vector.extract_strided_slice %21 {offsets = [384, 0], sizes = [128, 128], strides = [1, 1]} : vector<2048x128xf32> to vector<128x128xf32>
      %28 = arith.maximumf %26, %27 : vector<128x128xf32>
      %29 = vector.extract_strided_slice %21 {offsets = [512, 0], sizes = [128, 128], strides = [1, 1]} : vector<2048x128xf32> to vector<128x128xf32>
      %30 = arith.maximumf %28, %29 : vector<128x128xf32>
      %31 = vector.extract_strided_slice %21 {offsets = [640, 0], sizes = [128, 128], strides = [1, 1]} : vector<2048x128xf32> to vector<128x128xf32>
      %32 = arith.maximumf %30, %31 : vector<128x128xf32>
      %33 = vector.extract_strided_slice %21 {offsets = [768, 0], sizes = [128, 128], strides = [1, 1]} : vector<2048x128xf32> to vector<128x128xf32>
      %34 = arith.maximumf %32, %33 : vector<128x128xf32>
      %35 = vector.extract_strided_slice %21 {offsets = [896, 0], sizes = [128, 128], strides = [1, 1]} : vector<2048x128xf32> to vector<128x128xf32>
      %36 = arith.maximumf %34, %35 : vector<128x128xf32>
      %37 = vector.extract_strided_slice %21 {offsets = [1024, 0], sizes = [128, 128], strides = [1, 1]} : vector<2048x128xf32> to vector<128x128xf32>
      %38 = arith.maximumf %36, %37 : vector<128x128xf32>
      %39 = vector.extract_strided_slice %21 {offsets = [1152, 0], sizes = [128, 128], strides = [1, 1]} : vector<2048x128xf32> to vector<128x128xf32>
      %40 = arith.maximumf %38, %39 : vector<128x128xf32>
      %41 = vector.extract_strided_slice %21 {offsets = [1280, 0], sizes = [128, 128], strides = [1, 1]} : vector<2048x128xf32> to vector<128x128xf32>
      %42 = arith.maximumf %40, %41 : vector<128x128xf32>
      %43 = vector.extract_strided_slice %21 {offsets = [1408, 0], sizes = [128, 128], strides = [1, 1]} : vector<2048x128xf32> to vector<128x128xf32>
      %44 = arith.maximumf %42, %43 : vector<128x128xf32>
      %45 = vector.extract_strided_slice %21 {offsets = [1536, 0], sizes = [128, 128], strides = [1, 1]} : vector<2048x128xf32> to vector<128x128xf32>
      %46 = arith.maximumf %44, %45 : vector<128x128xf32>
      %47 = vector.extract_strided_slice %21 {offsets = [1664, 0], sizes = [128, 128], strides = [1, 1]} : vector<2048x128xf32> to vector<128x128xf32>
      %48 = arith.maximumf %46, %47 : vector<128x128xf32>
      %49 = vector.extract_strided_slice %21 {offsets = [1792, 0], sizes = [128, 128], strides = [1, 1]} : vector<2048x128xf32> to vector<128x128xf32>
      %50 = arith.maximumf %48, %49 : vector<128x128xf32>
      %51 = vector.extract_strided_slice %21 {offsets = [1920, 0], sizes = [128, 128], strides = [1, 1]} : vector<2048x128xf32> to vector<128x128xf32>
      %52 = arith.maximumf %50, %51 : vector<128x128xf32>
      %53 = arith.maximumf %arg9, %52 : vector<128x128xf32>
      scf.yield %53 : vector<128x128xf32>
    }
    %c28_i32_0 = arith.constant 28 : i32
    %c28_i32_1 = arith.constant 28 : i32
    %c4_i32 = arith.constant 4 : i32
    %3 = arith.addi %c28_i32_1, %c4_i32 : i32
    %c1_i32_2 = arith.constant 1 : i32
    %4 = scf.for %arg8 = %c28_i32_1 to %3 step %c1_i32_2 iter_args(%arg9 = %2) -> (vector<128x128xf32>)  : i32 {
      %c16_i32 = arith.constant 16 : i32
      %16 = arith.muli %arg8, %c16_i32 : i32
      %17 = tpu.assume_multiple %16, 16 : i32
      %18 = arith.index_cast %17 : i32 to index
      %c0_13 = arith.constant 0 : index
      %19 = vector.load %arg1[%18, %c0_13] : memref<576x128xbf16, #tpu.memory_space<vmem>>, vector<80x128xbf16>
      %c0_14 = arith.constant 0 : index
      %c0_15 = arith.constant 0 : index
      %20 = vector.load %arg2[%c0_14, %c0_15] : memref<2048x80xbf16, #tpu.memory_space<vmem>>, vector<2048x80xbf16>
      %cst_16 = arith.constant dense<0.000000e+00> : vector<2048x128xf32>
      %21 = tpu.matmul %20, %19, %cst_16 {dimension_numbers = #tpu.dot_dimension_numbers<[1], [0], [0], [1], [0, 0, 1, 1], [], []>} : vector<2048x80xbf16>, vector<80x128xbf16>, vector<2048x128xf32> -> vector<2048x128xf32>
      %c0_17 = arith.constant 0 : index
      %c0_18 = arith.constant 0 : index
      %22 = vector.load %arg3[%c0_17, %c0_18] : memref<2048x1xi32, #tpu.memory_space<vmem>>, vector<2048x1xi32>
      %c16_i32_19 = arith.constant 16 : i32
      %23 = arith.muli %arg8, %c16_i32_19 : i32
      %24 = vector.broadcast %23 : i32 to vector<2048x1xi32>
      %25 = arith.cmpi sge, %22, %24 : vector<2048x1xi32>
      %cst_20 = arith.constant -1.000000e+30 : f32
      %26 = vector.shape_cast %25 : vector<2048x1xi1> to vector<2048x1xi1>
      %27 = vector.broadcast %26 : vector<2048x1xi1> to vector<2048x128xi1>
      %28 = vector.broadcast %cst_20 : f32 to vector<2048x128xf32>
      %29 = arith.select %27, %21, %28 : vector<2048x128xi1>, vector<2048x128xf32>
      %30 = vector.extract_strided_slice %29 {offsets = [0, 0], sizes = [128, 128], strides = [1, 1]} : vector<2048x128xf32> to vector<128x128xf32>
      %31 = vector.extract_strided_slice %29 {offsets = [128, 0], sizes = [128, 128], strides = [1, 1]} : vector<2048x128xf32> to vector<128x128xf32>
      %32 = arith.maximumf %30, %31 : vector<128x128xf32>
      %33 = vector.extract_strided_slice %29 {offsets = [256, 0], sizes = [128, 128], strides = [1, 1]} : vector<2048x128xf32> to vector<128x128xf32>
      %34 = arith.maximumf %32, %33 : vector<128x128xf32>
      %35 = vector.extract_strided_slice %29 {offsets = [384, 0], sizes = [128, 128], strides = [1, 1]} : vector<2048x128xf32> to vector<128x128xf32>
      %36 = arith.maximumf %34, %35 : vector<128x128xf32>
      %37 = vector.extract_strided_slice %29 {offsets = [512, 0], sizes = [128, 128], strides = [1, 1]} : vector<2048x128xf32> to vector<128x128xf32>
      %38 = arith.maximumf %36, %37 : vector<128x128xf32>
      %39 = vector.extract_strided_slice %29 {offsets = [640, 0], sizes = [128, 128], strides = [1, 1]} : vector<2048x128xf32> to vector<128x128xf32>
      %40 = arith.maximumf %38, %39 : vector<128x128xf32>
      %41 = vector.extract_strided_slice %29 {offsets = [768, 0], sizes = [128, 128], strides = [1, 1]} : vector<2048x128xf32> to vector<128x128xf32>
      %42 = arith.maximumf %40, %41 : vector<128x128xf32>
      %43 = vector.extract_strided_slice %29 {offsets = [896, 0], sizes = [128, 128], strides = [1, 1]} : vector<2048x128xf32> to vector<128x128xf32>
      %44 = arith.maximumf %42, %43 : vector<128x128xf32>
      %45 = vector.extract_strided_slice %29 {offsets = [1024, 0], sizes = [128, 128], strides = [1, 1]} : vector<2048x128xf32> to vector<128x128xf32>
      %46 = arith.maximumf %44, %45 : vector<128x128xf32>
      %47 = vector.extract_strided_slice %29 {offsets = [1152, 0], sizes = [128, 128], strides = [1, 1]} : vector<2048x128xf32> to vector<128x128xf32>
      %48 = arith.maximumf %46, %47 : vector<128x128xf32>
      %49 = vector.extract_strided_slice %29 {offsets = [1280, 0], sizes = [128, 128], strides = [1, 1]} : vector<2048x128xf32> to vector<128x128xf32>
      %50 = arith.maximumf %48, %49 : vector<128x128xf32>
      %51 = vector.extract_strided_slice %29 {offsets = [1408, 0], sizes = [128, 128], strides = [1, 1]} : vector<2048x128xf32> to vector<128x128xf32>
      %52 = arith.maximumf %50, %51 : vector<128x128xf32>
      %53 = vector.extract_strided_slice %29 {offsets = [1536, 0], sizes = [128, 128], strides = [1, 1]} : vector<2048x128xf32> to vector<128x128xf32>
      %54 = arith.maximumf %52, %53 : vector<128x128xf32>
      %55 = vector.extract_strided_slice %29 {offsets = [1664, 0], sizes = [128, 128], strides = [1, 1]} : vector<2048x128xf32> to vector<128x128xf32>
      %56 = arith.maximumf %54, %55 : vector<128x128xf32>
      %57 = vector.extract_strided_slice %29 {offsets = [1792, 0], sizes = [128, 128], strides = [1, 1]} : vector<2048x128xf32> to vector<128x128xf32>
      %58 = arith.maximumf %56, %57 : vector<128x128xf32>
      %59 = vector.extract_strided_slice %29 {offsets = [1920, 0], sizes = [128, 128], strides = [1, 1]} : vector<2048x128xf32> to vector<128x128xf32>
      %60 = arith.maximumf %58, %59 : vector<128x128xf32>
      %61 = arith.maximumf %arg9, %60 : vector<128x128xf32>
      scf.yield %61 : vector<128x128xf32>
    }
    %c4_i32_3 = arith.constant 4 : i32
    %c0 = arith.constant 0 : index
    %c0_4 = arith.constant 0 : index
    %5 = vector.load %arg4[%c0, %c0_4] : memref<128x1xf32, #tpu.memory_space<vmem>>, vector<128x1xf32>
    %6 = vector.broadcast %5 : vector<128x1xf32> to vector<128x128xf32>
    %7 = arith.addf %4, %6 : vector<128x128xf32>
    %cst_5 = arith.constant 0.000000e+00 : f32
    %8 = vector.broadcast %cst_5 : f32 to vector<128x128xf32>
    %9 = arith.maximumf %7, %8 : vector<128x128xf32>
    %c0_6 = arith.constant 0 : index
    %c0_7 = arith.constant 0 : index
    %10 = vector.load %arg5[%c0_6, %c0_7] : memref<8x128xf32, #tpu.memory_space<vmem>>, vector<8x128xf32>
    %cst_8 = arith.constant dense<0.000000e+00> : vector<8x128xf32>
    %11 = tpu.matmul %10, %9, %cst_8 {dimension_numbers = #tpu.dot_dimension_numbers<[1], [0], [0], [1], [0, 0, 1, 1], [], []>} : vector<8x128xf32>, vector<128x128xf32>, vector<8x128xf32> -> vector<8x128xf32>
    %c0_9 = arith.constant 0 : index
    %c0_10 = arith.constant 0 : index
    %12 = vector.load %arg6[%c0_9, %c0_10] : memref<8x1xf32, #tpu.memory_space<vmem>>, vector<8x1xf32>
    %13 = vector.broadcast %12 : vector<8x1xf32> to vector<8x128xf32>
    %14 = arith.addf %11, %13 : vector<8x128xf32>
    %c0_11 = arith.constant 0 : index
    %c0_12 = arith.constant 0 : index
    %15 = vector.load %arg7[%c0_11, %c0_12] : memref<8x128xf32, #tpu.memory_space<vmem>>, vector<8x128xf32>
    tpu.vector_store %arg7[%c0_11, %c0_12], %14 {strides = array<i32>} : memref<8x128xf32, #tpu.memory_space<vmem>>, vector<8x128xf32>,
    return
  }
  func.func @transform_0(%arg0: i32) -> (i32, i32) {
    %c0_i32 = arith.constant 0 : i32
    %c0_i32_0 = arith.constant 0 : i32
    return %c0_i32, %arg0 : i32, i32
  }
  func.func @transform_1(%arg0: i32) -> (i32, i32) {
    %c0_i32 = arith.constant 0 : i32
    %c0_i32_0 = arith.constant 0 : i32
    %c0_i32_1 = arith.constant 0 : i32
    return %c0_i32, %c0_i32_0 : i32, i32
  }
  func.func @transform_2(%arg0: i32) -> (i32, i32) {
    %c0_i32 = arith.constant 0 : i32
    %c0_i32_0 = arith.constant 0 : i32
    %c0_i32_1 = arith.constant 0 : i32
    return %c0_i32, %c0_i32_0 : i32, i32
  }
  func.func @transform_3(%arg0: i32) -> (i32, i32) {
    %c0_i32 = arith.constant 0 : i32
    %c0_i32_0 = arith.constant 0 : i32
    %c0_i32_1 = arith.constant 0 : i32
    return %c0_i32, %c0_i32_0 : i32, i32
  }
  func.func @transform_4(%arg0: i32) -> (i32, i32) {
    %c0_i32 = arith.constant 0 : i32
    %c0_i32_0 = arith.constant 0 : i32
    %c0_i32_1 = arith.constant 0 : i32
    return %c0_i32, %c0_i32_0 : i32, i32
  }
  func.func @transform_5(%arg0: i32) -> (i32, i32) {
    %c0_i32 = arith.constant 0 : i32
    %c0_i32_0 = arith.constant 0 : i32
    %c0_i32_1 = arith.constant 0 : i32
    return %c0_i32, %c0_i32_0 : i32, i32
  }
  func.func @transform_6(%arg0: i32) -> (i32, i32) {
    %c0_i32 = arith.constant 0 : i32
    %c0_i32_0 = arith.constant 0 : i32
    return %c0_i32, %arg0 : i32, i32
  }
}

</mosaic_0001>

<bundles_post_ra>
// kernel: net2_forward.1
= control target key start
LH: loop header
LB: loop body
LE: loop exit
PB: predicated region body
PF: predicated region fallthrough
CT: control target
= control target key end

     0   :  { %v9994_v0 = vmov -1e+30   ;;  %v9996_v1 = vmov -1e+30   ;;  %v9998_v2 = vmov -1e+30   ;;  %s15636_s0 = inlined_call_operand.vmem [shape: bf16[576,128], index: 0, kind: input, shape index: {}]   ;;  %s15637_s1 = inlined_call_operand.vmem [shape: bf16[2048,80], index: 1, kind: input, shape index: {}]   ;;  %s15638_s2 = inlined_call_operand.vmem [shape: s32[2048,1], index: 2, kind: input, shape index: {}]   ;;  %s15639_s3 = inlined_call_operand.vmem [shape: f32[128,1], index: 3, kind: input, shape index: {}]   ;;  %s15640_s4 = inlined_call_operand.vmem [shape: f32[8,128], index: 4, kind: input, shape index: {}]   ;;  %s15641_s5 = inlined_call_operand.vmem [shape: f32[8,1], index: 5, kind: input, shape index: {}]   ;;  %s15642_s6 = inlined_call_operand.vmem [shape: f32[8,128], index: 6, kind: output, shape index: {}]  }
   0x1   :  { %v10000_v3 = vmov -1e+30   ;;  %v10002_v4 = vmov -1e+30   ;;  %v10004_v5 = vmov -1e+30  }
   0x2   :  { %v10006_v6 = vmov -1e+30   ;;  %v10008_v7 = vmov -1e+30   ;;  %v10010_v8 = vmov -1e+30  }
   0x3   :  { %v10012_v9 = vmov -1e+30   ;;  %v10014_v10 = vmov -1e+30   ;;  %v10016_v11 = vmov -1e+30  }
   0x4   :  { %v10018_v12 = vmov -1e+30   ;;  %v10020_v13 = vmov -1e+30   ;;  %v10022_v14 = vmov -1e+30  }
   0x5   :  { %v10024_v15 = vmov -1e+30   ;;  %s10026_s21 = smov 0  }
   0x6 LB: > { %v9417_v16 = vld [vmem:[%s15637_s1] sm:$0xff]   ;;  %vm987_vm0 = vcmask 654336   ;;  %s7715_s24 = sshll.u32 %s9884_s21, 4  ;;  %v9418_v23 = vld [vmem:[%s15637_s1 + $0x8] sm:$0xff]   ;;  %v9419_v24 = vld [vmem:[%s15637_s1 + $0x10] sm:$0xff]   ;;  %s29_s21 = sadd.s32 1, %s9884_s21   ;;  %s9884_s21 = sphi %s10026_s21, %s29_s21   ;;  %v9880_v15 = vphi %v10024_v15, %v15703_v15   ;;  %v9876_v14 = vphi %v10022_v14, %v15702_v14   ;;  %v9872_v13 = vphi %v10020_v13, %v15701_v13   ;;  %v9868_v12 = vphi %v10018_v12, %v15700_v12   ;;  %v9864_v11 = vphi %v10016_v11, %v15699_v11   ;;  %v9860_v10 = vphi %v10014_v10, %v15698_v10   ;;  %v9856_v9 = vphi %v10012_v9, %v15697_v9   ;;  %v9852_v8 = vphi %v10010_v8, %v15696_v8   ;;  %v9848_v7 = vphi %v10008_v7, %v15695_v7   ;;  %v9844_v6 = vphi %v10006_v6, %v15694_v6   ;;  %v9840_v5 = vphi %v10004_v5, %v15693_v5   ;;  %v9836_v4 = vphi %v10002_v4, %v15692_v4   ;;  %v9832_v3 = vphi %v10000_v3, %v15691_v3   ;;  %v9828_v2 = vphi %v9998_v2, %v15690_v2   ;;  %v9824_v1 = vphi %v9996_v1, %v15689_v1   ;;  %v9820_v0 = vphi %v9994_v0, %v15688_v0  }
   0x7   : > { %8534 = vmatprep.mubr.msk.bf16.mxu0 %vm987_vm0, %v9417_v16  ;;  %s47_s25 = sshra.s32 %s7715_s24, 3  ;;  %v9421_v17 = vld [vmem:[%s15637_s1 + $0x200] sm:$0xff]   ;;  %v9422_v25 = vld [vmem:[%s15637_s1 + $0x208] sm:$0xff]   ;;  %v9425_v26 = vld [vmem:[%s15637_s1 + $0x210] sm:$0xff]   ;;  %p11375_p0 = scmp.ge.s32.totalorder %s29_s21, 28  }
   0x8   : > { %s7716_s26 = sshll.u32 %s47_s25, 2  ;;  %8662 = vmatprep.mubr.msk.bf16.mxu1 %vm987_vm0, %v9421_v17  ;;  %v9420_v27 = vld [vmem:[%s15637_s1 + $0x18] sm:$0xff]   ;;  %v9423_v28 = vld [vmem:[%s15637_s1 + $0x20] sm:$0xff]   ;;  %v9424_v31 = vld [vmem:[%s15637_s1 + $0x28] sm:$0xff]   ;;  %s11463_s21 = smov (%p11375_p0), 28  }
   0x9   : > { %s50_s7 = scalar_lea.vmem %s15636_s0, %s7716_s26  ;;  %v9426_v29 = vld [vmem:[%s15637_s1 + $0x218] sm:$0xff]   ;;  %v9429_v30 = vld [vmem:[%s15637_s1 + $0x220] sm:$0xff]   ;;  %v9427_v32 = vld [vmem:[%s15637_s1 + $0x30] sm:$0xff]  }
   0xa   : > { %v9412_v18 = vld [vmem:[%s50_s7] sm:$0xff]   ;;  %v9413_v19 = vld [vmem:[%s50_s7 + $0x8] sm:$0xff]   ;;  %v9414_v20 = vld [vmem:[%s50_s7 + $0x10] sm:$0xff]  }
   0xb   : > { %8524 = vmatprep.subr.bf16.mxu0 %v9412_v18  ;;  %9115 = vmatprep.subr.bf16.mxu1 %v9412_v18  ;;  %v9415_v21 = vld [vmem:[%s50_s7 + $0x18] sm:$0xff]   ;;  %v9416_v22 = vld [vmem:[%s50_s7 + $0x20] sm:$0xff]   ;;  %v9430_v33 = vld [vmem:[%s15637_s1 + $0x228] sm:$0xff]  }
   0xc   : > { %8525 = vmatpush3.bf16.msra.mxu0 %v9412_v18  ;;  %9120 = vmatpush3.bf16.msra.mxu1 %v9412_v18  ;;  %v9433_v34 = vld [vmem:[%s15637_s1 + $0x230] sm:$0xff]   ;;  %v9428_v35 = vld [vmem:[%s15637_s1 + $0x38] sm:$0xff]   ;;  %v9431_v36 = vld [vmem:[%s15637_s1 + $0x40] sm:$0xff]  }
   0xd   : > { %8526 = vmatprep.subr.bf16.mxu0 %v9413_v19  ;;  %9116 = vmatprep.subr.bf16.mxu1 %v9413_v19  ;;  %v9434_v37 = vld [vmem:[%s15637_s1 + $0x238] sm:$0xff]   ;;  %v9437_v38 = vld [vmem:[%s15637_s1 + $0x240] sm:$0xff]   ;;  %v9432_v39 = vld [vmem:[%s15637_s1 + $0x48] sm:$0xff]  }
   0xe   : > { %v9435_v40 = vld [vmem:[%s15637_s1 + $0x50] sm:$0xff]   ;;  %v9438_v41 = vld [vmem:[%s15637_s1 + $0x248] sm:$0xff]   ;;  %v9436_v43 = vld [vmem:[%s15637_s1 + $0x58] sm:$0xff]  }
   0xf   : > { %v9441_v42 = vld [vmem:[%s15637_s1 + $0x250] sm:$0xff]   ;;  %v9439_v44 = vld [vmem:[%s15637_s1 + $0x60] sm:$0xff]   ;;  %v9442_v45 = vld [vmem:[%s15637_s1 + $0x258] sm:$0xff]  }
  0x10   : > { %8527 = vmatpush3.bf16.msra.mxu0 %v9413_v19  ;;  %9121 = vmatpush3.bf16.msra.mxu1 %v9413_v19  ;;  %v9445_v46 = vld [vmem:[%s15637_s1 + $0x260] sm:$0xff]   ;;  %v9440_v47 = vld [vmem:[%s15637_s1 + $0x68] sm:$0xff]   ;;  %v9443_v48 = vld [vmem:[%s15637_s1 + $0x70] sm:$0xff]  }
  0x11   : > { %8528 = vmatprep.subr.bf16.mxu0 %v9414_v20  ;;  %9117 = vmatprep.subr.bf16.mxu1 %v9414_v20  ;;  %v9446_v49 = vld [vmem:[%s15637_s1 + $0x268] sm:$0xff]   ;;  %v9449_v50 = vld [vmem:[%s15637_s1 + $0x270] sm:$0xff]   ;;  %v9444_v51 = vld [vmem:[%s15637_s1 + $0x78] sm:$0xff]  }
  0x12   : > { %v9447_v52 = vld [vmem:[%s15637_s1 + $0x80] sm:$0xff]   ;;  %v9450_v53 = vld [vmem:[%s15637_s1 + $0x278] sm:$0xff]   ;;  %v9448_v55 = vld [vmem:[%s15637_s1 + $0x88] sm:$0xff]  }
  0x13   : > { %v9453_v54 = vld [vmem:[%s15637_s1 + $0x280] sm:$0xff]   ;;  %v9451_v56 = vld [vmem:[%s15637_s1 + $0x90] sm:$0xff]   ;;  %v9454_v57 = vld [vmem:[%s15637_s1 + $0x288] sm:$0xff]  }
  0x14   : > { %8529 = vmatpush3.bf16.msra.mxu0 %v9414_v20  ;;  %9122 = vmatpush3.bf16.msra.mxu1 %v9414_v20  ;;  %v9457_v58 = vld [vmem:[%s15637_s1 + $0x290] sm:$0xff]   ;;  %v9452_v59 = vld [vmem:[%s15637_s1 + $0x98] sm:$0xff]   ;;  %v9455_v60 = vld [vmem:[%s15637_s1 + $0xa0] sm:$0xff]  }
  0x15   : > { %8530 = vmatprep.subr.bf16.mxu0 %v9415_v21  ;;  %9118 = vmatprep.subr.bf16.mxu1 %v9415_v21  ;;  %v9458_v61 = vld [vmem:[%s15637_s1 + $0x298] sm:$0xff]   ;;  %v9461_v62 = vld [vmem:[%s15637_s1 + $0x2a0] sm:$0xff]   ;;  %v9456_v63 = vld [vmem:[%s15637_s1 + $0xa8] sm:$0xff]  }
  0x16   : > { %v9459_v16 = vld [vmem:[%s15637_s1 + $0xb0] sm:$0xff]   ;;  %v9462_v17 = vld [vmem:[%s15637_s1 + $0x2a8] sm:$0xff]   ;;  %v9460_v19 = vld [vmem:[%s15637_s1 + $0xb8] sm:$0xff]  }
  0x17   : > { %v9465_v18 = vld [vmem:[%s15637_s1 + $0x2b0] sm:$0xff]   ;;  %v9466_v20 = vld [vmem:[%s15637_s1 + $0x2b8] sm:$0xff]  }
  0x18   : > { %8531 = vmatpush3.bf16.msra.mxu0 %v9415_v21  ;;  %9123 = vmatpush3.bf16.msra.mxu1 %v9415_v21  ;;  %v9463_v21 = vld [vmem:[%s15637_s1 + $0xc0] sm:$0xff]  }
  0x19   : > { %8532 = vmatprep.subr.bf16.mxu0 %v9416_v22  ;;  %9119 = vmatprep.subr.bf16.mxu1 %v9416_v22 }
  0x1c   : > { %8533 = vmatpush3.bf16.msra.mxu0 %v9416_v22  ;;  %9124 = vmatpush3.bf16.msra.mxu1 %v9416_v22  ;;  %v9469_v22 = vld [vmem:[%s15637_s1 + $0x2c0] sm:$0xff]  }
  0x1f   : > { %8535 = vmatmul.mubr.msk.bf16.vlgmr.msra.gmra.mrb[0].mxu0 %vm987_vm0, %v9418_v23  ;;  %8663 = vmatmul.mubr.msk.bf16.vlgmr.msra.gmra.mrb[0].mxu1 %vm987_vm0, %v9422_v25  ;;  %v9464_v23 = vld [vmem:[%s15637_s1 + $0xc8] sm:$0xff]   ;;  %v9467_v25 = vld [vmem:[%s15637_s1 + $0xd0] sm:$0xff]  }
  0x20   : > { %8538 = vmatprep.mubr.msk.bf16.mxu0 %vm987_vm0, %v9419_v24  ;;  %8666 = vmatprep.mubr.msk.bf16.mxu1 %vm987_vm0, %v9425_v26  ;;  %v9470_v24 = vld [vmem:[%s15637_s1 + $0x2c8] sm:$0xff]   ;;  %v9473_v26 = vld [vmem:[%s15637_s1 + $0x2d0] sm:$0xff]  }
  0x27   : > { %8539 = vmatmul.mubr.msk.bf16.gmra.mrb[4].mxu0 %vm987_vm0, %v9420_v27  ;;  %8667 = vmatmul.mubr.msk.bf16.gmra.mrb[4].mxu1 %vm987_vm0, %v9426_v29  ;;  %v9468_v27 = vld [vmem:[%s15637_s1 + $0xd8] sm:$0xff]   ;;  %v9471_v29 = vld [vmem:[%s15637_s1 + $0xe0] sm:$0xff]  }
  0x28   : > { %8542 = vmatprep.mubr.msk.bf16.mxu0 %vm987_vm0, %v9423_v28  ;;  %8670 = vmatprep.mubr.msk.bf16.mxu1 %vm987_vm0, %v9429_v30  ;;  %v9474_v28 = vld [vmem:[%s15637_s1 + $0x2d8] sm:$0xff]   ;;  %v9477_v30 = vld [vmem:[%s15637_s1 + $0x2e0] sm:$0xff]  }
  0x2f   : > { %8543 = vmatmul.mubr.msk.bf16.gmra.mrb[8].mxu0 %vm987_vm0, %v9424_v31  ;;  %8671 = vmatmul.mubr.msk.bf16.gmra.mrb[8].mxu1 %vm987_vm0, %v9430_v33  ;;  %v9472_v31 = vld [vmem:[%s15637_s1 + $0xe8] sm:$0xff]   ;;  %v9475_v33 = vld [vmem:[%s15637_s1 + $0xf0] sm:$0xff]  }
  0x30   : > { %8546 = vmatprep.mubr.msk.bf16.mxu0 %vm987_vm0, %v9427_v32  ;;  %8674 = vmatprep.mubr.msk.bf16.mxu1 %vm987_vm0, %v9433_v34  ;;  %v9478_v32 = vld [vmem:[%s15637_s1 + $0x2e8] sm:$0xff]   ;;  %v9481_v34 = vld [vmem:[%s15637_s1 + $0x2f0] sm:$0xff]  }
  0x37   : > { %8547 = vmatmul.mubr.msk.bf16.gmra.mrb[12].mxu0 %vm987_vm0, %v9428_v35  ;;  %8675 = vmatmul.mubr.msk.bf16.gmra.mrb[12].mxu1 %vm987_vm0, %v9434_v37  ;;  %v9476_v35 = vld [vmem:[%s15637_s1 + $0xf8] sm:$0xff]   ;;  %v9479_v37 = vld [vmem:[%s15637_s1 + $0x100] sm:$0xff]  }
  0x38   : > { %8550 = vmatprep.mubr.msk.bf16.mxu0 %vm987_vm0, %v9431_v36  ;;  %8678 = vmatprep.mubr.msk.bf16.mxu1 %vm987_vm0, %v9437_v38  ;;  %v9482_v36 = vld [vmem:[%s15637_s1 + $0x2f8] sm:$0xff]   ;;  %v9485_v38 = vld [vmem:[%s15637_s1 + $0x300] sm:$0xff]  }
  0x3f   : > { %8551 = vmatmul.mubr.msk.bf16.gmra.mrb[16].mxu0 %vm987_vm0, %v9432_v39  ;;  %8679 = vmatmul.mubr.msk.bf16.gmra.mrb[16].mxu1 %vm987_vm0, %v9438_v41  ;;  %v9480_v39 = vld [vmem:[%s15637_s1 + $0x108] sm:$0xff]   ;;  %v9483_v41 = vld [vmem:[%s15637_s1 + $0x110] sm:$0xff]  }
  0x40   : > { %8554 = vmatprep.mubr.msk.bf16.mxu0 %vm987_vm0, %v9435_v40  ;;  %8682 = vmatprep.mubr.msk.bf16.mxu1 %vm987_vm0, %v9441_v42  ;;  %v9486_v40 = vld [vmem:[%s15637_s1 + $0x308] sm:$0xff]   ;;  %v9489_v42 = vld [vmem:[%s15637_s1 + $0x310] sm:$0xff]  }
  0x47   : > { %8555 = vmatmul.mubr.msk.bf16.gmra.mrb[20].mxu0 %vm987_vm0, %v9436_v43  ;;  %8683 = vmatmul.mubr.msk.bf16.gmra.mrb[20].mxu1 %vm987_vm0, %v9442_v45  ;;  %v9484_v43 = vld [vmem:[%s15637_s1 + $0x118] sm:$0xff]   ;;  %v9487_v45 = vld [vmem:[%s15637_s1 + $0x120] sm:$0xff]  }
  0x48   : > { %8558 = vmatprep.mubr.msk.bf16.mxu0 %vm987_vm0, %v9439_v44  ;;  %8686 = vmatprep.mubr.msk.bf16.mxu1 %vm987_vm0, %v9445_v46  ;;  %v9490_v44 = vld [vmem:[%s15637_s1 + $0x318] sm:$0xff]   ;;  %v9493_v46 = vld [vmem:[%s15637_s1 + $0x320] sm:$0xff]  }
  0x4f   : > { %8559 = vmatmul.mubr.msk.bf16.gmra.mrb[24].mxu0 %vm987_vm0, %v9440_v47  ;;  %8687 = vmatmul.mubr.msk.bf16.gmra.mrb[24].mxu1 %vm987_vm0, %v9446_v49  ;;  %v9488_v47 = vld [vmem:[%s15637_s1 + $0x128] sm:$0xff]   ;;  %v9491_v49 = vld [vmem:[%s15637_s1 + $0x130] sm:$0xff]  }
  0x50   : > { %8562 = vmatprep.mubr.msk.bf16.mxu0 %vm987_vm0, %v9443_v48  ;;  %8690 = vmatprep.mubr.msk.bf16.mxu1 %vm987_vm0, %v9449_v50  ;;  %v9494_v48 = vld [vmem:[%s15637_s1 + $0x328] sm:$0xff]   ;;  %v9497_v50 = vld [vmem:[%s15637_s1 + $0x330] sm:$0xff]  }
  0x57   : > { %8563 = vmatmul.mubr.msk.bf16.gmra.mrb[28].mxu0 %vm987_vm0, %v9444_v51  ;;  %8691 = vmatmul.mubr.msk.bf16.gmra.mrb[28].mxu1 %vm987_vm0, %v9450_v53  ;;  %v9492_v51 = vld [vmem:[%s15637_s1 + $0x138] sm:$0xff]   ;;  %v9495_v53 = vld [vmem:[%s15637_s1 + $0x140] sm:$0xff]  }
  0x58   : > { %8566 = vmatprep.mubr.msk.bf16.mxu0 %vm987_vm0, %v9447_v52  ;;  %8694 = vmatprep.mubr.msk.bf16.mxu1 %vm987_vm0, %v9453_v54  ;;  %v9498_v52 = vld [vmem:[%s15637_s1 + $0x338] sm:$0xff]   ;;  %v9501_v54 = vld [vmem:[%s15637_s1 + $0x340] sm:$0xff]  }
  0x5f   : > { %8567 = vmatmul.mubr.msk.bf16.gmra.mrb[32].mxu0 %vm987_vm0, %v9448_v55  ;;  %8695 = vmatmul.mubr.msk.bf16.gmra.mrb[32].mxu1 %vm987_vm0, %v9454_v57  ;;  %v9496_v55 = vld [vmem:[%s15637_s1 + $0x148] sm:$0xff]   ;;  %v9499_v57 = vld [vmem:[%s15637_s1 + $0x150] sm:$0xff]  }
  0x60   : > { %8570 = vmatprep.mubr.msk.bf16.mxu0 %vm987_vm0, %v9451_v56  ;;  %8698 = vmatprep.mubr.msk.bf16.mxu1 %vm987_vm0, %v9457_v58  ;;  %v9502_v56 = vld [vmem:[%s15637_s1 + $0x348] sm:$0xff]   ;;  %v9505_v58 = vld [vmem:[%s15637_s1 + $0x350] sm:$0xff]  }
  0x67   : > { %8571 = vmatmul.mubr.msk.bf16.gmra.mrb[36].mxu0 %vm987_vm0, %v9452_v59  ;;  %8699 = vmatmul.mubr.msk.bf16.gmra.mrb[36].mxu1 %vm987_vm0, %v9458_v61  ;;  %v9500_v59 = vld [vmem:[%s15637_s1 + $0x158] sm:$0xff]   ;;  %v9503_v61 = vld [vmem:[%s15637_s1 + $0x160] sm:$0xff]  }
  0x68   : > { %8574 = vmatprep.mubr.msk.bf16.mxu0 %vm987_vm0, %v9455_v60  ;;  %8702 = vmatprep.mubr.msk.bf16.mxu1 %vm987_vm0, %v9461_v62  ;;  %v9506_v60 = vld [vmem:[%s15637_s1 + $0x358] sm:$0xff]   ;;  %v9509_v62 = vld [vmem:[%s15637_s1 + $0x360] sm:$0xff]  }
  0x6f   : > { %8575 = vmatmul.mubr.msk.bf16.gmra.mrb[40].mxu0 %vm987_vm0, %v9456_v63  ;;  %8703 = vmatmul.mubr.msk.bf16.gmra.mrb[40].mxu1 %vm987_vm0, %v9462_v17  ;;  %v9504_v63 = vld [vmem:[%s15637_s1 + $0x168] sm:$0xff]   ;;  %v9507_v17 = vld [vmem:[%s15637_s1 + $0x170] sm:$0xff]  }
  0x70   : > { %8578 = vmatprep.mubr.msk.bf16.mxu0 %vm987_vm0, %v9459_v16  ;;  %8706 = vmatprep.mubr.msk.bf16.mxu1 %vm987_vm0, %v9465_v18  ;;  %v9510_v16 = vld [vmem:[%s15637_s1 + $0x368] sm:$0xff]   ;;  %v9513_v18 = vld [vmem:[%s15637_s1 + $0x370] sm:$0xff]  }
  0x77   : > { %8579 = vmatmul.mubr.msk.bf16.gmra.mrb[44].mxu0 %vm987_vm0, %v9460_v19  ;;  %8707 = vmatmul.mubr.msk.bf16.gmra.mrb[44].mxu1 %vm987_vm0, %v9466_v20  ;;  %v9508_v19 = vld [vmem:[%s15637_s1 + $0x178] sm:$0xff]  }
  0x78   : > { %8582 = vmatprep.mubr.msk.bf16.mxu0 %vm987_vm0, %v9463_v21  ;;  %8710 = vmatprep.mubr.msk.bf16.mxu1 %vm987_vm0, %v9469_v22  ;;  %v9514_v20 = vld [vmem:[%s15637_s1 + $0x378] sm:$0xff]   ;;  %v9511_v21 = vld [vmem:[%s15637_s1 + $0x180] sm:$0xff]  }
  0x79   : > { %v9517_v22 = vld [vmem:[%s15637_s1 + $0x380] sm:$0xff]  }
  0x7f   : > { %8583 = vmatmul.mubr.msk.bf16.gmra.mrb[48].mxu0 %vm987_vm0, %v9464_v23  ;;  %8711 = vmatmul.mubr.msk.bf16.gmra.mrb[48].mxu1 %vm987_vm0, %v9470_v24  ;;  %v9512_v23 = vld [vmem:[%s15637_s1 + $0x188] sm:$0xff]  }
  0x80   : > { %8586 = vmatprep.mubr.msk.bf16.mxu0 %vm987_vm0, %v9467_v25  ;;  %8714 = vmatprep.mubr.msk.bf16.mxu1 %vm987_vm0, %v9473_v26  ;;  %v9518_v24 = vld [vmem:[%s15637_s1 + $0x388] sm:$0xff]   ;;  %v9515_v25 = vld [vmem:[%s15637_s1 + $0x190] sm:$0xff]  }
  0x81   : > { %v9521_v26 = vld [vmem:[%s15637_s1 + $0x390] sm:$0xff]  }
  0x87   : > { %8587 = vmatmul.mubr.msk.bf16.gmra.mrb[52].mxu0 %vm987_vm0, %v9468_v27  ;;  %8715 = vmatmul.mubr.msk.bf16.gmra.mrb[52].mxu1 %vm987_vm0, %v9474_v28  ;;  %v9516_v27 = vld [vmem:[%s15637_s1 + $0x198] sm:$0xff]  }
  0x88   : > { %8590 = vmatprep.mubr.msk.bf16.mxu0 %vm987_vm0, %v9471_v29  ;;  %8718 = vmatprep.mubr.msk.bf16.mxu1 %vm987_vm0, %v9477_v30  ;;  %v9522_v28 = vld [vmem:[%s15637_s1 + $0x398] sm:$0xff]   ;;  %v9519_v29 = vld [vmem:[%s15637_s1 + $0x1a0] sm:$0xff]  }
  0x89   : > { %v9525_v30 = vld [vmem:[%s15637_s1 + $0x3a0] sm:$0xff]  }
  0x8f   : > { %8591 = vmatmul.mubr.msk.bf16.gmra.mrb[56].mxu0 %vm987_vm0, %v9472_v31  ;;  %8719 = vmatmul.mubr.msk.bf16.gmra.mrb[56].mxu1 %vm987_vm0, %v9478_v32  ;;  %v9520_v31 = vld [vmem:[%s15637_s1 + $0x1a8] sm:$0xff]  }
  0x90   : > { %8594 = vmatprep.mubr.msk.bf16.mxu0 %vm987_vm0, %v9475_v33  ;;  %8722 = vmatprep.mubr.msk.bf16.mxu1 %vm987_vm0, %v9481_v34  ;;  %v9526_v32 = vld [vmem:[%s15637_s1 + $0x3a8] sm:$0xff]   ;;  %v9523_v33 = vld [vmem:[%s15637_s1 + $0x1b0] sm:$0xff]  }
  0x91   : > { %v9529_v34 = vld [vmem:[%s15637_s1 + $0x3b0] sm:$0xff]  }
  0x97   : > { %8595 = vmatmul.mubr.msk.bf16.gmra.mrb[60].mxu0 %vm987_vm0, %v9476_v35  ;;  %8723 = vmatmul.mubr.msk.bf16.gmra.mrb[60].mxu1 %vm987_vm0, %v9482_v36 }
  0x98   : > { %8598 = vmatprep.mubr.msk.bf16.mxu0 %vm987_vm0, %v9479_v37  ;;  %8726 = vmatprep.mubr.msk.bf16.mxu1 %vm987_vm0, %v9485_v38  ;;  %v9524_v38 = vld [vmem:[%s15637_s1 + $0x1b8] sm:$0xff]  }
  0x9f   : > { %8599 = vmatmul.mubr.msk.bf16.gmra.mrb[64].mxu0 %vm987_vm0, %v9480_v39  ;;  %8727 = vmatmul.mubr.msk.bf16.gmra.mrb[64].mxu1 %vm987_vm0, %v9486_v40 }
  0xa0   : > { %8602 = vmatprep.mubr.msk.bf16.mxu0 %vm987_vm0, %v9483_v41  ;;  %8730 = vmatprep.mubr.msk.bf16.mxu1 %vm987_vm0, %v9489_v42  ;;  %v9530_v41 = vld [vmem:[%s15637_s1 + $0x3b8] sm:$0xff]  }
  0xa7   : > { %8603 = vmatmul.mubr.msk.bf16.gmra.mrb[68].mxu0 %vm987_vm0, %v9484_v43  ;;  %8731 = vmatmul.mubr.msk.bf16.gmra.mrb[68].mxu1 %vm987_vm0, %v9490_v44  ;;  %v9527_v43 = vld [vmem:[%s15637_s1 + $0x1c0] sm:$0xff]  }
  0xa8   : > { %8606 = vmatprep.mubr.msk.bf16.mxu0 %vm987_vm0, %v9487_v45  ;;  %8734 = vmatprep.mubr.msk.bf16.mxu1 %vm987_vm0, %v9493_v46  ;;  %v9533_v46 = vld [vmem:[%s15637_s1 + $0x3c0] sm:$0xff]  }
  0xaf   : > { %8607 = vmatmul.mubr.msk.bf16.gmra.mrb[72].mxu0 %vm987_vm0, %v9488_v47  ;;  %8735 = vmatmul.mubr.msk.bf16.gmra.mrb[72].mxu1 %vm987_vm0, %v9494_v48 }
  0xb0   : > { %8610 = vmatprep.mubr.msk.bf16.mxu0 %vm987_vm0, %v9491_v49  ;;  %8738 = vmatprep.mubr.msk.bf16.mxu1 %vm987_vm0, %v9497_v50 }
  0xb7   : > { %8611 = vmatmul.mubr.msk.bf16.gmra.mrb[76].mxu0 %vm987_vm0, %v9492_v51  ;;  %8739 = vmatmul.mubr.msk.bf16.gmra.mrb[76].mxu1 %vm987_vm0, %v9498_v52 }
  0xb8   : > { %8614 = vmatprep.mubr.msk.bf16.mxu0 %vm987_vm0, %v9495_v53  ;;  %8742 = vmatprep.mubr.msk.bf16.mxu1 %vm987_vm0, %v9501_v54  ;;  %v9528_v54 = vld [vmem:[%s15637_s1 + $0x1c8] sm:$0xff]  }
  0xbf   : > { %8615 = vmatmul.mubr.msk.bf16.gmra.mrb[80].mxu0 %vm987_vm0, %v9496_v55  ;;  %8743 = vmatmul.mubr.msk.bf16.gmra.mrb[80].mxu1 %vm987_vm0, %v9502_v56 }
  0xc0   : > { %8618 = vmatprep.mubr.msk.bf16.mxu0 %vm987_vm0, %v9499_v57  ;;  %8746 = vmatprep.mubr.msk.bf16.mxu1 %vm987_vm0, %v9505_v58  ;;  %v9534_v57 = vld [vmem:[%s15637_s1 + $0x3c8] sm:$0xff]  }
  0xc7   : > { %8619 = vmatmul.mubr.msk.bf16.gmra.mrb[84].mxu0 %vm987_vm0, %v9500_v59  ;;  %8747 = vmatmul.mubr.msk.bf16.gmra.mrb[84].mxu1 %vm987_vm0, %v9506_v60  ;;  %v9531_v59 = vld [vmem:[%s15637_s1 + $0x1d0] sm:$0xff]  }
  0xc8   : > { %8622 = vmatprep.mubr.msk.bf16.mxu0 %vm987_vm0, %v9503_v61  ;;  %8750 = vmatprep.mubr.msk.bf16.mxu1 %vm987_vm0, %v9509_v62  ;;  %v9537_v62 = vld [vmem:[%s15637_s1 + $0x3d0] sm:$0xff]  }
  0xcf   : > { %8623 = vmatmul.mubr.msk.bf16.gmra.mrb[88].mxu0 %vm987_vm0, %v9504_v63  ;;  %8751 = vmatmul.mubr.msk.bf16.gmra.mrb[88].mxu1 %vm987_vm0, %v9510_v16 }
  0xd0   : > { %8626 = vmatprep.mubr.msk.bf16.mxu0 %vm987_vm0, %v9507_v17  ;;  %8754 = vmatprep.mubr.msk.bf16.mxu1 %vm987_vm0, %v9513_v18 }
  0xd7   : > { %8627 = vmatmul.mubr.msk.bf16.gmra.mrb[92].mxu0 %vm987_vm0, %v9508_v19  ;;  %8755 = vmatmul.mubr.msk.bf16.gmra.mrb[92].mxu1 %vm987_vm0, %v9514_v20 }
  0xd8   : > { %8630 = vmatprep.mubr.msk.bf16.mxu0 %vm987_vm0, %v9511_v21  ;;  %8758 = vmatprep.mubr.msk.bf16.mxu1 %vm987_vm0, %v9517_v22  ;;  %v9532_v22 = vld [vmem:[%s15637_s1 + $0x1d8] sm:$0xff]  }
  0xdf   : > { %8631 = vmatmul.mubr.msk.bf16.gmra.mrb[96].mxu0 %vm987_vm0, %v9512_v23  ;;  %8759 = vmatmul.mubr.msk.bf16.gmra.mrb[96].mxu1 %vm987_vm0, %v9518_v24 }
  0xe0   : > { %8634 = vmatprep.mubr.msk.bf16.mxu0 %vm987_vm0, %v9515_v25  ;;  %8762 = vmatprep.mubr.msk.bf16.mxu1 %vm987_vm0, %v9521_v26  ;;  %v9538_v25 = vld [vmem:[%s15637_s1 + $0x3d8] sm:$0xff]  }
  0xe7   : > { %8635 = vmatmul.mubr.msk.bf16.gmra.mrb[100].mxu0 %vm987_vm0, %v9516_v27  ;;  %8763 = vmatmul.mubr.msk.bf16.gmra.mrb[100].mxu1 %vm987_vm0, %v9522_v28  ;;  %v9535_v27 = vld [vmem:[%s15637_s1 + $0x1e0] sm:$0xff]   ;;  %v9540_v28 = vld [vmem:[%s15637_s1 + $0x1f8] sm:$0xff]  }
  0xe8   : > { %8638 = vmatprep.mubr.msk.bf16.mxu0 %vm987_vm0, %v9519_v29  ;;  %8766 = vmatprep.mubr.msk.bf16.mxu1 %vm987_vm0, %v9525_v30  ;;  %v9541_v30 = vld [vmem:[%s15637_s1 + $0x3e0] sm:$0xff]  }
  0xef   : > { %8639 = vmatmul.mubr.msk.bf16.gmra.mrb[104].mxu0 %vm987_vm0, %v9520_v31  ;;  %8767 = vmatmul.mubr.msk.bf16.gmra.mrb[104].mxu1 %vm987_vm0, %v9526_v32 }
  0xf0   : > { %8642 = vmatprep.mubr.msk.bf16.mxu0 %vm987_vm0, %v9523_v33  ;;  %8770 = vmatprep.mubr.msk.bf16.mxu1 %vm987_vm0, %v9529_v34 }
  0xf2   : > { %v10523_v35 = vpop.f32.mrb[0].mxu0  ;;  %v10525_v36 = vpop.f32.mrb[0].mxu1 }
  0xf3   : > { %v10527_v37 = vpop.f32.mrb[1].mxu0  ;;  %v2431_v39 = vmax.f32 %v10523_v35, %v10525_v36  ;;  %v10534_v40 = vpop.f32.mrb[1].mxu1 }
  0xf4   : > { %v10539_v42 = vpop.f32.mrb[2].mxu0  ;;  %v2429_v44 = vmax.f32 %v10527_v37, %v10534_v40  ;;  %v10546_v45 = vpop.f32.mrb[2].mxu1 }
  0xf5   : > { %v10551_v47 = vpop.f32.mrb[3].mxu0  ;;  %v2432_v48 = vmax.f32 %v10539_v42, %v10546_v45  ;;  %v10555_v49 = vpop.f32.mrb[3].mxu1 }
  0xf6   : > { %v2430_v50 = vmax.f32 %v10551_v47, %v10555_v49 }
  0xf7   : > { %8643 = vmatmul.mubr.msk.bf16.gmra.mrb[108].mxu0 %vm987_vm0, %v9524_v38  ;;  %8771 = vmatmul.mubr.msk.bf16.gmra.mrb[108].mxu1 %vm987_vm0, %v9530_v41 }
  0xf8   : > { %8646 = vmatprep.mubr.msk.bf16.mxu0 %vm987_vm0, %v9527_v43  ;;  %8774 = vmatprep.mubr.msk.bf16.mxu1 %vm987_vm0, %v9533_v46  ;;  %v9536_v46 = vld [vmem:[%s15637_s1 + $0x1e8] sm:$0xff]  }
  0xfa   : > { %v10563_v51 = vpop.f32.mrb[4].mxu0  ;;  %v10565_v52 = vpop.f32.mrb[4].mxu1 }
  0xfb   : > { %v10567_v53 = vpop.f32.mrb[5].mxu0  ;;  %v2435_v55 = vmax.f32 %v10563_v51, %v10565_v52  ;;  %v10574_v56 = vpop.f32.mrb[5].mxu1 }
  0xfc   : > { %v10579_v58 = vpop.f32.mrb[6].mxu0  ;;  %v2433_v60 = vmax.f32 %v10567_v53, %v10574_v56  ;;  %v10586_v61 = vpop.f32.mrb[6].mxu1 }
  0xfd   : > { %v10591_v63 = vpop.f32.mrb[7].mxu0  ;;  %v10595_v17 = vpop.f32.mrb[7].mxu1 }
  0xff   : > { %8647 = vmatmul.mubr.msk.bf16.gmra.mrb[112].mxu0 %vm987_vm0, %v9528_v54  ;;  %8775 = vmatmul.mubr.msk.bf16.gmra.mrb[112].mxu1 %vm987_vm0, %v9534_v57 }
 0x100   : > { %8650 = vmatprep.mubr.msk.bf16.mxu0 %vm987_vm0, %v9531_v59  ;;  %8778 = vmatprep.mubr.msk.bf16.mxu1 %vm987_vm0, %v9537_v62  ;;  %v9542_v59 = vld [vmem:[%s15637_s1 + $0x3e8] sm:$0xff]  }
 0x102   : > { %v10603_v19 = vpop.f32.mrb[8].mxu0  ;;  %v10605_v20 = vpop.f32.mrb[8].mxu1 }
 0x103   : > { %v10607_v21 = vpop.f32.mrb[9].mxu0  ;;  %v10614_v24 = vpop.f32.mrb[9].mxu1 }
 0x104   : > { %v10619_v26 = vpop.f32.mrb[10].mxu0  ;;  %v10626_v29 = vpop.f32.mrb[10].mxu1 }
 0x105   : > { %v10631_v31 = vpop.f32.mrb[11].mxu0  ;;  %v10635_v33 = vpop.f32.mrb[11].mxu1 }
 0x107   : > { %8651 = vmatmul.mubr.msk.bf16.gmra.mrb[116].mxu0 %vm987_vm0, %v9532_v22  ;;  %8779 = vmatmul.mubr.msk.bf16.gmra.mrb[116].mxu1 %vm987_vm0, %v9538_v25  ;;  %v9539_v22 = vld [vmem:[%s15637_s1 + $0x1f0] sm:$0xff]  }
 0x108   : > { %8654 = vmatprep.mubr.msk.bf16.mxu0 %vm987_vm0, %v9535_v27  ;;  %8782 = vmatprep.mubr.msk.bf16.mxu1 %vm987_vm0, %v9541_v30  ;;  %v9543_v30 = vld [vmem:[%s15637_s1 + $0x3f0] sm:$0xff]  }
 0x10a   : > { %v10643_v38 = vpop.f32.mrb[12].mxu0  ;;  %v10645_v41 = vpop.f32.mrb[12].mxu1 }
 0x10b   : > { %v10647_v43 = vpop.f32.mrb[13].mxu0  ;;  %v10654_v57 = vpop.f32.mrb[13].mxu1 }
 0x10c   : > { %v10659_v62 = vpop.f32.mrb[14].mxu0  ;;  %v10666_v27 = vpop.f32.mrb[14].mxu1 }
 0x10d   : > { %v10671_v54 = vpop.f32.mrb[15].mxu0  ;;  %v10675_v32 = vpop.f32.mrb[15].mxu1 }
 0x10f   : > { %8655 = vmatmul.mubr.msk.bf16.gmra.mrb[120].mxu0 %vm987_vm0, %v9536_v46  ;;  %8783 = vmatmul.mubr.msk.bf16.gmra.mrb[120].mxu1 %vm987_vm0, %v9542_v59  ;;  %v9544_v59 = vld [vmem:[%s15637_s1 + $0x3f8] sm:$0xff]  }
 0x110   : > { %8658 = vmatprep.mubr.msk.bf16.mxu0 %vm987_vm0, %v9539_v22  ;;  %8786 = vmatprep.mubr.msk.bf16.mxu1 %vm987_vm0, %v9543_v30 }
 0x112   : > { %v8552_v25 = vpop.f32.mrb[16].mxu0  ;;  %v10683_v23 = vpop.f32.mrb[16].mxu1 }
 0x113   : > { %v10688_v34 = vmax.f32 %v2431_v39, %v8552_v25  ;;  %v1470_v18 = vpop.f32.mrb[17].mxu0  ;;  %v10693_v46 = vpop.f32.mrb[17].mxu1 }
 0x114   : > { %v10701_v22 = vmax.f32 %v2429_v44, %v1470_v18  ;;  %v8553_v30 = vpop.f32.mrb[18].mxu0  ;;  %v10703_v35 = vpop.f32.mrb[18].mxu1 }
 0x115   : > { %v10708_v36 = vmax.f32 %v2432_v48, %v8553_v30  ;;  %v1473_v39 = vpop.f32.mrb[19].mxu0  ;;  %v2463_v25 = vmax.f32 %v10688_v34, %v10683_v23  ;;  %v10712_v16 = vpop.f32.mrb[19].mxu1 }
 0x116   : > { %v10717_v37 = vmax.f32 %v2430_v50, %v1473_v39  ;;  %v2461_v40 = vmax.f32 %v10701_v22, %v10693_v46  ;;  %v15667_v22 = vmax.f32 %v10603_v19, %v10605_v20 }
 0x117   : > { %8659 = vmatmul.mubr.msk.bf16.gmra.mrb[124].mxu0 %vm987_vm0, %v9540_v28  ;;  %v2464_v42 = vmax.f32 %v10708_v36, %v10703_v35  ;;  %8787 = vmatmul.mubr.msk.bf16.gmra.mrb[124].mxu1 %vm987_vm0, %v9544_v59  ;;  %v15668_v35 = vmax.f32 %v10607_v21, %v10614_v24 }
 0x118   : > { %v2462_v44 = vmax.f32 %v10717_v37, %v10712_v16  ;;  %v15665_v16 = vmax.f32 %v10579_v58, %v10586_v61 }
 0x11a   : > { %v8556_v45 = vpop.f32.mrb[20].mxu0  ;;  %v10727_v48 = vpop.f32.mrb[20].mxu1 }
 0x11b   : > { %v10732_v47 = vmax.f32 %v2435_v55, %v8556_v45  ;;  %v1486_v49 = vpop.f32.mrb[21].mxu0  ;;  %v10734_v50 = vpop.f32.mrb[21].mxu1  ;;  %v15666_v55 = vmax.f32 %v10591_v63, %v10595_v17  ;;  %v15669_v45 = vmax.f32 %v10619_v26, %v10626_v29 }
 0x11c   : > { %v10739_v18 = vmax.f32 %v2433_v60, %v1486_v49  ;;  %v8557_v23 = vpop.f32.mrb[22].mxu0  ;;  %v10741_v28 = vpop.f32.mrb[22].mxu1  ;;  %v15670_v49 = vmax.f32 %v10631_v31, %v10635_v33 }
 0x11d   : > { %v10746_v34 = vmax.f32 %v15665_v16, %v8557_v23  ;;  %v1489_v46 = vpop.f32.mrb[23].mxu0  ;;  %v2467_v51 = vmax.f32 %v10732_v47, %v10727_v48  ;;  %v10750_v52 = vpop.f32.mrb[23].mxu1  ;;  %v15671_v23 = vmax.f32 %v10643_v38, %v10645_v41  ;;  %v15672_v16 = vmax.f32 %v10647_v43, %v10654_v57 }
 0x11e   : > { %v10755_v53 = vmax.f32 %v15666_v55, %v1489_v46  ;;  %v2465_v56 = vmax.f32 %v10739_v18, %v10734_v50  ;;  %v15673_v55 = vmax.f32 %v10659_v62, %v10666_v27 }
 0x11f   : > { %v2468_v60 = vmax.f32 %v10746_v34, %v10741_v28 }
 0x120   : > { %v2466_v58 = vmax.f32 %v10755_v53, %v10750_v52 }
 0x122   : > { %v8560_v61 = vpop.f32.mrb[24].mxu0  ;;  %v10763_v59 = vpop.f32.mrb[24].mxu1 }
 0x123   : > { %v10768_v30 = vmax.f32 %v15667_v22, %v8560_v61  ;;  %v1502_v63 = vpop.f32.mrb[25].mxu0  ;;  %v10770_v17 = vpop.f32.mrb[25].mxu1 }
 0x124   : > { %v10775_v36 = vmax.f32 %v15668_v35, %v1502_v63  ;;  %v8561_v39 = vpop.f32.mrb[26].mxu0  ;;  %v10777_v37 = vpop.f32.mrb[26].mxu1 }
 0x125   : > { %v10782_v48 = vmax.f32 %v15669_v45, %v8561_v39  ;;  %v1505_v47 = vpop.f32.mrb[27].mxu0  ;;  %v2471_v19 = vmax.f32 %v10768_v30, %v10763_v59  ;;  %v10786_v20 = vpop.f32.mrb[27].mxu1  ;;  %v15674_v59 = vmax.f32 %v10671_v54, %v10675_v32 }
 0x126   : > { %v10791_v21 = vmax.f32 %v15670_v49, %v1505_v47  ;;  %v2469_v24 = vmax.f32 %v10775_v36, %v10770_v17 }
 0x127   : > { %v2472_v50 = vmax.f32 %v10782_v48, %v10777_v37 }
 0x128   : > { %v2470_v26 = vmax.f32 %v10791_v21, %v10786_v20 }
 0x12a   : > { %v8564_v29 = vpop.f32.mrb[28].mxu0  ;;  %v10799_v18 = vpop.f32.mrb[28].mxu1 }
 0x12b   : > { %v10804_v28 = vmax.f32 %v15671_v23, %v8564_v29  ;;  %v1518_v31 = vpop.f32.mrb[29].mxu0  ;;  %v10806_v33 = vpop.f32.mrb[29].mxu1 }
 0x12c   : > { %v10811_v34 = vmax.f32 %v15672_v16, %v1518_v31  ;;  %v8565_v46 = vpop.f32.mrb[30].mxu0  ;;  %v10813_v52 = vpop.f32.mrb[30].mxu1 }
 0x12d   : > { %v10818_v53 = vmax.f32 %v15673_v55, %v8565_v46  ;;  %v1521_v61 = vpop.f32.mrb[31].mxu0  ;;  %v2475_v38 = vmax.f32 %v10804_v28, %v10799_v18  ;;  %v10822_v41 = vpop.f32.mrb[31].mxu1 }
 0x12e   : > { %v10827_v43 = vmax.f32 %v15674_v59, %v1521_v61  ;;  %v2473_v57 = vmax.f32 %v10811_v34, %v10806_v33 }
 0x12f   : > { %v2476_v22 = vmax.f32 %v10818_v53, %v10813_v52 }
 0x130   : > { %v2474_v62 = vmax.f32 %v10827_v43, %v10822_v41 }
 0x132   : > { %v8568_v27 = vpop.f32.mrb[32].mxu0  ;;  %v10835_v30 = vpop.f32.mrb[32].mxu1 }
 0x133   : > { %v10837_v63 = vmax.f32 %v2463_v25, %v8568_v27  ;;  %v1534_v17 = vpop.f32.mrb[33].mxu0  ;;  %v10839_v35 = vpop.f32.mrb[33].mxu1 }
 0x134   : > { %v10841_v32 = vmax.f32 %v2461_v40, %v1534_v17  ;;  %v8569_v54 = vpop.f32.mrb[34].mxu0  ;;  %v10843_v36 = vpop.f32.mrb[34].mxu1 }
 0x135   : > { %v10845_v39 = vmax.f32 %v2464_v42, %v8569_v54  ;;  %v1537_v37 = vpop.f32.mrb[35].mxu0  ;;  %v2495_v45 = vmax.f32 %v10837_v63, %v10835_v30  ;;  %v10849_v48 = vpop.f32.mrb[35].mxu1 }
 0x136   : > { %v10851_v47 = vmax.f32 %v2462_v44, %v1537_v37  ;;  %v2493_v25 = vmax.f32 %v10841_v32, %v10839_v35 }
 0x137   : > { %v2496_v40 = vmax.f32 %v10845_v39, %v10843_v36 }
 0x138   : > { %v2494_v20 = vmax.f32 %v10851_v47, %v10849_v48 }
 0x13a   : > { %v8572_v49 = vpop.f32.mrb[36].mxu0  ;;  %v10859_v42 = vpop.f32.mrb[36].mxu1 }
 0x13b   : > { %v10861_v21 = vmax.f32 %v2467_v51, %v8572_v49  ;;  %v1550_v29 = vpop.f32.mrb[37].mxu0  ;;  %v10863_v18 = vpop.f32.mrb[37].mxu1 }
 0x13c   : > { %v10865_v23 = vmax.f32 %v2465_v56, %v1550_v29  ;;  %v8573_v44 = vpop.f32.mrb[38].mxu0  ;;  %v10867_v28 = vpop.f32.mrb[38].mxu1 }
 0x13d   : > { %v10869_v31 = vmax.f32 %v2468_v60, %v8573_v44  ;;  %v1553_v33 = vpop.f32.mrb[39].mxu0  ;;  %v2499_v16 = vmax.f32 %v10861_v21, %v10859_v42  ;;  %v10873_v34 = vpop.f32.mrb[39].mxu1 }
 0x13e   : > { %v10875_v46 = vmax.f32 %v2466_v58, %v1553_v33  ;;  %v2497_v51 = vmax.f32 %v10865_v23, %v10863_v18 }
 0x13f   : > { %v2500_v56 = vmax.f32 %v10869_v31, %v10867_v28 }
 0x140   : > { %v2498_v52 = vmax.f32 %v10875_v46, %v10873_v34 }
 0x142   : > { %v8576_v55 = vpop.f32.mrb[40].mxu0  ;;  %v10883_v60 = vpop.f32.mrb[40].mxu1 }
 0x143   : > { %v10885_v53 = vmax.f32 %v2471_v19, %v8576_v55  ;;  %v1566_v61 = vpop.f32.mrb[41].mxu0  ;;  %v10887_v41 = vpop.f32.mrb[41].mxu1 }
 0x144   : > { %v10889_v59 = vmax.f32 %v2469_v24, %v1566_v61  ;;  %v8577_v58 = vpop.f32.mrb[42].mxu0  ;;  %v10891_v43 = vpop.f32.mrb[42].mxu1 }
 0x145   : > { %v10893_v27 = vmax.f32 %v2472_v50, %v8577_v58  ;;  %v1569_v30 = vpop.f32.mrb[43].mxu0  ;;  %v2503_v63 = vmax.f32 %v10885_v53, %v10883_v60  ;;  %v10897_v17 = vpop.f32.mrb[43].mxu1 }
 0x146   : > { %v10899_v35 = vmax.f32 %v2470_v26, %v1569_v30  ;;  %v2501_v19 = vmax.f32 %v10889_v59, %v10887_v41 }
 0x147   : > { %v2504_v24 = vmax.f32 %v10893_v27, %v10891_v43 }
 0x148   : > { %v2502_v32 = vmax.f32 %v10899_v35, %v10897_v17 }
 0x14a   : > { %v8580_v54 = vpop.f32.mrb[44].mxu0  ;;  %v10907_v50 = vpop.f32.mrb[44].mxu1 }
 0x14b   : > { %v10909_v36 = vmax.f32 %v2475_v38, %v8580_v54  ;;  %v1582_v39 = vpop.f32.mrb[45].mxu0  ;;  %v10911_v37 = vpop.f32.mrb[45].mxu1 }
 0x14c   : > { %v10913_v48 = vmax.f32 %v2473_v57, %v1582_v39  ;;  %v8581_v26 = vpop.f32.mrb[46].mxu0  ;;  %v10915_v47 = vpop.f32.mrb[46].mxu1 }
 0x14d   : > { %v10917_v49 = vmax.f32 %v2476_v22, %v8581_v26  ;;  %v1585_v42 = vpop.f32.mrb[47].mxu0  ;;  %v2507_v21 = vmax.f32 %v10909_v36, %v10907_v50  ;;  %v10921_v29 = vpop.f32.mrb[47].mxu1 }
 0x14e   : > { %v10923_v18 = vmax.f32 %v2474_v62, %v1585_v42  ;;  %v2505_v38 = vmax.f32 %v10913_v48, %v10911_v37 }
 0x14f   : > { %v2508_v57 = vmax.f32 %v10917_v49, %v10915_v47 }
 0x150   : > { %v2506_v23 = vmax.f32 %v10923_v18, %v10921_v29 }
 0x152   : > { %v8584_v44 = vpop.f32.mrb[48].mxu0  ;;  %v10931_v22 = vpop.f32.mrb[48].mxu1 }
 0x153   : > { %v10933_v28 = vmax.f32 %v2495_v45, %v8584_v44  ;;  %v1598_v31 = vpop.f32.mrb[49].mxu0  ;;  %v10935_v33 = vpop.f32.mrb[49].mxu1 }
 0x154   : > { %v10937_v34 = vmax.f32 %v2493_v25, %v1598_v31  ;;  %v8585_v62 = vpop.f32.mrb[50].mxu0  ;;  %v10939_v46 = vpop.f32.mrb[50].mxu1 }
 0x155   : > { %v10941_v55 = vmax.f32 %v2496_v40, %v8585_v62  ;;  %v1601_v60 = vpop.f32.mrb[51].mxu0  ;;  %v2527_v53 = vmax.f32 %v10933_v28, %v10931_v22  ;;  %v10945_v61 = vpop.f32.mrb[51].mxu1 }
 0x156   : > { %v10947_v41 = vmax.f32 %v2494_v20, %v1601_v60  ;;  %v2525_v45 = vmax.f32 %v10937_v34, %v10935_v33 }
 0x157   : > { %v2528_v25 = vmax.f32 %v10941_v55, %v10939_v46 }
 0x158   : > { %v2526_v59 = vmax.f32 %v10947_v41, %v10945_v61 }
 0x15a   : > { %v8588_v58 = vpop.f32.mrb[52].mxu0  ;;  %v10955_v40 = vpop.f32.mrb[52].mxu1 }
 0x15b   : > { %v10957_v43 = vmax.f32 %v2499_v16, %v8588_v58  ;;  %v1614_v27 = vpop.f32.mrb[53].mxu0  ;;  %v10959_v30 = vpop.f32.mrb[53].mxu1 }
 0x15c   : > { %v10961_v17 = vmax.f32 %v2497_v51, %v1614_v27  ;;  %v8589_v20 = vpop.f32.mrb[54].mxu0  ;;  %v10963_v35 = vpop.f32.mrb[54].mxu1 }
 0x15d   : > { %v10965_v54 = vmax.f32 %v2500_v56, %v8589_v20  ;;  %v1617_v50 = vpop.f32.mrb[55].mxu0  ;;  %v2531_v36 = vmax.f32 %v10957_v43, %v10955_v40  ;;  %v10969_v39 = vpop.f32.mrb[55].mxu1 }
 0x15e   : > { %v10971_v37 = vmax.f32 %v2498_v52, %v1617_v50  ;;  %v2529_v16 = vmax.f32 %v10961_v17, %v10959_v30 }
 0x15f   : > { %v2532_v51 = vmax.f32 %v10965_v54, %v10963_v35 }
 0x160   : > { %v2530_v48 = vmax.f32 %v10971_v37, %v10969_v39 }
 0x162   : > { %v8592_v26 = vpop.f32.mrb[56].mxu0  ;;  %v10979_v56 = vpop.f32.mrb[56].mxu1 }
 0x163   : > { %v10981_v47 = vmax.f32 %v2503_v63, %v8592_v26  ;;  %v1630_v49 = vpop.f32.mrb[57].mxu0  ;;  %v10983_v42 = vpop.f32.mrb[57].mxu1 }
 0x164   : > { %v10985_v29 = vmax.f32 %v2501_v19, %v1630_v49  ;;  %v8593_v52 = vpop.f32.mrb[58].mxu0  ;;  %v10987_v18 = vpop.f32.mrb[58].mxu1 }
 0x165   : > { %v10989_v44 = vmax.f32 %v2504_v24, %v8593_v52  ;;  %v1633_v22 = vpop.f32.mrb[59].mxu0  ;;  %v2535_v28 = vmax.f32 %v10981_v47, %v10979_v56  ;;  %v10993_v31 = vpop.f32.mrb[59].mxu1 }
 0x166   : > { %v10995_v33 = vmax.f32 %v2502_v32, %v1633_v22  ;;  %v2533_v63 = vmax.f32 %v10985_v29, %v10983_v42 }
 0x167   : > { %v2536_v19 = vmax.f32 %v10989_v44, %v10987_v18 }
 0x168   : > { %v2534_v34 = vmax.f32 %v10995_v33, %v10993_v31 }
 0x16a   : > { %v8596_v62 = vpop.f32.mrb[60].mxu0  ;;  %v11003_v24 = vpop.f32.mrb[60].mxu1 }
 0x16b   : > { %v11005_v46 = vmax.f32 %v2507_v21, %v8596_v62  ;;  %v1646_v55 = vpop.f32.mrb[61].mxu0  ;;  %v11007_v60 = vpop.f32.mrb[61].mxu1 }
 0x16c   : > { %v11009_v61 = vmax.f32 %v2505_v38, %v1646_v55  ;;  %v8597_v32 = vpop.f32.mrb[62].mxu0  ;;  %v11011_v41 = vpop.f32.mrb[62].mxu1 }
 0x16d   : > { %v11013_v58 = vmax.f32 %v2508_v57, %v8597_v32  ;;  %v1649_v40 = vpop.f32.mrb[63].mxu0  ;;  %v2539_v43 = vmax.f32 %v11005_v46, %v11003_v24  ;;  %v11017_v27 = vpop.f32.mrb[63].mxu1 }
 0x16e   : > { %v11019_v30 = vmax.f32 %v2506_v23, %v1649_v40  ;;  %v2537_v21 = vmax.f32 %v11009_v61, %v11007_v60 }
 0x16f   : > { %v2540_v38 = vmax.f32 %v11013_v58, %v11011_v41 }
 0x170   : > { %v2538_v17 = vmax.f32 %v11019_v30, %v11017_v27 }
 0x172   : > { %v8600_v20 = vpop.f32.mrb[64].mxu0  ;;  %v11027_v57 = vpop.f32.mrb[64].mxu1 }
 0x173   : > { %v11029_v35 = vmax.f32 %v2527_v53, %v8600_v20  ;;  %v1662_v54 = vpop.f32.mrb[65].mxu0  ;;  %v11031_v50 = vpop.f32.mrb[65].mxu1 }
 0x174   : > { %v11033_v39 = vmax.f32 %v2525_v45, %v1662_v54  ;;  %v8601_v23 = vpop.f32.mrb[66].mxu0  ;;  %v11035_v37 = vpop.f32.mrb[66].mxu1 }
 0x175   : > { %v11037_v26 = vmax.f32 %v2528_v25, %v8601_v23  ;;  %v1665_v56 = vpop.f32.mrb[67].mxu0  ;;  %v2559_v47 = vmax.f32 %v11029_v35, %v11027_v57  ;;  %v11041_v49 = vpop.f32.mrb[67].mxu1 }
 0x176   : > { %v11043_v42 = vmax.f32 %v2526_v59, %v1665_v56  ;;  %v2557_v53 = vmax.f32 %v11033_v39, %v11031_v50 }
 0x177   : > { %v2560_v45 = vmax.f32 %v11037_v26, %v11035_v37 }
 0x178   : > { %v2558_v29 = vmax.f32 %v11043_v42, %v11041_v49 }
 0x17a   : > { %v8604_v52 = vpop.f32.mrb[68].mxu0  ;;  %v11051_v25 = vpop.f32.mrb[68].mxu1 }
 0x17b   : > { %v11053_v18 = vmax.f32 %v2531_v36, %v8604_v52  ;;  %v1678_v44 = vpop.f32.mrb[69].mxu0  ;;  %v11055_v22 = vpop.f32.mrb[69].mxu1 }
 0x17c   : > { %v11057_v31 = vmax.f32 %v2529_v16, %v1678_v44  ;;  %v8605_v59 = vpop.f32.mrb[70].mxu0  ;;  %v11059_v33 = vpop.f32.mrb[70].mxu1 }
 0x17d   : > { %v11061_v62 = vmax.f32 %v2532_v51, %v8605_v59  ;;  %v1681_v24 = vpop.f32.mrb[71].mxu0  ;;  %v2563_v46 = vmax.f32 %v11053_v18, %v11051_v25  ;;  %v11065_v55 = vpop.f32.mrb[71].mxu1 }
 0x17e   : > { %v11067_v60 = vmax.f32 %v2530_v48, %v1681_v24  ;;  %v2561_v36 = vmax.f32 %v11057_v31, %v11055_v22 }
 0x17f   : > { %v2564_v16 = vmax.f32 %v11061_v62, %v11059_v33 }
 0x180   : > { %v2562_v61 = vmax.f32 %v11067_v60, %v11065_v55 }
 0x182   : > { %v8608_v32 = vpop.f32.mrb[72].mxu0  ;;  %v11075_v51 = vpop.f32.mrb[72].mxu1 }
 0x183   : > { %v11077_v41 = vmax.f32 %v2535_v28, %v8608_v32  ;;  %v1694_v58 = vpop.f32.mrb[73].mxu0  ;;  %v11079_v40 = vpop.f32.mrb[73].mxu1 }
 0x184   : > { %v11081_v27 = vmax.f32 %v2533_v63, %v1694_v58  ;;  %v8609_v48 = vpop.f32.mrb[74].mxu0  ;;  %v11083_v30 = vpop.f32.mrb[74].mxu1 }
 0x185   : > { %v11085_v20 = vmax.f32 %v2536_v19, %v8609_v48  ;;  %v1697_v57 = vpop.f32.mrb[75].mxu0  ;;  %v2567_v35 = vmax.f32 %v11077_v41, %v11075_v51  ;;  %v11089_v54 = vpop.f32.mrb[75].mxu1 }
 0x186   : > { %v11091_v50 = vmax.f32 %v2534_v34, %v1697_v57  ;;  %v2565_v28 = vmax.f32 %v11081_v27, %v11079_v40 }
 0x187   : > { %v2568_v63 = vmax.f32 %v11085_v20, %v11083_v30 }
 0x188   : > { %v2566_v39 = vmax.f32 %v11091_v50, %v11089_v54 }
 0x18a   : > { %v8612_v23 = vpop.f32.mrb[76].mxu0  ;;  %v11099_v19 = vpop.f32.mrb[76].mxu1 }
 0x18b   : > { %v11101_v37 = vmax.f32 %v2539_v43, %v8612_v23  ;;  %v1710_v26 = vpop.f32.mrb[77].mxu0  ;;  %v11103_v56 = vpop.f32.mrb[77].mxu1 }
 0x18c   : > { %v11105_v49 = vmax.f32 %v2537_v21, %v1710_v26  ;;  %v8613_v34 = vpop.f32.mrb[78].mxu0  ;;  %v11107_v42 = vpop.f32.mrb[78].mxu1 }
 0x18d   : > { %v11109_v52 = vmax.f32 %v2540_v38, %v8613_v34  ;;  %v1713_v25 = vpop.f32.mrb[79].mxu0  ;;  %v2571_v18 = vmax.f32 %v11101_v37, %v11099_v19  ;;  %v11113_v44 = vpop.f32.mrb[79].mxu1 }
 0x18e   : > { %v11115_v22 = vmax.f32 %v2538_v17, %v1713_v25  ;;  %v2569_v43 = vmax.f32 %v11105_v49, %v11103_v56 }
 0x18f   : > { %v2572_v21 = vmax.f32 %v11109_v52, %v11107_v42 }
 0x190   : > { %v2570_v31 = vmax.f32 %v11115_v22, %v11113_v44 }
 0x192   : > { %v8616_v59 = vpop.f32.mrb[80].mxu0  ;;  %v11123_v38 = vpop.f32.mrb[80].mxu1 }
 0x193   : > { %v11125_v33 = vmax.f32 %v2559_v47, %v8616_v59  ;;  %v1726_v62 = vpop.f32.mrb[81].mxu0  ;;  %v11127_v24 = vpop.f32.mrb[81].mxu1 }
 0x194   : > { %v11129_v55 = vmax.f32 %v2557_v53, %v1726_v62  ;;  %v8617_v17 = vpop.f32.mrb[82].mxu0  ;;  %v11131_v60 = vpop.f32.mrb[82].mxu1 }
 0x195   : > { %v11133_v32 = vmax.f32 %v2560_v45, %v8617_v17  ;;  %v1729_v51 = vpop.f32.mrb[83].mxu0  ;;  %v2591_v41 = vmax.f32 %v11125_v33, %v11123_v38  ;;  %v11137_v58 = vpop.f32.mrb[83].mxu1 }
 0x196   : > { %v11139_v40 = vmax.f32 %v2558_v29, %v1729_v51  ;;  %v2589_v47 = vmax.f32 %v11129_v55, %v11127_v24 }
 0x197   : > { %v2592_v53 = vmax.f32 %v11133_v32, %v11131_v60 }
 0x198   : > { %v2590_v27 = vmax.f32 %v11139_v40, %v11137_v58 }
 0x19a   : > { %v8620_v48 = vpop.f32.mrb[84].mxu0  ;;  %v11147_v45 = vpop.f32.mrb[84].mxu1 }
 0x19b   : > { %v11149_v30 = vmax.f32 %v2563_v46, %v8620_v48  ;;  %v1742_v20 = vpop.f32.mrb[85].mxu0  ;;  %v11151_v57 = vpop.f32.mrb[85].mxu1 }
 0x19c   : > { %v11153_v54 = vmax.f32 %v2561_v36, %v1742_v20  ;;  %v8621_v29 = vpop.f32.mrb[86].mxu0  ;;  %v11155_v50 = vpop.f32.mrb[86].mxu1 }
 0x19d   : > { %v11157_v23 = vmax.f32 %v2564_v16, %v8621_v29  ;;  %v1745_v19 = vpop.f32.mrb[87].mxu0  ;;  %v2595_v37 = vmax.f32 %v11149_v30, %v11147_v45  ;;  %v11161_v26 = vpop.f32.mrb[87].mxu1 }
 0x19e   : > { %v11163_v56 = vmax.f32 %v2562_v61, %v1745_v19  ;;  %v2593_v46 = vmax.f32 %v11153_v54, %v11151_v57 }
 0x19f   : > { %v2596_v36 = vmax.f32 %v11157_v23, %v11155_v50 }
 0x1a0   : > { %v2594_v49 = vmax.f32 %v11163_v56, %v11161_v26 }
 0x1a2   : > { %v8624_v34 = vpop.f32.mrb[88].mxu0  ;;  %v11171_v16 = vpop.f32.mrb[88].mxu1 }
 0x1a3   : > { %v11173_v42 = vmax.f32 %v2567_v35, %v8624_v34  ;;  %v1758_v52 = vpop.f32.mrb[89].mxu0  ;;  %v11175_v25 = vpop.f32.mrb[89].mxu1 }
 0x1a4   : > { %v11177_v44 = vmax.f32 %v2565_v28, %v1758_v52  ;;  %v8625_v61 = vpop.f32.mrb[90].mxu0  ;;  %v11179_v22 = vpop.f32.mrb[90].mxu1 }
 0x1a5   : > { %v11181_v59 = vmax.f32 %v2568_v63, %v8625_v61  ;;  %v1761_v38 = vpop.f32.mrb[91].mxu0  ;;  %v2599_v33 = vmax.f32 %v11173_v42, %v11171_v16  ;;  %v11185_v62 = vpop.f32.mrb[91].mxu1 }
 0x1a6   : > { %v11187_v24 = vmax.f32 %v2566_v39, %v1761_v38  ;;  %v2597_v35 = vmax.f32 %v11177_v44, %v11175_v25 }
 0x1a7   : > { %v2600_v28 = vmax.f32 %v11181_v59, %v11179_v22 }
 0x1a8   : > { %v2598_v55 = vmax.f32 %v11187_v24, %v11185_v62 }
 0x1aa   : > { %v8628_v17 = vpop.f32.mrb[92].mxu0  ;;  %v11195_v63 = vpop.f32.mrb[92].mxu1 }
 0x1ab   : > { %v11197_v60 = vmax.f32 %v2571_v18, %v8628_v17  ;;  %v1774_v32 = vpop.f32.mrb[93].mxu0  ;;  %v11199_v51 = vpop.f32.mrb[93].mxu1 }
 0x1ac   : > { %v11201_v58 = vmax.f32 %v2569_v43, %v1774_v32  ;;  %v8629_v39 = vpop.f32.mrb[94].mxu0  ;;  %v11203_v40 = vpop.f32.mrb[94].mxu1 }
 0x1ad   : > { %v11205_v48 = vmax.f32 %v2572_v21, %v8629_v39  ;;  %v1777_v45 = vpop.f32.mrb[95].mxu0  ;;  %v2603_v30 = vmax.f32 %v11197_v60, %v11195_v63  ;;  %v11209_v20 = vpop.f32.mrb[95].mxu1 }
 0x1ae   : > { %v11211_v57 = vmax.f32 %v2570_v31, %v1777_v45  ;;  %v2601_v18 = vmax.f32 %v11201_v58, %v11199_v51 }
 0x1af   : > { %v2604_v43 = vmax.f32 %v11205_v48, %v11203_v40 }
 0x1b0   : > { %v2602_v54 = vmax.f32 %v11211_v57, %v11209_v20 }
 0x1b2   : > { %v8632_v29 = vpop.f32.mrb[96].mxu0  ;;  %v11219_v21 = vpop.f32.mrb[96].mxu1 }
 0x1b3   : > { %v11221_v50 = vmax.f32 %v2591_v41, %v8632_v29  ;;  %v1790_v23 = vpop.f32.mrb[97].mxu0  ;;  %v11223_v19 = vpop.f32.mrb[97].mxu1 }
 0x1b4   : > { %v11225_v26 = vmax.f32 %v2589_v47, %v1790_v23  ;;  %v8633_v31 = vpop.f32.mrb[98].mxu0  ;;  %v11227_v56 = vpop.f32.mrb[98].mxu1 }
 0x1b5   : > { %v11229_v34 = vmax.f32 %v2592_v53, %v8633_v31  ;;  %v1793_v16 = vpop.f32.mrb[99].mxu0  ;;  %v2623_v42 = vmax.f32 %v11221_v50, %v11219_v21  ;;  %v11233_v52 = vpop.f32.mrb[99].mxu1 }
 0x1b6   : > { %v11235_v25 = vmax.f32 %v2590_v27, %v1793_v16  ;;  %v2621_v41 = vmax.f32 %v11225_v26, %v11223_v19 }
 0x1b7   : > { %v2624_v47 = vmax.f32 %v11229_v34, %v11227_v56 }
 0x1b8   : > { %v2622_v44 = vmax.f32 %v11235_v25, %v11233_v52 }
 0x1ba   : > { %v8636_v61 = vpop.f32.mrb[100].mxu0  ;;  %v11243_v53 = vpop.f32.mrb[100].mxu1 }
 0x1bb   : > { %v11245_v22 = vmax.f32 %v2595_v37, %v8636_v61  ;;  %v1806_v59 = vpop.f32.mrb[101].mxu0  ;;  %v11247_v38 = vpop.f32.mrb[101].mxu1 }
 0x1bc   : > { %v11249_v62 = vmax.f32 %v2593_v46, %v1806_v59  ;;  %v8637_v27 = vpop.f32.mrb[102].mxu0  ;;  %v11251_v24 = vpop.f32.mrb[102].mxu1 }
 0x1bd   : > { %v11253_v17 = vmax.f32 %v2596_v36, %v8637_v27  ;;  %v1809_v63 = vpop.f32.mrb[103].mxu0  ;;  %v2627_v60 = vmax.f32 %v11245_v22, %v11243_v53  ;;  %v11257_v32 = vpop.f32.mrb[103].mxu1 }
 0x1be   : > { %v11259_v51 = vmax.f32 %v2594_v49, %v1809_v63  ;;  %v2625_v37 = vmax.f32 %v11249_v62, %v11247_v38 }
 0x1bf   : > { %v2628_v46 = vmax.f32 %v11253_v17, %v11251_v24 }
 0x1c0   : > { %v2626_v58 = vmax.f32 %v11259_v51, %v11257_v32 }
 0x1c2   : > { %v8640_v39 = vpop.f32.mrb[104].mxu0  ;;  %v11267_v36 = vpop.f32.mrb[104].mxu1 }
 0x1c3   : > { %v11269_v40 = vmax.f32 %v2599_v33, %v8640_v39  ;;  %v1822_v48 = vpop.f32.mrb[105].mxu0  ;;  %v11271_v45 = vpop.f32.mrb[105].mxu1 }
 0x1c4   : > { %v11273_v20 = vmax.f32 %v2597_v35, %v1822_v48  ;;  %v8641_v49 = vpop.f32.mrb[106].mxu0  ;;  %v11275_v57 = vpop.f32.mrb[106].mxu1 }
 0x1c5   : > { %v11277_v29 = vmax.f32 %v2600_v28, %v8641_v49  ;;  %v1825_v21 = vpop.f32.mrb[107].mxu0  ;;  %v2631_v50 = vmax.f32 %v11269_v40, %v11267_v36  ;;  %v11281_v23 = vpop.f32.mrb[107].mxu1 }
 0x1c6   : > { %v11283_v19 = vmax.f32 %v2598_v55, %v1825_v21  ;;  %v2629_v33 = vmax.f32 %v11273_v20, %v11271_v45 }
 0x1c7   : > { %v2632_v35 = vmax.f32 %v11277_v29, %v11275_v57 }
 0x1c8   : > { %v2630_v26 = vmax.f32 %v11283_v19, %v11281_v23 }
 0x1ca   : > { %v8644_v31 = vpop.f32.mrb[108].mxu0  ;;  %v11291_v28 = vpop.f32.mrb[108].mxu1 }
 0x1cb   : > { %v11293_v56 = vmax.f32 %v2603_v30, %v8644_v31  ;;  %v1838_v34 = vpop.f32.mrb[109].mxu0  ;;  %v11295_v16 = vpop.f32.mrb[109].mxu1 }
 0x1cc   : > { %v11297_v52 = vmax.f32 %v2601_v18, %v1838_v34  ;;  %v8645_v55 = vpop.f32.mrb[110].mxu0  ;;  %v11299_v25 = vpop.f32.mrb[110].mxu1 }
 0x1cd   : > { %v11301_v61 = vmax.f32 %v2604_v43, %v8645_v55  ;;  %v1841_v53 = vpop.f32.mrb[111].mxu0  ;;  %v11305_v59 = vpop.f32.mrb[111].mxu1 }
 0x1ce   : > { %v11307_v38 = vmax.f32 %v2602_v54, %v1841_v53  ;;  %v15684_v23 = vmax.f32 %v11297_v52, %v11295_v16 }
 0x1d2   : > { %v8648_v27 = vpop.f32.mrb[112].mxu0  ;;  %v8776_v43 = vpop.f32.mrb[112].mxu1 }
 0x1d3   : > { %v2639_v24 = vmax.f32 %v2623_v42, %v8648_v27  ;;  %v1854_v17 = vpop.f32.mrb[113].mxu0  ;;  %v2366_v63 = vpop.f32.mrb[113].mxu1 }
 0x1d4   : > { %v2637_v39 = vmax.f32 %v2621_v41, %v1854_v17  ;;  %v8649_v48 = vpop.f32.mrb[114].mxu0  ;;  %v8777_v49 = vpop.f32.mrb[114].mxu1 }
 0x1d5   : > { %v2640_v21 = vmax.f32 %v2624_v47, %v8649_v48  ;;  %v1857_v54 = vpop.f32.mrb[115].mxu0  ;;  %v2655_v31 = vmax.f32 %v2639_v24, %v9872_v13  ;;  %v2369_v34 = vpop.f32.mrb[115].mxu1 }
 0x1d6   : > { %v2638_v55 = vmax.f32 %v2622_v44, %v1857_v54  ;;  %v2653_v53 = vmax.f32 %v2637_v39, %v9880_v15 }
 0x1d7   : > { %v11317_v13 = vmax.f32 %v8776_v43, %v2655_v31   ;;  %v2656_v62 = vmax.f32 %v2640_v21, %v9868_v12 }
 0x1d8   : > { %v11320_v15 = vmax.f32 %v2366_v63, %v2653_v53   ;;  %v2654_v42 = vmax.f32 %v2638_v55, %v9876_v14 }
 0x1d9   : > { %v15675_v18 = vmov %v11317_v13  ;;  %v11323_v12 = vmax.f32 %v8777_v49, %v2656_v62  }
 0x1da   : > { %v15676_v30 = vmov %v11320_v15  ;;  %v8652_v27 = vpop.f32.mrb[116].mxu0  ;;  %v11325_v14 = vmax.f32 %v2369_v34, %v2654_v42   ;;  %v8780_v17 = vpop.f32.mrb[116].mxu1 }
 0x1db   : > { %v15677_v41 = vmov %v11323_v12  ;;  %v2643_v48 = vmax.f32 %v2627_v60, %v8652_v27  ;;  %v1870_v24 = vpop.f32.mrb[117].mxu0  ;;  %v2382_v22 = vpop.f32.mrb[117].mxu1 }
 0x1dc   : > { %v15678_v47 = vmov %v11325_v14  ;;  %v2641_v44 = vmax.f32 %v2625_v37, %v1870_v24  ;;  %v8653_v54 = vpop.f32.mrb[118].mxu0  ;;  %v8781_v39 = vpop.f32.mrb[118].mxu1 }
 0x1dd   : > { %v2644_v43 = vmax.f32 %v2628_v46, %v8653_v54  ;;  %v1873_v13 = vpop.f32.mrb[119].mxu0  ;;  %v2659_v21 = vmax.f32 %v2643_v48, %v9856_v9  ;;  %v2385_v63 = vpop.f32.mrb[119].mxu1 }
 0x1de   : > { %v2642_v15 = vmax.f32 %v2626_v58, %v1873_v13  ;;  %v2657_v12 = vmax.f32 %v2641_v44, %v9864_v11 }
 0x1df   : > { %v11332_v9 = vmax.f32 %v8780_v17, %v2659_v21   ;;  %v2660_v14 = vmax.f32 %v2644_v43, %v9852_v8 }
 0x1e0   : > { %v11335_v11 = vmax.f32 %v2382_v22, %v2657_v12   ;;  %v2658_v37 = vmax.f32 %v2642_v15, %v9860_v10  ;;  %v15700_v12 = vmov %v15677_v41  ;;  %v15703_v15 = vmov %v15676_v30 }
 0x1e1   : > { %v15679_v62 = vmov %v11332_v9  ;;  %v11338_v8 = vmax.f32 %v8781_v39, %v2660_v14   ;;  %v15702_v14 = vmov %v15678_v47 }
 0x1e2   : > { %v15680_v60 = vmov %v11335_v11  ;;  %v8656_v49 = vpop.f32.mrb[120].mxu0  ;;  %v11340_v10 = vmax.f32 %v2385_v63, %v2658_v37   ;;  %v8784_v34 = vpop.f32.mrb[120].mxu1 }
 0x1e3   : > { %v15681_v46 = vmov %v11338_v8  ;;  %v2647_v32 = vmax.f32 %v2631_v50, %v8656_v49  ;;  %v1886_v51 = vpop.f32.mrb[121].mxu0  ;;  %v2398_v58 = vpop.f32.mrb[121].mxu1 }
 0x1e4   : > { %v15682_v31 = vmov %v11340_v10  ;;  %v2645_v9 = vmax.f32 %v2629_v33, %v1886_v51  ;;  %v8657_v22 = vpop.f32.mrb[122].mxu0  ;;  %v8785_v11 = vpop.f32.mrb[122].mxu1 }
 0x1e5   : > { %v2648_v8 = vmax.f32 %v2632_v35, %v8657_v22  ;;  %v1889_v55 = vpop.f32.mrb[123].mxu0  ;;  %v2663_v10 = vmax.f32 %v2647_v32, %v9840_v5  ;;  %v2401_v53 = vpop.f32.mrb[123].mxu1  ;;  %v15683_v5 = vmax.f32 %v11293_v56, %v11291_v28  ;;  %v15686_v28 = vmax.f32 %v11307_v38, %v11305_v59 }
 0x1e6   : > { %v2646_v36 = vmax.f32 %v2630_v26, %v1889_v55  ;;  %v2661_v40 = vmax.f32 %v2645_v9, %v9848_v7  ;;  %v15697_v9 = vmov %v15679_v62 }
 0x1e7   : > { %v2679_v50 = vmax.f32 %v8784_v34, %v2663_v10   ;;  %v2664_v45 = vmax.f32 %v2648_v8, %v9836_v4  ;;  %v15685_v4 = vmax.f32 %v11301_v61, %v11299_v25  ;;  %v15696_v8 = vmov %v15681_v46 }
 0x1e8   : > { %v2677_v20 = vmax.f32 %v2398_v58, %v2661_v40   ;;  %v2662_v33 = vmax.f32 %v2646_v36, %v9844_v6  ;;  %v15698_v10 = vmov %v15682_v31 }
 0x1e9   : > { %v2680_v42 = vmax.f32 %v8785_v11, %v2664_v45   ;;  %v15699_v11 = vmov %v15680_v60 }
 0x1ea   : > { %v8660_v27 = vpop.f32.mrb[124].mxu0  ;;  %v2678_v57 = vmax.f32 %v2401_v53, %v2662_v33   ;;  %v8788_v29 = vpop.f32.mrb[124].mxu1 }
 0x1eb   : > { %v2651_v35 = vmax.f32 %v15683_v5, %v8660_v27  ;;  %v1902_v17 = vpop.f32.mrb[125].mxu0  ;;  %v2414_v48 = vpop.f32.mrb[125].mxu1  ;;  %v15693_v5 = vmov %v2679_v50 }
 0x1ec   : > { %v2649_v7 = vmax.f32 %v15684_v23, %v1902_v17  ;;  %v8661_v19 = vpop.f32.mrb[126].mxu0  ;;  %v8789_v26 = vpop.f32.mrb[126].mxu1 }
 0x1ed   : > { %v2652_v6 = vmax.f32 %v15685_v4, %v8661_v19  ;;  %v1905_v24 = vpop.f32.mrb[127].mxu0  ;;  %v2667_v44 = vmax.f32 %v2651_v35, %v9824_v1  ;;  %v2417_v54 = vpop.f32.mrb[127].mxu1  ;;  %v15692_v4 = vmov %v2680_v42 }
 0x1ee   : > { %v2650_v56 = vmax.f32 %v15686_v28, %v1905_v24  ;;  %v2665_v39 = vmax.f32 %v2649_v7, %v9832_v3  ;;  %v15695_v7 = vmov %v2677_v20  ;;  %28 = sbr.rel (!%p11375_p0) target bundleno = 6 (0x6), region = 60 }
 0x1ef   : > { %v2683_v43 = vmax.f32 %v8788_v29, %v2667_v44   ;;  %v2668_v16 = vmax.f32 %v2652_v6, %v9820_v0  ;;  %v15694_v6 = vmov %v2678_v57 }
 0x1f0   : > { %v2681_v52 = vmax.f32 %v2414_v48, %v2665_v39   ;;  %v2666_v13 = vmax.f32 %v2650_v56, %v9828_v2 }
 0x1f1   : > { %v2684_v21 = vmax.f32 %v8789_v26, %v2668_v16   ;;  %v15689_v1 = vmov %v2683_v43 }
 0x1f2   : > { %v2682_v63 = vmax.f32 %v2417_v54, %v2666_v13   ;;  %v15691_v3 = vmov %v2681_v52  ;;  %v15701_v13 = vmov %v15675_v18 }
 0x1f3   : > { %v15688_v0 = vmov %v2684_v21 }
 0x1f4   : > { %v15690_v2 = vmov %v2682_v63 }
 0x1f5 LB: > { %15704 = vst [vmem:[#allocation2_spill] sm:$0xff] %v9888_v21  ;;  %15705 = vst [vmem:[#allocation3_spill] sm:$0xff] %v9892_v43  ;;  %v5092_v0 = vld [vmem:[%s15638_s2 + $0x10] sm:$0xff]  ;;  %v15643_v1 = vmov 0   ;;  %v5090_v2 = vld [vmem:[%s15638_s2] sm:$0xff]  ;;  %s7978_s16 = sshll.u32 %s9952_s21, 4  ;;  %s9952_s21 = sphi %s11463_s21, %s2690_s21   ;;  %v9948_v30 = vphi %v15676_v30, %v16184_v30   ;;  %v9944_v47 = vphi %v15678_v47, %v16183_v47   ;;  %v9940_v18 = vphi %v15675_v18, %v16182_v18   ;;  %v9936_v41 = vphi %v15677_v41, %v16181_v41   ;;  %v9932_v60 = vphi %v15680_v60, %v16180_v60   ;;  %v9928_v31 = vphi %v15682_v31, %v16179_v31   ;;  %v9924_v62 = vphi %v15679_v62, %v16178_v62   ;;  %v9920_v46 = vphi %v15681_v46, %v16177_v46   ;;  %v9916_v20 = vphi %v2677_v20, %v16176_v20   ;;  %v9912_v57 = vphi %v2678_v57, %v16175_v57   ;;  %v9908_v50 = vphi %v2679_v50, %v16174_v50   ;;  %v9904_v42 = vphi %v2680_v42, %v16173_v42   ;;  %v9900_v52 = vphi %v2681_v52, %v16172_v52   ;;  %v9896_v63 = vphi %v2682_v63, %v16171_v63   ;;  %v9892_v43 = vphi %v2683_v43, %v16170_v43   ;;  %v9888_v21 = vphi %v2684_v21, %v16169_v21  }
 0x1f6   : > { %15706 = vst [vmem:[#allocation4_spill] sm:$0xff] %v9896_v63  ;;  %15707 = vst [vmem:[#allocation5_spill] sm:$0xff] %v9900_v52  ;;  %9546 = vset.pattern.permute.xlu1 %v15643_v1  ;;  %9545 = vset.pattern.permute.xlu0 %v15643_v1  ;;  %v5093_v3 = vld [vmem:[%s15638_s2 + $0x18] sm:$0xff]  ;;  %v5091_v25 = vld [vmem:[%s15638_s2 + $0x8] sm:$0xff]  ;;  %v11531_v61 = vstv %s7978_s16  ;;  %s2708_s17 = sshra.s32 %s7978_s16, 3  ;;  %s2690_s21 = sadd.s32 1, %s9952_s21  }
 0x1f7   : > { %15708 = vst [vmem:[#allocation6_spill] sm:$0xff] %v9904_v42  ;;  %15709 = vst [vmem:[#allocation7_spill] sm:$0xff] %v9908_v50  ;;  %v5095_v59 = vld [vmem:[%s15638_s2 + $0x28] sm:$0xff]  ;;  %vm5349_vm1 = vcmp.ge.s32.totalorder %v5092_v0, %v11531_v61  ;;  %vm5347_vm2 = vcmp.ge.s32.totalorder %v5090_v2, %v11531_v61  ;;  %s7979_s20 = sshll.u32 %s2708_s17, 2  ;;  %vm5350_vm3 = vcmp.ge.s32.totalorder %v5093_v3, %v11531_v61  ;;  %v9552_v38 = vld [vmem:[%s15637_s1] sm:$0xff]   ;;  %p15499_p1 = scmp.ge.s32.totalorder %s2690_s21, 32  }
 0x1f8   : > { %15710 = vst [vmem:[#allocation8_spill] sm:$0xff] %v9912_v57  ;;  %15711 = vst [vmem:[#allocation9_spill] sm:$0xff] %v9916_v20  ;;  %vm5348_vm4 = vcmp.ge.s32.totalorder %v5091_v25, %v11531_v61  ;;  %v5605_v15 = vsel %vm5349_vm1, 1, %v15643_v1  ;;  %v5603_v12 = vsel %vm5347_vm2, 1, %v15643_v1  ;;  %s11548_s26 = scalar_lea.vmem %s15636_s0, %s7979_s20  ;;  %v5094_v14 = vld [vmem:[%s15638_s2 + $0x20] sm:$0xff]  ;;  %v5606_v49 = vsel %vm5350_vm3, 1, %v15643_v1  ;;  %8800 = vmatprep.mubr.msk.bf16.mxu0 %vm987_vm0, %v9552_v38 }
 0x1f9   : > { %15712 = vst [vmem:[#allocation10_spill] sm:$0xff] %v9920_v46  ;;  %15713 = vst [vmem:[#allocation11_spill] sm:$0xff] %v9924_v62  ;;  %5866 = vperm.xlu1 %9546, %v5605_v15   ;;  %5860 = vperm.xlu0 %9545, %v5603_v12   ;;  %v9547_v37 = vld [vmem:[%s11548_s26] sm:$0xff]   ;;  %v5604_v34 = vsel %vm5348_vm4, 1, %v15643_v1  ;;  %v9548_v32 = vld [vmem:[%s11548_s26 + $0x8] sm:$0xff]   ;;  %vm5352_vm5 = vcmp.ge.s32.totalorder %v5095_v59, %v11531_v61  ;;  %vm5351_vm6 = vcmp.ge.s32.totalorder %v5094_v14, %v11531_v61 }
 0x1fa   : > { %15714 = vst [vmem:[#allocation12_spill] sm:$0xff] %v9928_v31  ;;  %15715 = vst [vmem:[#allocation13_spill] sm:$0xff] %v9932_v60  ;;  %8790 = vmatprep.subr.bf16.mxu0 %v9547_v37  ;;  %v5097_v51 = vld [vmem:[%s15638_s2 + $0x38] sm:$0xff]  ;;  %9125 = vmatprep.subr.bf16.mxu1 %v9547_v37  ;;  %v5096_v58 = vld [vmem:[%s15638_s2 + $0x30] sm:$0xff]  ;;  %v5608_v9 = vsel %vm5352_vm5, 1, %v15643_v1  ;;  %v5607_v22 = vsel %vm5351_vm6, 1, %v15643_v1 }
 0x1fb   : > { %15716 = vst [vmem:[#allocation14_spill] sm:$0xff] %v9936_v41  ;;  %15717 = vst [vmem:[#allocation15_spill] sm:$0xff] %v9940_v18  ;;  %8791 = vmatpush3.bf16.msra.mxu0 %v9547_v37  ;;  %9130 = vmatpush3.bf16.msra.mxu1 %v9547_v37  ;;  %v9549_v11 = vld [vmem:[%s11548_s26 + $0x10] sm:$0xff]   ;;  %vm5354_vm7 = vcmp.ge.s32.totalorder %v5097_v51, %v11531_v61  ;;  %vm5353_vm8 = vcmp.ge.s32.totalorder %v5096_v58, %v11531_v61  ;;  %v5099_v8 = vld [vmem:[%s15638_s2 + $0x48] sm:$0xff] }
 0x1fc   : > { %15718 = vst [vmem:[#allocation16_spill] sm:$0xff] %v9944_v47  ;;  %15719 = vst [vmem:[#allocation17_spill] sm:$0xff] %v9948_v30  ;;  %8792 = vmatprep.subr.bf16.mxu0 %v9548_v32  ;;  %9126 = vmatprep.subr.bf16.mxu1 %v9548_v32  ;;  %v5098_v55 = vld [vmem:[%s15638_s2 + $0x40] sm:$0xff]  ;;  %v5610_v10 = vsel %vm5354_vm7, 1, %v15643_v1  ;;  %v5609_v53 = vsel %vm5353_vm8, 1, %v15643_v1  ;;  %v9550_v36 = vld [vmem:[%s11548_s26 + $0x18] sm:$0xff]   ;;  %vm5356_vm9 = vcmp.ge.s32.totalorder %v5099_v8, %v11531_v61 }
 0x1fd   : > { %5869 = vperm.xlu1 %9546, %v5606_v49   ;;  %5863 = vperm.xlu0 %9545, %v5604_v34   ;;  %vm5355_vm10 = vcmp.ge.s32.totalorder %v5098_v55, %v11531_v61  ;;  %v5101_v40 = vld [vmem:[%s15638_s2 + $0x58] sm:$0xff]  ;;  %v5100_v45 = vld [vmem:[%s15638_s2 + $0x50] sm:$0xff]  ;;  %v5612_v33 = vsel %vm5356_vm9, 1, %v15643_v1  ;;  %v9551_v29 = vld [vmem:[%s11548_s26 + $0x20] sm:$0xff]  }
 0x1fe   : > { %v5611_v27 = vsel %vm5355_vm10, 1, %v15643_v1  ;;  %vm5358_vm11 = vcmp.ge.s32.totalorder %v5101_v40, %v11531_v61  ;;  %vm5357_vm12 = vcmp.ge.s32.totalorder %v5100_v45, %v11531_v61  ;;  %v5103_v5 = vld [vmem:[%s15638_s2 + $0x68] sm:$0xff]  ;;  %v5102_v35 = vld [vmem:[%s15638_s2 + $0x60] sm:$0xff]  ;;  %v5105_v7 = vld [vmem:[%s15638_s2 + $0x78] sm:$0xff] }
 0x1ff   : > { %8793 = vmatpush3.bf16.msra.mxu0 %v9548_v32  ;;  %9131 = vmatpush3.bf16.msra.mxu1 %v9548_v32  ;;  %v5614_v17 = vsel %vm5358_vm11, 1, %v15643_v1  ;;  %v5613_v48 = vsel %vm5357_vm12, 1, %v15643_v1  ;;  %v9553_v23 = vld [vmem:[%s15637_s1 + $0x8] sm:$0xff]   ;;  %vm5360_vm13 = vcmp.ge.s32.totalorder %v5103_v5, %v11531_v61  ;;  %vm5359_vm14 = vcmp.ge.s32.totalorder %v5102_v35, %v11531_v61  ;;  %v5104_v19 = vld [vmem:[%s15638_s2 + $0x70] sm:$0xff]  ;;  %v5106_v44 = vld [vmem:[%s15638_s2 + $0x80] sm:$0xff] }
 0x200   : > { %8794 = vmatprep.subr.bf16.mxu0 %v9549_v11  ;;  %9127 = vmatprep.subr.bf16.mxu1 %v9549_v11  ;;  %v9554_v26 = vld [vmem:[%s15637_s1 + $0x10] sm:$0xff]   ;;  %v5616_v4 = vsel %vm5360_vm13, 1, %v15643_v1  ;;  %v5615_v6 = vsel %vm5359_vm14, 1, %v15643_v1  ;;  %vm5362_vm15 = vcmp.ge.s32.totalorder %v5105_v7, %v11531_v61  ;;  %vm5361_vm1 = vcmp.ge.s32.totalorder %v5104_v19, %v11531_v61  ;;  %v5107_v24 = vld [vmem:[%s15638_s2 + $0x88] sm:$0xff]  ;;  %v9555_v56 = vld [vmem:[%s15637_s1 + $0x18] sm:$0xff]  }
 0x201   : > { %5875 = vperm.xlu1 %9546, %v5608_v9   ;;  %5872 = vperm.xlu0 %9545, %v5607_v22   ;;  %v5618_v54 = vsel %vm5362_vm15, 1, %v15643_v1  ;;  %v5617_v28 = vsel %vm5361_vm1, 1, %v15643_v1  ;;  %vm5364_vm2 = vcmp.ge.s32.totalorder %v5107_v24, %v11531_v61  ;;  %vm5363_vm3 = vcmp.ge.s32.totalorder %v5106_v44, %v11531_v61  ;;  %v5109_v39 = vld [vmem:[%s15638_s2 + $0x98] sm:$0xff]  ;;  %v5108_v16 = vld [vmem:[%s15638_s2 + $0x90] sm:$0xff]  ;;  %v9556_v13 = vld [vmem:[%s15637_s1 + $0x20] sm:$0xff]  }
 0x202   : > { %v5620_v0 = vsel %vm5364_vm2, 1, %v15643_v1  ;;  %v5619_v2 = vsel %vm5363_vm3, 1, %v15643_v1  ;;  %vm5366_vm4 = vcmp.ge.s32.totalorder %v5109_v39, %v11531_v61  ;;  %vm5365_vm5 = vcmp.ge.s32.totalorder %v5108_v16, %v11531_v61  ;;  %v5111_v3 = vld [vmem:[%s15638_s2 + $0xa8] sm:$0xff]  ;;  %v5110_v25 = vld [vmem:[%s15638_s2 + $0xa0] sm:$0xff]  ;;  %v5113_v12 = vld [vmem:[%s15638_s2 + $0xb8] sm:$0xff] }
 0x203   : > { %8795 = vmatpush3.bf16.msra.mxu0 %v9549_v11  ;;  %9132 = vmatpush3.bf16.msra.mxu1 %v9549_v11  ;;  %v5622_v59 = vsel %vm5366_vm4, 1, %v15643_v1  ;;  %v5621_v38 = vsel %vm5365_vm5, 1, %v15643_v1  ;;  %v9557_v15 = vld [vmem:[%s15637_s1 + $0x28] sm:$0xff]   ;;  %vm5368_vm6 = vcmp.ge.s32.totalorder %v5111_v3, %v11531_v61  ;;  %vm5367_vm7 = vcmp.ge.s32.totalorder %v5110_v25, %v11531_v61  ;;  %v5112_v14 = vld [vmem:[%s15638_s2 + $0xb0] sm:$0xff]  ;;  %v5114_v51 = vld [vmem:[%s15638_s2 + $0xc0] sm:$0xff] }
 0x204   : > { %8796 = vmatprep.subr.bf16.mxu0 %v9550_v36  ;;  %9128 = vmatprep.subr.bf16.mxu1 %v9550_v36  ;;  %v9558_v37 = vld [vmem:[%s15637_s1 + $0x30] sm:$0xff]   ;;  %v5624_v49 = vsel %vm5368_vm6, 1, %v15643_v1  ;;  %v5623_v34 = vsel %vm5367_vm7, 1, %v15643_v1  ;;  %vm5370_vm8 = vcmp.ge.s32.totalorder %v5113_v12, %v11531_v61  ;;  %vm5369_vm9 = vcmp.ge.s32.totalorder %v5112_v14, %v11531_v61  ;;  %v5115_v32 = vld [vmem:[%s15638_s2 + $0xc8] sm:$0xff]  ;;  %v9559_v22 = vld [vmem:[%s15637_s1 + $0x38] sm:$0xff]  }
 0x205   : > { %5881 = vperm.xlu1 %9546, %v5610_v10   ;;  %5878 = vperm.xlu0 %9545, %v5609_v53   ;;  %v5626_v58 = vsel %vm5370_vm8, 1, %v15643_v1  ;;  %v5625_v9 = vsel %vm5369_vm9, 1, %v15643_v1  ;;  %vm5372_vm10 = vcmp.ge.s32.totalorder %v5115_v32, %v11531_v61  ;;  %vm5371_vm11 = vcmp.ge.s32.totalorder %v5114_v51, %v11531_v61  ;;  %v5117_v11 = vld [vmem:[%s15638_s2 + $0xd8] sm:$0xff]  ;;  %v5116_v8 = vld [vmem:[%s15638_s2 + $0xd0] sm:$0xff]  ;;  %v9560_v55 = vld [vmem:[%s15637_s1 + $0x40] sm:$0xff]  }
 0x206   : > { %v5628_v10 = vsel %vm5372_vm10, 1, %v15643_v1  ;;  %v5627_v53 = vsel %vm5371_vm11, 1, %v15643_v1  ;;  %vm5374_vm12 = vcmp.ge.s32.totalorder %v5117_v11, %v11531_v61  ;;  %vm5373_vm13 = vcmp.ge.s32.totalorder %v5116_v8, %v11531_v61  ;;  %v5118_v40 = vld [vmem:[%s15638_s2 + $0xe0] sm:$0xff]  ;;  %v5120_v5 = vld [vmem:[%s15638_s2 + $0xf0] sm:$0xff]  ;;  %v5133_v32 = vld [vmem:[%s15638_s2 + $0x158] sm:$0xff] }
 0x207   : > { %8797 = vmatpush3.bf16.msra.mxu0 %v9550_v36  ;;  %9133 = vmatpush3.bf16.msra.mxu1 %v9550_v36  ;;  %v5119_v36 = vld [vmem:[%s15638_s2 + $0xe8] sm:$0xff]  ;;  %v5630_v45 = vsel %vm5374_vm12, 1, %v15643_v1  ;;  %vm5375_vm15 = vcmp.ge.s32.totalorder %v5118_v40, %v11531_v61  ;;  %v9562_v35 = vld [vmem:[%s15637_s1 + $0x50] sm:$0xff]   ;;  %vm5377_vm2 = vcmp.ge.s32.totalorder %v5120_v5, %v11531_v61  ;;  %v5122_v7 = vld [vmem:[%s15638_s2 + $0x100] sm:$0xff] }
 0x208   : > { %8798 = vmatprep.subr.bf16.mxu0 %v9551_v29  ;;  %9129 = vmatprep.subr.bf16.mxu1 %v9551_v29  ;;  %vm5376_vm14 = vcmp.ge.s32.totalorder %v5119_v36, %v11531_v61  ;;  %vm5379_vm4 = vcmp.ge.s32.totalorder %v5122_v7, %v11531_v61  ;;  %v5124_v24 = vld [vmem:[%s15638_s2 + $0x110] sm:$0xff]  ;;  %v9564_v44 = vld [vmem:[%s15637_s1 + $0x60] sm:$0xff]   ;;  %v5135_v8 = vld [vmem:[%s15638_s2 + $0x168] sm:$0xff] }
 0x209   : > { %5887 = vperm.xlu1 %9546, %v5612_v33   ;;  %5884 = vperm.xlu0 %9545, %v5611_v27   ;;  %v5629_v33 = vsel %vm5373_vm13, 1, %v15643_v1  ;;  %v9561_v27 = vld [vmem:[%s15637_s1 + $0x48] sm:$0xff]   ;;  %vm5381_vm6 = vcmp.ge.s32.totalorder %v5124_v24, %v11531_v61  ;;  %v5126_v39 = vld [vmem:[%s15638_s2 + $0x120] sm:$0xff]  ;;  %v5128_v3 = vld [vmem:[%s15638_s2 + $0x130] sm:$0xff]  ;;  %vm5390_vm13 = vcmp.ge.s32.totalorder %v5133_v32, %v11531_v61 }
 0x20a   : > { %vm5383_vm8 = vcmp.ge.s32.totalorder %v5126_v39, %v11531_v61  ;;  %v9566_v25 = vld [vmem:[%s15637_s1 + $0x70] sm:$0xff]   ;;  %vm5385_vm10 = vcmp.ge.s32.totalorder %v5128_v3, %v11531_v61  ;;  %v5130_v12 = vld [vmem:[%s15638_s2 + $0x140] sm:$0xff]  ;;  %v9569_v40 = vld [vmem:[%s15637_s1 + $0x88] sm:$0xff]  }
 0x20b   : > { %8799 = vmatpush3.bf16.msra.mxu0 %v9551_v29  ;;  %9134 = vmatpush3.bf16.msra.mxu1 %v9551_v29  ;;  %v5121_v29 = vld [vmem:[%s15638_s2 + $0xf8] sm:$0xff]  ;;  %vm5387_vm12 = vcmp.ge.s32.totalorder %v5130_v12, %v11531_v61  ;;  %v5132_v51 = vld [vmem:[%s15638_s2 + $0x150] sm:$0xff]  ;;  %v5143_v39 = vld [vmem:[%s15638_s2 + $0x1a8] sm:$0xff] }
 0x20c   : > { %vm5378_vm1 = vcmp.ge.s32.totalorder %v5121_v29, %v11531_v61  ;;  %v5643_v11 = vsel %vm5387_vm12, 1, %v15643_v1  ;;  %v9570_v29 = vld [vmem:[%s15637_s1 + $0x90] sm:$0xff]   ;;  %v9603_v3 = vld [vmem:[%s15637_s1 + $0x238] sm:$0xff]  }
 0x20d   : > { %5893 = vperm.xlu1 %9546, %v5614_v17   ;;  %5890 = vperm.xlu0 %9545, %v5613_v48   ;;  %v5632_v17 = vsel %vm5376_vm14, 1, %v15643_v1  ;;  %v5631_v48 = vsel %vm5375_vm15, 1, %v15643_v1  ;;  %v5634_v19 = vsel %vm5378_vm1, 1, %v15643_v1  ;;  %vm5389_vm14 = vcmp.ge.s32.totalorder %v5132_v51, %v11531_v61  ;;  %v5140_v24 = vld [vmem:[%s15638_s2 + $0x190] sm:$0xff] }
 0x20e   : > { %8801 = vmatmul.mubr.msk.bf16.vlgmr.msra.gmra.mrb[0].mxu0 %vm987_vm0, %v9553_v23  ;;  %v5123_v23 = vld [vmem:[%s15638_s2 + $0x108] sm:$0xff]  ;;  %v5645_v36 = vsel %vm5389_vm14, 1, %v15643_v1  ;;  %vm5392_vm15 = vcmp.ge.s32.totalorder %v5135_v8, %v11531_v61  ;;  %v9576_v8 = vld [vmem:[%s15637_s1 + $0xc0] sm:$0xff]   ;;  %v5200_v57 = vld [vmem:[%s15638_s2 + $0x370] sm:$0xff] }
 0x20f   : > { %8804 = vmatprep.mubr.msk.bf16.mxu0 %vm987_vm0, %v9554_v26  ;;  %v5633_v26 = vsel %vm5377_vm2, 1, %v15643_v1  ;;  %vm5380_vm3 = vcmp.ge.s32.totalorder %v5123_v23, %v11531_v61  ;;  %v5648_v5 = vsel %vm5392_vm15, 1, %v15643_v1  ;;  %v5138_v23 = vld [vmem:[%s15638_s2 + $0x180] sm:$0xff]  ;;  %v5204_v31 = vld [vmem:[%s15638_s2 + $0x390] sm:$0xff] }
 0x210   : > { %v5208_v47 = vld [vmem:[%s15638_s2 + $0x3b0] sm:$0xff] }
 0x211   : > { %5899 = vperm.xlu1 %9546, %v5616_v4   ;;  %5896 = vperm.xlu0 %9545, %v5615_v6   ;;  %v9563_v4 = vld [vmem:[%s15637_s1 + $0x58] sm:$0xff]  }
 0x212   : > { %v5125_v6 = vld [vmem:[%s15638_s2 + $0x118] sm:$0xff] }
 0x213   : > { %vm5382_vm5 = vcmp.ge.s32.totalorder %v5125_v6, %v11531_v61  ;;  %v5141_v6 = vld [vmem:[%s15638_s2 + $0x198] sm:$0xff] }
 0x214   : > { %v5638_v16 = vsel %vm5382_vm5, 1, %v15643_v1  ;;  %vm5395_vm5 = vcmp.ge.s32.totalorder %v5138_v23, %v11531_v61 }
 0x215   : > { %5905 = vperm.xlu1 %9546, %v5618_v54   ;;  %5902 = vperm.xlu0 %9545, %v5617_v28   ;;  %v5636_v54 = vsel %vm5380_vm3, 1, %v15643_v1  ;;  %v5635_v28 = vsel %vm5379_vm4, 1, %v15643_v1 }
 0x216   : > { %8805 = vmatmul.mubr.msk.bf16.gmra.mrb[4].mxu0 %vm987_vm0, %v9555_v56  ;;  %v5127_v56 = vld [vmem:[%s15638_s2 + $0x128] sm:$0xff] }
 0x217   : > { %8808 = vmatprep.mubr.msk.bf16.mxu0 %vm987_vm0, %v9556_v13  ;;  %v5637_v13 = vsel %vm5381_vm6, 1, %v15643_v1  ;;  %vm5384_vm7 = vcmp.ge.s32.totalorder %v5127_v56, %v11531_v61  ;;  %v5651_v56 = vsel %vm5395_vm5, 1, %v15643_v1  ;;  %vm5398_vm6 = vcmp.ge.s32.totalorder %v5141_v6, %v11531_v61 }
 0x219   : > { %5911 = vperm.xlu1 %9546, %v5620_v0   ;;  %5908 = vperm.xlu0 %9545, %v5619_v2   ;;  %v9565_v0 = vld [vmem:[%s15637_s1 + $0x68] sm:$0xff]   ;;  %v5129_v2 = vld [vmem:[%s15638_s2 + $0x138] sm:$0xff] }
 0x21a   : > { %vm5386_vm9 = vcmp.ge.s32.totalorder %v5129_v2, %v11531_v61 }
 0x21b   : > { %v5642_v14 = vsel %vm5386_vm9, 1, %v15643_v1 }
 0x21d   : > { %5917 = vperm.xlu1 %9546, %v5622_v59   ;;  %5914 = vperm.xlu0 %9545, %v5621_v38   ;;  %v5640_v59 = vsel %vm5384_vm7, 1, %v15643_v1  ;;  %v5639_v38 = vsel %vm5383_vm8, 1, %v15643_v1  ;;  %vm5397_vm7 = vcmp.ge.s32.totalorder %v5140_v24, %v11531_v61  ;;  %vm5400_vm8 = vcmp.ge.s32.totalorder %v5143_v39, %v11531_v61  ;;  %v9615_v24 = vld [vmem:[%s15637_s1 + $0x268] sm:$0xff]  }
 0x21e   : > { %8809 = vmatmul.mubr.msk.bf16.gmra.mrb[8].mxu0 %vm987_vm0, %v9557_v15  ;;  %v5131_v15 = vld [vmem:[%s15638_s2 + $0x148] sm:$0xff]  ;;  %v5653_v2 = vsel %vm5397_vm7, 1, %v15643_v1  ;;  %v5656_v12 = vsel %vm5400_vm8, 1, %v15643_v1 }
 0x21f   : > { %8812 = vmatprep.mubr.msk.bf16.mxu0 %vm987_vm0, %v9558_v37  ;;  %v9567_v37 = vld [vmem:[%s15637_s1 + $0x78] sm:$0xff]   ;;  %vm5388_vm11 = vcmp.ge.s32.totalorder %v5131_v15, %v11531_v61  ;;  %v9574_v15 = vld [vmem:[%s15637_s1 + $0xb0] sm:$0xff]  }
 0x221   : > { %5923 = vperm.xlu1 %9546, %v5624_v49   ;;  %5920 = vperm.xlu0 %9545, %v5623_v34   ;;  %v5641_v49 = vsel %vm5385_vm10, 1, %v15643_v1  ;;  %v9590_v34 = vld [vmem:[%s15637_s1 + $0x200] sm:$0xff]  }
 0x222   : > { %8928 = vmatprep.mubr.msk.bf16.mxu1 %vm987_vm0, %v9590_v34  ;;  %v9575_v34 = vld [vmem:[%s15637_s1 + $0xb8] sm:$0xff]  }
 0x225   : > { %5929 = vperm.xlu1 %9546, %v5626_v58   ;;  %5926 = vperm.xlu0 %9545, %v5625_v9   ;;  %v9568_v58 = vld [vmem:[%s15637_s1 + $0x80] sm:$0xff]   ;;  %v9591_v9 = vld [vmem:[%s15637_s1 + $0x208] sm:$0xff]  }
 0x226   : > { %8813 = vmatmul.mubr.msk.bf16.gmra.mrb[12].mxu0 %vm987_vm0, %v9559_v22  ;;  %v5644_v22 = vsel %vm5388_vm11, 1, %v15643_v1  ;;  %8929 = vmatmul.mubr.msk.bf16.vlgmr.msra.gmra.mrb[0].mxu1 %vm987_vm0, %v9591_v9  ;;  %v5148_v9 = vld [vmem:[%s15638_s2 + $0x1d0] sm:$0xff] }
 0x227   : > { %8816 = vmatprep.mubr.msk.bf16.mxu0 %vm987_vm0, %v9560_v55  ;;  %v5134_v55 = vld [vmem:[%s15638_s2 + $0x160] sm:$0xff]  ;;  %vm5405_vm15 = vcmp.ge.s32.totalorder %v5148_v9, %v11531_v61 }
 0x228   : > { %vm5391_vm1 = vcmp.ge.s32.totalorder %v5134_v55, %v11531_v61 }
 0x229   : > { %5935 = vperm.xlu1 %9546, %v5628_v10   ;;  %5932 = vperm.xlu0 %9545, %v5627_v53   ;;  %v9594_v10 = vld [vmem:[%s15637_s1 + $0x210] sm:$0xff]   ;;  %v5646_v53 = vsel %vm5390_vm13, 1, %v15643_v1 }
 0x22a   : > { %8932 = vmatprep.mubr.msk.bf16.mxu1 %vm987_vm0, %v9594_v10 }
 0x22d   : > { %5941 = vperm.xlu1 %9546, %v5630_v45   ;;  %5938 = vperm.xlu0 %9545, %v5629_v33   ;;  %v5137_v45 = vld [vmem:[%s15638_s2 + $0x178] sm:$0xff] }
 0x22e   : > { %8817 = vmatmul.mubr.msk.bf16.gmra.mrb[16].mxu0 %vm987_vm0, %v9561_v27  ;;  %v9595_v33 = vld [vmem:[%s15637_s1 + $0x218] sm:$0xff]   ;;  %v5136_v27 = vld [vmem:[%s15638_s2 + $0x170] sm:$0xff]  ;;  %vm5394_vm2 = vcmp.ge.s32.totalorder %v5137_v45, %v11531_v61  ;;  %v9577_v45 = vld [vmem:[%s15637_s1 + $0xc8] sm:$0xff]  }
 0x22f   : > { %8820 = vmatprep.mubr.msk.bf16.mxu0 %vm987_vm0, %v9562_v35  ;;  %v5647_v35 = vsel %vm5391_vm1, 1, %v15643_v1  ;;  %8933 = vmatmul.mubr.msk.bf16.gmra.mrb[4].mxu1 %vm987_vm0, %v9595_v33  ;;  %vm5393_vm3 = vcmp.ge.s32.totalorder %v5136_v27, %v11531_v61  ;;  %v5650_v7 = vsel %vm5394_vm2, 1, %v15643_v1  ;;  %v5661_v33 = vsel %vm5405_vm15, 1, %v15643_v1  ;;  %v9611_v27 = vld [vmem:[%s15637_s1 + $0x258] sm:$0xff]  }
 0x231   : > { %5947 = vperm.xlu1 %9546, %v5632_v17   ;;  %5944 = vperm.xlu0 %9545, %v5631_v48   ;;  %v9598_v17 = vld [vmem:[%s15637_s1 + $0x220] sm:$0xff]   ;;  %v5139_v48 = vld [vmem:[%s15638_s2 + $0x188] sm:$0xff] }
 0x232   : > { %8936 = vmatprep.mubr.msk.bf16.mxu1 %vm987_vm0, %v9598_v17  ;;  %vm5396_vm4 = vcmp.ge.s32.totalorder %v5139_v48, %v11531_v61  ;;  %v9578_v17 = vld [vmem:[%s15637_s1 + $0xd0] sm:$0xff]  }
 0x235   : > { %5953 = vperm.xlu1 %9546, %v5634_v19   ;;  %5950 = vperm.xlu0 %9545, %v5633_v26   ;;  %v9571_v19 = vld [vmem:[%s15637_s1 + $0x98] sm:$0xff]   ;;  %v5649_v26 = vsel %vm5393_vm3, 1, %v15643_v1 }
 0x236   : > { %8821 = vmatmul.mubr.msk.bf16.gmra.mrb[20].mxu0 %vm987_vm0, %v9563_v4  ;;  %v9599_v4 = vld [vmem:[%s15637_s1 + $0x228] sm:$0xff]  }
 0x237   : > { %8824 = vmatprep.mubr.msk.bf16.mxu0 %vm987_vm0, %v9564_v44  ;;  %v9572_v44 = vld [vmem:[%s15637_s1 + $0xa0] sm:$0xff]   ;;  %8937 = vmatmul.mubr.msk.bf16.gmra.mrb[8].mxu1 %vm987_vm0, %v9599_v4  ;;  %v9579_v4 = vld [vmem:[%s15637_s1 + $0xd8] sm:$0xff]  }
 0x239   : > { %5959 = vperm.xlu1 %9546, %v5636_v54   ;;  %5956 = vperm.xlu0 %9545, %v5635_v28   ;;  %v9602_v54 = vld [vmem:[%s15637_s1 + $0x230] sm:$0xff]   ;;  %v5652_v28 = vsel %vm5396_vm4, 1, %v15643_v1 }
 0x23a   : > { %8940 = vmatprep.mubr.msk.bf16.mxu1 %vm987_vm0, %v9602_v54  ;;  %v5157_v54 = vld [vmem:[%s15638_s2 + $0x218] sm:$0xff] }
 0x23b   : > { %vm5414_vm7 = vcmp.ge.s32.totalorder %v5157_v54, %v11531_v61 }
 0x23d   : > { %5965 = vperm.xlu1 %9546, %v5638_v16   ;;  %5962 = vperm.xlu0 %9545, %v5637_v13   ;;  %v5142_v16 = vld [vmem:[%s15638_s2 + $0x1a0] sm:$0xff]  ;;  %v5654_v13 = vsel %vm5398_vm6, 1, %v15643_v1 }
 0x23e   : > { %8825 = vmatmul.mubr.msk.bf16.gmra.mrb[24].mxu0 %vm987_vm0, %v9565_v0  ;;  %v9573_v0 = vld [vmem:[%s15637_s1 + $0xa8] sm:$0xff]   ;;  %vm5399_vm9 = vcmp.ge.s32.totalorder %v5142_v16, %v11531_v61 }
 0x23f   : > { %8828 = vmatprep.mubr.msk.bf16.mxu0 %vm987_vm0, %v9566_v25  ;;  %v9606_v25 = vld [vmem:[%s15637_s1 + $0x240] sm:$0xff]   ;;  %8941 = vmatmul.mubr.msk.bf16.gmra.mrb[12].mxu1 %vm987_vm0, %v9603_v3 }
 0x240   : > { %8944 = vmatprep.mubr.msk.bf16.mxu1 %vm987_vm0, %v9606_v25  ;;  %v5158_v3 = vld [vmem:[%s15638_s2 + $0x220] sm:$0xff]  ;;  %v9581_v25 = vld [vmem:[%s15637_s1 + $0xe8] sm:$0xff]  }
 0x241   : > { %5971 = vperm.xlu1 %9546, %v5640_v59   ;;  %5968 = vperm.xlu0 %9545, %v5639_v38   ;;  %v5145_v59 = vld [vmem:[%s15638_s2 + $0x1b8] sm:$0xff]  ;;  %v5144_v38 = vld [vmem:[%s15638_s2 + $0x1b0] sm:$0xff] }
 0x242   : > { %vm5402_vm10 = vcmp.ge.s32.totalorder %v5145_v59, %v11531_v61  ;;  %vm5401_vm11 = vcmp.ge.s32.totalorder %v5144_v38, %v11531_v61  ;;  %v5670_v59 = vsel %vm5414_vm7, 1, %v15643_v1 }
 0x243   : > { %v5658_v32 = vsel %vm5402_vm10, 1, %v15643_v1  ;;  %v5657_v51 = vsel %vm5401_vm11, 1, %v15643_v1  ;;  %vm5415_vm10 = vcmp.ge.s32.totalorder %v5158_v3, %v11531_v61 }
 0x245   : > { %5977 = vperm.xlu1 %9546, %v5642_v14   ;;  %5974 = vperm.xlu0 %9545, %v5641_v49   ;;  %v5655_v14 = vsel %vm5399_vm9, 1, %v15643_v1  ;;  %v5146_v49 = vld [vmem:[%s15638_s2 + $0x1c0] sm:$0xff] }
 0x246   : > { %8829 = vmatmul.mubr.msk.bf16.gmra.mrb[28].mxu0 %vm987_vm0, %v9567_v37  ;;  %v5147_v37 = vld [vmem:[%s15638_s2 + $0x1c8] sm:$0xff]  ;;  %vm5403_vm13 = vcmp.ge.s32.totalorder %v5146_v49, %v11531_v61 }
 0x247   : > { %8832 = vmatprep.mubr.msk.bf16.mxu0 %vm987_vm0, %v9568_v58  ;;  %v5149_v58 = vld [vmem:[%s15638_s2 + $0x1d8] sm:$0xff]  ;;  %vm5404_vm12 = vcmp.ge.s32.totalorder %v5147_v37, %v11531_v61  ;;  %v5659_v10 = vsel %vm5403_vm13, 1, %v15643_v1  ;;  %v9622_v37 = vld [vmem:[%s15637_s1 + $0x280] sm:$0xff]  }
 0x248   : > { %v5660_v55 = vsel %vm5404_vm12, 1, %v15643_v1  ;;  %vm5406_vm14 = vcmp.ge.s32.totalorder %v5149_v58, %v11531_v61  ;;  %v5671_v58 = vsel %vm5415_vm10, 1, %v15643_v1 }
 0x249   : > { %5983 = vperm.xlu1 %9546, %v5644_v22   ;;  %5980 = vperm.xlu0 %9545, %v5643_v11   ;;  %v9607_v22 = vld [vmem:[%s15637_s1 + $0x248] sm:$0xff]   ;;  %v9610_v11 = vld [vmem:[%s15637_s1 + $0x250] sm:$0xff]  }
 0x24a   : > { %8945 = vmatmul.mubr.msk.bf16.gmra.mrb[16].mxu1 %vm987_vm0, %v9607_v22 }
 0x24b   : > { %8948 = vmatprep.mubr.msk.bf16.mxu1 %vm987_vm0, %v9610_v11  ;;  %v5163_v11 = vld [vmem:[%s15638_s2 + $0x248] sm:$0xff] }
 0x24c   : > { %vm5420_vm13 = vcmp.ge.s32.totalorder %v5163_v11, %v11531_v61  ;;  %v9634_v11 = vld [vmem:[%s15637_s1 + $0x2b0] sm:$0xff]  }
 0x24d   : > { %5989 = vperm.xlu1 %9546, %v5646_v53   ;;  %5986 = vperm.xlu0 %9545, %v5645_v36   ;;  %v5151_v53 = vld [vmem:[%s15638_s2 + $0x1e8] sm:$0xff]  ;;  %v5150_v36 = vld [vmem:[%s15638_s2 + $0x1e0] sm:$0xff] }
 0x24e   : > { %8833 = vmatmul.mubr.msk.bf16.gmra.mrb[32].mxu0 %vm987_vm0, %v9569_v40  ;;  %v5662_v40 = vsel %vm5406_vm14, 1, %v15643_v1  ;;  %vm5408_vm1 = vcmp.ge.s32.totalorder %v5151_v53, %v11531_v61  ;;  %vm5407_vm2 = vcmp.ge.s32.totalorder %v5150_v36, %v11531_v61  ;;  %v5165_v36 = vld [vmem:[%s15638_s2 + $0x258] sm:$0xff] }
 0x24f   : > { %8836 = vmatprep.mubr.msk.bf16.mxu0 %vm987_vm0, %v9570_v29  ;;  %v5153_v29 = vld [vmem:[%s15638_s2 + $0x1f8] sm:$0xff]  ;;  %v5664_v48 = vsel %vm5408_vm1, 1, %v15643_v1  ;;  %v5663_v23 = vsel %vm5407_vm2, 1, %v15643_v1  ;;  %vm5422_vm15 = vcmp.ge.s32.totalorder %v5165_v36, %v11531_v61 }
 0x250   : > { %vm5410_vm3 = vcmp.ge.s32.totalorder %v5153_v29, %v11531_v61 }
 0x251   : > { %5995 = vperm.xlu1 %9546, %v5648_v5   ;;  %5992 = vperm.xlu0 %9545, %v5647_v35   ;;  %v5152_v5 = vld [vmem:[%s15638_s2 + $0x1f0] sm:$0xff]  ;;  %v9614_v35 = vld [vmem:[%s15637_s1 + $0x260] sm:$0xff]  }
 0x252   : > { %8949 = vmatmul.mubr.msk.bf16.gmra.mrb[20].mxu1 %vm987_vm0, %v9611_v27  ;;  %vm5409_vm4 = vcmp.ge.s32.totalorder %v5152_v5, %v11531_v61  ;;  %v9584_v5 = vld [vmem:[%s15637_s1 + $0x100] sm:$0xff]  }
 0x253   : > { %8952 = vmatprep.mubr.msk.bf16.mxu1 %vm987_vm0, %v9614_v35  ;;  %v5665_v6 = vsel %vm5409_vm4, 1, %v15643_v1  ;;  %v5676_v35 = vsel %vm5420_vm13, 1, %v15643_v1 }
 0x255   : > { %6001 = vperm.xlu1 %9546, %v5650_v7   ;;  %5998 = vperm.xlu0 %9545, %v5649_v26   ;;  %v5155_v7 = vld [vmem:[%s15638_s2 + $0x208] sm:$0xff]  ;;  %v5666_v26 = vsel %vm5410_vm3, 1, %v15643_v1 }
 0x256   : > { %8837 = vmatmul.mubr.msk.bf16.gmra.mrb[36].mxu0 %vm987_vm0, %v9571_v19  ;;  %v5154_v19 = vld [vmem:[%s15638_s2 + $0x200] sm:$0xff]  ;;  %vm5412_vm5 = vcmp.ge.s32.totalorder %v5155_v7, %v11531_v61 }
 0x257   : > { %8840 = vmatprep.mubr.msk.bf16.mxu0 %vm987_vm0, %v9572_v44  ;;  %vm5411_vm6 = vcmp.ge.s32.totalorder %v5154_v19, %v11531_v61  ;;  %v9618_v44 = vld [vmem:[%s15637_s1 + $0x270] sm:$0xff]   ;;  %v5668_v39 = vsel %vm5412_vm5, 1, %v15643_v1  ;;  %v5166_v19 = vld [vmem:[%s15638_s2 + $0x260] sm:$0xff] }
 0x258   : > { %v5667_v16 = vsel %vm5411_vm6, 1, %v15643_v1  ;;  %vm5423_vm3 = vcmp.ge.s32.totalorder %v5166_v19, %v11531_v61 }
 0x259   : > { %6007 = vperm.xlu1 %9546, %v5652_v28   ;;  %6004 = vperm.xlu0 %9545, %v5651_v56   ;;  %v5156_v28 = vld [vmem:[%s15638_s2 + $0x210] sm:$0xff]  ;;  %v9580_v56 = vld [vmem:[%s15637_s1 + $0xe0] sm:$0xff]   ;;  %v5679_v3 = vsel %vm5423_vm3, 1, %v15643_v1 }
 0x25a   : > { %8953 = vmatmul.mubr.msk.bf16.gmra.mrb[24].mxu1 %vm987_vm0, %v9615_v24  ;;  %vm5413_vm8 = vcmp.ge.s32.totalorder %v5156_v28, %v11531_v61  ;;  %v9627_v24 = vld [vmem:[%s15637_s1 + $0x298] sm:$0xff]  }
 0x25b   : > { %8956 = vmatprep.mubr.msk.bf16.mxu1 %vm987_vm0, %v9618_v44  ;;  %v5669_v38 = vsel %vm5413_vm8, 1, %v15643_v1  ;;  %v9630_v44 = vld [vmem:[%s15637_s1 + $0x2a0] sm:$0xff]  }
 0x25d   : > { %6013 = vperm.xlu1 %9546, %v5654_v13   ;;  %6010 = vperm.xlu0 %9545, %v5653_v2   ;;  %v5159_v13 = vld [vmem:[%s15638_s2 + $0x228] sm:$0xff] }
 0x25e   : > { %8841 = vmatmul.mubr.msk.bf16.gmra.mrb[40].mxu0 %vm987_vm0, %v9573_v0  ;;  %vm5416_vm9 = vcmp.ge.s32.totalorder %v5159_v13, %v11531_v61 }
 0x25f   : > { %8844 = vmatprep.mubr.msk.bf16.mxu0 %vm987_vm0, %v9574_v15  ;;  %v5161_v15 = vld [vmem:[%s15638_s2 + $0x238] sm:$0xff] }
 0x260   : > { %vm5418_vm11 = vcmp.ge.s32.totalorder %v5161_v15, %v11531_v61  ;;  %v5170_v15 = vld [vmem:[%s15638_s2 + $0x280] sm:$0xff] }
 0x261   : > { %6019 = vperm.xlu1 %9546, %v5656_v12   ;;  %6016 = vperm.xlu0 %9545, %v5655_v14   ;;  %v5160_v12 = vld [vmem:[%s15638_s2 + $0x230] sm:$0xff]  ;;  %v9619_v14 = vld [vmem:[%s15637_s1 + $0x278] sm:$0xff]   ;;  %vm5427_vm7 = vcmp.ge.s32.totalorder %v5170_v15, %v11531_v61 }
 0x262   : > { %8957 = vmatmul.mubr.msk.bf16.gmra.mrb[28].mxu1 %vm987_vm0, %v9619_v14  ;;  %vm5417_vm12 = vcmp.ge.s32.totalorder %v5160_v12, %v11531_v61  ;;  %v5683_v36 = vsel %vm5427_vm7, 1, %v15643_v1 }
 0x263   : > { %8960 = vmatprep.mubr.msk.bf16.mxu1 %vm987_vm0, %v9622_v37  ;;  %v5673_v53 = vsel %vm5417_vm12, 1, %v15643_v1  ;;  %v9587_v37 = vld [vmem:[%s15637_s1 + $0x118] sm:$0xff]  }
 0x265   : > { %6025 = vperm.xlu1 %9546, %v5658_v32   ;;  %6022 = vperm.xlu0 %9545, %v5657_v51   ;;  %v9582_v32 = vld [vmem:[%s15637_s1 + $0xf0] sm:$0xff]   ;;  %v5672_v51 = vsel %vm5416_vm9, 1, %v15643_v1 }
 0x266   : > { %8845 = vmatmul.mubr.msk.bf16.gmra.mrb[44].mxu0 %vm987_vm0, %v9575_v34 }
 0x267   : > { %8848 = vmatprep.mubr.msk.bf16.mxu0 %vm987_vm0, %v9576_v8  ;;  %v5162_v8 = vld [vmem:[%s15638_s2 + $0x240] sm:$0xff] }
 0x268   : > { %vm5419_vm14 = vcmp.ge.s32.totalorder %v5162_v8, %v11531_v61 }
 0x269   : > { %6031 = vperm.xlu1 %9546, %v5660_v55   ;;  %6028 = vperm.xlu0 %9545, %v5659_v10   ;;  %v9583_v55 = vld [vmem:[%s15637_s1 + $0xf8] sm:$0xff]   ;;  %v5674_v10 = vsel %vm5418_vm11, 1, %v15643_v1 }
 0x26d   : > { %6037 = vperm.xlu1 %9546, %v5662_v40   ;;  %6034 = vperm.xlu0 %9545, %v5661_v33   ;;  %v9623_v40 = vld [vmem:[%s15637_s1 + $0x288] sm:$0xff]   ;;  %v9626_v33 = vld [vmem:[%s15637_s1 + $0x290] sm:$0xff]  }
 0x26e   : > { %8849 = vmatmul.mubr.msk.bf16.gmra.mrb[48].mxu0 %vm987_vm0, %v9577_v45  ;;  %v5164_v45 = vld [vmem:[%s15638_s2 + $0x250] sm:$0xff]  ;;  %8961 = vmatmul.mubr.msk.bf16.gmra.mrb[32].mxu1 %vm987_vm0, %v9623_v40  ;;  %v5175_v40 = vld [vmem:[%s15638_s2 + $0x2a8] sm:$0xff] }
 0x26f   : > { %8852 = vmatprep.mubr.msk.bf16.mxu0 %vm987_vm0, %v9578_v17  ;;  %v5675_v17 = vsel %vm5419_vm14, 1, %v15643_v1  ;;  %vm5421_vm1 = vcmp.ge.s32.totalorder %v5164_v45, %v11531_v61  ;;  %8964 = vmatprep.mubr.msk.bf16.mxu1 %vm987_vm0, %v9626_v33  ;;  %v5174_v45 = vld [vmem:[%s15638_s2 + $0x2a0] sm:$0xff]  ;;  %vm5432_vm10 = vcmp.ge.s32.totalorder %v5175_v40, %v11531_v61 }
 0x270   : > { %vm5431_vm11 = vcmp.ge.s32.totalorder %v5174_v45, %v11531_v61 }
 0x271   : > { %6043 = vperm.xlu1 %9546, %v5664_v48   ;;  %6040 = vperm.xlu0 %9545, %v5663_v23   ;;  %v5167_v48 = vld [vmem:[%s15638_s2 + $0x268] sm:$0xff] }
 0x272   : > { %vm5424_vm2 = vcmp.ge.s32.totalorder %v5167_v48, %v11531_v61  ;;  %v5177_v48 = vld [vmem:[%s15638_s2 + $0x2b8] sm:$0xff] }
 0x273   : > { %v5680_v13 = vsel %vm5424_vm2, 1, %v15643_v1  ;;  %vm5434_vm12 = vcmp.ge.s32.totalorder %v5177_v48, %v11531_v61 }
 0x275   : > { %6049 = vperm.xlu1 %9546, %v5666_v26   ;;  %6046 = vperm.xlu0 %9545, %v5665_v6   ;;  %v5678_v26 = vsel %vm5422_vm15, 1, %v15643_v1  ;;  %v5677_v6 = vsel %vm5421_vm1, 1, %v15643_v1 }
 0x276   : > { %8853 = vmatmul.mubr.msk.bf16.gmra.mrb[52].mxu0 %vm987_vm0, %v9579_v4  ;;  %v9585_v4 = vld [vmem:[%s15637_s1 + $0x108] sm:$0xff]   ;;  %8965 = vmatmul.mubr.msk.bf16.gmra.mrb[36].mxu1 %vm987_vm0, %v9627_v24  ;;  %v9638_v24 = vld [vmem:[%s15637_s1 + $0x2c0] sm:$0xff]  }
 0x277   : > { %8856 = vmatprep.mubr.msk.bf16.mxu0 %vm987_vm0, %v9580_v56  ;;  %v5169_v56 = vld [vmem:[%s15638_s2 + $0x278] sm:$0xff]  ;;  %8968 = vmatprep.mubr.msk.bf16.mxu1 %vm987_vm0, %v9630_v44 }
 0x278   : > { %v12047_v0 = vpop.permute.xlu1 %5866  ;;  %v12049_v2 = vpop.permute.xlu0 %5860  ;;  %vm5426_vm4 = vcmp.ge.s32.totalorder %v5169_v56, %v11531_v61 }
 0x279   : > { %6055 = vperm.xlu1 %9546, %v5668_v39   ;;  %6052 = vperm.xlu0 %9545, %v5667_v16   ;;  %v5168_v39 = vld [vmem:[%s15638_s2 + $0x270] sm:$0xff]  ;;  %v5682_v12 = vsel %vm5426_vm4, 1, %v15643_v1 }
 0x27a   : > { %v9586_v16 = vld [vmem:[%s15637_s1 + $0x110] sm:$0xff]   ;;  %vm5425_vm5 = vcmp.ge.s32.totalorder %v5168_v39, %v11531_v61  ;;  %v5688_v39 = vsel %vm5432_vm10, 1, %v15643_v1 }
 0x27b   : > { %v5681_v14 = vsel %vm5425_vm5, 1, %v15643_v1 }
 0x27c   : > { %v12074_v49 = vpop.permute.xlu1 %5869  ;;  %v12076_v34 = vpop.permute.xlu0 %5863 }
 0x27d   : > { %6061 = vperm.xlu1 %9546, %v5670_v59   ;;  %6058 = vperm.xlu0 %9545, %v5669_v38  }
 0x27e   : > { %8857 = vmatmul.mubr.msk.bf16.gmra.mrb[56].mxu0 %vm987_vm0, %v9581_v25  ;;  %v5171_v25 = vld [vmem:[%s15638_s2 + $0x288] sm:$0xff] }
 0x27f   : > { %8860 = vmatprep.mubr.msk.bf16.mxu0 %vm987_vm0, %v9582_v32  ;;  %v9631_v32 = vld [vmem:[%s15637_s1 + $0x2a8] sm:$0xff]   ;;  %vm5428_vm6 = vcmp.ge.s32.totalorder %v5171_v25, %v11531_v61 }
 0x280   : > { %v12088_v9 = vpop.permute.xlu1 %5875  ;;  %v12090_v22 = vpop.permute.xlu0 %5872  ;;  %8969 = vmatmul.mubr.msk.bf16.gmra.mrb[40].mxu1 %vm987_vm0, %v9631_v32 }
 0x281   : > { %6067 = vperm.xlu1 %9546, %v5672_v51   ;;  %6064 = vperm.xlu0 %9545, %v5671_v58   ;;  %v5173_v51 = vld [vmem:[%s15638_s2 + $0x298] sm:$0xff]  ;;  %v5172_v58 = vld [vmem:[%s15638_s2 + $0x290] sm:$0xff] }
 0x282   : > { %vm5430_vm8 = vcmp.ge.s32.totalorder %v5173_v51, %v11531_v61  ;;  %vm5429_vm9 = vcmp.ge.s32.totalorder %v5172_v58, %v11531_v61  ;;  %8972 = vmatprep.mubr.msk.bf16.mxu1 %vm987_vm0, %v9634_v11  ;;  %v5180_v51 = vld [vmem:[%s15638_s2 + $0x2d0] sm:$0xff]  ;;  %v9639_v58 = vld [vmem:[%s15637_s1 + $0x2c8] sm:$0xff]   ;;  %v9596_v11 = vld [vmem:[%s15637_s1 + $0x140] sm:$0xff]  }
 0x283   : > { %v5685_v19 = vsel %vm5429_vm9, 1, %v15643_v1  ;;  %vm5437_vm2 = vcmp.ge.s32.totalorder %v5180_v51, %v11531_v61  ;;  %v5187_v51 = vld [vmem:[%s15638_s2 + $0x308] sm:$0xff] }
 0x284   : > { %v12118_v27 = vpop.permute.xlu1 %5881  ;;  %v12120_v29 = vpop.permute.xlu0 %5878  ;;  %vm5444_vm7 = vcmp.ge.s32.totalorder %v5187_v51, %v11531_v61 }
 0x285   : > { %6073 = vperm.xlu1 %9546, %v5674_v10   ;;  %6070 = vperm.xlu0 %9545, %v5673_v53   ;;  %v9588_v10 = vld [vmem:[%s15637_s1 + $0x120] sm:$0xff]   ;;  %v5684_v53 = vsel %vm5428_vm6, 1, %v15643_v1 }
 0x286   : > { %8861 = vmatmul.mubr.msk.bf16.gmra.mrb[60].mxu0 %vm987_vm0, %v9583_v55 }
 0x287   : > { %8864 = vmatprep.mubr.msk.bf16.mxu0 %vm987_vm0, %v9584_v5 }
 0x288   : > { %v12135_v23 = vpop.permute.xlu1 %5887  ;;  %v12137_v7 = vpop.permute.xlu0 %5884 }
 0x289   : > { %6079 = vperm.xlu1 %9546, %v5676_v35   ;;  %6076 = vperm.xlu0 %9545, %v5675_v17   ;;  %v5686_v35 = vsel %vm5430_vm8, 1, %v15643_v1  ;;  %v9589_v17 = vld [vmem:[%s15637_s1 + $0x128] sm:$0xff]  }
 0x28c   : > { %v12156_v54 = vpop.permute.xlu1 %5893  ;;  %v12158_v28 = vpop.permute.xlu0 %5890 }
 0x28d   : > { %6085 = vperm.xlu1 %9546, %v5678_v26   ;;  %6082 = vperm.xlu0 %9545, %v5677_v6   ;;  %v5176_v26 = vld [vmem:[%s15638_s2 + $0x2b0] sm:$0xff] }
 0x28e   : > { %8865 = vmatmul.mubr.msk.bf16.gmra.mrb[64].mxu0 %vm987_vm0, %v9585_v4  ;;  %v9635_v4 = vld [vmem:[%s15637_s1 + $0x2b8] sm:$0xff]   ;;  %v9592_v6 = vld [vmem:[%s15637_s1 + $0x130] sm:$0xff]   ;;  %vm5433_vm13 = vcmp.ge.s32.totalorder %v5176_v26, %v11531_v61 }
 0x28f   : > { %8868 = vmatprep.mubr.msk.bf16.mxu0 %vm987_vm0, %v9586_v16  ;;  %v5687_v16 = vsel %vm5431_vm11, 1, %v15643_v1  ;;  %8973 = vmatmul.mubr.msk.bf16.gmra.mrb[44].mxu1 %vm987_vm0, %v9635_v4  ;;  %v5689_v32 = vsel %vm5433_vm13, 1, %v15643_v1  ;;  %v9597_v4 = vld [vmem:[%s15637_s1 + $0x148] sm:$0xff]  }
 0x290   : > { %v12179_v59 = vpop.permute.xlu1 %5899  ;;  %v12181_v38 = vpop.permute.xlu0 %5896  ;;  %8976 = vmatprep.mubr.msk.bf16.mxu1 %vm987_vm0, %v9638_v24  ;;  %v5693_v24 = vsel %vm5437_vm2, 1, %v15643_v1 }
 0x291   : > { %6091 = vperm.xlu1 %9546, %v5680_v13   ;;  %6088 = vperm.xlu0 %9545, %v5679_v3   ;;  %v5179_v13 = vld [vmem:[%s15638_s2 + $0x2c8] sm:$0xff]  ;;  %v5178_v3 = vld [vmem:[%s15638_s2 + $0x2c0] sm:$0xff] }
 0x292   : > { %vm5436_vm14 = vcmp.ge.s32.totalorder %v5179_v13, %v11531_v61  ;;  %vm5435_vm15 = vcmp.ge.s32.totalorder %v5178_v3, %v11531_v61  ;;  %v9600_v13 = vld [vmem:[%s15637_s1 + $0x150] sm:$0xff]   ;;  %v9644_v3 = vld [vmem:[%s15637_s1 + $0x2e0] sm:$0xff]  }
 0x293   : > { %v5692_v40 = vsel %vm5436_vm14, 1, %v15643_v1  ;;  %v5691_v45 = vsel %vm5435_vm15, 1, %v15643_v1 }
 0x294   : > { %v12206_v8 = vpop.permute.xlu1 %5905  ;;  %v12208_v55 = vpop.permute.xlu0 %5902 }
 0x295   : > { %6097 = vperm.xlu1 %9546, %v5682_v12   ;;  %6094 = vperm.xlu0 %9545, %v5681_v14   ;;  %v5690_v12 = vsel %vm5434_vm12, 1, %v15643_v1  ;;  %v9593_v14 = vld [vmem:[%s15637_s1 + $0x138] sm:$0xff]  }
 0x296   : > { %8869 = vmatmul.mubr.msk.bf16.gmra.mrb[68].mxu0 %vm987_vm0, %v9587_v37  ;;  %v5181_v37 = vld [vmem:[%s15638_s2 + $0x2d8] sm:$0xff] }
 0x297   : > { %8872 = vmatprep.mubr.msk.bf16.mxu0 %vm987_vm0, %v9588_v10  ;;  %v9642_v10 = vld [vmem:[%s15637_s1 + $0x2d0] sm:$0xff]   ;;  %vm5438_vm1 = vcmp.ge.s32.totalorder %v5181_v37, %v11531_v61  ;;  %8977 = vmatmul.mubr.msk.bf16.gmra.mrb[48].mxu1 %vm987_vm0, %v9639_v58  ;;  %v5186_v58 = vld [vmem:[%s15638_s2 + $0x300] sm:$0xff] }
 0x298   : > { %v12226_v33 = vpop.permute.xlu1 %5911  ;;  %v12228_v5 = vpop.permute.xlu0 %5908  ;;  %8980 = vmatprep.mubr.msk.bf16.mxu1 %vm987_vm0, %v9642_v10  ;;  %v5694_v26 = vsel %vm5438_vm1, 1, %v15643_v1  ;;  %vm5443_vm8 = vcmp.ge.s32.totalorder %v5186_v58, %v11531_v61 }
 0x299   : > { %6103 = vperm.xlu1 %9546, %v5684_v53   ;;  %6100 = vperm.xlu0 %9545, %v5683_v36  }
 0x29c   : > { %v12253_v44 = vpop.permute.xlu1 %5917  ;;  %v12255_v56 = vpop.permute.xlu0 %5914 }
 0x29d   : > { %6109 = vperm.xlu1 %9546, %v5686_v35   ;;  %6106 = vperm.xlu0 %9545, %v5685_v19   ;;  %v5183_v35 = vld [vmem:[%s15638_s2 + $0x2e8] sm:$0xff] }
 0x29e   : > { %8873 = vmatmul.mubr.msk.bf16.gmra.mrb[72].mxu0 %vm987_vm0, %v9589_v17  ;;  %v5182_v17 = vld [vmem:[%s15638_s2 + $0x2e0] sm:$0xff]  ;;  %vm5440_vm3 = vcmp.ge.s32.totalorder %v5183_v35, %v11531_v61  ;;  %v5189_v35 = vld [vmem:[%s15638_s2 + $0x318] sm:$0xff] }
 0x29f   : > { %8876 = vmatprep.mubr.msk.bf16.mxu0 %vm987_vm0, %v9592_v6  ;;  %v5185_v6 = vld [vmem:[%s15638_s2 + $0x2f8] sm:$0xff]  ;;  %vm5439_vm4 = vcmp.ge.s32.totalorder %v5182_v17, %v11531_v61  ;;  %v5696_v37 = vsel %vm5440_vm3, 1, %v15643_v1  ;;  %vm5446_vm9 = vcmp.ge.s32.totalorder %v5189_v35, %v11531_v61 }
 0x2a0   : > { %v12270_v25 = vpop.permute.xlu1 %5923  ;;  %v12272_v15 = vpop.permute.xlu0 %5920  ;;  %vm5442_vm5 = vcmp.ge.s32.totalorder %v5185_v6, %v11531_v61  ;;  %v9604_v6 = vld [vmem:[%s15637_s1 + $0x160] sm:$0xff]  }
 0x2a1   : > { %6115 = vperm.xlu1 %9546, %v5688_v39   ;;  %6112 = vperm.xlu0 %9545, %v5687_v16   ;;  %v5184_v39 = vld [vmem:[%s15638_s2 + $0x2f0] sm:$0xff]  ;;  %v9643_v16 = vld [vmem:[%s15637_s1 + $0x2d8] sm:$0xff]  }
 0x2a2   : > { %8981 = vmatmul.mubr.msk.bf16.gmra.mrb[52].mxu1 %vm987_vm0, %v9643_v16  ;;  %vm5441_vm6 = vcmp.ge.s32.totalorder %v5184_v39, %v11531_v61 }
 0x2a3   : > { %8984 = vmatprep.mubr.msk.bf16.mxu1 %vm987_vm0, %v9644_v3  ;;  %v5697_v17 = vsel %vm5441_vm6, 1, %v15643_v1  ;;  %v5699_v3 = vsel %vm5443_vm8, 1, %v15643_v1 }
 0x2a4   : > { %v12297_v53 = vpop.permute.xlu1 %5929  ;;  %v12299_v36 = vpop.permute.xlu0 %5926 }
 0x2a5   : > { %6121 = vperm.xlu1 %9546, %v5690_v12   ;;  %6118 = vperm.xlu0 %9545, %v5689_v32   ;;  %v5695_v32 = vsel %vm5439_vm4, 1, %v15643_v1 }
 0x2a6   : > { %8877 = vmatmul.mubr.msk.bf16.gmra.mrb[76].mxu0 %vm987_vm0, %v9593_v14 }
 0x2a7   : > { %8880 = vmatprep.mubr.msk.bf16.mxu0 %vm987_vm0, %v9596_v11 }
 0x2a8   : > { %v12314_v48 = vpop.permute.xlu1 %5935  ;;  %v12316_v19 = vpop.permute.xlu0 %5932 }
 0x2a9   : > { %6127 = vperm.xlu1 %9546, %v5692_v40   ;;  %6124 = vperm.xlu0 %9545, %v5691_v45   ;;  %v5698_v40 = vsel %vm5442_vm5, 1, %v15643_v1  ;;  %v9601_v45 = vld [vmem:[%s15637_s1 + $0x158] sm:$0xff]  }
 0x2ac   : > { %v12341_v12 = vpop.permute.xlu1 %5941  ;;  %v12343_v14 = vpop.permute.xlu0 %5938 }
 0x2ad   : > { %6133 = vperm.xlu1 %9546, %v5694_v26   ;;  %6130 = vperm.xlu0 %9545, %v5693_v24   ;;  %v5188_v26 = vld [vmem:[%s15638_s2 + $0x310] sm:$0xff] }
 0x2ae   : > { %8881 = vmatmul.mubr.msk.bf16.gmra.mrb[80].mxu0 %vm987_vm0, %v9597_v4  ;;  %v9645_v4 = vld [vmem:[%s15637_s1 + $0x2e8] sm:$0xff]   ;;  %v9646_v24 = vld [vmem:[%s15637_s1 + $0x2f0] sm:$0xff]   ;;  %vm5445_vm10 = vcmp.ge.s32.totalorder %v5188_v26, %v11531_v61 }
 0x2af   : > { %8884 = vmatprep.mubr.msk.bf16.mxu0 %vm987_vm0, %v9600_v13  ;;  %v5700_v13 = vsel %vm5444_vm7, 1, %v15643_v1  ;;  %8985 = vmatmul.mubr.msk.bf16.gmra.mrb[56].mxu1 %vm987_vm0, %v9645_v4  ;;  %v5701_v35 = vsel %vm5445_vm10, 1, %v15643_v1  ;;  %v5192_v26 = vld [vmem:[%s15638_s2 + $0x330] sm:$0xff]  ;;  %v9647_v4 = vld [vmem:[%s15637_s1 + $0x2f8] sm:$0xff]   ;;  %vm5457_vm7 = vcmp.ge.s32.totalorder %v5200_v57, %v11531_v61 }
 0x2b0   : > { %v12358_v11 = vpop.permute.xlu1 %5947  ;;  %v12360_v10 = vpop.permute.xlu0 %5944  ;;  %8988 = vmatprep.mubr.msk.bf16.mxu1 %vm987_vm0, %v9646_v24  ;;  %v9648_v24 = vld [vmem:[%s15637_s1 + $0x300] sm:$0xff]   ;;  %vm5449_vm14 = vcmp.ge.s32.totalorder %v5192_v26, %v11531_v61  ;;  %v9649_v26 = vld [vmem:[%s15637_s1 + $0x308] sm:$0xff]  }
 0x2b1   : > { %6139 = vperm.xlu1 %9546, %v5696_v37   ;;  %6136 = vperm.xlu0 %9545, %v5695_v32   ;;  %v5191_v37 = vld [vmem:[%s15638_s2 + $0x328] sm:$0xff]  ;;  %v5190_v32 = vld [vmem:[%s15638_s2 + $0x320] sm:$0xff] }
 0x2b2   : > { %vm5448_vm11 = vcmp.ge.s32.totalorder %v5191_v37, %v11531_v61  ;;  %vm5447_vm12 = vcmp.ge.s32.totalorder %v5190_v32, %v11531_v61 }
 0x2b3   : > { %v5704_v37 = vsel %vm5448_vm11, 1, %v15643_v1  ;;  %v5703_v32 = vsel %vm5447_vm12, 1, %v15643_v1  ;;  %vm5461_vm11 = vcmp.ge.s32.totalorder %v5204_v31, %v11531_v61 }
 0x2b4   : > { %v12385_v39 = vpop.permute.xlu1 %5953  ;;  %v12387_v16 = vpop.permute.xlu0 %5950 }
 0x2b5   : > { %6145 = vperm.xlu1 %9546, %v5698_v40   ;;  %6142 = vperm.xlu0 %9545, %v5697_v17   ;;  %v5702_v40 = vsel %vm5446_vm9, 1, %v15643_v1  ;;  %v5193_v17 = vld [vmem:[%s15638_s2 + $0x338] sm:$0xff] }
 0x2b6   : > { %8885 = vmatmul.mubr.msk.bf16.gmra.mrb[84].mxu0 %vm987_vm0, %v9601_v45  ;;  %v9605_v45 = vld [vmem:[%s15637_s1 + $0x168] sm:$0xff]   ;;  %vm5450_vm13 = vcmp.ge.s32.totalorder %v5193_v17, %v11531_v61  ;;  %v5705_v17 = vsel %vm5449_vm14, 1, %v15643_v1 }
 0x2b7   : > { %8888 = vmatprep.mubr.msk.bf16.mxu0 %vm987_vm0, %v9604_v6  ;;  %v9608_v6 = vld [vmem:[%s15637_s1 + $0x170] sm:$0xff]   ;;  %8989 = vmatmul.mubr.msk.bf16.gmra.mrb[60].mxu1 %vm987_vm0, %v9647_v4  ;;  %v9609_v4 = vld [vmem:[%s15637_s1 + $0x178] sm:$0xff]  }
 0x2b8   : > { %v12402_v51 = vpop.permute.xlu1 %5959  ;;  %v12404_v58 = vpop.permute.xlu0 %5956  ;;  %8992 = vmatprep.mubr.msk.bf16.mxu1 %vm987_vm0, %v9648_v24 }
 0x2b9   : > { %15720 = vst [vmem:[#allocation18_spill] sm:$0xff] %v12402_v51  ;;  %15721 = vst [vmem:[#allocation19_spill] sm:$0xff] %v12404_v58  ;;  %6151 = vperm.xlu1 %9546, %v5700_v13   ;;  %6148 = vperm.xlu0 %9545, %v5699_v3   ;;  %v5240_v58 = vld [vmem:[%s15638_s2 + $0x4b0] sm:$0xff] }
 0x2bc   : > { %v12429_v13 = vpop.permute.xlu1 %5965  ;;  %v12431_v3 = vpop.permute.xlu0 %5962 }
 0x2bd   : > { %15722 = vst [vmem:[#allocation20_spill] sm:$0xff] %v12429_v13  ;;  %15723 = vst [vmem:[#allocation21_spill] sm:$0xff] %v12431_v3  ;;  %6157 = vperm.xlu1 %9546, %v5702_v40   ;;  %6154 = vperm.xlu0 %9545, %v5701_v35   ;;  %v5195_v40 = vld [vmem:[%s15638_s2 + $0x348] sm:$0xff]  ;;  %v5706_v35 = vsel %vm5450_vm13, 1, %v15643_v1  ;;  %v5196_v1 = vld [vmem:[%s15638_s2 + $0x350] sm:$0xff] }
 0x2be   : > { %8889 = vmatmul.mubr.msk.bf16.gmra.mrb[88].mxu0 %vm987_vm0, %v9605_v45  ;;  %v5194_v45 = vld [vmem:[%s15638_s2 + $0x340] sm:$0xff]  ;;  %vm5452_vm15 = vcmp.ge.s32.totalorder %v5195_v40, %v11531_v61  ;;  %vm5453_vm3 = vcmp.ge.s32.totalorder %v5196_v1, %v11531_v61 }
 0x2bf   : > { %8892 = vmatprep.mubr.msk.bf16.mxu0 %vm987_vm0, %v9608_v6  ;;  %vm5451_vm1 = vcmp.ge.s32.totalorder %v5194_v45, %v11531_v61  ;;  %v9650_v6 = vld [vmem:[%s15637_s1 + $0x310] sm:$0xff]   ;;  %v9612_v40 = vld [vmem:[%s15637_s1 + $0x180] sm:$0xff]   ;;  %v15728_v45 = vmov 0   ;;  %8993 = vmatmul.mubr.msk.bf16.gmra.mrb[64].mxu1 %vm987_vm0, %v9649_v26 }
 0x2c0   : > { %v12440_v43 = vpop.permute.xlu1 %5971  ;;  %v12442_v21 = vpop.permute.xlu0 %5968  ;;  %v5708_v63 = vsel %vm5452_vm15, 1, %v15728_v45  ;;  %v5707_v52 = vsel %vm5451_vm1, 1, %v15728_v45  ;;  %8996 = vmatprep.mubr.msk.bf16.mxu1 %vm987_vm0, %v9650_v6  ;;  %v5709_v26 = vsel %vm5453_vm3, 1, %v15728_v45  ;;  %v9613_v6 = vld [vmem:[%s15637_s1 + $0x188] sm:$0xff]   ;;  %vm5465_vm15 = vcmp.ge.s32.totalorder %v5208_v47, %v11531_v61 }
 0x2c1   : > { %15724 = vst [vmem:[#allocation22_spill] sm:$0xff] %v12440_v43  ;;  %15725 = vst [vmem:[#allocation23_spill] sm:$0xff] %v12442_v21  ;;  %6163 = vperm.xlu1 %9546, %v5704_v37   ;;  %6160 = vperm.xlu0 %9545, %v5703_v32   ;;  %v5197_v32 = vld [vmem:[%s15638_s2 + $0x358] sm:$0xff]  ;;  %v5223_v43 = vld [vmem:[%s15638_s2 + $0x428] sm:$0xff] }
 0x2c2   : > { %vm5454_vm2 = vcmp.ge.s32.totalorder %v5197_v32, %v11531_v61 }
 0x2c3   : > { %v5710_v1 = vsel %vm5454_vm2, 1, %v15728_v45 }
 0x2c4   : > { %v12464_v24 = vpop.permute.xlu1 %5977  ;;  %v12466_v37 = vpop.permute.xlu0 %5974 }
 0x2c5   : > { %15726 = vst [vmem:[#allocation24_spill] sm:$0xff] %v12464_v24  ;;  %15727 = vst [vmem:[#allocation25_spill] sm:$0xff] %v12466_v37  ;;  %6169 = vperm.xlu1 %9546, %v5706_v35   ;;  %6166 = vperm.xlu0 %9545, %v5705_v17   ;;  %v5199_v35 = vld [vmem:[%s15638_s2 + $0x368] sm:$0xff]  ;;  %v5198_v17 = vld [vmem:[%s15638_s2 + $0x360] sm:$0xff] }
 0x2c6   : > { %8893 = vmatmul.mubr.msk.bf16.gmra.mrb[92].mxu0 %vm987_vm0, %v9609_v4  ;;  %v9651_v4 = vld [vmem:[%s15637_s1 + $0x318] sm:$0xff]   ;;  %vm5456_vm4 = vcmp.ge.s32.totalorder %v5199_v35, %v11531_v61  ;;  %vm5455_vm5 = vcmp.ge.s32.totalorder %v5198_v17, %v11531_v61  ;;  %v9616_v35 = vld [vmem:[%s15637_s1 + $0x190] sm:$0xff]  }
 0x2c7   : > { %8896 = vmatprep.mubr.msk.bf16.mxu0 %vm987_vm0, %v9612_v40  ;;  %v5201_v40 = vld [vmem:[%s15638_s2 + $0x378] sm:$0xff]  ;;  %v5712_v17 = vsel %vm5456_vm4, 1, %v15728_v45  ;;  %v5711_v20 = vsel %vm5455_vm5, 1, %v15728_v45  ;;  %8997 = vmatmul.mubr.msk.bf16.gmra.mrb[68].mxu1 %vm987_vm0, %v9651_v4  ;;  %v5713_v4 = vsel %vm5457_vm7, 1, %v15728_v45 }
 0x2c8   : > { %v12484_v50 = vpop.permute.xlu1 %5983  ;;  %v12486_v42 = vpop.permute.xlu0 %5980  ;;  %vm5458_vm6 = vcmp.ge.s32.totalorder %v5201_v40, %v11531_v61 }
 0x2c9   : > { %15729 = vst [vmem:[#allocation26_spill] sm:$0xff] %v12484_v50  ;;  %15730 = vst [vmem:[#allocation27_spill] sm:$0xff] %v12486_v42  ;;  %6175 = vperm.xlu1 %9546, %v5708_v63   ;;  %6172 = vperm.xlu0 %9545, %v5707_v52   ;;  %v9652_v52 = vld [vmem:[%s15637_s1 + $0x320] sm:$0xff]   ;;  %v5714_v57 = vsel %vm5458_vm6, 1, %v15728_v45  ;;  %v5219_v50 = vld [vmem:[%s15638_s2 + $0x408] sm:$0xff] }
 0x2ca   : > { %9000 = vmatprep.mubr.msk.bf16.mxu1 %vm987_vm0, %v9652_v52  ;;  %v9617_v52 = vld [vmem:[%s15637_s1 + $0x198] sm:$0xff]   ;;  %v5220_v42 = vld [vmem:[%s15638_s2 + $0x410] sm:$0xff] }
 0x2cc   : > { %v12508_v63 = vpop.permute.xlu1 %5989  ;;  %v12510_v32 = vpop.permute.xlu0 %5986 }
 0x2cd   : > { %15731 = vst [vmem:[#allocation28_spill] sm:$0xff] %v12508_v63  ;;  %15732 = vst [vmem:[#allocation29_spill] sm:$0xff] %v12510_v32  ;;  %6181 = vperm.xlu1 %9546, %v5710_v1   ;;  %6178 = vperm.xlu0 %9545, %v5709_v26   ;;  %v5203_v1 = vld [vmem:[%s15638_s2 + $0x388] sm:$0xff]  ;;  %v5202_v26 = vld [vmem:[%s15638_s2 + $0x380] sm:$0xff] }
 0x2ce   : > { %8897 = vmatmul.mubr.msk.bf16.gmra.mrb[96].mxu0 %vm987_vm0, %v9613_v6  ;;  %v9653_v6 = vld [vmem:[%s15637_s1 + $0x328] sm:$0xff]   ;;  %vm5460_vm8 = vcmp.ge.s32.totalorder %v5203_v1, %v11531_v61  ;;  %vm5459_vm9 = vcmp.ge.s32.totalorder %v5202_v26, %v11531_v61  ;;  %v9620_v1 = vld [vmem:[%s15637_s1 + $0x1a0] sm:$0xff]   ;;  %v5221_v63 = vld [vmem:[%s15638_s2 + $0x418] sm:$0xff] }
 0x2cf   : > { %8900 = vmatprep.mubr.msk.bf16.mxu0 %vm987_vm0, %v9616_v35  ;;  %v5716_v26 = vsel %vm5460_vm8, 1, %v15728_v45  ;;  %v5715_v60 = vsel %vm5459_vm9, 1, %v15728_v45  ;;  %9001 = vmatmul.mubr.msk.bf16.gmra.mrb[72].mxu1 %vm987_vm0, %v9653_v6  ;;  %v5717_v6 = vsel %vm5461_vm11, 1, %v15728_v45  ;;  %vm5476_vm9 = vcmp.ge.s32.totalorder %v5219_v50, %v11531_v61  ;;  %v9636_v50 = vld [vmem:[%s15637_s1 + $0x1e0] sm:$0xff]  }
 0x2d0   : > { %v12528_v62 = vpop.permute.xlu1 %5995  ;;  %v12530_v46 = vpop.permute.xlu0 %5992  ;;  %vm5478_vm11 = vcmp.ge.s32.totalorder %v5221_v63, %v11531_v61 }
 0x2d1   : > { %15733 = vst [vmem:[#allocation30_spill] sm:$0xff] %v12528_v62  ;;  %15734 = vst [vmem:[#allocation31_spill] sm:$0xff] %v12530_v46  ;;  %6187 = vperm.xlu1 %9546, %v5712_v17   ;;  %6184 = vperm.xlu0 %9545, %v5711_v20   ;;  %v9654_v20 = vld [vmem:[%s15637_s1 + $0x330] sm:$0xff]   ;;  %v5205_v17 = vld [vmem:[%s15638_s2 + $0x398] sm:$0xff] }
 0x2d2   : > { %vm5462_vm10 = vcmp.ge.s32.totalorder %v5205_v17, %v11531_v61  ;;  %9004 = vmatprep.mubr.msk.bf16.mxu1 %vm987_vm0, %v9654_v20  ;;  %v9621_v20 = vld [vmem:[%s15637_s1 + $0x1a8] sm:$0xff]   ;;  %v5216_v46 = vld [vmem:[%s15638_s2 + $0x3f0] sm:$0xff] }
 0x2d3   : > { %v5718_v31 = vsel %vm5462_vm10, 1, %v15728_v45  ;;  %v5215_v62 = vld [vmem:[%s15638_s2 + $0x3e8] sm:$0xff]  ;;  %vm5473_vm8 = vcmp.ge.s32.totalorder %v5216_v46, %v11531_v61 }
 0x2d4   : > { %v12552_v40 = vpop.permute.xlu1 %6001  ;;  %v12554_v35 = vpop.permute.xlu0 %5998  ;;  %vm5472_vm5 = vcmp.ge.s32.totalorder %v5215_v62, %v11531_v61  ;;  %v9632_v62 = vld [vmem:[%s15637_s1 + $0x1d0] sm:$0xff]  }
 0x2d5   : > { %15735 = vst [vmem:[#allocation32_spill] sm:$0xff] %v12552_v40  ;;  %15736 = vst [vmem:[#allocation33_spill] sm:$0xff] %v12554_v35  ;;  %6193 = vperm.xlu1 %9546, %v5714_v57   ;;  %6190 = vperm.xlu0 %9545, %v5713_v4   ;;  %v5207_v57 = vld [vmem:[%s15638_s2 + $0x3a8] sm:$0xff]  ;;  %v5206_v4 = vld [vmem:[%s15638_s2 + $0x3a0] sm:$0xff] }
 0x2d6   : > { %8901 = vmatmul.mubr.msk.bf16.gmra.mrb[100].mxu0 %vm987_vm0, %v9617_v52  ;;  %v9655_v52 = vld [vmem:[%s15637_s1 + $0x338] sm:$0xff]   ;;  %vm5464_vm12 = vcmp.ge.s32.totalorder %v5207_v57, %v11531_v61  ;;  %vm5463_vm13 = vcmp.ge.s32.totalorder %v5206_v4, %v11531_v61  ;;  %v9624_v57 = vld [vmem:[%s15637_s1 + $0x1b0] sm:$0xff]  }
 0x2d7   : > { %8904 = vmatprep.mubr.msk.bf16.mxu0 %vm987_vm0, %v9620_v1  ;;  %v5720_v4 = vsel %vm5464_vm12, 1, %v15728_v45  ;;  %v5719_v30 = vsel %vm5463_vm13, 1, %v15728_v45  ;;  %9005 = vmatmul.mubr.msk.bf16.gmra.mrb[76].mxu1 %vm987_vm0, %v9655_v52  ;;  %v5217_v40 = vld [vmem:[%s15638_s2 + $0x3f8] sm:$0xff]  ;;  %vm5477_vm12 = vcmp.ge.s32.totalorder %v5220_v42, %v11531_v61  ;;  %v5734_v42 = vsel %vm5478_vm11, 1, %v15728_v45 }
 0x2d8   : > { %v12572_v18 = vpop.permute.xlu1 %6007  ;;  %v12574_v41 = vpop.permute.xlu0 %6004  ;;  %vm5474_vm7 = vcmp.ge.s32.totalorder %v5217_v40, %v11531_v61  ;;  %vm5480_vm13 = vcmp.ge.s32.totalorder %v5223_v43, %v11531_v61  ;;  %v9640_v43 = vld [vmem:[%s15637_s1 + $0x1f0] sm:$0xff]  }
 0x2d9   : > { %15737 = vst [vmem:[#allocation34_spill] sm:$0xff] %v12572_v18  ;;  %15738 = vst [vmem:[#allocation35_spill] sm:$0xff] %v12574_v41  ;;  %6199 = vperm.xlu1 %9546, %v5716_v26   ;;  %6196 = vperm.xlu0 %9545, %v5715_v60   ;;  %v9656_v60 = vld [vmem:[%s15637_s1 + $0x340] sm:$0xff]   ;;  %v5209_v26 = vld [vmem:[%s15638_s2 + $0x3b8] sm:$0xff]  ;;  %v5730_v46 = vsel %vm5474_vm7, 1, %v15728_v45  ;;  %v5736_v51 = vsel %vm5480_vm13, 1, %v15728_v45 }
 0x2da   : > { %vm5466_vm14 = vcmp.ge.s32.totalorder %v5209_v26, %v11531_v61  ;;  %9008 = vmatprep.mubr.msk.bf16.mxu1 %vm987_vm0, %v9656_v60  ;;  %v9657_v60 = vld [vmem:[%s15637_s1 + $0x348] sm:$0xff]   ;;  %v5212_v41 = vld [vmem:[%s15638_s2 + $0x3d0] sm:$0xff]  ;;  %vm6645_vm7 = vcmp.eq.s32.totalorder %v12255_v56, 1 }
 0x2db   : > { %v5722_v47 = vsel %vm5466_vm14, 1, %v15728_v45  ;;  %vm5469_vm4 = vcmp.ge.s32.totalorder %v5212_v41, %v11531_v61 }
 0x2dc   : > { %v12596_v17 = vpop.permute.xlu1 %6013  ;;  %v12598_v1 = vpop.permute.xlu0 %6010 }
 0x2dd   : > { %15739 = vst [vmem:[#allocation36_spill] sm:$0xff] %v12596_v17  ;;  %15740 = vst [vmem:[#allocation37_spill] sm:$0xff] %v12598_v1  ;;  %6205 = vperm.xlu1 %9546, %v5718_v31   ;;  %6202 = vperm.xlu0 %9545, %v5717_v6   ;;  %v5211_v31 = vld [vmem:[%s15638_s2 + $0x3c8] sm:$0xff]  ;;  %v5210_v6 = vld [vmem:[%s15638_s2 + $0x3c0] sm:$0xff] }
 0x2de   : > { %8905 = vmatmul.mubr.msk.bf16.gmra.mrb[104].mxu0 %vm987_vm0, %v9621_v20  ;;  %v5721_v20 = vsel %vm5465_vm15, 1, %v15728_v45  ;;  %vm5468_vm1 = vcmp.ge.s32.totalorder %v5211_v31, %v11531_v61  ;;  %vm5467_vm2 = vcmp.ge.s32.totalorder %v5210_v6, %v11531_v61  ;;  %v9628_v31 = vld [vmem:[%s15637_s1 + $0x1c0] sm:$0xff]  }
 0x2df   : > { %8908 = vmatprep.mubr.msk.bf16.mxu0 %vm987_vm0, %v9624_v57  ;;  %v9625_v57 = vld [vmem:[%s15637_s1 + $0x1b8] sm:$0xff]   ;;  %9009 = vmatmul.mubr.msk.bf16.gmra.mrb[80].mxu1 %vm987_vm0, %v9657_v60  ;;  %v5214_v60 = vld [vmem:[%s15638_s2 + $0x3e0] sm:$0xff] }
 0x2e0   : > { %v12616_v18 = vpop.permute.xlu1 %6019  ;;  %v12618_v17 = vpop.permute.xlu0 %6016  ;;  %vm5471_vm6 = vcmp.ge.s32.totalorder %v5214_v60, %v11531_v61 }
 0x2e1   : > { %15741 = vst [vmem:[#allocation38_spill] sm:$0xff] %v12616_v18  ;;  %15742 = vst [vmem:[#allocation39_spill] sm:$0xff] %v12618_v17  ;;  %6211 = vperm.xlu1 %9546, %v5720_v4   ;;  %6208 = vperm.xlu0 %9545, %v5719_v30   ;;  %v12627_v52 = vpop.f32.mrb[0].mxu0  ;;  %v9658_v30 = vld [vmem:[%s15637_s1 + $0x350] sm:$0xff]   ;;  %v5213_v17 = vld [vmem:[%s15638_s2 + $0x3d8] sm:$0xff] }
 0x2e2   : > { %v12634_v26 = vpop.f32.mrb[1].mxu0  ;;  %vm5470_vm3 = vcmp.ge.s32.totalorder %v5213_v17, %v11531_v61  ;;  %9012 = vmatprep.mubr.msk.bf16.mxu1 %vm987_vm0, %v9658_v30  ;;  %v9659_v30 = vld [vmem:[%s15637_s1 + $0x358] sm:$0xff]  }
 0x2e3   : > { %v12657_v6 = vpop.f32.mrb[2].mxu0  ;;  %v5726_v41 = vsel %vm5470_vm3, 1, %v15728_v45  ;;  %vm6627_vm3 = vcmp.eq.s32.totalorder %v12049_v2, 1 }
 0x2e4   : > { %v12644_v4 = vpop.permute.xlu1 %6025  ;;  %v12646_v18 = vpop.permute.xlu0 %6022 }
 0x2e5   : > { %15743 = vst [vmem:[#allocation40_spill] sm:$0xff] %v12644_v4  ;;  %15744 = vst [vmem:[#allocation41_spill] sm:$0xff] %v12646_v18  ;;  %6217 = vperm.xlu1 %9546, %v5722_v47   ;;  %6214 = vperm.xlu0 %9545, %v5721_v20   ;;  %v12659_v1 = vpop.f32.mrb[3].mxu0  ;;  %v5724_v4 = vsel %vm5468_vm1, 1, %v15728_v45  ;;  %v5723_v18 = vsel %vm5467_vm2, 1, %v15728_v45  ;;  %vm6629_vm2 = vcmp.eq.s32.totalorder %v12047_v0, 1 }
 0x2e6   : > { %8909 = vmatmul.mubr.msk.bf16.gmra.mrb[108].mxu0 %vm987_vm0, %v9625_v57  ;;  %v5725_v57 = vsel %vm5469_vm4, 1, %v15728_v45  ;;  %vm6630_vm4 = vcmp.eq.s32.totalorder %v12074_v49, 1  ;;  %v12864_v56 = vsel %vm6629_vm2, %v12627_v52, -1e+30  ;;  %vm6634_vm2 = vcmp.eq.s32.totalorder %v12118_v27, 1 }
 0x2e7   : > { %8912 = vmatprep.mubr.msk.bf16.mxu0 %vm987_vm0, %v9628_v31  ;;  %9013 = vmatmul.mubr.msk.bf16.gmra.mrb[84].mxu1 %vm987_vm0, %v9659_v30  ;;  %v5729_v30 = vsel %vm5473_vm8, 1, %v15728_v45  ;;  %vm6643_vm8 = vcmp.eq.s32.totalorder %v12228_v5, 1 }
 0x2e8   : > { %v12668_v47 = vpop.permute.xlu1 %6031  ;;  %v12670_v20 = vpop.permute.xlu0 %6028 }
 0x2e9   : > { %15745 = vst [vmem:[#allocation42_spill] sm:$0xff] %v12668_v47  ;;  %15746 = vst [vmem:[#allocation43_spill] sm:$0xff] %v12670_v20  ;;  %6223 = vperm.xlu1 %9546, %v5724_v4   ;;  %6220 = vperm.xlu0 %9545, %v5723_v18   ;;  %v12679_v17 = vpop.f32.mrb[4].mxu0  ;;  %v9629_v47 = vld [vmem:[%s15637_s1 + $0x1c8] sm:$0xff]   ;;  %v9660_v18 = vld [vmem:[%s15637_s1 + $0x360] sm:$0xff]  }
 0x2ea   : > { %v12686_v31 = vpop.f32.mrb[5].mxu0  ;;  %9016 = vmatprep.mubr.msk.bf16.mxu1 %vm987_vm0, %v9660_v18  ;;  %v9661_v18 = vld [vmem:[%s15637_s1 + $0x368] sm:$0xff]  }
 0x2eb   : > { %v12709_v60 = vpop.f32.mrb[6].mxu0 }
 0x2ec   : > { %v12696_v4 = vpop.permute.xlu1 %6037  ;;  %v12698_v20 = vpop.permute.xlu0 %6034 }
 0x2ed   : > { %15747 = vst [vmem:[#allocation44_spill] sm:$0xff] %v12696_v4  ;;  %15748 = vst [vmem:[#allocation45_spill] sm:$0xff] %v12698_v20  ;;  %6229 = vperm.xlu1 %9546, %v5726_v41   ;;  %6226 = vperm.xlu0 %9545, %v5725_v57   ;;  %v12711_v35 = vpop.f32.mrb[7].mxu0  ;;  %v5728_v4 = vsel %vm5472_vm5, 1, %v15728_v45  ;;  %v5727_v20 = vsel %vm5471_vm6, 1, %v15728_v45  ;;  %vm6628_vm5 = vcmp.eq.s32.totalorder %v12076_v34, 1 }
 0x2ee   : > { %8913 = vmatmul.mubr.msk.bf16.gmra.mrb[112].mxu0 %vm987_vm0, %v9629_v47  ;;  %v5218_v47 = vld [vmem:[%s15638_s2 + $0x400] sm:$0xff] }
 0x2ef   : > { %8916 = vmatprep.mubr.msk.bf16.mxu0 %vm987_vm0, %v9632_v62  ;;  %vm5475_vm10 = vcmp.ge.s32.totalorder %v5218_v47, %v11531_v61  ;;  %9017 = vmatmul.mubr.msk.bf16.gmra.mrb[88].mxu1 %vm987_vm0, %v9661_v18  ;;  %v5733_v18 = vsel %vm5477_vm12, 1, %v15728_v45  ;;  %vm6644_vm12 = vcmp.eq.s32.totalorder %v12226_v33, 1  ;;  %v5230_v33 = vld [vmem:[%s15638_s2 + $0x460] sm:$0xff] }
 0x2f0   : > { %v12720_v41 = vpop.permute.xlu1 %6043  ;;  %v12722_v57 = vpop.permute.xlu0 %6040 }
 0x2f1   : > { %15749 = vst [vmem:[#allocation46_spill] sm:$0xff] %v12720_v41  ;;  %15750 = vst [vmem:[#allocation47_spill] sm:$0xff] %v12722_v57  ;;  %6235 = vperm.xlu1 %9546, %v5728_v4   ;;  %6232 = vperm.xlu0 %9545, %v5727_v20   ;;  %v12731_v40 = vpop.f32.mrb[8].mxu0  ;;  %v9633_v41 = vld [vmem:[%s15637_s1 + $0x1d8] sm:$0xff]   ;;  %v9662_v20 = vld [vmem:[%s15637_s1 + $0x370] sm:$0xff]  }
 0x2f2   : > { %v12738_v62 = vpop.f32.mrb[9].mxu0  ;;  %9020 = vmatprep.mubr.msk.bf16.mxu1 %vm987_vm0, %v9662_v20  ;;  %v9637_v20 = vld [vmem:[%s15637_s1 + $0x1e8] sm:$0xff]  }
 0x2f3   : > { %v12761_v47 = vpop.f32.mrb[10].mxu0 }
 0x2f4   : > { %v12748_v4 = vpop.permute.xlu1 %6049  ;;  %v12750_v57 = vpop.permute.xlu0 %6046 }
 0x2f5   : > { %15751 = vst [vmem:[#allocation48_spill] sm:$0xff] %v12748_v4  ;;  %15752 = vst [vmem:[#allocation49_spill] sm:$0xff] %v12750_v57  ;;  %6241 = vperm.xlu1 %9546, %v5730_v46   ;;  %6238 = vperm.xlu0 %9545, %v5729_v30   ;;  %v12763_v32 = vpop.f32.mrb[11].mxu0  ;;  %v5732_v4 = vsel %vm5476_vm9, 1, %v15728_v45  ;;  %v5731_v57 = vsel %vm5475_vm10, 1, %v15728_v45  ;;  %vm6646_vm10 = vcmp.eq.s32.totalorder %v12253_v44, 1 }
 0x2f6   : > { %8917 = vmatmul.mubr.msk.bf16.gmra.mrb[116].mxu0 %vm987_vm0, %v9633_v41  ;;  %v5222_v41 = vld [vmem:[%s15638_s2 + $0x420] sm:$0xff]  ;;  %v12910_v44 = vsel %vm6628_vm5, %v12659_v1, -1e+30  ;;  %vm6647_vm5 = vcmp.eq.s32.totalorder %v12272_v15, 1 }
 0x2f7   : > { %8920 = vmatprep.mubr.msk.bf16.mxu0 %vm987_vm0, %v9636_v50  ;;  %v9663_v50 = vld [vmem:[%s15637_s1 + $0x378] sm:$0xff]   ;;  %vm5479_vm14 = vcmp.ge.s32.totalorder %v5222_v41, %v11531_v61 }
 0x2f8   : > { %v12772_v46 = vpop.permute.xlu1 %6055  ;;  %v12774_v30 = vpop.permute.xlu0 %6052  ;;  %v5735_v13 = vsel %vm5479_vm14, 1, %v15728_v45  ;;  %9021 = vmatmul.mubr.msk.bf16.gmra.mrb[92].mxu1 %vm987_vm0, %v9663_v50  ;;  %v9641_v50 = vld [vmem:[%s15637_s1 + $0x1f8] sm:$0xff]   ;;  %vm6633_vm14 = vcmp.eq.s32.totalorder %v12120_v29, 1 }
 0x2f9   : > { %15753 = vst [vmem:[#allocation50_spill] sm:$0xff] %v12772_v46  ;;  %15754 = vst [vmem:[#allocation51_spill] sm:$0xff] %v12774_v30  ;;  %6247 = vperm.xlu1 %9546, %v5732_v4   ;;  %6244 = vperm.xlu0 %9545, %v5731_v57   ;;  %v12783_v63 = vpop.f32.mrb[12].mxu0  ;;  %v5225_v57 = vld [vmem:[%s15638_s2 + $0x438] sm:$0xff]  ;;  %v5224_v4 = vld [vmem:[%s15638_s2 + $0x430] sm:$0xff] }
 0x2fa   : > { %v12793_v46 = vpop.f32.mrb[13].mxu0  ;;  %v9664_v30 = vld [vmem:[%s15637_s1 + $0x380] sm:$0xff]   ;;  %vm5482_vm15 = vcmp.ge.s32.totalorder %v5225_v57, %v11531_v61  ;;  %vm5481_vm1 = vcmp.ge.s32.totalorder %v5224_v4, %v11531_v61  ;;  %v9665_v57 = vld [vmem:[%s15637_s1 + $0x388] sm:$0xff]  }
 0x2fb   : > { %v12813_v41 = vpop.f32.mrb[14].mxu0  ;;  %9024 = vmatprep.mubr.msk.bf16.mxu1 %vm987_vm0, %v9664_v30  ;;  %v5738_v30 = vsel %vm5482_vm15, 1, %v15728_v45  ;;  %vm6631_vm15 = vcmp.eq.s32.totalorder %v12090_v22, 1 }
 0x2fc   : > { %v12806_v24 = vpop.permute.xlu1 %6061  ;;  %v12808_v21 = vpop.permute.xlu0 %6058 }
 0x2fd   : > { %15755 = vst [vmem:[#allocation52_spill] sm:$0xff] %v12806_v24  ;;  %15756 = vst [vmem:[#allocation53_spill] sm:$0xff] %v12808_v21  ;;  %6253 = vperm.xlu1 %9546, %v5734_v42   ;;  %6250 = vperm.xlu0 %9545, %v5733_v18   ;;  %v12815_v37 = vpop.f32.mrb[15].mxu0  ;;  %v5227_v24 = vld [vmem:[%s15638_s2 + $0x448] sm:$0xff]  ;;  %v5226_v42 = vld [vmem:[%s15638_s2 + $0x440] sm:$0xff] }
 0x2fe   : > { %15757 = vst [vmem:[#allocation54_spill] sm:$0xff] %v12815_v37  ;;  %8921 = vmatmul.mubr.msk.bf16.gmra.mrb[120].mxu0 %vm987_vm0, %v9637_v20  ;;  %v5737_v20 = vsel %vm5481_vm1, 1, %v15728_v45  ;;  %vm5484_vm6 = vcmp.ge.s32.totalorder %v5227_v24, %v11531_v61  ;;  %vm5483_vm9 = vcmp.ge.s32.totalorder %v5226_v42, %v11531_v61  ;;  %v12900_v24 = vsel %vm6630_vm4, %v12657_v6, -1e+30 }
 0x2ff   : > { %8924 = vmatprep.mubr.msk.bf16.mxu0 %vm987_vm0, %v9640_v43  ;;  %v9666_v43 = vld [vmem:[%s15637_s1 + $0x390] sm:$0xff]   ;;  %vm6632_vm1 = vcmp.eq.s32.totalorder %v12088_v9, 1  ;;  %vm6649_vm4 = vcmp.eq.s32.totalorder %v12299_v36, 1  ;;  %v12953_v36 = vsel %vm6633_vm14, %v12679_v17, -1e+30  ;;  %vm6638_vm14 = vcmp.eq.s32.totalorder %v12156_v54, 1 }
 0x300   : > { %v12833_v18 = vpop.permute.xlu1 %6067  ;;  %v12835_v21 = vpop.permute.xlu0 %6064  ;;  %9025 = vmatmul.mubr.msk.bf16.gmra.mrb[96].mxu1 %vm987_vm0, %v9665_v57 }
 0x301   : > { %15758 = vst [vmem:[#allocation55_spill] sm:$0xff] %v12833_v18  ;;  %15759 = vst [vmem:[#allocation56_spill] sm:$0xff] %v12835_v21  ;;  %6259 = vperm.xlu1 %9546, %v5736_v51   ;;  %6256 = vperm.xlu0 %9545, %v5735_v13   ;;  %v8818_v18 = vpop.f32.mrb[16].mxu0  ;;  %v5229_v51 = vld [vmem:[%s15638_s2 + $0x458] sm:$0xff]  ;;  %v5228_v13 = vld [vmem:[%s15638_s2 + $0x450] sm:$0xff] }
 0x302   : > { %v12866_v5 = vsel %vm6645_vm7, %v8818_v18, -1e+30  ;;  %v4131_v4 = vpop.f32.mrb[17].mxu0  ;;  %v12874_v21 = vsel %vm6627_vm3, %v12634_v26, -1e+30  ;;  %v5740_v18 = vsel %vm5484_vm6, 1, %v15728_v45  ;;  %vm5486_vm11 = vcmp.ge.s32.totalorder %v5229_v51, %v11531_v61  ;;  %9028 = vmatprep.mubr.msk.bf16.mxu1 %vm987_vm0, %v9666_v43 }
 0x303   : > { %v12882_v52 = vsel %vm6643_vm8, %v4131_v4, -1e+30  ;;  %v8819_v2 = vpop.f32.mrb[18].mxu0  ;;  %v5739_v26 = vsel %vm5483_vm9, 1, %v15728_v45  ;;  %v5231_v4 = vld [vmem:[%s15638_s2 + $0x468] sm:$0xff]  ;;  %vm5485_vm13 = vcmp.ge.s32.totalorder %v5228_v13, %v11531_v61  ;;  %vm5487_vm6 = vcmp.ge.s32.totalorder %v5230_v33, %v11531_v61  ;;  %v5232_v51 = vld [vmem:[%s15638_s2 + $0x470] sm:$0xff] }
 0x304   : > { %v12878_v3 = vpop.permute.xlu1 %6073  ;;  %v12880_v0 = vpop.permute.xlu0 %6070  ;;  %v5741_v57 = vsel %vm5485_vm13, 1, %v15728_v45  ;;  %vm5488_vm3 = vcmp.ge.s32.totalorder %v5231_v4, %v11531_v61  ;;  %v9667_v13 = vld [vmem:[%s15637_s1 + $0x398] sm:$0xff]   ;;  %vm6650_vm7 = vcmp.eq.s32.totalorder %v12297_v53, 1  ;;  %v12989_v4 = vsel %vm6634_vm2, %v12709_v60, -1e+30  ;;  %v5234_v60 = vld [vmem:[%s15638_s2 + $0x480] sm:$0xff] }
 0x305   : > { %6265 = vperm.xlu1 %9546, %v5738_v30   ;;  %6262 = vperm.xlu0 %9545, %v5737_v20   ;;  %v12902_v30 = vsel %vm6646_vm10, %v8819_v2, -1e+30  ;;  %v4134_v20 = vpop.f32.mrb[19].mxu0  ;;  %vm6648_vm9 = vcmp.eq.s32.totalorder %v12270_v25, 1  ;;  %vm5489_vm10 = vcmp.ge.s32.totalorder %v5232_v51, %v11531_v61  ;;  %v12999_v53 = vsel %vm6632_vm1, %v12711_v35, -1e+30 }
 0x306   : > { %v12914_v49 = vsel %vm6644_vm12, %v4134_v20, -1e+30  ;;  %8925 = vmatmul.mubr.msk.bf16.gmra.mrb[124].mxu0 %vm987_vm0, %v9641_v50  ;;  %v5742_v50 = vsel %vm5486_vm11, 1, %v15728_v45  ;;  %v12963_v20 = vsel %vm6631_vm15, %v12686_v31, -1e+30  ;;  %v5743_v31 = vsel %vm5487_vm6, 1, %v15728_v45 }
 0x307   : > { %vm6637_vm11 = vcmp.eq.s32.totalorder %v12158_v28, 1  ;;  %vm6635_vm12 = vcmp.eq.s32.totalorder %v12137_v7, 1  ;;  %vm6636_vm13 = vcmp.eq.s32.totalorder %v12135_v23, 1  ;;  %vm6653_vm1 = vcmp.eq.s32.totalorder %v12343_v14, 1  ;;  %v9669_v51 = vld [vmem:[%s15637_s1 + $0x3a8] sm:$0xff]  }
 0x308   : > { %v12926_v1 = vpop.permute.xlu1 %6079  ;;  %v12928_v6 = vpop.permute.xlu0 %6076  ;;  %9029 = vmatmul.mubr.msk.bf16.gmra.mrb[100].mxu1 %vm987_vm0, %v9667_v13  ;;  %vm6651_vm2 = vcmp.eq.s32.totalorder %v12316_v19, 1  ;;  %v13041_v14 = vsel %vm6637_vm11, %v12731_v40, -1e+30  ;;  %v13051_v9 = vsel %vm6635_vm12, %v12738_v62, -1e+30  ;;  %vm6652_vm6 = vcmp.eq.s32.totalorder %v12314_v48, 1 }
 0x309   : > { %6271 = vperm.xlu1 %9546, %v5740_v18   ;;  %6268 = vperm.xlu0 %9545, %v5739_v26   ;;  %v8822_v43 = vpop.f32.mrb[20].mxu0  ;;  %v5233_v18 = vld [vmem:[%s15638_s2 + $0x478] sm:$0xff]  ;;  %v9668_v26 = vld [vmem:[%s15637_s1 + $0x3a0] sm:$0xff]   ;;  %vm6657_vm11 = vcmp.eq.s32.totalorder %v12387_v16, 1 }
 0x30a   : > { %v12955_v15 = vsel %vm6649_vm4, %v8822_v43, -1e+30  ;;  %v4147_v2 = vpop.f32.mrb[21].mxu0  ;;  %v5744_v43 = vsel %vm5488_vm3, 1, %v15728_v45  ;;  %vm5490_vm8 = vcmp.ge.s32.totalorder %v5233_v18, %v11531_v61  ;;  %9032 = vmatprep.mubr.msk.bf16.mxu1 %vm987_vm0, %v9668_v26  ;;  %v5745_v26 = vsel %vm5489_vm10, 1, %v15728_v45  ;;  %v5236_v18 = vld [vmem:[%s15638_s2 + $0x490] sm:$0xff] }
 0x30b   : > { %v12971_v17 = vsel %vm6647_vm5, %v4147_v2, -1e+30  ;;  %v8823_v22 = vpop.f32.mrb[22].mxu0  ;;  %v5235_v2 = vld [vmem:[%s15638_s2 + $0x488] sm:$0xff]  ;;  %v5746_v13 = vsel %vm5490_vm8, 1, %v15728_v45  ;;  %vm5491_vm3 = vcmp.ge.s32.totalorder %v5234_v60, %v11531_v61  ;;  %vm6654_vm4 = vcmp.eq.s32.totalorder %v12341_v12, 1 }
 0x30c   : > { %v12967_v42 = vpop.permute.xlu1 %6085  ;;  %v12969_v29 = vpop.permute.xlu0 %6082  ;;  %vm5492_vm15 = vcmp.ge.s32.totalorder %v5235_v2, %v11531_v61  ;;  %v5747_v62 = vsel %vm5491_vm3, 1, %v15728_v45  ;;  %v13084_v12 = vsel %vm6636_vm13, %v12763_v32, -1e+30  ;;  %v5238_v48 = vld [vmem:[%s15638_s2 + $0x4a0] sm:$0xff]  ;;  %vm6639_vm8 = vcmp.eq.s32.totalorder %v12181_v38, 1  ;;  %v9673_v38 = vld [vmem:[%s15637_s1 + $0x3c8] sm:$0xff]  }
 0x30d   : > { %6277 = vperm.xlu1 %9546, %v5742_v50   ;;  %6274 = vperm.xlu0 %9545, %v5741_v57   ;;  %v12991_v50 = vsel %vm6650_vm7, %v8823_v22, -1e+30  ;;  %v4150_v57 = vpop.f32.mrb[23].mxu0  ;;  %vm5493_vm7 = vcmp.ge.s32.totalorder %v5236_v18, %v11531_v61  ;;  %vm6640_vm10 = vcmp.eq.s32.totalorder %v12179_v59, 1  ;;  %vm5495_vm13 = vcmp.ge.s32.totalorder %v5238_v48, %v11531_v61  ;;  %v9671_v18 = vld [vmem:[%s15637_s1 + $0x3b8] sm:$0xff]   ;;  %v9672_v16 = vld [vmem:[%s15637_s1 + $0x3c0] sm:$0xff]  }
 0x30e   : > { %v13003_v27 = vsel %vm6648_vm9, %v4150_v57, -1e+30  ;;  %v9670_v57 = vld [vmem:[%s15637_s1 + $0x3b0] sm:$0xff]   ;;  %vm6641_vm9 = vcmp.eq.s32.totalorder %v12208_v55, 1  ;;  %v13139_v23 = vsel %vm6639_vm8, %v12793_v46, -1e+30 }
 0x30f   : > { %v13118_v55 = vsel %vm6641_vm9, %v12783_v63, -1e+30  ;;  %v5243_v59 = vld [vmem:[%s15638_s2 + $0x4c8] sm:$0xff] }
 0x310   : > { %v13014_v25 = vpop.permute.xlu1 %6091  ;;  %v13016_v35 = vpop.permute.xlu0 %6088  ;;  %9033 = vmatmul.mubr.msk.bf16.gmra.mrb[104].mxu1 %vm987_vm0, %v9669_v51  ;;  %v5241_v51 = vld [vmem:[%s15638_s2 + $0x4b8] sm:$0xff] }
 0x311   : > { %6283 = vperm.xlu1 %9546, %v5744_v43   ;;  %6280 = vperm.xlu0 %9545, %v5743_v31   ;;  %v8826_v22 = vpop.f32.mrb[24].mxu0  ;;  %v5237_v43 = vld [vmem:[%s15638_s2 + $0x498] sm:$0xff]  ;;  %vm5498_vm3 = vcmp.ge.s32.totalorder %v5241_v51, %v11531_v61  ;;  %v9674_v51 = vld [vmem:[%s15637_s1 + $0x3d0] sm:$0xff]  }
 0x312   : > { %v13043_v19 = vsel %vm6653_vm1, %v8826_v22, -1e+30  ;;  %v4163_v31 = vpop.f32.mrb[25].mxu0  ;;  %v5748_v22 = vsel %vm5492_vm15, 1, %v15728_v45  ;;  %vm5494_vm5 = vcmp.ge.s32.totalorder %v5237_v43, %v11531_v61  ;;  %9036 = vmatprep.mubr.msk.bf16.mxu1 %vm987_vm0, %v9670_v57  ;;  %v13115_v57 = vpop.f32.mrb[0].mxu1  ;;  %vm6642_vm15 = vcmp.eq.s32.totalorder %v12206_v8, 1 }
 0x313   : > { %v13059_v40 = vsel %vm6651_vm2, %v4163_v31, -1e+30  ;;  %v8827_v7 = vpop.f32.mrb[26].mxu0  ;;  %v13074_v31 = vsel %vm6638_vm14, %v12761_v47, -1e+30  ;;  %v5239_v47 = vld [vmem:[%s15638_s2 + $0x4a8] sm:$0xff] }
 0x314   : > { %v13055_v37 = vpop.permute.xlu1 %6097  ;;  %v13057_v28 = vpop.permute.xlu0 %6094  ;;  %v13076_v2 = vsel %vm6654_vm4, %v8827_v7, -1e+30  ;;  %15761 = vst [vmem:[#allocation58_spill] sm:$0xff] %v13115_v57  ;;  %vm5496_vm12 = vcmp.ge.s32.totalorder %v5239_v47, %v11531_v61  ;;  %vm6655_vm14 = vcmp.eq.s32.totalorder %v12360_v10, 1  ;;  %vm6658_vm1 = vcmp.eq.s32.totalorder %v12385_v39, 1  ;;  %v15765_v39 = vld [vmem:[#allocation54_spill] sm:$0xff] }
 0x315   : > { %6289 = vperm.xlu1 %9546, %v5746_v13   ;;  %6286 = vperm.xlu0 %9545, %v5745_v26   ;;  %v4166_v33 = vpop.f32.mrb[27].mxu0  ;;  %v5749_v26 = vsel %vm5493_vm7, 1, %v15728_v45  ;;  %v13123_v43 = vpop.f32.mrb[1].mxu1  ;;  %v5752_v8 = vsel %vm5496_vm12, 1, %v15728_v45  ;;  %vm6656_vm2 = vcmp.eq.s32.totalorder %v12358_v11, 1  ;;  %vm5497_vm4 = vcmp.ge.s32.totalorder %v5240_v58, %v11531_v61 }
 0x316   : > { %v13088_v54 = vsel %vm6652_vm6, %v4166_v33, -1e+30  ;;  %v5750_v33 = vsel %vm5494_vm5, 1, %v15728_v45  ;;  %v13131_v63 = vpop.f32.mrb[2].mxu1  ;;  %v13175_v47 = vsel %vm6640_vm10, %v15765_v39, -1e+30  ;;  %vm5500_vm7 = vcmp.ge.s32.totalorder %v5243_v59, %v11531_v61 }
 0x317   : > { %15762 = vst [vmem:[#allocation59_spill] sm:$0xff] %v13131_v63  ;;  %v5754_v39 = vsel %vm5498_vm3, 1, %v15728_v45  ;;  %v5753_v11 = vsel %vm5497_vm4, 1, %v15728_v45  ;;  %v15776_v57 = vmax.f32 %v12874_v21, %v12882_v52  ;;  %v15780_v52 = vmax.f32 %v12900_v24, %v12902_v30  ;;  %v5247_v24 = vld [vmem:[%s15638_s2 + $0x4e8] sm:$0xff]  ;;  %v5246_v30 = vld [vmem:[%s15638_s2 + $0x4e0] sm:$0xff] }
 0x318   : > { %v13100_v32 = vpop.permute.xlu1 %6103  ;;  %v13102_v13 = vpop.permute.xlu0 %6100  ;;  %9037 = vmatmul.mubr.msk.bf16.gmra.mrb[108].mxu1 %vm987_vm0, %v9671_v18 }
 0x319   : > { %15760 = vst [vmem:[#allocation57_spill] sm:$0xff] %v13100_v32  ;;  %6295 = vperm.xlu1 %9546, %v5748_v22   ;;  %6292 = vperm.xlu0 %9545, %v5747_v62   ;;  %v8830_v7 = vpop.f32.mrb[28].mxu0  ;;  %v5245_v32 = vld [vmem:[%s15638_s2 + $0x4d8] sm:$0xff] }
 0x31a   : > { %v13128_v22 = vsel %vm6657_vm11, %v8830_v7, -1e+30  ;;  %v4179_v62 = vpop.f32.mrb[29].mxu0  ;;  %v13162_v7 = vpop.f32.mrb[3].mxu1  ;;  %9040 = vmatprep.mubr.msk.bf16.mxu1 %vm987_vm0, %v9672_v16  ;;  %vm5502_vm11 = vcmp.ge.s32.totalorder %v5245_v32, %v11531_v61 }
 0x31b   : > { %v13148_v10 = vsel %vm6655_vm14, %v4179_v62, -1e+30  ;;  %v8831_v46 = vpop.f32.mrb[30].mxu0  ;;  %v5751_v62 = vsel %vm5495_vm13, 1, %v15728_v45  ;;  %v13195_v58 = vpop.f32.mrb[4].mxu1 }
 0x31c   : > { %v13144_v60 = vpop.permute.xlu1 %6109  ;;  %v13146_v34 = vpop.permute.xlu0 %6106  ;;  %15768 = vst [vmem:[#allocation63_spill] sm:$0xff] %v13195_v58  ;;  %v15773_v58 = vmax.f32 %v12864_v56, %v12866_v5  ;;  %v15777_v5 = vld [vmem:[#allocation20_spill] sm:$0xff] }
 0x31d   : > { %15763 = vst [vmem:[#allocation60_spill] sm:$0xff] %v13144_v60  ;;  %15764 = vst [vmem:[#allocation61_spill] sm:$0xff] %v13146_v34  ;;  %6301 = vperm.xlu1 %9546, %v5750_v33   ;;  %6298 = vperm.xlu0 %9545, %v5749_v26   ;;  %v13165_v60 = vsel %vm6642_vm15, %v12813_v41, -1e+30  ;;  %v13167_v34 = vsel %vm6658_vm1, %v8831_v46, -1e+30  ;;  %vm5504_vm15 = vcmp.ge.s32.totalorder %v5247_v24, %v11531_v61 }
 0x31e   : > { %v4182_v33 = vpop.f32.mrb[31].mxu0  ;;  %v5242_v46 = vld [vmem:[%s15638_s2 + $0x4c0] sm:$0xff]  ;;  %v13202_v48 = vpop.f32.mrb[5].mxu1  ;;  %vm6662_vm9 = vcmp.eq.s32.totalorder %v15777_v5, 1  ;;  %vm5503_vm1 = vcmp.ge.s32.totalorder %v5246_v30, %v11531_v61  ;;  %v15797_v24 = vmax.f32 %v12999_v53, %v13003_v27  ;;  %v15801_v53 = vld [vmem:[#allocation29_spill] sm:$0xff] }
 0x31f   : > { %v13179_v26 = vsel %vm6656_vm2, %v4182_v33, -1e+30  ;;  %v15769_v33 = vld [vmem:[#allocation21_spill] sm:$0xff]  ;;  %vm5499_vm8 = vcmp.ge.s32.totalorder %v5242_v46, %v11531_v61 }
 0x320   : > { %v13185_v41 = vpop.permute.xlu1 %6115  ;;  %v13187_v18 = vpop.permute.xlu0 %6112  ;;  %vm6661_vm5 = vcmp.eq.s32.totalorder %v15769_v33, 1  ;;  %15770 = vst [vmem:[#allocation21_spill] sm:$0xff] %v13202_v48  ;;  %v5755_v21 = vsel %vm5499_vm8, 1, %v15728_v45  ;;  %9041 = vmatmul.mubr.msk.bf16.gmra.mrb[112].mxu1 %vm987_vm0, %v9673_v38 }
 0x321   : > { %15766 = vst [vmem:[#allocation54_spill] sm:$0xff] %v13185_v41  ;;  %15767 = vst [vmem:[#allocation62_spill] sm:$0xff] %v13187_v18  ;;  %6307 = vperm.xlu1 %9546, %v5752_v8   ;;  %6304 = vperm.xlu0 %9545, %v5751_v62   ;;  %v8834_v16 = vpop.f32.mrb[32].mxu0  ;;  %v15771_v62 = vld [vmem:[#allocation19_spill] sm:$0xff]  ;;  %v13210_v33 = vpop.f32.mrb[6].mxu1 }
 0x322   : > { %v6917_v41 = vsel %vm6661_vm5, %v8834_v16, -1e+30  ;;  %v4195_v8 = vpop.f32.mrb[33].mxu0  ;;  %vm6659_vm6 = vcmp.eq.s32.totalorder %v15771_v62, 1  ;;  %15772 = vst [vmem:[#allocation19_spill] sm:$0xff] %v13210_v33  ;;  %v5244_v33 = vld [vmem:[%s15638_s2 + $0x4d0] sm:$0xff]  ;;  %9044 = vmatprep.mubr.msk.bf16.mxu1 %vm987_vm0, %v9674_v51 }
 0x323   : > { %v13218_v18 = vmax.f32 %v15773_v58, %v6917_v41  ;;  %v6915_v62 = vsel %vm6659_vm6, %v4195_v8, -1e+30  ;;  %v8835_v56 = vpop.f32.mrb[34].mxu0  ;;  %v13236_v41 = vpop.f32.mrb[7].mxu1  ;;  %vm5501_vm12 = vcmp.ge.s32.totalorder %v5244_v33, %v11531_v61  ;;  %vm6669_vm6 = vcmp.eq.s32.totalorder %v15801_v53, 1  ;;  %v5253_v53 = vld [vmem:[%s15638_s2 + $0x518] sm:$0xff] }
 0x324   : > { %v13220_v48 = vpop.permute.xlu1 %6121  ;;  %v13222_v16 = vpop.permute.xlu0 %6118  ;;  %v13233_v63 = vmax.f32 %v15776_v57, %v6915_v62  ;;  %15778 = vst [vmem:[#allocation20_spill] sm:$0xff] %v13236_v41  ;;  %v6918_v58 = vsel %vm6662_vm9, %v8835_v56, -1e+30  ;;  %v5757_v33 = vsel %vm5501_vm12, 1, %v15728_v45  ;;  %v9675_v62 = vld [vmem:[%s15637_s1 + $0x3d8] sm:$0xff]   ;;  %vm5510_vm12 = vcmp.ge.s32.totalorder %v5253_v53, %v11531_v61 }
 0x325   : > { %15774 = vst [vmem:[#allocation64_spill] sm:$0xff] %v13220_v48  ;;  %15775 = vst [vmem:[#allocation65_spill] sm:$0xff] %v13222_v16  ;;  %6313 = vperm.xlu1 %9546, %v5754_v39   ;;  %6310 = vperm.xlu0 %9545, %v5753_v11   ;;  %v4198_v8 = vpop.f32.mrb[35].mxu0  ;;  %v15779_v48 = vld [vmem:[#allocation18_spill] sm:$0xff]  ;;  %v5756_v16 = vsel %vm5500_vm7, 1, %v15728_v45  ;;  %v13249_v57 = vmax.f32 %v15780_v52, %v6918_v58  ;;  %v13269_v32 = vpop.f32.mrb[8].mxu1 }
 0x326   : > { %vm6660_vm10 = vcmp.eq.s32.totalorder %v15779_v48, 1  ;;  %v15781_v48 = vmax.f32 %v12910_v44, %v12914_v49  ;;  %15784 = vst [vmem:[#allocation67_spill] sm:$0xff] %v13269_v32  ;;  %v15785_v44 = vld [vmem:[#allocation25_spill] sm:$0xff]  ;;  %v5758_v49 = vsel %vm5502_vm11, 1, %v15728_v45  ;;  %v13274_v51 = vpop.f32.mrb[9].mxu1  ;;  %v15787_v58 = vld [vmem:[#allocation23_spill] sm:$0xff] }
 0x327   : > { %v6916_v11 = vsel %vm6660_vm10, %v4198_v8, -1e+30  ;;  %vm6665_vm13 = vcmp.eq.s32.totalorder %v15785_v44, 1  ;;  %15786 = vst [vmem:[#allocation25_spill] sm:$0xff] %v13274_v51  ;;  %vm6663_vm14 = vcmp.eq.s32.totalorder %v15787_v58, 1  ;;  %v9676_v8 = vld [vmem:[%s15637_s1 + $0x3e0] sm:$0xff]  }
 0x328   : > { %v13257_v59 = vmax.f32 %v15781_v48, %v6916_v11  ;;  %v13259_v46 = vpop.permute.xlu1 %6127  ;;  %v13261_v38 = vpop.permute.xlu0 %6124  ;;  %v5249_v44 = vld [vmem:[%s15638_s2 + $0x4f8] sm:$0xff]  ;;  %v5248_v58 = vld [vmem:[%s15638_s2 + $0x4f0] sm:$0xff]  ;;  %9045 = vmatmul.mubr.msk.bf16.gmra.mrb[116].mxu1 %vm987_vm0, %v9675_v62 }
 0x329   : > { %15782 = vst [vmem:[#allocation18_spill] sm:$0xff] %v13259_v46  ;;  %15783 = vst [vmem:[#allocation66_spill] sm:$0xff] %v13261_v38  ;;  %6319 = vperm.xlu1 %9546, %v5756_v16   ;;  %6316 = vperm.xlu0 %9545, %v5755_v21   ;;  %v8838_v39 = vpop.f32.mrb[36].mxu0  ;;  %v13282_v16 = vpop.f32.mrb[10].mxu1  ;;  %v15789_v21 = vmax.f32 %v12953_v36, %v12955_v15  ;;  %v15792_v46 = vmax.f32 %v12963_v20, %v12971_v17  ;;  %v15793_v15 = vld [vmem:[#allocation24_spill] sm:$0xff]  ;;  %v5759_v20 = vsel %vm5503_vm1, 1, %v15728_v45 }
 0x32a   : > { %v6921_v56 = vsel %vm6665_vm13, %v8838_v39, -1e+30  ;;  %v4211_v5 = vpop.f32.mrb[37].mxu0  ;;  %15788 = vst [vmem:[#allocation23_spill] sm:$0xff] %v13282_v16  ;;  %vm6666_vm2 = vcmp.eq.s32.totalorder %v15793_v15, 1  ;;  %v15796_v17 = vmax.f32 %v12989_v4, %v12991_v50  ;;  %vm5506_vm4 = vcmp.ge.s32.totalorder %v5249_v44, %v11531_v61  ;;  %9048 = vmatprep.mubr.msk.bf16.mxu1 %vm987_vm0, %v9676_v8  ;;  %v5251_v4 = vld [vmem:[%s15638_s2 + $0x508] sm:$0xff] }
 0x32b   : > { %v13290_v52 = vmax.f32 %v15789_v21, %v6921_v56  ;;  %v6919_v39 = vsel %vm6663_vm14, %v4211_v5, -1e+30  ;;  %v8839_v36 = vpop.f32.mrb[38].mxu0  ;;  %v13308_v56 = vpop.f32.mrb[11].mxu1  ;;  %vm5505_vm5 = vcmp.ge.s32.totalorder %v5248_v58, %v11531_v61  ;;  %v5250_v50 = vld [vmem:[%s15638_s2 + $0x500] sm:$0xff]  ;;  %v5762_v27 = vsel %vm5506_vm4, 1, %v15728_v45 }
 0x32c   : > { %v13292_v11 = vpop.permute.xlu1 %6133  ;;  %v13294_v48 = vpop.permute.xlu0 %6130  ;;  %v13305_v32 = vmax.f32 %v15792_v46, %v6919_v39  ;;  %15794 = vst [vmem:[#allocation24_spill] sm:$0xff] %v13308_v56  ;;  %v6922_v5 = vsel %vm6666_vm2, %v8839_v36, -1e+30  ;;  %v5761_v39 = vsel %vm5505_vm5, 1, %v15728_v45  ;;  %v9677_v58 = vld [vmem:[%s15637_s1 + $0x3e8] sm:$0xff]   ;;  %vm5508_vm8 = vcmp.ge.s32.totalorder %v5251_v4, %v11531_v61 }
 0x32d   : > { %15790 = vst [vmem:[#allocation68_spill] sm:$0xff] %v13292_v11  ;;  %15791 = vst [vmem:[#allocation69_spill] sm:$0xff] %v13294_v48  ;;  %6325 = vperm.xlu1 %9546, %v5758_v49   ;;  %6322 = vperm.xlu0 %9545, %v5757_v33   ;;  %v4214_v21 = vpop.f32.mrb[39].mxu0  ;;  %v15795_v11 = vld [vmem:[#allocation22_spill] sm:$0xff]  ;;  %v5760_v48 = vsel %vm5504_vm15, 1, %v15728_v45  ;;  %v13321_v46 = vmax.f32 %v15796_v17, %v6922_v5  ;;  %v13341_v8 = vpop.f32.mrb[12].mxu1  ;;  %vm5507_vm9 = vcmp.ge.s32.totalorder %v5250_v50, %v11531_v61 }
 0x32e   : > { %vm6664_vm3 = vcmp.eq.s32.totalorder %v15795_v11, 1  ;;  %15800 = vst [vmem:[#allocation71_spill] sm:$0xff] %v13341_v8  ;;  %v13346_v44 = vpop.f32.mrb[13].mxu1  ;;  %v15803_v5 = vld [vmem:[#allocation27_spill] sm:$0xff]  ;;  %v15813_v4 = vmax.f32 %v13084_v12, %v13088_v54  ;;  %v15817_v12 = vld [vmem:[#allocation33_spill] sm:$0xff]  ;;  %v5766_v54 = vsel %vm5510_vm12, 1, %v15728_v45 }
 0x32f   : > { %v6920_v49 = vsel %vm6664_vm3, %v4214_v21, -1e+30  ;;  %15802 = vst [vmem:[#allocation29_spill] sm:$0xff] %v13346_v44  ;;  %vm6667_vm7 = vcmp.eq.s32.totalorder %v15803_v5, 1  ;;  %v9678_v21 = vld [vmem:[%s15637_s1 + $0x3f0] sm:$0xff]   ;;  %vm6673_vm14 = vcmp.eq.s32.totalorder %v15817_v12, 1 }
 0x330   : > { %v13329_v33 = vmax.f32 %v15797_v24, %v6920_v49  ;;  %v13331_v30 = vpop.permute.xlu1 %6139  ;;  %v13333_v62 = vpop.permute.xlu0 %6136  ;;  %v5252_v5 = vld [vmem:[%s15638_s2 + $0x510] sm:$0xff]  ;;  %9049 = vmatmul.mubr.msk.bf16.gmra.mrb[120].mxu1 %vm987_vm0, %v9677_v58  ;;  %v15867_v8 = vld [vmem:[#allocation42_spill] sm:$0xff] }
 0x331   : > { %15798 = vst [vmem:[#allocation22_spill] sm:$0xff] %v13331_v30  ;;  %15799 = vst [vmem:[#allocation70_spill] sm:$0xff] %v13333_v62  ;;  %6331 = vperm.xlu1 %9546, %v5760_v48   ;;  %6328 = vperm.xlu0 %9545, %v5759_v20   ;;  %v8842_v11 = vpop.f32.mrb[40].mxu0  ;;  %v13354_v48 = vpop.f32.mrb[14].mxu1  ;;  %v15805_v20 = vmax.f32 %v13041_v14, %v13043_v19  ;;  %v15808_v30 = vmax.f32 %v13051_v9, %v13059_v40  ;;  %v15809_v19 = vld [vmem:[#allocation28_spill] sm:$0xff]  ;;  %v5763_v9 = vsel %vm5507_vm9, 1, %v15728_v45 }
 0x332   : > { %v6925_v36 = vsel %vm6669_vm6, %v8842_v11, -1e+30  ;;  %v4227_v15 = vpop.f32.mrb[41].mxu0  ;;  %15804 = vst [vmem:[#allocation27_spill] sm:$0xff] %v13354_v48  ;;  %vm6670_vm10 = vcmp.eq.s32.totalorder %v15809_v19, 1  ;;  %v15812_v40 = vmax.f32 %v13074_v31, %v13076_v2  ;;  %vm5509_vm13 = vcmp.ge.s32.totalorder %v5252_v5, %v11531_v61  ;;  %9052 = vmatprep.mubr.msk.bf16.mxu1 %vm987_vm0, %v9678_v21  ;;  %v5255_v31 = vld [vmem:[%s15638_s2 + $0x528] sm:$0xff] }
 0x333   : > { %v13362_v17 = vmax.f32 %v15805_v20, %v6925_v36  ;;  %v6923_v11 = vsel %vm6667_vm7, %v4227_v15, -1e+30  ;;  %v8843_v14 = vpop.f32.mrb[42].mxu0  ;;  %v13380_v36 = vpop.f32.mrb[15].mxu1  ;;  %v5254_v2 = vld [vmem:[%s15638_s2 + $0x520] sm:$0xff]  ;;  %v9679_v5 = vld [vmem:[%s15637_s1 + $0x3f8] sm:$0xff]   ;;  %vm5512_vm1 = vcmp.ge.s32.totalorder %v5255_v31, %v11531_v61  ;;  %v15830_v31 = vmax.f32 %v13175_v47, %v13179_v26 }
 0x334   : > { %v13364_v49 = vpop.permute.xlu1 %6145  ;;  %v13366_v24 = vpop.permute.xlu0 %6142  ;;  %v13377_v62 = vmax.f32 %v15808_v30, %v6923_v11  ;;  %15810 = vst [vmem:[#allocation28_spill] sm:$0xff] %v13380_v36  ;;  %v6926_v15 = vsel %vm6670_vm10, %v8843_v14, -1e+30  ;;  %v5765_v11 = vsel %vm5509_vm13, 1, %v15728_v45  ;;  %vm5511_vm2 = vcmp.ge.s32.totalorder %v5254_v2, %v11531_v61  ;;  %v5256_v12 = vld [vmem:[%s15638_s2 + $0x530] sm:$0xff]  ;;  %v15835_v47 = vld [vmem:[#allocation37_spill] sm:$0xff] }
 0x335   : > { %15806 = vst [vmem:[#allocation72_spill] sm:$0xff] %v13364_v49  ;;  %15807 = vst [vmem:[#allocation73_spill] sm:$0xff] %v13366_v24  ;;  %6337 = vperm.xlu1 %9546, %v5762_v27   ;;  %6334 = vperm.xlu0 %9545, %v5761_v39   ;;  %v4230_v20 = vpop.f32.mrb[43].mxu0  ;;  %v15811_v49 = vld [vmem:[#allocation26_spill] sm:$0xff]  ;;  %v5764_v24 = vsel %vm5508_vm8, 1, %v15728_v45  ;;  %v13393_v30 = vmax.f32 %v15812_v40, %v6926_v15  ;;  %v13413_v21 = vpop.f32.mrb[16].mxu1  ;;  %vm5513_vm6 = vcmp.ge.s32.totalorder %v5256_v12, %v11531_v61 }
 0x336   : > { %vm6668_vm11 = vcmp.eq.s32.totalorder %v15811_v49, 1  ;;  %15816 = vst [vmem:[#allocation75_spill] sm:$0xff] %v13413_v21  ;;  %v13418_v53 = vpop.f32.mrb[17].mxu1  ;;  %v15819_v15 = vld [vmem:[#allocation31_spill] sm:$0xff]  ;;  %vm6677_vm7 = vcmp.eq.s32.totalorder %v15835_v47, 1  ;;  %v5769_v12 = vsel %vm5513_vm6, 1, %v15728_v45 }
 0x337   : > { %v6924_v27 = vsel %vm6668_vm11, %v4230_v20, -1e+30  ;;  %15818 = vst [vmem:[#allocation33_spill] sm:$0xff] %v13418_v53  ;;  %vm6671_vm15 = vcmp.eq.s32.totalorder %v15819_v15, 1  ;;  %v15821_v20 = vmax.f32 %v13118_v55, %v13128_v22  ;;  %v15824_v15 = vmax.f32 %v13139_v23, %v13148_v10  ;;  %v15825_v22 = vld [vmem:[#allocation32_spill] sm:$0xff] }
 0x338   : > { %v13401_v39 = vmax.f32 %v15813_v4, %v6924_v27  ;;  %v13403_v50 = vpop.permute.xlu1 %6151  ;;  %v13405_v58 = vpop.permute.xlu0 %6148  ;;  %vm6674_vm3 = vcmp.eq.s32.totalorder %v15825_v22, 1  ;;  %v5767_v23 = vsel %vm5511_vm2, 1, %v15728_v45  ;;  %9053 = vmatmul.mubr.msk.bf16.gmra.mrb[124].mxu1 %vm987_vm0, %v9679_v5  ;;  %v15828_v10 = vmax.f32 %v13165_v60, %v13167_v34  ;;  %v5259_v34 = vld [vmem:[%s15638_s2 + $0x548] sm:$0xff]  ;;  %v5258_v60 = vld [vmem:[%s15638_s2 + $0x540] sm:$0xff] }
 0x339   : > { %15814 = vst [vmem:[#allocation26_spill] sm:$0xff] %v13403_v50  ;;  %15815 = vst [vmem:[#allocation74_spill] sm:$0xff] %v13405_v58  ;;  %6343 = vperm.xlu1 %9546, %v5764_v24   ;;  %6340 = vperm.xlu0 %9545, %v5763_v9   ;;  %v8846_v49 = vpop.f32.mrb[44].mxu0  ;;  %v13426_v24 = vpop.f32.mrb[18].mxu1  ;;  %vm5516_vm9 = vcmp.ge.s32.totalorder %v5259_v34, %v11531_v61  ;;  %vm5515_vm10 = vcmp.ge.s32.totalorder %v5258_v60, %v11531_v61  ;;  %v15855_v58 = vld [vmem:[#allocation38_spill] sm:$0xff]  ;;  %vm9957_vm0 = vmmov (%p15499_p1), 0  }
 0x33a   : > { %v6929_v14 = vsel %vm6673_vm14, %v8846_v49, -1e+30  ;;  %v4243_v19 = vpop.f32.mrb[45].mxu0  ;;  %15820 = vst [vmem:[#allocation31_spill] sm:$0xff] %v13426_v24  ;;  %v5257_v49 = vld [vmem:[%s15638_s2 + $0x538] sm:$0xff]  ;;  %v5771_v47 = vsel %vm5515_vm10, 1, %v15728_v45 }
 0x33b   : > { %v13431_v9 = vmax.f32 %v15821_v20, %v6929_v14  ;;  %v6927_v4 = vsel %vm6671_vm15, %v4243_v19, -1e+30  ;;  %v8847_v55 = vpop.f32.mrb[46].mxu0  ;;  %v13449_v14 = vpop.f32.mrb[19].mxu1  ;;  %vm5514_vm5 = vcmp.ge.s32.totalorder %v5257_v49, %v11531_v61 }
 0x33c   : > { %v13433_v40 = vpop.permute.xlu1 %6157  ;;  %v13435_v27 = vpop.permute.xlu0 %6154  ;;  %v13446_v50 = vmax.f32 %v15824_v15, %v6927_v4  ;;  %15826 = vst [vmem:[#allocation32_spill] sm:$0xff] %v13449_v14  ;;  %v6930_v19 = vsel %vm6674_vm3, %v8847_v55, -1e+30  ;;  %v5770_v26 = vsel %vm5514_vm5, 1, %v15728_v45  ;;  %vm6680_vm5 = vcmp.eq.s32.totalorder %v15855_v58, 1  ;;  %v5266_v58 = vld [vmem:[%s15638_s2 + $0x580] sm:$0xff] }
 0x33d   : > { %15822 = vst [vmem:[#allocation76_spill] sm:$0xff] %v13433_v40  ;;  %15823 = vst [vmem:[#allocation77_spill] sm:$0xff] %v13435_v27  ;;  %6349 = vperm.xlu1 %9546, %v5766_v54   ;;  %6346 = vperm.xlu0 %9545, %v5765_v11   ;;  %v4246_v20 = vpop.f32.mrb[47].mxu0  ;;  %v15827_v40 = vld [vmem:[#allocation30_spill] sm:$0xff]  ;;  %v5768_v27 = vsel %vm5512_vm1, 1, %v15728_v45  ;;  %v13462_v54 = vmax.f32 %v15828_v10, %v6930_v19  ;;  %v13481_v5 = vpop.f32.mrb[20].mxu1  ;;  %vm5523_vm10 = vcmp.ge.s32.totalorder %v5266_v58, %v11531_v61 }
 0x33e   : > { %vm6672_vm4 = vcmp.eq.s32.totalorder %v15827_v40, 1  ;;  %15834 = vst [vmem:[#allocation81_spill] sm:$0xff] %v13481_v5  ;;  %v13486_v15 = vpop.f32.mrb[21].mxu1  ;;  %v15837_v19 = vld [vmem:[#allocation35_spill] sm:$0xff]  ;;  %v5779_v21 = vsel %vm5523_vm10, 1, %v15728_v45 }
 0x33f   : > { %15829 = vst [vmem:[#allocation30_spill] sm:$0xff] %v13462_v54  ;;  %v6928_v11 = vsel %vm6672_vm4, %v4246_v20, -1e+30  ;;  %15836 = vst [vmem:[#allocation37_spill] sm:$0xff] %v13486_v15  ;;  %vm6675_vm8 = vcmp.eq.s32.totalorder %v15837_v19, 1  ;;  %v15841_v20 = vld [vmem:[#allocation36_spill] sm:$0xff] }
 0x340   : > { %v13469_v40 = vmax.f32 %v15830_v31, %v6928_v11  ;;  %v13471_v4 = vpop.permute.xlu1 %6163  ;;  %v13473_v2 = vpop.permute.xlu0 %6160  ;;  %v5261_v31 = vld [vmem:[%s15638_s2 + $0x558] sm:$0xff]  ;;  %vm6678_vm11 = vcmp.eq.s32.totalorder %v15841_v20, 1  ;;  %v5263_v20 = vld [vmem:[%s15638_s2 + $0x568] sm:$0xff] }
 0x341   : > { %15832 = vst [vmem:[#allocation79_spill] sm:$0xff] %v13471_v4  ;;  %15833 = vst [vmem:[#allocation80_spill] sm:$0xff] %v13473_v2  ;;  %6355 = vperm.xlu1 %9546, %v5768_v27   ;;  %6352 = vperm.xlu0 %9545, %v5767_v23   ;;  %v8850_v49 = vpop.f32.mrb[48].mxu0  ;;  %v13493_v27 = vpop.f32.mrb[22].mxu1  ;;  %v5772_v2 = vsel %vm5516_vm9, 1, %v15728_v45  ;;  %vm5518_vm13 = vcmp.ge.s32.totalorder %v5261_v31, %v11531_v61  ;;  %vm5520_vm1 = vcmp.ge.s32.totalorder %v5263_v20, %v11531_v61  ;;  %v5269_v20 = vld [vmem:[%s15638_s2 + $0x598] sm:$0xff] }
 0x342   : > { %15831 = vst [vmem:[#allocation78_spill] sm:$0xff] %v13469_v40  ;;  %v13488_v55 = vsel %vm6677_vm7, %v8850_v49, -1e+30  ;;  %v4259_v22 = vpop.f32.mrb[49].mxu0  ;;  %15838 = vst [vmem:[#allocation35_spill] sm:$0xff] %v13493_v27  ;;  %v5260_v49 = vld [vmem:[%s15638_s2 + $0x550] sm:$0xff] }
 0x343   : > { %v13501_v11 = vsel %vm6675_vm8, %v4259_v22, -1e+30  ;;  %v8851_v19 = vpop.f32.mrb[50].mxu0  ;;  %v13512_v4 = vpop.f32.mrb[23].mxu1  ;;  %vm5517_vm14 = vcmp.ge.s32.totalorder %v5260_v49, %v11531_v61  ;;  %v15849_v27 = vld [vmem:[#allocation39_spill] sm:$0xff] }
 0x344   : > { %v13497_v23 = vpop.permute.xlu1 %6169  ;;  %v13499_v10 = vpop.permute.xlu0 %6166  ;;  %15842 = vst [vmem:[#allocation36_spill] sm:$0xff] %v13512_v4  ;;  %v13514_v22 = vsel %vm6678_vm11, %v8851_v19, -1e+30  ;;  %v15847_v19 = vld [vmem:[#allocation41_spill] sm:$0xff]  ;;  %v5773_v5 = vsel %vm5517_vm14, 1, %v15728_v45  ;;  %vm6679_vm2 = vcmp.eq.s32.totalorder %v15849_v27, 1  ;;  %vm5526_vm14 = vcmp.ge.s32.totalorder %v5269_v20, %v11531_v61 }
 0x345   : > { %15839 = vst [vmem:[#allocation82_spill] sm:$0xff] %v13497_v23  ;;  %15840 = vst [vmem:[#allocation83_spill] sm:$0xff] %v13499_v10  ;;  %6361 = vperm.xlu1 %9546, %v5770_v26   ;;  %6358 = vperm.xlu0 %9545, %v5769_v12   ;;  %v4262_v23 = vpop.f32.mrb[51].mxu0  ;;  %v15843_v10 = vld [vmem:[#allocation34_spill] sm:$0xff]  ;;  %v13541_v31 = vpop.f32.mrb[24].mxu1  ;;  %vm6681_vm15 = vcmp.eq.s32.totalorder %v15847_v19, 1 }
 0x346   : > { %vm6676_vm12 = vcmp.eq.s32.totalorder %v15843_v10, 1  ;;  %15846 = vst [vmem:[#allocation85_spill] sm:$0xff] %v13541_v31  ;;  %v5774_v26 = vsel %vm5518_vm13, 1, %v15728_v45  ;;  %v13547_v34 = vpop.f32.mrb[25].mxu1  ;;  %v5264_v27 = vld [vmem:[%s15638_s2 + $0x570] sm:$0xff]  ;;  %v5776_v19 = vsel %vm5520_vm1, 1, %v15728_v45 }
 0x347   : > { %v13525_v12 = vsel %vm6676_vm12, %v4262_v23, -1e+30  ;;  %v5262_v23 = vld [vmem:[%s15638_s2 + $0x560] sm:$0xff]  ;;  %15848 = vst [vmem:[#allocation41_spill] sm:$0xff] %v13547_v34  ;;  %vm5521_vm7 = vcmp.ge.s32.totalorder %v5264_v27, %v11531_v61  ;;  %vm6684_vm13 = vcmp.eq.s32.totalorder %v15867_v8, 1  ;;  %v5273_v8 = vld [vmem:[%s15638_s2 + $0x5b8] sm:$0xff] }
 0x348   : > { %v13534_v10 = vpop.permute.xlu1 %6175  ;;  %v13536_v60 = vpop.permute.xlu0 %6172  ;;  %vm5519_vm3 = vcmp.ge.s32.totalorder %v5262_v23, %v11531_v61 }
 0x349   : > { %15844 = vst [vmem:[#allocation34_spill] sm:$0xff] %v13534_v10  ;;  %15845 = vst [vmem:[#allocation84_spill] sm:$0xff] %v13536_v60  ;;  %6367 = vperm.xlu1 %9546, %v5772_v2   ;;  %6364 = vperm.xlu0 %9545, %v5771_v47   ;;  %v8854_v49 = vpop.f32.mrb[52].mxu0  ;;  %v5265_v2 = vld [vmem:[%s15638_s2 + $0x578] sm:$0xff]  ;;  %v13556_v47 = vpop.f32.mrb[26].mxu1  ;;  %v5775_v34 = vsel %vm5519_vm3, 1, %v15728_v45 }
 0x34a   : > { %v13549_v10 = vsel %vm6681_vm15, %v8854_v49, -1e+30  ;;  %v4275_v60 = vpop.f32.mrb[53].mxu0  ;;  %15850 = vst [vmem:[#allocation39_spill] sm:$0xff] %v13556_v47  ;;  %v15853_v47 = vld [vmem:[#allocation40_spill] sm:$0xff]  ;;  %vm5522_vm6 = vcmp.ge.s32.totalorder %v5265_v2, %v11531_v61 }
 0x34b   : > { %v13564_v49 = vsel %vm6679_vm2, %v4275_v60, -1e+30  ;;  %v8855_v15 = vpop.f32.mrb[54].mxu0  ;;  %vm6682_vm4 = vcmp.eq.s32.totalorder %v15853_v47, 1 }
 0x34c   : > { %v13560_v31 = vpop.permute.xlu1 %6181  ;;  %v13562_v4 = vpop.permute.xlu0 %6178  ;;  %v13577_v60 = vsel %vm6682_vm4, %v8855_v15, -1e+30  ;;  %v5267_v15 = vld [vmem:[%s15638_s2 + $0x588] sm:$0xff] }
 0x34d   : > { %15851 = vst [vmem:[#allocation86_spill] sm:$0xff] %v13560_v31  ;;  %15852 = vst [vmem:[#allocation87_spill] sm:$0xff] %v13562_v4  ;;  %6373 = vperm.xlu1 %9546, %v5774_v26   ;;  %6370 = vperm.xlu0 %9545, %v5773_v5   ;;  %v13575_v31 = vpop.f32.mrb[27].mxu1  ;;  %v4278_v4 = vpop.f32.mrb[55].mxu0  ;;  %v15859_v5 = vld [vmem:[#allocation45_spill] sm:$0xff]  ;;  %vm5524_vm9 = vcmp.ge.s32.totalorder %v5267_v15, %v11531_v61  ;;  %v5270_v15 = vld [vmem:[%s15638_s2 + $0x5a0] sm:$0xff] }
 0x34e   : > { %15854 = vst [vmem:[#allocation40_spill] sm:$0xff] %v13575_v31  ;;  %v13586_v26 = vsel %vm6680_vm5, %v4278_v4, -1e+30  ;;  %v5778_v4 = vsel %vm5522_vm6, 1, %v15728_v45  ;;  %v13602_v47 = vpop.f32.mrb[28].mxu1  ;;  %vm6685_vm8 = vcmp.eq.s32.totalorder %v15859_v5, 1  ;;  %vm5527_vm2 = vcmp.ge.s32.totalorder %v5270_v15, %v11531_v61 }
 0x34f   : > { %15858 = vst [vmem:[#allocation89_spill] sm:$0xff] %v13602_v47  ;;  %v5777_v31 = vsel %vm5521_vm7, 1, %v15728_v45  ;;  %v5268_v5 = vld [vmem:[%s15638_s2 + $0x590] sm:$0xff]  ;;  %vm5530_vm6 = vcmp.ge.s32.totalorder %v5273_v8, %v11531_v61  ;;  %v5279_v15 = vld [vmem:[%s15638_s2 + $0x5e8] sm:$0xff] }
 0x350   : > { %v13597_v23 = vpop.permute.xlu1 %6187  ;;  %v13599_v2 = vpop.permute.xlu0 %6184  ;;  %vm5525_vm15 = vcmp.ge.s32.totalorder %v5268_v5, %v11531_v61  ;;  %v5782_v5 = vsel %vm5526_vm14, 1, %v15728_v45  ;;  %v5276_v8 = vld [vmem:[%s15638_s2 + $0x5d0] sm:$0xff] }
 0x351   : > { %15856 = vst [vmem:[#allocation38_spill] sm:$0xff] %v13597_v23  ;;  %15857 = vst [vmem:[#allocation88_spill] sm:$0xff] %v13599_v2  ;;  %6379 = vperm.xlu1 %9546, %v5776_v19   ;;  %6376 = vperm.xlu0 %9545, %v5775_v34   ;;  %v8858_v27 = vpop.f32.mrb[56].mxu0  ;;  %v13611_v23 = vpop.f32.mrb[29].mxu1  ;;  %v15861_v2 = vld [vmem:[#allocation43_spill] sm:$0xff]  ;;  %vm5533_vm14 = vcmp.ge.s32.totalorder %v5276_v8, %v11531_v61 }
 0x352   : > { %15860 = vst [vmem:[#allocation45_spill] sm:$0xff] %v13611_v23  ;;  %v13613_v34 = vsel %vm6685_vm8, %v8858_v27, -1e+30  ;;  %v4291_v19 = vpop.f32.mrb[57].mxu0  ;;  %vm6683_vm11 = vcmp.eq.s32.totalorder %v15861_v2, 1  ;;  %v13619_v47 = vpop.f32.mrb[30].mxu1 }
 0x353   : > { %15862 = vst [vmem:[#allocation43_spill] sm:$0xff] %v13619_v47  ;;  %v13627_v53 = vsel %vm6683_vm11, %v4291_v19, -1e+30  ;;  %v8859_v2 = vpop.f32.mrb[58].mxu0  ;;  %v15865_v23 = vld [vmem:[#allocation44_spill] sm:$0xff]  ;;  %v5780_v47 = vsel %vm5524_vm9, 1, %v15728_v45 }
 0x354   : > { %v13623_v24 = vpop.permute.xlu1 %6193  ;;  %v13625_v14 = vpop.permute.xlu0 %6190  ;;  %vm6686_vm12 = vcmp.eq.s32.totalorder %v15865_v23, 1  ;;  %v15871_v27 = vld [vmem:[#allocation49_spill] sm:$0xff] }
 0x355   : > { %15863 = vst [vmem:[#allocation90_spill] sm:$0xff] %v13623_v24  ;;  %15864 = vst [vmem:[#allocation91_spill] sm:$0xff] %v13625_v14  ;;  %6385 = vperm.xlu1 %9546, %v5778_v4   ;;  %6382 = vperm.xlu0 %9545, %v5777_v31   ;;  %v13638_v24 = vpop.f32.mrb[31].mxu1  ;;  %v13640_v19 = vsel %vm6686_vm12, %v8859_v2, -1e+30  ;;  %v4294_v14 = vpop.f32.mrb[59].mxu0 }
 0x356   : > { %15866 = vst [vmem:[#allocation44_spill] sm:$0xff] %v13638_v24  ;;  %v5271_v31 = vld [vmem:[%s15638_s2 + $0x5a8] sm:$0xff]  ;;  %v13653_v23 = vsel %vm6684_vm13, %v4294_v14, -1e+30  ;;  %v5781_v2 = vsel %vm5525_vm15, 1, %v15728_v45  ;;  %v13665_v58 = vpop.f32.mrb[32].mxu1  ;;  %vm5536_vm15 = vcmp.ge.s32.totalorder %v5279_v15, %v11531_v61 }
 0x357   : > { %vm5528_vm1 = vcmp.ge.s32.totalorder %v5271_v31, %v11531_v61  ;;  %15870 = vst [vmem:[#allocation93_spill] sm:$0xff] %v13665_v58  ;;  %vm6689_vm3 = vcmp.eq.s32.totalorder %v15871_v27, 1  ;;  %v15873_v24 = vld [vmem:[#allocation47_spill] sm:$0xff]  ;;  %v5274_v27 = vld [vmem:[%s15638_s2 + $0x5c0] sm:$0xff] }
 0x358   : > { %v13657_v4 = vpop.permute.xlu1 %6199  ;;  %v13659_v20 = vpop.permute.xlu0 %6196  ;;  %vm6687_vm4 = vcmp.eq.s32.totalorder %v15873_v24, 1  ;;  %v5783_v24 = vsel %vm5527_vm2, 1, %v15728_v45  ;;  %vm5531_vm10 = vcmp.ge.s32.totalorder %v5274_v27, %v11531_v61 }
 0x359   : > { %15868 = vst [vmem:[#allocation42_spill] sm:$0xff] %v13657_v4  ;;  %15869 = vst [vmem:[#allocation92_spill] sm:$0xff] %v13659_v20  ;;  %6391 = vperm.xlu1 %9546, %v5780_v47   ;;  %6388 = vperm.xlu0 %9545, %v5779_v21   ;;  %v8862_v14 = vpop.f32.mrb[60].mxu0  ;;  %v5272_v21 = vld [vmem:[%s15638_s2 + $0x5b0] sm:$0xff]  ;;  %v5275_v47 = vld [vmem:[%s15638_s2 + $0x5c8] sm:$0xff]  ;;  %v13677_v4 = vpop.f32.mrb[33].mxu1 }
 0x35a   : > { %15872 = vst [vmem:[#allocation49_spill] sm:$0xff] %v13677_v4  ;;  %v13679_v20 = vsel %vm6689_vm3, %v8862_v14, -1e+30  ;;  %v4307_v58 = vpop.f32.mrb[61].mxu0  ;;  %v13685_v48 = vpop.f32.mrb[34].mxu1  ;;  %v5784_v14 = vsel %vm5528_vm1, 1, %v15728_v45  ;;  %vm5529_vm7 = vcmp.ge.s32.totalorder %v5272_v21, %v11531_v61  ;;  %vm5532_vm9 = vcmp.ge.s32.totalorder %v5275_v47, %v11531_v61 }
 0x35b   : > { %15874 = vst [vmem:[#allocation47_spill] sm:$0xff] %v13685_v48  ;;  %v13693_v38 = vsel %vm6687_vm4, %v4307_v58, -1e+30  ;;  %v8863_v36 = vpop.f32.mrb[62].mxu0  ;;  %v15877_v4 = vld [vmem:[#allocation48_spill] sm:$0xff]  ;;  %v13706_v58 = vpop.f32.mrb[35].mxu1 }
 0x35c   : > { %v13689_v44 = vpop.permute.xlu1 %6205  ;;  %v13691_v16 = vpop.permute.xlu0 %6202  ;;  %vm6690_vm5 = vcmp.eq.s32.totalorder %v15877_v4, 1  ;;  %15878 = vst [vmem:[#allocation48_spill] sm:$0xff] %v13706_v58  ;;  %v5788_v47 = vsel %vm5532_vm9, 1, %v15728_v45  ;;  %v5787_v27 = vsel %vm5531_vm10, 1, %v15728_v45  ;;  %v5278_v21 = vld [vmem:[%s15638_s2 + $0x5e0] sm:$0xff] }
 0x35d   : > { %15875 = vst [vmem:[#allocation94_spill] sm:$0xff] %v13689_v44  ;;  %15876 = vst [vmem:[#allocation95_spill] sm:$0xff] %v13691_v16  ;;  %6397 = vperm.xlu1 %9546, %v5782_v5   ;;  %6394 = vperm.xlu0 %9545, %v5781_v2   ;;  %v13708_v31 = vsel %vm6690_vm5, %v8863_v36, -1e+30  ;;  %v4310_v44 = vpop.f32.mrb[63].mxu0  ;;  %v15880_v16 = vld [vmem:[#allocation46_spill] sm:$0xff]  ;;  %vm5535_vm2 = vcmp.ge.s32.totalorder %v5278_v21, %v11531_v61 }
 0x35e   : > { %15879 = vst [vmem:[#allocation96_spill] sm:$0xff] %v13708_v31  ;;  %vm6688_vm8 = vcmp.eq.s32.totalorder %v15880_v16, 1  ;;  %v5786_v36 = vsel %vm5530_vm6, 1, %v15728_v45  ;;  %v5277_v16 = vld [vmem:[%s15638_s2 + $0x5d8] sm:$0xff]  ;;  %v13738_v48 = vpop.f32.mrb[36].mxu1 }
 0x35f   : > { %v13715_v5 = vsel %vm6688_vm8, %v4310_v44, -1e+30  ;;  %v5785_v44 = vsel %vm5529_vm7, 1, %v15728_v45  ;;  %15884 = vst [vmem:[#allocation99_spill] sm:$0xff] %v13738_v48  ;;  %v13750_v58 = vpop.f32.mrb[37].mxu1  ;;  %v15887_v48 = vld [vmem:[#allocation51_spill] sm:$0xff]  ;;  %vm5534_vm13 = vcmp.ge.s32.totalorder %v5277_v16, %v11531_v61 }
 0x360   : > { %15881 = vst [vmem:[#allocation46_spill] sm:$0xff] %v13715_v5  ;;  %v13719_v4 = vpop.permute.xlu1 %6211  ;;  %v13721_v2 = vpop.permute.xlu0 %6208  ;;  %vm6691_vm12 = vcmp.eq.s32.totalorder %v15887_v48, 1  ;;  %v15889_v5 = vmax.f32 %v13218_v18, %v13488_v55  ;;  %v15891_v48 = vmax.f32 %v13233_v63, %v13501_v11  ;;  %v15892_v18 = vld [vmem:[#allocation52_spill] sm:$0xff]  ;;  %v15894_v63 = vmax.f32 %v13249_v57, %v13514_v22  ;;  %v5285_v21 = vld [vmem:[%s15638_s2 + $0x618] sm:$0xff] }
 0x361   : > { %15882 = vst [vmem:[#allocation97_spill] sm:$0xff] %v13719_v4  ;;  %15883 = vst [vmem:[#allocation98_spill] sm:$0xff] %v13721_v2  ;;  %6403 = vperm.xlu1 %9546, %v5784_v14   ;;  %6400 = vperm.xlu0 %9545, %v5783_v24   ;;  %v8866_v14 = vpop.f32.mrb[64].mxu0  ;;  %v15885_v24 = vld [vmem:[#allocation53_spill] sm:$0xff]  ;;  %v5280_v2 = vld [vmem:[%s15638_s2 + $0x5f0] sm:$0xff]  ;;  %v13757_v41 = vpop.f32.mrb[38].mxu1  ;;  %vm5542_vm10 = vcmp.ge.s32.totalorder %v5285_v21, %v11531_v61 }
 0x362   : > { %vm6693_vm11 = vcmp.eq.s32.totalorder %v15885_v24, 1  ;;  %v5281_v4 = vld [vmem:[%s15638_s2 + $0x5f8] sm:$0xff]  ;;  %15886 = vst [vmem:[#allocation53_spill] sm:$0xff] %v13750_v58  ;;  %v4323_v51 = vpop.f32.mrb[65].mxu0  ;;  %v5283_v24 = vld [vmem:[%s15638_s2 + $0x608] sm:$0xff]  ;;  %15888 = vst [vmem:[#allocation51_spill] sm:$0xff] %v13757_v41  ;;  %vm5537_vm5 = vcmp.ge.s32.totalorder %v5280_v2, %v11531_v61 }
 0x363   : > { %v6949_v56 = vsel %vm6693_vm11, %v8866_v14, -1e+30  ;;  %v6947_v14 = vsel %vm6691_vm12, %v4323_v51, -1e+30  ;;  %v8867_v41 = vpop.f32.mrb[66].mxu0  ;;  %vm6694_vm1 = vcmp.eq.s32.totalorder %v15892_v18, 1  ;;  %vm5538_vm3 = vcmp.ge.s32.totalorder %v5281_v4, %v11531_v61 }
 0x364   : > { %v13762_v40 = vmax.f32 %v15889_v5, %v6949_v56  ;;  %v13764_v31 = vpop.permute.xlu1 %6217  ;;  %v13766_v58 = vpop.permute.xlu0 %6214  ;;  %v13773_v54 = vmax.f32 %v15891_v48, %v6947_v14  ;;  %v6950_v51 = vsel %vm6694_vm1, %v8867_v41, -1e+30  ;;  %v15893_v5 = vld [vmem:[#allocation50_spill] sm:$0xff]  ;;  %vm5540_vm6 = vcmp.ge.s32.totalorder %v5283_v24, %v11531_v61  ;;  %v15899_v4 = vld [vmem:[#allocation56_spill] sm:$0xff]  ;;  %v5287_v18 = vld [vmem:[%s15638_s2 + $0x628] sm:$0xff] }
 0x365   : > { %15890 = vst [vmem:[#allocation100_spill] sm:$0xff] %v13764_v31  ;;  %6409 = vperm.xlu1 %9546, %v5786_v36   ;;  %6406 = vperm.xlu0 %9545, %v5785_v44   ;;  %v13778_v56 = vpop.f32.mrb[39].mxu1  ;;  %v4326_v55 = vpop.f32.mrb[67].mxu0  ;;  %vm6692_vm4 = vcmp.eq.s32.totalorder %v15893_v5, 1  ;;  %v13786_v11 = vmax.f32 %v15894_v63, %v6950_v51  ;;  %v5790_v44 = vsel %vm5534_vm13, 1, %v15728_v45  ;;  %v15895_v41 = vmax.f32 %v13257_v59, %v13525_v12  ;;  %v5282_v59 = vld [vmem:[%s15638_s2 + $0x600] sm:$0xff] }
 0x366   : > { %v6948_v36 = vsel %vm6692_vm4, %v4326_v55, -1e+30  ;;  %v5789_v57 = vsel %vm5533_vm14, 1, %v15728_v45  ;;  %v5792_v22 = vsel %vm5536_vm15, 1, %v15728_v45  ;;  %v5791_v16 = vsel %vm5535_vm2, 1, %v15728_v45  ;;  %v5286_v51 = vld [vmem:[%s15638_s2 + $0x620] sm:$0xff] }
 0x367   : > { %v13794_v14 = vmax.f32 %v15895_v41, %v6948_v36  ;;  %v13815_v12 = vsel %vm5538_vm3, 1, %v15728_v45  ;;  %v13818_v8 = vsel %vm5537_vm5, 1, %v15728_v45  ;;  %v13821_v15 = vsel %vm5540_vm6, 1, %v15728_v45  ;;  %v5288_v36 = vld [vmem:[%s15638_s2 + $0x630] sm:$0xff] }
 0x368   : > { %v13796_v48 = vpop.permute.xlu1 %6223  ;;  %v13798_v2 = vpop.permute.xlu0 %6220  ;;  %vm6697_vm7 = vcmp.eq.s32.totalorder %v12880_v0, 1  ;;  %vm6695_vm8 = vcmp.eq.s32.totalorder %v15899_v4, 1  ;;  %vm5539_vm9 = vcmp.ge.s32.totalorder %v5282_v59, %v11531_v61  ;;  %v5289_v0 = vld [vmem:[%s15638_s2 + $0x638] sm:$0xff]  ;;  %v15902_v4 = vmax.f32 %v13290_v52, %v13549_v10  ;;  %v15904_v52 = vld [vmem:[#allocation55_spill] sm:$0xff] }
 0x369   : > { %15896 = vst [vmem:[#allocation52_spill] sm:$0xff] %v13796_v48  ;;  %15897 = vst [vmem:[#allocation50_spill] sm:$0xff] %v13798_v2  ;;  %6415 = vperm.xlu1 %9546, %v5788_v47   ;;  %6412 = vperm.xlu0 %9545, %v5787_v27   ;;  %v5284_v47 = vld [vmem:[%s15638_s2 + $0x610] sm:$0xff]  ;;  %v13829_v27 = vpop.f32.mrb[40].mxu1  ;;  %v8870_v24 = vpop.f32.mrb[68].mxu0  ;;  %v15903_v31 = vmax.f32 %v13305_v32, %v13564_v49  ;;  %vm6698_vm12 = vcmp.eq.s32.totalorder %v12878_v3, 1  ;;  %vm5544_vm14 = vcmp.ge.s32.totalorder %v5287_v18, %v11531_v61 }
 0x36a   : > { %15898 = vst [vmem:[#allocation101_spill] sm:$0xff] %v13829_v27  ;;  %v13839_v55 = vpop.f32.mrb[41].mxu1  ;;  %v6953_v5 = vsel %vm6697_vm7, %v8870_v24, -1e+30  ;;  %v4339_v63 = vpop.f32.mrb[69].mxu0  ;;  %vm5541_vm11 = vcmp.ge.s32.totalorder %v5284_v47, %v11531_v61  ;;  %vm6696_vm13 = vcmp.eq.s32.totalorder %v15904_v52, 1  ;;  %vm5543_vm15 = vcmp.ge.s32.totalorder %v5286_v51, %v11531_v61 }
 0x36b   : > { %15900 = vst [vmem:[#allocation56_spill] sm:$0xff] %v13839_v55  ;;  %v13848_v41 = vpop.f32.mrb[42].mxu1  ;;  %v13853_v48 = vmax.f32 %v15902_v4, %v6953_v5  ;;  %v6951_v27 = vsel %vm6695_vm8, %v4339_v63, -1e+30  ;;  %v5291_v10 = vld [vmem:[%s15638_s2 + $0x648] sm:$0xff]  ;;  %vm5546_vm1 = vcmp.ge.s32.totalorder %v5289_v0, %v11531_v61  ;;  %vm5545_vm2 = vcmp.ge.s32.totalorder %v5288_v36, %v11531_v61  ;;  %v5290_v3 = vld [vmem:[%s15638_s2 + $0x640] sm:$0xff] }
 0x36c   : > { %15901 = vst [vmem:[#allocation102_spill] sm:$0xff] %v13848_v41  ;;  %v13855_v2 = vpop.permute.xlu1 %6229  ;;  %v13857_v24 = vpop.permute.xlu0 %6226  ;;  %v13864_v55 = vmax.f32 %v15903_v31, %v6951_v27  ;;  %v15905_v32 = vmax.f32 %v13321_v46, %v13577_v60  ;;  %v5293_v27 = vld [vmem:[%s15638_s2 + $0x658] sm:$0xff]  ;;  %v15906_v46 = vmax.f32 %v13329_v33, %v13586_v26  ;;  %v13910_v59 = vsel %vm5541_vm11, 1, %v15728_v45  ;;  %v5292_v33 = vld [vmem:[%s15638_s2 + $0x650] sm:$0xff]  ;;  %v5294_v0 = vld [vmem:[%s15638_s2 + $0x660] sm:$0xff] }
 0x36d   : > { %6421 = vperm.xlu1 %9546, %v5790_v44   ;;  %6418 = vperm.xlu0 %9545, %v5789_v57   ;;  %v8871_v41 = vpop.f32.mrb[70].mxu0  ;;  %v13872_v5 = vpop.f32.mrb[43].mxu1  ;;  %v13888_v44 = vsel %vm5539_vm9, 1, %v15728_v45  ;;  %v13893_v57 = vsel %vm5542_vm10, 1, %v15728_v45  ;;  %v13915_v21 = vsel %vm5544_vm14, 1, %v15728_v45  ;;  %vm5548_vm3 = vcmp.ge.s32.totalorder %v5291_v10, %v11531_v61 }
 0x36e   : > { %v6954_v63 = vsel %vm6698_vm12, %v8871_v41, -1e+30  ;;  %v4342_v4 = vpop.f32.mrb[71].mxu0  ;;  %v13924_v26 = vsel %vm5543_vm15, 1, %v15728_v45  ;;  %v13929_v47 = vsel %vm5546_vm1, 1, %v15728_v45  ;;  %v13934_v18 = vsel %vm5545_vm2, 1, %v15728_v45 }
 0x36f   : > { %v13883_v49 = vmax.f32 %v15905_v32, %v6954_v63  ;;  %v6952_v31 = vsel %vm6696_vm13, %v4342_v4, -1e+30  ;;  %vm5547_vm4 = vcmp.ge.s32.totalorder %v5290_v3, %v11531_v61  ;;  %vm6701_vm5 = vcmp.eq.s32.totalorder %v12969_v29, 1 }
 0x370   : > { %v13901_v60 = vmax.f32 %v15906_v46, %v6952_v31  ;;  %v13903_v41 = vpop.permute.xlu1 %6235  ;;  %v13905_v52 = vpop.permute.xlu0 %6232  ;;  %vm6699_vm6 = vcmp.eq.s32.totalorder %v12928_v6, 1  ;;  %vm6700_vm7 = vcmp.eq.s32.totalorder %v12926_v1, 1  ;;  %vm5550_vm8 = vcmp.ge.s32.totalorder %v5293_v27, %v11531_v61  ;;  %v5297_v6 = vld [vmem:[%s15638_s2 + $0x678] sm:$0xff] }
 0x371   : > { %15907 = vst [vmem:[#allocation55_spill] sm:$0xff] %v13903_v41  ;;  %15908 = vst [vmem:[#allocation103_spill] sm:$0xff] %v13905_v52  ;;  %6427 = vperm.xlu1 %9546, %v5792_v22   ;;  %6424 = vperm.xlu0 %9545, %v5791_v16   ;;  %v5295_v22 = vld [vmem:[%s15638_s2 + $0x668] sm:$0xff]  ;;  %v13940_v16 = vpop.f32.mrb[44].mxu1  ;;  %v8874_v51 = vpop.f32.mrb[72].mxu0  ;;  %v13954_v32 = vsel %vm5548_vm3, 1, %v15728_v45  ;;  %vm5549_vm9 = vcmp.ge.s32.totalorder %v5292_v33, %v11531_v61  ;;  %v15911_v31 = vmax.f32 %v13362_v17, %v13613_v34 }
 0x372   : > { %15909 = vst [vmem:[#allocation104_spill] sm:$0xff] %v13940_v16  ;;  %v13949_v36 = vpop.f32.mrb[45].mxu1  ;;  %v6957_v63 = vsel %vm6701_vm5, %v8874_v51, -1e+30  ;;  %v4355_v4 = vpop.f32.mrb[73].mxu0  ;;  %v13974_v52 = vsel %vm5547_vm4, 1, %v15728_v45  ;;  %vm5552_vm10 = vcmp.ge.s32.totalorder %v5295_v22, %v11531_v61  ;;  %v15912_v16 = vmax.f32 %v13377_v62, %v13627_v53 }
 0x373   : > { %v13960_v29 = vpop.f32.mrb[46].mxu1  ;;  %v13965_v46 = vmax.f32 %v15911_v31, %v6957_v63  ;;  %v6955_v10 = vsel %vm6699_vm6, %v4355_v4, -1e+30  ;;  %v8875_v17 = vpop.f32.mrb[74].mxu0  ;;  %vm6702_vm11 = vcmp.eq.s32.totalorder %v12967_v42, 1  ;;  %v13988_v34 = vsel %vm5550_vm8, 1, %v15728_v45 }
 0x374   : > { %15910 = vst [vmem:[#allocation105_spill] sm:$0xff] %v13960_v29  ;;  %v13967_v51 = vpop.permute.xlu1 %6241  ;;  %v13969_v41 = vpop.permute.xlu0 %6238  ;;  %v13980_v29 = vmax.f32 %v15912_v16, %v6955_v10  ;;  %vm5551_vm12 = vcmp.ge.s32.totalorder %v5294_v0, %v11531_v61  ;;  %v5296_v62 = vld [vmem:[%s15638_s2 + $0x670] sm:$0xff]  ;;  %v6958_v3 = vsel %vm6702_vm11, %v8875_v17, -1e+30  ;;  %vm6703_vm13 = vcmp.eq.s32.totalorder %v13016_v35, 1  ;;  %v5299_v33 = vld [vmem:[%s15638_s2 + $0x688] sm:$0xff] }
 0x375   : > { %6433 = vperm.xlu1 %9546, %v13815_v12   ;;  %6430 = vperm.xlu0 %9545, %v13818_v8   ;;  %v13994_v53 = vpop.f32.mrb[47].mxu1  ;;  %v4358_v12 = vpop.f32.mrb[75].mxu0  ;;  %v14000_v42 = vsel %vm5549_vm9, 1, %v15728_v45  ;;  %vm5554_vm14 = vcmp.ge.s32.totalorder %v5297_v6, %v11531_v61  ;;  %v15913_v8 = vmax.f32 %v13393_v30, %v13640_v19  ;;  %vm6704_vm15 = vcmp.eq.s32.totalorder %v13014_v25, 1  ;;  %v15924_v6 = vld [vmem:[#allocation57_spill] sm:$0xff] }
 0x376   : > { %v6956_v16 = vsel %vm6700_vm7, %v4358_v12, -1e+30  ;;  %v14014_v63 = vsel %vm5552_vm10, 1, %v15728_v45  ;;  %v15914_v4 = vmax.f32 %v13401_v39, %v13653_v23  ;;  %vm6705_vm1 = vcmp.eq.s32.totalorder %v13057_v28, 1  ;;  %v5298_v23 = vld [vmem:[%s15638_s2 + $0x680] sm:$0xff]  ;;  %v14042_v22 = vpop.f32.mrb[48].mxu1 }
 0x377   : > { %v14006_v27 = vmax.f32 %v15913_v8, %v6958_v3  ;;  %v14028_v1 = vsel %vm5551_vm12, 1, %v15728_v45  ;;  %vm5553_vm2 = vcmp.ge.s32.totalorder %v5296_v62, %v11531_v61  ;;  %vm6706_vm5 = vcmp.eq.s32.totalorder %v13055_v37, 1  ;;  %15915 = vst [vmem:[#allocation106_spill] sm:$0xff] %v14042_v22  ;;  %v14051_v10 = vpop.f32.mrb[49].mxu1  ;;  %v5303_v37 = vld [vmem:[%s15638_s2 + $0x6a8] sm:$0xff] }
 0x378   : > { %v14022_v30 = vmax.f32 %v15914_v4, %v6956_v16  ;;  %v6248_v19 = vpop.permute.xlu1 %6247  ;;  %v6245_v31 = vpop.permute.xlu0 %6244  ;;  %v14037_v39 = vsel %vm5554_vm14, 1, %v15728_v45  ;;  %vm5556_vm6 = vcmp.ge.s32.totalorder %v5299_v33, %v11531_v61  ;;  %v15917_v16 = vmax.f32 %v13431_v9, %v13679_v20  ;;  %v5300_v20 = vld [vmem:[%s15638_s2 + $0x690] sm:$0xff] }
 0x379   : > { %vm6755_vm3 = vcmp.eq.s32.totalorder %v6245_v31, 1  ;;  %6439 = vperm.xlu1 %9546, %v13821_v15   ;;  %6436 = vperm.xlu0 %9545, %v13888_v44   ;;  %vm6756_vm4 = vcmp.eq.s32.totalorder %v6248_v19, 1  ;;  %v8878_v44 = vpop.f32.mrb[76].mxu0  ;;  %v14067_v8 = vpop.f32.mrb[50].mxu1  ;;  %vm6707_vm7 = vcmp.eq.s32.totalorder %v13102_v13, 1  ;;  %vm5555_vm8 = vcmp.ge.s32.totalorder %v5298_v23, %v11531_v61 }
 0x37a   : > { %v14045_v0 = vsel %vm6755_vm3, %v13123_v43, -1e+30  ;;  %v14048_v15 = vsel %vm6756_vm4, %v13162_v7, -1e+30  ;;  %v6961_v3 = vsel %vm6705_vm1, %v8878_v44, -1e+30  ;;  %v15918_v62 = vmax.f32 %v13446_v50, %v13693_v38 }
 0x37b   : > { %v4371_v12 = vpop.f32.mrb[77].mxu0  ;;  %v14062_v43 = vsel %vm5553_vm2, 1, %v15728_v45  ;;  %v5301_v7 = vld [vmem:[%s15638_s2 + $0x698] sm:$0xff]  ;;  %15916 = vst [vmem:[#allocation107_spill] sm:$0xff] %v14067_v8  ;;  %v14072_v4 = vmax.f32 %v15917_v16, %v6961_v3  ;;  %v14088_v35 = vsel %vm5556_vm6, 1, %v15728_v45  ;;  %v14093_v3 = vpop.f32.mrb[51].mxu1  ;;  %vm5557_vm1 = vcmp.ge.s32.totalorder %v5300_v20, %v11531_v61 }
 0x37c   : > { %v6254_v19 = vpop.permute.xlu1 %6253  ;;  %v6251_v28 = vpop.permute.xlu0 %6250  ;;  %v6959_v31 = vsel %vm6703_vm13, %v4371_v12, -1e+30  ;;  %v15919_v12 = vld [vmem:[#allocation59_spill] sm:$0xff]  ;;  %v15920_v50 = vld [vmem:[#allocation58_spill] sm:$0xff]  ;;  %vm5558_vm11 = vcmp.ge.s32.totalorder %v5301_v7, %v11531_v61  ;;  %vm6708_vm12 = vcmp.eq.s32.totalorder %v15924_v6, 1  ;;  %v15936_v20 = vmax.f32 %v13773_v54, %v14045_v0 }
 0x37d   : > { %vm6758_vm9 = vcmp.eq.s32.totalorder %v6254_v19, 1  ;;  %vm6757_vm10 = vcmp.eq.s32.totalorder %v6251_v28, 1  ;;  %v14081_v44 = vmax.f32 %v15918_v62, %v6959_v31  ;;  %6445 = vperm.xlu1 %9546, %v13893_v57   ;;  %6442 = vperm.xlu0 %9545, %v13910_v59   ;;  %v8879_v9 = vpop.f32.mrb[78].mxu0  ;;  %v15921_v19 = vld [vmem:[#allocation30_spill] sm:$0xff]  ;;  %v15922_v28 = vld [vmem:[#allocation96_spill] sm:$0xff]  ;;  %v14131_v25 = vsel %vm5558_vm11, 1, %v15728_v45 }
 0x37e   : > { %v7014_v38 = vsel %vm6758_vm9, %v15919_v12, -1e+30  ;;  %v7013_v16 = vsel %vm6757_vm10, %v15920_v50, -1e+30  ;;  %v6962_v57 = vsel %vm6706_vm5, %v8879_v9, -1e+30  ;;  %v15923_v31 = vmax.f32 %v15921_v19, %v15922_v28 }
 0x37f   : > { %v7206_v59 = vmax.f32 %v13786_v11, %v7014_v38  ;;  %v7205_v33 = vmax.f32 %v13762_v40, %v7013_v16  ;;  %v4374_v17 = vpop.f32.mrb[79].mxu0  ;;  %v14111_v12 = vsel %vm5555_vm8, 1, %v15728_v45  ;;  %v15925_v38 = vld [vmem:[#allocation61_spill] sm:$0xff]  ;;  %v15926_v50 = vld [vmem:[#allocation60_spill] sm:$0xff]  ;;  %v15927_v16 = vld [vmem:[#allocation78_spill] sm:$0xff]  ;;  %v14136_v28 = vpop.f32.mrb[52].mxu1 }
 0x380   : > { %v14105_v62 = vmax.f32 %v15923_v31, %v6962_v57  ;;  %v6960_v40 = vsel %vm6704_vm15, %v4374_v17, -1e+30  ;;  %v6260_v11 = vpop.permute.xlu1 %6259  ;;  %v6257_v9 = vpop.permute.xlu0 %6256  ;;  %vm6709_vm13 = vcmp.eq.s32.totalorder %v15925_v38, 1  ;;  %vm6710_vm14 = vcmp.eq.s32.totalorder %v15926_v50, 1  ;;  %v15928_v57 = vld [vmem:[#allocation46_spill] sm:$0xff]  ;;  %15930 = vst [vmem:[#allocation59_spill] sm:$0xff] %v14136_v28 }
 0x381   : > { %v15929_v23 = vmax.f32 %v15927_v16, %v15928_v57  ;;  %vm6759_vm2 = vcmp.eq.s32.totalorder %v6257_v9, 1  ;;  %6451 = vperm.xlu1 %9546, %v13915_v21   ;;  %6448 = vperm.xlu0 %9545, %v13924_v26   ;;  %vm6760_vm3 = vcmp.eq.s32.totalorder %v6260_v11, 1  ;;  %v5302_v17 = vld [vmem:[%s15638_s2 + $0x6a0] sm:$0xff]  ;;  %v15931_v31 = vld [vmem:[#allocation21_spill] sm:$0xff]  ;;  %v15932_v9 = vld [vmem:[#allocation20_spill] sm:$0xff]  ;;  %v8882_v21 = vpop.f32.mrb[80].mxu0  ;;  %vm5560_vm15 = vcmp.ge.s32.totalorder %v5303_v37, %v11531_v61 }
 0x382   : > { %v14142_v16 = vsel %vm6760_vm3, %v15932_v9, -1e+30  ;;  %v14145_v26 = vpop.f32.mrb[53].mxu1  ;;  %v6965_v57 = vsel %vm6709_vm13, %v8882_v21, -1e+30  ;;  %v5305_v9 = vld [vmem:[%s15638_s2 + $0x6b8] sm:$0xff]  ;;  %vm5559_vm5 = vcmp.ge.s32.totalorder %v5302_v17, %v11531_v61 }
 0x383   : > { %v14124_v19 = vmax.f32 %v15929_v23, %v6960_v40  ;;  %v14139_v40 = vsel %vm6759_vm2, %v15931_v31, -1e+30  ;;  %15933 = vst [vmem:[#allocation58_spill] sm:$0xff] %v14145_v26  ;;  %v4387_v23 = vpop.f32.mrb[81].mxu0  ;;  %v14156_v31 = vsel %vm5557_vm1, 1, %v15728_v45  ;;  %v14161_v28 = vpop.f32.mrb[54].mxu1  ;;  %v14163_v26 = vmax.f32 %v7205_v33, %v6965_v57 }
 0x384   : > { %15934 = vst [vmem:[#allocation30_spill] sm:$0xff] %v14161_v28  ;;  %v6266_v7 = vpop.permute.xlu1 %6265  ;;  %v6263_v22 = vpop.permute.xlu0 %6262  ;;  %v6963_v38 = vsel %vm6707_vm7, %v4387_v23, -1e+30  ;;  %v15935_v21 = vld [vmem:[#allocation62_spill] sm:$0xff]  ;;  %v14179_v13 = vsel %vm5560_vm15, 1, %v15728_v45  ;;  %v15938_v57 = vld [vmem:[#allocation19_spill] sm:$0xff]  ;;  %vm5562_vm7 = vcmp.ge.s32.totalorder %v5305_v9, %v11531_v61 }
 0x385   : > { %vm6711_vm4 = vcmp.eq.s32.totalorder %v15935_v21, 1  ;;  %vm6762_vm6 = vcmp.eq.s32.totalorder %v6266_v7, 1  ;;  %vm6761_vm8 = vcmp.eq.s32.totalorder %v6263_v22, 1  ;;  %v14172_v11 = vmax.f32 %v15936_v20, %v6963_v38  ;;  %6457 = vperm.xlu1 %9546, %v13929_v47   ;;  %6454 = vperm.xlu0 %9545, %v13934_v18   ;;  %v8883_v33 = vpop.f32.mrb[82].mxu0  ;;  %v5304_v7 = vld [vmem:[%s15638_s2 + $0x6b0] sm:$0xff]  ;;  %v14184_v22 = vpop.f32.mrb[55].mxu1 }
 0x386   : > { %15937 = vst [vmem:[#allocation96_spill] sm:$0xff] %v14184_v22  ;;  %v7018_v54 = vsel %vm6762_vm6, %v15938_v57, -1e+30  ;;  %v15939_v0 = vld [vmem:[#allocation63_spill] sm:$0xff]  ;;  %v6966_v47 = vsel %vm6710_vm14, %v8883_v33, -1e+30  ;;  %vm5561_vm13 = vcmp.ge.s32.totalorder %v5304_v7, %v11531_v61  ;;  %v15950_v7 = vmax.f32 %v13864_v55, %v14139_v40 }
 0x387   : > { %v7017_v23 = vsel %vm6761_vm8, %v15939_v0, -1e+30  ;;  %v7210_v18 = vmax.f32 %v13883_v49, %v7018_v54  ;;  %v14193_v38 = vmax.f32 %v7206_v59, %v6966_v47  ;;  %v4390_v20 = vpop.f32.mrb[83].mxu0  ;;  %v15940_v28 = vld [vmem:[#allocation54_spill] sm:$0xff]  ;;  %v14199_v57 = vsel %vm5559_vm5, 1, %v15728_v45  ;;  %v15941_v22 = vld [vmem:[#allocation65_spill] sm:$0xff] }
 0x388   : > { %v7209_v37 = vmax.f32 %v13853_v48, %v7017_v23  ;;  %vm6712_vm9 = vcmp.eq.s32.totalorder %v15940_v28, 1  ;;  %v6964_v50 = vsel %vm6708_vm12, %v4390_v20, -1e+30  ;;  %v6272_v33 = vpop.permute.xlu1 %6271  ;;  %v6269_v0 = vpop.permute.xlu0 %6268  ;;  %vm6713_vm10 = vcmp.eq.s32.totalorder %v15941_v22, 1  ;;  %v15942_v49 = vld [vmem:[#allocation64_spill] sm:$0xff]  ;;  %v5307_v17 = vld [vmem:[%s15638_s2 + $0x6c8] sm:$0xff] }
 0x389   : > { %vm6714_vm11 = vcmp.eq.s32.totalorder %v15942_v49, 1  ;;  %v15943_v48 = vmax.f32 %v13794_v14, %v14048_v15  ;;  %vm6763_vm14 = vcmp.eq.s32.totalorder %v6269_v0, 1  ;;  %6463 = vperm.xlu1 %9546, %v13954_v32   ;;  %6460 = vperm.xlu0 %9545, %v13974_v52   ;;  %vm6764_vm1 = vcmp.eq.s32.totalorder %v6272_v33, 1  ;;  %v5306_v14 = vld [vmem:[%s15638_s2 + $0x6c0] sm:$0xff]  ;;  %v14224_v15 = vpop.f32.mrb[56].mxu1  ;;  %v15945_v54 = vld [vmem:[#allocation25_spill] sm:$0xff] }
 0x38a   : > { %v14216_v6 = vsel %vm5562_vm7, 1, %v15728_v45  ;;  %15944 = vst [vmem:[#allocation57_spill] sm:$0xff] %v14224_v15  ;;  %v14227_v32 = vsel %vm6763_vm14, %v15945_v54, -1e+30  ;;  %v15946_v52 = vld [vmem:[#allocation24_spill] sm:$0xff]  ;;  %v8886_v47 = vpop.f32.mrb[84].mxu0  ;;  %vm5564_vm2 = vcmp.ge.s32.totalorder %v5307_v17, %v11531_v61  ;;  %vm5563_vm5 = vcmp.ge.s32.totalorder %v5306_v14, %v11531_v61 }
 0x38b   : > { %v14209_v59 = vmax.f32 %v15943_v48, %v6964_v50  ;;  %v14230_v23 = vsel %vm6764_vm1, %v15946_v52, -1e+30  ;;  %v14232_v9 = vpop.f32.mrb[57].mxu1  ;;  %v6969_v33 = vsel %vm6713_vm10, %v8886_v47, -1e+30  ;;  %v4403_v0 = vpop.f32.mrb[85].mxu0 }
 0x38c   : > { %15947 = vst [vmem:[#allocation61_spill] sm:$0xff] %v14232_v9  ;;  %v14243_v48 = vsel %vm5561_vm13, 1, %v15728_v45  ;;  %v14245_v54 = vpop.f32.mrb[58].mxu1  ;;  %v14247_v52 = vmax.f32 %v7209_v37, %v6969_v33  ;;  %v6278_v15 = vpop.permute.xlu1 %6277  ;;  %v6967_v20 = vsel %vm6711_vm4, %v4403_v0, -1e+30  ;;  %v15949_v8 = vld [vmem:[#allocation66_spill] sm:$0xff] }
 0x38d   : > { %15948 = vst [vmem:[#allocation60_spill] sm:$0xff] %v14245_v54  ;;  %v6275_v9 = vpop.permute.xlu0 %6274  ;;  %vm6715_vm12 = vcmp.eq.s32.totalorder %v15949_v8, 1  ;;  %vm6766_vm3 = vcmp.eq.s32.totalorder %v6278_v15, 1  ;;  %v14256_v22 = vmax.f32 %v15950_v7, %v6967_v20  ;;  %6469 = vperm.xlu1 %9546, %v13988_v34   ;;  %6466 = vperm.xlu0 %9545, %v14000_v42   ;;  %v8887_v37 = vpop.f32.mrb[86].mxu0  ;;  %v5309_v21 = vld [vmem:[%s15638_s2 + $0x6d8] sm:$0xff]  ;;  %v5308_v15 = vld [vmem:[%s15638_s2 + $0x6d0] sm:$0xff] }
 0x38e   : > { %vm6765_vm15 = vcmp.eq.s32.totalorder %v6275_v9, 1  ;;  %v14267_v47 = vpop.f32.mrb[59].mxu1  ;;  %v15951_v55 = vld [vmem:[#allocation23_spill] sm:$0xff]  ;;  %v6970_v34 = vsel %vm6714_vm11, %v8887_v37, -1e+30  ;;  %v4406_v7 = vpop.f32.mrb[87].mxu0  ;;  %vm5566_vm8 = vcmp.ge.s32.totalorder %v5309_v21, %v11531_v61  ;;  %vm5565_vm10 = vcmp.ge.s32.totalorder %v5308_v15, %v11531_v61 }
 0x38f   : > { %v7022_v40 = vsel %vm6766_vm3, %v15951_v55, -1e+30  ;;  %v15952_v9 = vld [vmem:[#allocation67_spill] sm:$0xff]  ;;  %v14275_v0 = vmax.f32 %v7210_v18, %v6970_v34  ;;  %v15953_v50 = vld [vmem:[#allocation18_spill] sm:$0xff]  ;;  %v14281_v54 = vsel %vm5564_vm2, 1, %v15728_v45  ;;  %v15954_v37 = vld [vmem:[#allocation69_spill] sm:$0xff] }
 0x390   : > { %v7021_v20 = vsel %vm6765_vm15, %v15952_v9, -1e+30  ;;  %v7214_v42 = vmax.f32 %v14006_v27, %v7022_v40  ;;  %vm6716_vm4 = vcmp.eq.s32.totalorder %v15953_v50, 1  ;;  %v6968_v55 = vsel %vm6712_vm9, %v4406_v7, -1e+30  ;;  %v6284_v9 = vpop.permute.xlu1 %6283  ;;  %v5311_v28 = vld [vmem:[%s15638_s2 + $0x6e8] sm:$0xff] }
 0x391   : > { %v7213_v33 = vmax.f32 %v13965_v46, %v7021_v20  ;;  %v6281_v49 = vpop.permute.xlu0 %6280  ;;  %vm6717_vm6 = vcmp.eq.s32.totalorder %v15954_v37, 1  ;;  %v14289_v46 = vsel %vm5563_vm5, 1, %v15728_v45  ;;  %v15955_v27 = vmax.f32 %v13901_v60, %v14142_v16  ;;  %6475 = vperm.xlu1 %9546, %v14014_v63   ;;  %6472 = vperm.xlu0 %9545, %v14028_v1   ;;  %v14303_v17 = vpop.f32.mrb[60].mxu1  ;;  %v15957_v14 = vld [vmem:[#allocation29_spill] sm:$0xff]  ;;  %v15958_v60 = vld [vmem:[#allocation28_spill] sm:$0xff]  ;;  %v5310_v21 = vld [vmem:[%s15638_s2 + $0x6e0] sm:$0xff] }
 0x392   : > { %vm6767_vm7 = vcmp.eq.s32.totalorder %v6281_v49, 1  ;;  %vm6768_vm9 = vcmp.eq.s32.totalorder %v6284_v9, 1  ;;  %15956 = vst [vmem:[#allocation78_spill] sm:$0xff] %v14303_v17  ;;  %v8890_v20 = vpop.f32.mrb[88].mxu0  ;;  %v14311_v34 = vpop.f32.mrb[61].mxu1  ;;  %v15959_v9 = vld [vmem:[#allocation68_spill] sm:$0xff]  ;;  %vm5568_vm1 = vcmp.ge.s32.totalorder %v5311_v28, %v11531_v61  ;;  %vm5567_vm3 = vcmp.ge.s32.totalorder %v5310_v21, %v11531_v61 }
 0x393   : > { %v14295_v18 = vmax.f32 %v15955_v27, %v6968_v55  ;;  %v14306_v40 = vsel %vm6767_vm7, %v15957_v14, -1e+30  ;;  %v14309_v16 = vsel %vm6768_vm9, %v15958_v60, -1e+30  ;;  %v6973_v7 = vsel %vm6717_vm6, %v8890_v20, -1e+30 }
 0x394   : > { %v4419_v55 = vpop.f32.mrb[89].mxu0  ;;  %vm6718_vm11 = vcmp.eq.s32.totalorder %v15959_v9, 1  ;;  %v14320_v49 = vpop.f32.mrb[62].mxu1  ;;  %v14322_v27 = vmax.f32 %v7213_v33, %v6973_v7  ;;  %v14329_v63 = vsel %vm5566_vm8, 1, %v15728_v45  ;;  %v14334_v37 = vsel %vm5565_vm10, 1, %v15728_v45  ;;  %v15962_v7 = vld [vmem:[#allocation27_spill] sm:$0xff] }
 0x395   : > { %15960 = vst [vmem:[#allocation46_spill] sm:$0xff] %v14320_v49  ;;  %v6290_v14 = vpop.permute.xlu1 %6289  ;;  %v6287_v60 = vpop.permute.xlu0 %6286  ;;  %v6971_v17 = vsel %vm6715_vm12, %v4419_v55, -1e+30  ;;  %v15961_v33 = vmax.f32 %v13980_v29, %v14227_v32  ;;  %6481 = vperm.xlu1 %9546, %v14037_v39   ;;  %6478 = vperm.xlu0 %9545, %v14062_v43   ;;  %v5313_v1 = vld [vmem:[%s15638_s2 + $0x6f8] sm:$0xff]  ;;  %v15965_v9 = vld [vmem:[#allocation22_spill] sm:$0xff]  ;;  %v5312_v28 = vld [vmem:[%s15638_s2 + $0x6f0] sm:$0xff]  ;;  %v15973_v21 = vmax.f32 %v14081_v44, %v14306_v40 }
 0x396   : > { %vm6770_vm13 = vcmp.eq.s32.totalorder %v6290_v14, 1  ;;  %vm6769_vm14 = vcmp.eq.s32.totalorder %v6287_v60, 1  ;;  %v8891_v8 = vpop.f32.mrb[90].mxu0  ;;  %v14347_v15 = vpop.f32.mrb[63].mxu1  ;;  %v15963_v14 = vld [vmem:[#allocation71_spill] sm:$0xff]  ;;  %vm6720_vm2 = vcmp.eq.s32.totalorder %v15965_v9, 1  ;;  %vm5570_vm6 = vcmp.ge.s32.totalorder %v5313_v1, %v11531_v61 }
 0x397   : > { %v14339_v20 = vmax.f32 %v15961_v33, %v6971_v17  ;;  %v7026_v55 = vsel %vm6770_vm13, %v15962_v7, -1e+30  ;;  %v7025_v60 = vsel %vm6769_vm14, %v15963_v14, -1e+30  ;;  %v6974_v29 = vsel %vm6718_vm11, %v8891_v8, -1e+30 }
 0x398   : > { %v7218_v39 = vmax.f32 %v14105_v62, %v7026_v55  ;;  %v7217_v43 = vmax.f32 %v14072_v4, %v7025_v60  ;;  %v14355_v32 = vmax.f32 %v7214_v42, %v6974_v29  ;;  %v4422_v17 = vpop.f32.mrb[91].mxu0  ;;  %v15964_v33 = vld [vmem:[#allocation70_spill] sm:$0xff]  ;;  %v14367_v4 = vsel %vm5568_vm1, 1, %v15728_v45  ;;  %v15967_v50 = vld [vmem:[#allocation73_spill] sm:$0xff]  ;;  %v14381_v8 = vpop.f32.mrb[64].mxu1  ;;  %v15976_v40 = vld [vmem:[#allocation75_spill] sm:$0xff] }
 0x399   : > { %vm6719_vm12 = vcmp.eq.s32.totalorder %v15964_v33, 1  ;;  %v6972_v7 = vsel %vm6716_vm4, %v4422_v17, -1e+30  ;;  %v6296_v14 = vpop.permute.xlu1 %6295  ;;  %v6293_v49 = vpop.permute.xlu0 %6292  ;;  %v15966_v62 = vmax.f32 %v14022_v30, %v14230_v23  ;;  %6487 = vperm.xlu1 %9546, %v14088_v35   ;;  %6484 = vperm.xlu0 %9545, %v14111_v12   ;;  %vm6721_vm4 = vcmp.eq.s32.totalorder %v15967_v50, 1  ;;  %15968 = vst [vmem:[#allocation21_spill] sm:$0xff] %v14381_v8  ;;  %v15969_v55 = vld [vmem:[#allocation33_spill] sm:$0xff] }
 0x39a   : > { %vm6771_vm15 = vcmp.eq.s32.totalorder %v6293_v49, 1  ;;  %vm6772_vm5 = vcmp.eq.s32.totalorder %v6296_v14, 1  ;;  %v15970_v30 = vld [vmem:[#allocation32_spill] sm:$0xff]  ;;  %v8894_v49 = vpop.f32.mrb[92].mxu0  ;;  %v14390_v35 = vpop.f32.mrb[65].mxu1  ;;  %v14399_v14 = vsel %vm5567_vm3, 1, %v15728_v45  ;;  %vm5569_vm7 = vcmp.ge.s32.totalorder %v5312_v28, %v11531_v61 }
 0x39b   : > { %v14373_v42 = vmax.f32 %v15966_v62, %v6972_v7  ;;  %v14384_v60 = vsel %vm6771_vm15, %v15969_v55, -1e+30  ;;  %v14387_v23 = vsel %vm6772_vm5, %v15970_v30, -1e+30  ;;  %v6977_v17 = vsel %vm6721_vm4, %v8894_v49, -1e+30 }
 0x39c   : > { %v4435_v7 = vpop.f32.mrb[93].mxu0  ;;  %v14401_v62 = vpop.f32.mrb[66].mxu1  ;;  %v14403_v50 = vmax.f32 %v7217_v43, %v6977_v17  ;;  %v15972_v12 = vld [vmem:[#allocation72_spill] sm:$0xff]  ;;  %v14419_v33 = vsel %vm5570_vm6, 1, %v15728_v45  ;;  %v5314_v29 = vld [vmem:[%s15638_s2 + $0x700] sm:$0xff]  ;;  %v15980_v9 = vld [vmem:[#allocation77_spill] sm:$0xff] }
 0x39d   : > { %15971 = vst [vmem:[#allocation20_spill] sm:$0xff] %v14401_v62  ;;  %v6302_v55 = vpop.permute.xlu1 %6301  ;;  %v6299_v30 = vpop.permute.xlu0 %6298  ;;  %v6975_v8 = vsel %vm6719_vm12, %v4435_v7, -1e+30  ;;  %vm6722_vm8 = vcmp.eq.s32.totalorder %v15972_v12, 1  ;;  %6493 = vperm.xlu1 %9546, %v14131_v25   ;;  %6490 = vperm.xlu0 %9545, %v14156_v31   ;;  %v5315_v12 = vld [vmem:[%s15638_s2 + $0x708] sm:$0xff]  ;;  %vm5571_vm3 = vcmp.ge.s32.totalorder %v5314_v29, %v11531_v61 }
 0x39e   : > { %vm6774_vm9 = vcmp.eq.s32.totalorder %v6302_v55, 1  ;;  %vm6773_vm10 = vcmp.eq.s32.totalorder %v6299_v30, 1  ;;  %v14412_v49 = vmax.f32 %v15973_v21, %v6975_v8  ;;  %v8895_v43 = vpop.f32.mrb[94].mxu0  ;;  %v14424_v17 = vpop.f32.mrb[67].mxu1  ;;  %v15975_v7 = vld [vmem:[#allocation31_spill] sm:$0xff]  ;;  %v14435_v21 = vsel %vm5569_vm7, 1, %v15728_v45 }
 0x39f   : > { %15974 = vst [vmem:[#allocation62_spill] sm:$0xff] %v14424_v17  ;;  %v7030_v44 = vsel %vm6774_vm9, %v15975_v7, -1e+30  ;;  %v7029_v8 = vsel %vm6773_vm10, %v15976_v40, -1e+30  ;;  %v4438_v1 = vpop.f32.mrb[95].mxu0  ;;  %vm5572_vm14 = vcmp.ge.s32.totalorder %v5315_v12, %v11531_v61  ;;  %v15986_v12 = vmax.f32 %v14172_v11, %v14384_v60 }
 0x3a0   : > { %v6978_v55 = vsel %vm6722_vm8, %v8895_v43, -1e+30  ;;  %v7238_v25 = vmax.f32 %v14193_v38, %v7030_v44  ;;  %v7237_v31 = vmax.f32 %v14163_v26, %v7029_v8  ;;  %v6976_v7 = vsel %vm6720_vm2, %v4438_v1, -1e+30  ;;  %v15977_v38 = vld [vmem:[#allocation74_spill] sm:$0xff]  ;;  %v5317_v44 = vld [vmem:[%s15638_s2 + $0x718] sm:$0xff] }
 0x3a1   : > { %v14430_v30 = vmax.f32 %v7218_v39, %v6978_v55  ;;  %v6308_v43 = vpop.permute.xlu1 %6307  ;;  %v6305_v40 = vpop.permute.xlu0 %6304  ;;  %vm6723_vm11 = vcmp.eq.s32.totalorder %v15977_v38, 1  ;;  %v15978_v26 = vld [vmem:[#allocation26_spill] sm:$0xff]  ;;  %v15979_v39 = vmax.f32 %v14124_v19, %v14309_v16  ;;  %6499 = vperm.xlu1 %9546, %v14179_v13   ;;  %6496 = vperm.xlu0 %9545, %v14199_v57   ;;  %vm6725_vm2 = vcmp.eq.s32.totalorder %v15980_v9, 1  ;;  %v5316_v8 = vld [vmem:[%s15638_s2 + $0x710] sm:$0xff]  ;;  %v15982_v19 = vld [vmem:[#allocation37_spill] sm:$0xff] }
 0x3a2   : > { %vm6724_vm13 = vcmp.eq.s32.totalorder %v15978_v26, 1  ;;  %vm6775_vm1 = vcmp.eq.s32.totalorder %v6305_v40, 1  ;;  %vm6776_vm12 = vcmp.eq.s32.totalorder %v6308_v43, 1  ;;  %v14459_v55 = vpop.f32.mrb[68].mxu1  ;;  %v15983_v1 = vld [vmem:[#allocation36_spill] sm:$0xff]  ;;  %v8898_v57 = vpop.f32.mrb[96].mxu0  ;;  %vm5574_vm5 = vcmp.ge.s32.totalorder %v5317_v44, %v11531_v61 }
 0x3a3   : > { %v14448_v28 = vmax.f32 %v15979_v39, %v6976_v7  ;;  %15981 = vst [vmem:[#allocation19_spill] sm:$0xff] %v14459_v55  ;;  %v14462_v16 = vsel %vm6775_vm1, %v15982_v19, -1e+30  ;;  %v14465_v13 = vsel %vm6776_vm12, %v15983_v1, -1e+30  ;;  %v14468_v7 = vpop.f32.mrb[69].mxu1  ;;  %vm5573_vm8 = vcmp.ge.s32.totalorder %v5316_v8, %v11531_v61 }
 0x3a4   : > { %15984 = vst [vmem:[#allocation63_spill] sm:$0xff] %v14468_v7  ;;  %v7239_v43 = vmax.f32 %v14256_v22, %v14462_v16  ;;  %v6981_v39 = vsel %vm6725_vm2, %v8898_v57, -1e+30  ;;  %v4451_v9 = vpop.f32.mrb[97].mxu0  ;;  %v14477_v19 = vsel %vm5572_vm14, 1, %v15728_v45  ;;  %v14479_v1 = vpop.f32.mrb[70].mxu1 }
 0x3a5   : > { %v14481_v55 = vmax.f32 %v7237_v31, %v6981_v39  ;;  %v6314_v62 = vpop.permute.xlu1 %6313  ;;  %v6311_v17 = vpop.permute.xlu0 %6310  ;;  %v6979_v7 = vsel %vm6723_vm11, %v4451_v9, -1e+30  ;;  %v15985_v22 = vld [vmem:[#allocation76_spill] sm:$0xff]  ;;  %6505 = vperm.xlu1 %9546, %v14216_v6   ;;  %6502 = vperm.xlu0 %9545, %v14243_v48   ;;  %v15987_v57 = vld [vmem:[#allocation35_spill] sm:$0xff]  ;;  %v15988_v9 = vld [vmem:[#allocation81_spill] sm:$0xff]  ;;  %v14506_v6 = vsel %vm5571_vm3, 1, %v15728_v45 }
 0x3a6   : > { %vm6726_vm15 = vcmp.eq.s32.totalorder %v15985_v22, 1  ;;  %vm6778_vm4 = vcmp.eq.s32.totalorder %v6314_v62, 1  ;;  %vm6777_vm6 = vcmp.eq.s32.totalorder %v6311_v17, 1  ;;  %v14490_v16 = vmax.f32 %v15986_v12, %v6979_v7  ;;  %v8899_v31 = vpop.f32.mrb[98].mxu0  ;;  %v14495_v38 = vpop.f32.mrb[71].mxu1  ;;  %v5319_v29 = vld [vmem:[%s15638_s2 + $0x728] sm:$0xff] }
 0x3a7   : > { %v7034_v39 = vsel %vm6778_vm4, %v15987_v57, -1e+30  ;;  %v7033_v22 = vsel %vm6777_vm6, %v15988_v9, -1e+30  ;;  %v6982_v62 = vsel %vm6726_vm15, %v8899_v31, -1e+30 }
 0x3a8   : > { %v7242_v17 = vmax.f32 %v14275_v0, %v7034_v39  ;;  %v7241_v11 = vmax.f32 %v14247_v52, %v7033_v22  ;;  %v14501_v60 = vmax.f32 %v7238_v25, %v6982_v62  ;;  %v4454_v7 = vpop.f32.mrb[99].mxu0  ;;  %v15989_v57 = vld [vmem:[#allocation80_spill] sm:$0xff]  ;;  %v14514_v0 = vsel %vm5574_vm5, 1, %v15728_v45  ;;  %v15991_v44 = vld [vmem:[#allocation83_spill] sm:$0xff]  ;;  %v5318_v31 = vld [vmem:[%s15638_s2 + $0x720] sm:$0xff]  ;;  %v14536_v9 = vpop.f32.mrb[72].mxu1 }
 0x3a9   : > { %v6980_v48 = vsel %vm6724_vm13, %v4454_v7, -1e+30  ;;  %v6320_v8 = vpop.permute.xlu1 %6319  ;;  %v6317_v12 = vpop.permute.xlu0 %6316  ;;  %vm6727_vm7 = vcmp.eq.s32.totalorder %v15989_v57, 1  ;;  %v14517_v52 = vsel %vm5573_vm8, 1, %v15728_v45  ;;  %v15990_v25 = vmax.f32 %v14209_v59, %v14387_v23  ;;  %6511 = vperm.xlu1 %9546, %v14281_v54   ;;  %6508 = vperm.xlu0 %9545, %v14289_v46   ;;  %v5321_v39 = vld [vmem:[%s15638_s2 + $0x738] sm:$0xff]  ;;  %15992 = vst [vmem:[#allocation54_spill] sm:$0xff] %v14536_v9 }
 0x3aa   : > { %vm6779_vm9 = vcmp.eq.s32.totalorder %v6317_v12, 1  ;;  %vm6780_vm10 = vcmp.eq.s32.totalorder %v6320_v8, 1  ;;  %vm6729_vm11 = vcmp.eq.s32.totalorder %v15991_v44, 1  ;;  %v15993_v59 = vld [vmem:[#allocation41_spill] sm:$0xff]  ;;  %v15994_v22 = vld [vmem:[#allocation40_spill] sm:$0xff]  ;;  %v8902_v46 = vpop.f32.mrb[100].mxu0  ;;  %vm5576_vm13 = vcmp.ge.s32.totalorder %v5319_v29, %v11531_v61 }
 0x3ab   : > { %v14525_v26 = vmax.f32 %v15990_v25, %v6980_v48  ;;  %v14539_v23 = vsel %vm6779_vm9, %v15993_v59, -1e+30  ;;  %v14542_v54 = vsel %vm6780_vm10, %v15994_v22, -1e+30  ;;  %v14544_v62 = vpop.f32.mrb[73].mxu1  ;;  %v4467_v12 = vpop.f32.mrb[101].mxu0  ;;  %vm5575_vm1 = vcmp.ge.s32.totalorder %v5318_v31, %v11531_v61 }
 0x3ac   : > { %15995 = vst [vmem:[#allocation65_spill] sm:$0xff] %v14544_v62  ;;  %v6985_v8 = vsel %vm6729_vm11, %v8902_v46, -1e+30  ;;  %v14551_v25 = vpop.f32.mrb[74].mxu1  ;;  %v6983_v40 = vsel %vm6727_vm7, %v4467_v12, -1e+30  ;;  %vm5578_vm3 = vcmp.ge.s32.totalorder %v5321_v39, %v11531_v61 }
 0x3ad   : > { %15996 = vst [vmem:[#allocation64_spill] sm:$0xff] %v14551_v25  ;;  %v14553_v44 = vmax.f32 %v7241_v11, %v6985_v8  ;;  %v6326_v59 = vpop.permute.xlu1 %6325  ;;  %v6323_v22 = vpop.permute.xlu0 %6322  ;;  %v15997_v9 = vld [vmem:[#allocation82_spill] sm:$0xff]  ;;  %v14559_v48 = vmax.f32 %v7239_v43, %v6983_v40  ;;  %6517 = vperm.xlu1 %9546, %v14329_v63   ;;  %6514 = vperm.xlu0 %9545, %v14334_v37   ;;  %v15999_v8 = vld [vmem:[#allocation39_spill] sm:$0xff]  ;;  %v16000_v12 = vld [vmem:[#allocation85_spill] sm:$0xff] }
 0x3ae   : > { %vm6730_vm14 = vcmp.eq.s32.totalorder %v15997_v9, 1  ;;  %vm6782_vm12 = vcmp.eq.s32.totalorder %v6326_v59, 1  ;;  %vm6781_vm2 = vcmp.eq.s32.totalorder %v6323_v22, 1  ;;  %v8903_v46 = vpop.f32.mrb[102].mxu0  ;;  %v14564_v11 = vpop.f32.mrb[75].mxu1  ;;  %v16001_v63 = vld [vmem:[#allocation79_spill] sm:$0xff] }
 0x3af   : > { %15998 = vst [vmem:[#allocation25_spill] sm:$0xff] %v14564_v11  ;;  %v7038_v57 = vsel %vm6782_vm12, %v15999_v8, -1e+30  ;;  %v7037_v7 = vsel %vm6781_vm2, %v16000_v12, -1e+30  ;;  %v4470_v40 = vpop.f32.mrb[103].mxu0  ;;  %v16009_v12 = vmax.f32 %v14339_v20, %v14539_v23 }
 0x3b0   : > { %v6986_v9 = vsel %vm6730_vm14, %v8903_v46, -1e+30  ;;  %v7246_v25 = vmax.f32 %v14355_v32, %v7038_v57  ;;  %v7245_v59 = vmax.f32 %v14322_v27, %v7037_v7  ;;  %vm6728_vm15 = vcmp.eq.s32.totalorder %v16001_v63, 1  ;;  %v5320_v37 = vld [vmem:[%s15638_s2 + $0x730] sm:$0xff]  ;;  %v16003_v29 = vld [vmem:[#allocation87_spill] sm:$0xff]  ;;  %v5322_v39 = vld [vmem:[%s15638_s2 + $0x740] sm:$0xff] }
 0x3b1   : > { %v14570_v43 = vmax.f32 %v7242_v17, %v6986_v9  ;;  %v6984_v22 = vsel %vm6728_vm15, %v4470_v40, -1e+30  ;;  %v6332_v11 = vpop.permute.xlu1 %6331  ;;  %v6329_v62 = vpop.permute.xlu0 %6328  ;;  %v14579_v46 = vsel %vm5576_vm13, 1, %v15728_v45  ;;  %v14584_v27 = vsel %vm5575_vm1, 1, %v15728_v45  ;;  %6523 = vperm.xlu1 %9546, %v14367_v4   ;;  %6520 = vperm.xlu0 %9545, %v14399_v14   ;;  %v5323_v31 = vld [vmem:[%s15638_s2 + $0x748] sm:$0xff]  ;;  %v16007_v63 = vld [vmem:[#allocation84_spill] sm:$0xff] }
 0x3b2   : > { %v14589_v32 = vsel %vm5578_vm3, 1, %v15728_v45  ;;  %v16002_v17 = vmax.f32 %v14295_v18, %v14465_v13  ;;  %vm6783_vm5 = vcmp.eq.s32.totalorder %v6329_v62, 1  ;;  %vm6784_vm4 = vcmp.eq.s32.totalorder %v6332_v11, 1  ;;  %v14605_v8 = vpop.f32.mrb[76].mxu1  ;;  %v16005_v18 = vld [vmem:[#allocation45_spill] sm:$0xff]  ;;  %v16006_v62 = vld [vmem:[#allocation44_spill] sm:$0xff] }
 0x3b3   : > { %vm6733_vm6 = vcmp.eq.s32.totalorder %v16003_v29, 1  ;;  %16004 = vst [vmem:[#allocation24_spill] sm:$0xff] %v14605_v8  ;;  %v14608_v13 = vsel %vm6783_vm5, %v16005_v18, -1e+30  ;;  %v14611_v4 = vsel %vm6784_vm4, %v16006_v62, -1e+30  ;;  %vm5577_vm8 = vcmp.ge.s32.totalorder %v5320_v37, %v11531_v61 }
 0x3b4   : > { %v14594_v7 = vmax.f32 %v16002_v17, %v6984_v22  ;;  %v8906_v14 = vpop.f32.mrb[104].mxu0  ;;  %v14614_v11 = vpop.f32.mrb[77].mxu1  ;;  %vm6731_vm7 = vcmp.eq.s32.totalorder %v16007_v63, 1  ;;  %vm5580_vm9 = vcmp.ge.s32.totalorder %v5323_v31, %v11531_v61  ;;  %vm5579_vm10 = vcmp.ge.s32.totalorder %v5322_v39, %v11531_v61  ;;  %v16013_v8 = vld [vmem:[#allocation89_spill] sm:$0xff]  ;;  %v16016_v37 = vld [vmem:[#allocation91_spill] sm:$0xff]  ;;  %v5324_v31 = vld [vmem:[%s15638_s2 + $0x750] sm:$0xff] }
 0x3b5   : > { %v6989_v9 = vsel %vm6733_vm6, %v8906_v14, -1e+30  ;;  %v4483_v40 = vpop.f32.mrb[105].mxu0  ;;  %v14621_v22 = vpop.f32.mrb[78].mxu1  ;;  %6529 = vperm.xlu1 %9546, %v14419_v33   ;;  %6526 = vperm.xlu0 %9545, %v14435_v21   ;;  %v16014_v33 = vld [vmem:[#allocation34_spill] sm:$0xff]  ;;  %v5325_v21 = vld [vmem:[%s15638_s2 + $0x758] sm:$0xff]  ;;  %vm5581_vm4 = vcmp.ge.s32.totalorder %v5324_v31, %v11531_v61 }
 0x3b6   : > { %16008 = vst [vmem:[#allocation66_spill] sm:$0xff] %v14621_v22  ;;  %v14623_v17 = vmax.f32 %v7245_v59, %v6989_v9  ;;  %v6338_v29 = vpop.permute.xlu1 %6337  ;;  %v6335_v18 = vpop.permute.xlu0 %6334  ;;  %v6987_v62 = vsel %vm6731_vm7, %v4483_v40, -1e+30  ;;  %v16010_v9 = vld [vmem:[#allocation86_spill] sm:$0xff]  ;;  %v16012_v40 = vld [vmem:[#allocation43_spill] sm:$0xff]  ;;  %vm6732_vm1 = vcmp.eq.s32.totalorder %v16014_v33, 1  ;;  %vm5582_vm15 = vcmp.ge.s32.totalorder %v5325_v21, %v11531_v61 }
 0x3b7   : > { %vm6786_vm11 = vcmp.eq.s32.totalorder %v6338_v29, 1  ;;  %vm6785_vm13 = vcmp.eq.s32.totalorder %v6335_v18, 1  ;;  %v14630_v14 = vmax.f32 %v16009_v12, %v6987_v62  ;;  %v8907_v59 = vpop.f32.mrb[106].mxu0  ;;  %vm6734_vm14 = vcmp.eq.s32.totalorder %v16010_v9, 1  ;;  %v14635_v63 = vpop.f32.mrb[79].mxu1  ;;  %v5327_v39 = vld [vmem:[%s15638_s2 + $0x768] sm:$0xff] }
 0x3b8   : > { %16011 = vst [vmem:[#allocation23_spill] sm:$0xff] %v14635_v63  ;;  %v7042_v57 = vsel %vm6786_vm11, %v16012_v40, -1e+30  ;;  %v7041_v22 = vsel %vm6785_vm13, %v16013_v8, -1e+30  ;;  %v4486_v12 = vpop.f32.mrb[107].mxu0  ;;  %vm5584_vm6 = vcmp.ge.s32.totalorder %v5327_v39, %v11531_v61 }
 0x3b9   : > { %v6990_v29 = vsel %vm6734_vm14, %v8907_v59, -1e+30  ;;  %v7250_v18 = vmax.f32 %v14430_v30, %v7042_v57  ;;  %v7249_v20 = vmax.f32 %v14403_v50, %v7041_v22  ;;  %v6988_v62 = vsel %vm6732_vm1, %v4486_v12, -1e+30  ;;  %6535 = vperm.xlu1 %9546, %v14477_v19   ;;  %6532 = vperm.xlu0 %9545, %v14506_v6   ;;  %v14676_v22 = vpop.f32.mrb[80].mxu1  ;;  %v16019_v59 = vld [vmem:[#allocation48_spill] sm:$0xff] }
 0x3ba   : > { %v14641_v23 = vmax.f32 %v7246_v25, %v6990_v29  ;;  %v6344_v9 = vpop.permute.xlu1 %6343  ;;  %v6341_v63 = vpop.permute.xlu0 %6340  ;;  %v14650_v8 = vsel %vm5577_vm8, 1, %v15728_v45  ;;  %v14655_v50 = vsel %vm5580_vm9, 1, %v15728_v45  ;;  %v14660_v30 = vsel %vm5579_vm10, 1, %v15728_v45  ;;  %16017 = vst [vmem:[#allocation67_spill] sm:$0xff] %v14676_v22  ;;  %v16026_v22 = vld [vmem:[#allocation93_spill] sm:$0xff]  ;;  %v16029_v21 = vld [vmem:[#allocation95_spill] sm:$0xff] }
 0x3bb   : > { %v16015_v25 = vmax.f32 %v14373_v42, %v14542_v54  ;;  %vm6788_vm12 = vcmp.eq.s32.totalorder %v6344_v9, 1  ;;  %vm6787_vm2 = vcmp.eq.s32.totalorder %v6341_v63, 1  ;;  %vm6737_vm3 = vcmp.eq.s32.totalorder %v16016_v37, 1  ;;  %v16018_v42 = vld [vmem:[#allocation49_spill] sm:$0xff]  ;;  %v8910_v19 = vpop.f32.mrb[108].mxu0  ;;  %v14685_v6 = vpop.f32.mrb[81].mxu1 }
 0x3bc   : > { %v14679_v54 = vsel %vm6787_vm2, %v16018_v42, -1e+30  ;;  %v14682_v63 = vsel %vm6788_vm12, %v16019_v59, -1e+30  ;;  %v6993_v12 = vsel %vm6737_vm3, %v8910_v19, -1e+30  ;;  %v16022_v29 = vmax.f32 %v14412_v49, %v14608_v13 }
 0x3bd   : > { %v14665_v57 = vmax.f32 %v16015_v25, %v6988_v62  ;;  %v4499_v33 = vpop.f32.mrb[109].mxu0  ;;  %v16020_v62 = vld [vmem:[#allocation88_spill] sm:$0xff]  ;;  %v14692_v9 = vpop.f32.mrb[82].mxu1  ;;  %v14694_v25 = vmax.f32 %v7249_v20, %v6993_v12  ;;  %6541 = vperm.xlu1 %9546, %v14514_v0   ;;  %6538 = vperm.xlu0 %9545, %v14517_v52   ;;  %v16023_v12 = vld [vmem:[#allocation90_spill] sm:$0xff]  ;;  %vm6741_vm14 = vcmp.eq.s32.totalorder %v16029_v21, 1  ;;  %v5329_v31 = vld [vmem:[%s15638_s2 + $0x778] sm:$0xff] }
 0x3be   : > { %vm6735_vm5 = vcmp.eq.s32.totalorder %v16020_v62, 1  ;;  %16021 = vst [vmem:[#allocation18_spill] sm:$0xff] %v14692_v9  ;;  %v6350_v37 = vpop.permute.xlu1 %6349  ;;  %v6347_v42 = vpop.permute.xlu0 %6346  ;;  %vm6738_vm9 = vcmp.eq.s32.totalorder %v16023_v12, 1  ;;  %v16027_v0 = vld [vmem:[#allocation38_spill] sm:$0xff]  ;;  %v5328_v39 = vld [vmem:[%s15638_s2 + $0x770] sm:$0xff]  ;;  %vm5586_vm2 = vcmp.ge.s32.totalorder %v5329_v31, %v11531_v61  ;;  %v5333_v31 = vld [vmem:[%s15638_s2 + $0x798] sm:$0xff] }
 0x3bf   : > { %v6991_v59 = vsel %vm6735_vm5, %v4499_v33, -1e+30  ;;  %vm6790_vm8 = vcmp.eq.s32.totalorder %v6350_v37, 1  ;;  %vm6789_vm7 = vcmp.eq.s32.totalorder %v6347_v42, 1  ;;  %v8911_v20 = vpop.f32.mrb[110].mxu0  ;;  %v14706_v62 = vpop.f32.mrb[83].mxu1  ;;  %vm5585_vm3 = vcmp.ge.s32.totalorder %v5328_v39, %v11531_v61 }
 0x3c0   : > { %v14701_v19 = vmax.f32 %v16022_v29, %v6991_v59  ;;  %16024 = vst [vmem:[#allocation69_spill] sm:$0xff] %v14706_v62  ;;  %v16025_v33 = vld [vmem:[#allocation47_spill] sm:$0xff]  ;;  %v7045_v9 = vsel %vm6789_vm7, %v16026_v22, -1e+30  ;;  %v6994_v37 = vsel %vm6738_vm9, %v8911_v20, -1e+30 }
 0x3c1   : > { %v7046_v40 = vsel %vm6790_vm8, %v16025_v33, -1e+30  ;;  %v7269_v49 = vmax.f32 %v14481_v55, %v7045_v9  ;;  %v14712_v13 = vmax.f32 %v7250_v18, %v6994_v37  ;;  %v4502_v29 = vpop.f32.mrb[111].mxu0  ;;  %vm6736_vm10 = vcmp.eq.s32.totalorder %v16027_v0, 1  ;;  %v5326_v52 = vld [vmem:[%s15638_s2 + $0x760] sm:$0xff]  ;;  %6547 = vperm.xlu1 %9546, %v14579_v46   ;;  %6544 = vperm.xlu0 %9545, %v14584_v27   ;;  %v14747_v9 = vpop.f32.mrb[84].mxu1 }
 0x3c2   : > { %v7270_v42 = vmax.f32 %v14501_v60, %v7046_v40  ;;  %v6992_v59 = vsel %vm6736_vm10, %v4502_v29, -1e+30  ;;  %v6356_v12 = vpop.permute.xlu1 %6355  ;;  %v6353_v62 = vpop.permute.xlu0 %6352  ;;  %v14721_v22 = vsel %vm5582_vm15, 1, %v15728_v45  ;;  %v14726_v55 = vsel %vm5581_vm4, 1, %v15728_v45  ;;  %16030 = vst [vmem:[#allocation29_spill] sm:$0xff] %v14747_v9  ;;  %v16032_v0 = vld [vmem:[#allocation92_spill] sm:$0xff] }
 0x3c3   : > { %v14731_v60 = vsel %vm5584_vm6, 1, %v15728_v45  ;;  %v16028_v18 = vmax.f32 %v14448_v28, %v14611_v4  ;;  %vm6792_vm11 = vcmp.eq.s32.totalorder %v6356_v12, 1  ;;  %vm6791_vm13 = vcmp.eq.s32.totalorder %v6353_v62, 1  ;;  %v16031_v28 = vld [vmem:[#allocation53_spill] sm:$0xff]  ;;  %v8914_v46 = vpop.f32.mrb[112].mxu0  ;;  %v14756_v27 = vpop.f32.mrb[85].mxu1 }
 0x3c4   : > { %v14750_v4 = vsel %vm6791_vm13, %v16031_v28, -1e+30  ;;  %v14753_v20 = vsel %vm6792_vm11, %v13778_v56, -1e+30  ;;  %vm5583_vm1 = vcmp.ge.s32.totalorder %v5326_v52, %v11531_v61  ;;  %v6997_v37 = vsel %vm6741_vm14, %v8914_v46, -1e+30 }
 0x3c5   : > { %v14736_v40 = vmax.f32 %v16028_v18, %v6992_v59  ;;  %v4515_v29 = vpop.f32.mrb[113].mxu0  ;;  %vm6739_vm12 = vcmp.eq.s32.totalorder %v16032_v0, 1  ;;  %v14763_v59 = vpop.f32.mrb[86].mxu1  ;;  %v14765_v12 = vmax.f32 %v7269_v49, %v6997_v37  ;;  %v16034_v28 = vmax.f32 %v14490_v16, %v14679_v54  ;;  %6553 = vperm.xlu1 %9546, %v14589_v32   ;;  %6550 = vperm.xlu0 %9545, %v14650_v8   ;;  %v16035_v37 = vld [vmem:[#allocation94_spill] sm:$0xff]  ;;  %v16037_v62 = vld [vmem:[#allocation99_spill] sm:$0xff] }
 0x3c6   : > { %16033 = vst [vmem:[#allocation28_spill] sm:$0xff] %v14763_v59  ;;  %v6362_v56 = vpop.permute.xlu1 %6361  ;;  %v6359_v18 = vpop.permute.xlu0 %6358  ;;  %v6995_v21 = vsel %vm6739_vm12, %v4515_v29, -1e+30  ;;  %vm6742_vm4 = vcmp.eq.s32.totalorder %v16035_v37, 1  ;;  %v16036_v29 = vld [vmem:[#allocation51_spill] sm:$0xff]  ;;  %v16038_v32 = vld [vmem:[#allocation42_spill] sm:$0xff]  ;;  %vm5590_vm14 = vcmp.ge.s32.totalorder %v5333_v31, %v11531_v61 }
 0x3c7   : > { %vm6794_vm15 = vcmp.eq.s32.totalorder %v6362_v56, 1  ;;  %vm6793_vm5 = vcmp.eq.s32.totalorder %v6359_v18, 1  ;;  %v14772_v46 = vmax.f32 %v16034_v28, %v6995_v21  ;;  %v8915_v49 = vpop.f32.mrb[114].mxu0  ;;  %v14777_v0 = vpop.f32.mrb[87].mxu1  ;;  %vm6740_vm6 = vcmp.eq.s32.totalorder %v16038_v32, 1  ;;  %v5331_v8 = vld [vmem:[%s15638_s2 + $0x788] sm:$0xff] }
 0x3c8   : > { %v7050_v33 = vsel %vm6794_vm15, %v16036_v29, -1e+30  ;;  %v7049_v9 = vsel %vm6793_vm5, %v16037_v62, -1e+30  ;;  %v6998_v56 = vsel %vm6742_vm4, %v8915_v49, -1e+30  ;;  %vm5588_vm10 = vcmp.ge.s32.totalorder %v5331_v8, %v11531_v61 }
 0x3c9   : > { %v7274_v18 = vmax.f32 %v14570_v43, %v7050_v33  ;;  %v7273_v16 = vmax.f32 %v14553_v44, %v7049_v9  ;;  %v14783_v54 = vmax.f32 %v7270_v42, %v6998_v56  ;;  %v4518_v21 = vpop.f32.mrb[115].mxu0  ;;  %v5839_v62 = vsel %vm5583_vm1, 1, %v15728_v45  ;;  %6559 = vperm.xlu1 %9546, %v14655_v50   ;;  %6556 = vperm.xlu0 %9545, %v14660_v30   ;;  %v5330_v52 = vld [vmem:[%s15638_s2 + $0x780] sm:$0xff]  ;;  %v14816_v39 = vpop.f32.mrb[88].mxu1  ;;  %v5332_v8 = vld [vmem:[%s15638_s2 + $0x790] sm:$0xff] }
 0x3ca   : > { %v6996_v28 = vsel %vm6740_vm6, %v4518_v21, -1e+30  ;;  %v6368_v37 = vpop.permute.xlu1 %6367  ;;  %v6365_v59 = vpop.permute.xlu0 %6364  ;;  %v14795_v44 = vsel %vm5586_vm2, 1, %v15728_v45  ;;  %v14800_v43 = vsel %vm5585_vm3, 1, %v15728_v45  ;;  %v16039_v42 = vmax.f32 %v14525_v26, %v14682_v63  ;;  %v16040_v26 = vld [vmem:[#allocation56_spill] sm:$0xff]  ;;  %v16041_v56 = vld [vmem:[#allocation98_spill] sm:$0xff] }
 0x3cb   : > { %vm6796_vm8 = vcmp.eq.s32.totalorder %v6368_v37, 1  ;;  %vm6795_vm7 = vcmp.eq.s32.totalorder %v6365_v59, 1  ;;  %vm6745_vm9 = vcmp.eq.s32.totalorder %v13766_v58, 1  ;;  %v8918_v50 = vpop.f32.mrb[116].mxu0  ;;  %v14825_v58 = vpop.f32.mrb[89].mxu1  ;;  %vm6743_vm11 = vcmp.eq.s32.totalorder %v16041_v56, 1 }
 0x3cc   : > { %v14805_v9 = vmax.f32 %v16039_v42, %v6996_v28  ;;  %v14819_v63 = vsel %vm6795_vm7, %v16040_v26, -1e+30  ;;  %v14822_v33 = vsel %vm6796_vm8, %v13872_v5, -1e+30  ;;  %v7001_v49 = vsel %vm6745_vm9, %v8918_v50, -1e+30 }
 0x3cd   : > { %v7275_v30 = vmax.f32 %v14630_v14, %v14819_v63  ;;  %v4531_v29 = vpop.f32.mrb[117].mxu0  ;;  %v14832_v21 = vpop.f32.mrb[90].mxu1  ;;  %v14834_v32 = vmax.f32 %v7273_v16, %v7001_v49  ;;  %vm5587_vm13 = vcmp.ge.s32.totalorder %v5330_v52, %v11531_v61  ;;  %v16042_v14 = vmax.f32 %v14559_v48, %v14750_v4  ;;  %6565 = vperm.xlu1 %9546, %v14721_v22   ;;  %v16043_v26 = vld [vmem:[#allocation100_spill] sm:$0xff]  ;;  %v16044_v50 = vld [vmem:[#allocation102_spill] sm:$0xff]  ;;  %v16046_v22 = vld [vmem:[#allocation97_spill] sm:$0xff] }
 0x3ce   : > { %v6374_v5 = vpop.permute.xlu1 %6373  ;;  %v6371_v28 = vpop.permute.xlu0 %6370  ;;  %v6999_v37 = vsel %vm6743_vm11, %v4531_v29, -1e+30  ;;  %6562 = vperm.xlu0 %9545, %v14726_v55   ;;  %vm6746_vm2 = vcmp.eq.s32.totalorder %v16043_v26, 1  ;;  %v16045_v29 = vld [vmem:[#allocation101_spill] sm:$0xff]  ;;  %vm6744_vm3 = vcmp.eq.s32.totalorder %v16046_v22, 1  ;;  %v5844_v26 = vsel %vm5588_vm10, 1, %v15728_v45 }
 0x3cf   : > { %vm6798_vm1 = vcmp.eq.s32.totalorder %v6374_v5, 1  ;;  %vm6797_vm12 = vcmp.eq.s32.totalorder %v6371_v28, 1  ;;  %v14841_v42 = vmax.f32 %v16042_v14, %v6999_v37  ;;  %v8919_v16 = vpop.f32.mrb[118].mxu0  ;;  %v14846_v63 = vpop.f32.mrb[91].mxu1  ;;  %vm6749_vm4 = vcmp.eq.s32.totalorder %v13857_v24, 1  ;;  %v5335_v52 = vld [vmem:[%s15638_s2 + $0x7a8] sm:$0xff] }
 0x3d0   : > { %v7054_v49 = vsel %vm6798_vm1, %v16044_v50, -1e+30  ;;  %v7053_v56 = vsel %vm6797_vm12, %v16045_v29, -1e+30  ;;  %v7002_v5 = vsel %vm6746_vm2, %v8919_v16, -1e+30  ;;  %vm5589_vm8 = vcmp.ge.s32.totalorder %v5332_v8, %v11531_v61 }
 0x3d1   : > { %v7278_v28 = vmax.f32 %v14641_v23, %v7054_v49  ;;  %v7277_v48 = vmax.f32 %v14623_v17, %v7053_v56  ;;  %v14852_v4 = vmax.f32 %v7274_v18, %v7002_v5  ;;  %v4534_v37 = vpop.f32.mrb[119].mxu0  ;;  %v5843_v16 = vsel %vm5587_vm13, 1, %v15728_v45  ;;  %6571 = vperm.xlu1 %9546, %v14731_v60   ;;  %v14879_v31 = vpop.f32.mrb[92].mxu1  ;;  %v16048_v29 = vld [vmem:[#allocation50_spill] sm:$0xff] }
 0x3d2   : > { %v7000_v55 = vsel %vm6744_vm3, %v4534_v37, -1e+30  ;;  %v6380_v14 = vpop.permute.xlu1 %6379  ;;  %v6377_v59 = vpop.permute.xlu0 %6376  ;;  %v14864_v17 = vsel %vm5590_vm14, 1, %v15728_v45  ;;  %v16047_v23 = vmax.f32 %v14594_v7, %v14753_v20  ;;  %6568 = vperm.xlu0 %9545, %v5839_v62   ;;  %vm6747_vm6 = vcmp.eq.s32.totalorder %v16048_v29, 1  ;;  %v16051_v29 = vld [vmem:[#allocation52_spill] sm:$0xff] }
 0x3d3   : > { %vm6800_vm15 = vcmp.eq.s32.totalorder %v6380_v14, 1  ;;  %vm6799_vm5 = vcmp.eq.s32.totalorder %v6377_v59, 1  ;;  %v8922_v60 = vpop.f32.mrb[120].mxu0  ;;  %v14887_v62 = vpop.f32.mrb[93].mxu1  ;;  %vm5592_vm7 = vcmp.ge.s32.totalorder %v5335_v52, %v11531_v61  ;;  %vm6750_vm11 = vcmp.eq.s32.totalorder %v13855_v2, 1  ;;  %v16049_v14 = vld [vmem:[#allocation105_spill] sm:$0xff] }
 0x3d4   : > { %v14869_v18 = vmax.f32 %v16047_v23, %v7000_v55  ;;  %v14882_v7 = vsel %vm6799_vm5, %v13949_v36, -1e+30  ;;  %v14885_v20 = vsel %vm6800_vm15, %v13994_v53, -1e+30  ;;  %v7005_v50 = vsel %vm6749_vm4, %v8922_v60, -1e+30 }
 0x3d5   : > { %v7279_v24 = vmax.f32 %v14701_v19, %v14882_v7  ;;  %v7280_v59 = vmax.f32 %v14736_v40, %v14885_v20  ;;  %v4547_v49 = vpop.f32.mrb[121].mxu0  ;;  %v14894_v56 = vpop.f32.mrb[94].mxu1  ;;  %v14896_v36 = vmax.f32 %v7277_v48, %v7005_v50  ;;  %6577 = vperm.xlu1 %9546, %v14795_v44   ;;  %v5334_v48 = vld [vmem:[%s15638_s2 + $0x7a0] sm:$0xff]  ;;  %v16050_v7 = vld [vmem:[#allocation104_spill] sm:$0xff]  ;;  %vm6748_vm13 = vcmp.eq.s32.totalorder %v16051_v29, 1 }
 0x3d6   : > { %v6386_v5 = vpop.permute.xlu1 %6385  ;;  %v6383_v53 = vpop.permute.xlu0 %6382  ;;  %v7003_v37 = vsel %vm6747_vm6, %v4547_v49, -1e+30  ;;  %6574 = vperm.xlu0 %9545, %v14800_v43   ;;  %vm5591_vm14 = vcmp.ge.s32.totalorder %v5334_v48, %v11531_v61  ;;  %vm6753_vm2 = vcmp.eq.s32.totalorder %v13969_v41, 1  ;;  %vm6754_vm6 = vcmp.eq.s32.totalorder %v13967_v51, 1 }
 0x3d7   : > { %vm6802_vm9 = vcmp.eq.s32.totalorder %v6386_v5, 1  ;;  %vm6801_vm10 = vcmp.eq.s32.totalorder %v6383_v53, 1  ;;  %v14900_v19 = vmax.f32 %v7275_v30, %v7003_v37  ;;  %v8923_v22 = vpop.f32.mrb[122].mxu0  ;;  %v14908_v55 = vpop.f32.mrb[95].mxu1  ;;  %v5845_v37 = vsel %vm5589_vm8, 1, %v15728_v45 }
 0x3d8   : > { %v7058_v23 = vsel %vm6802_vm9, %v16049_v14, -1e+30  ;;  %v7057_v60 = vsel %vm6801_vm10, %v16050_v7, -1e+30  ;;  %v7006_v50 = vsel %vm6750_vm11, %v8923_v22, -1e+30 }
 0x3d9   : > { %v7282_v30 = vmax.f32 %v14712_v13, %v7058_v23  ;;  %v7281_v44 = vmax.f32 %v14694_v25, %v7057_v60  ;;  %v14914_v49 = vmax.f32 %v7278_v28, %v7006_v50  ;;  %v4550_v43 = vpop.f32.mrb[123].mxu0  ;;  %v5848_v22 = vsel %vm5592_vm7, 1, %v15728_v45  ;;  %6583 = vperm.xlu1 %9546, %v5844_v26   ;;  %v5337_v28 = vld [vmem:[%s15638_s2 + $0x7b8] sm:$0xff]  ;;  %v14933_v8 = vpop.f32.mrb[96].mxu1  ;;  %v16053_v7 = vld [vmem:[#allocation103_spill] sm:$0xff] }
 0x3da   : > { %v7004_v2 = vsel %vm6748_vm13, %v4550_v43, -1e+30  ;;  %v6392_v5 = vpop.permute.xlu1 %6391  ;;  %v6389_v53 = vpop.permute.xlu0 %6388  ;;  %v16052_v25 = vmax.f32 %v14665_v57, %v14822_v33  ;;  %6580 = vperm.xlu0 %9545, %v5843_v16   ;;  %vm6751_vm3 = vcmp.eq.s32.totalorder %v16053_v7, 1  ;;  %vm5594_vm15 = vcmp.ge.s32.totalorder %v5337_v28, %v11531_v61  ;;  %v16056_v7 = vld [vmem:[#allocation55_spill] sm:$0xff]  ;;  %v5341_v28 = vld [vmem:[%s15638_s2 + $0x7d8] sm:$0xff] }
 0x3db   : > { %vm6804_vm1 = vcmp.eq.s32.totalorder %v6392_v5, 1  ;;  %vm6803_vm12 = vcmp.eq.s32.totalorder %v6389_v53, 1  ;;  %v8926_v57 = vpop.f32.mrb[124].mxu0  ;;  %v14941_v33 = vpop.f32.mrb[97].mxu1  ;;  %vm6752_vm7 = vcmp.eq.s32.totalorder %v16056_v7, 1 }
 0x3dc   : > { %v14927_v13 = vmax.f32 %v16052_v25, %v7004_v2  ;;  %v14936_v52 = vsel %vm6803_vm12, %v14051_v10, -1e+30  ;;  %v14939_v14 = vsel %vm6804_vm1, %v14093_v3, -1e+30  ;;  %v7009_v16 = vsel %vm6753_vm2, %v8926_v57, -1e+30 }
 0x3dd   : > { %v4563_v23 = vpop.f32.mrb[125].mxu0  ;;  %v5336_v10 = vld [vmem:[%s15638_s2 + $0x7b0] sm:$0xff]  ;;  %v14951_v60 = vpop.f32.mrb[98].mxu1  ;;  %v14953_v3 = vmax.f32 %v7281_v44, %v7009_v16  ;;  %v5847_v2 = vsel %vm5591_vm14, 1, %v15728_v45  ;;  %6589 = vperm.xlu1 %9546, %v14864_v17   ;;  %v16054_v25 = vld [vmem:[#allocation107_spill] sm:$0xff]  ;;  %v16055_v16 = vld [vmem:[#allocation106_spill] sm:$0xff]  ;;  %vm5598_vm12 = vcmp.ge.s32.totalorder %v5341_v28, %v11531_v61 }
 0x3de   : > { %v6398_v50 = vpop.permute.xlu1 %6397  ;;  %v6395_v43 = vpop.permute.xlu0 %6394  ;;  %v7007_v29 = vsel %vm6751_vm3, %v4563_v23, -1e+30  ;;  %6586 = vperm.xlu0 %9545, %v5845_v37   ;;  %vm5593_vm8 = vcmp.ge.s32.totalorder %v5336_v10, %v11531_v61  ;;  %v16059_v17 = vld [vmem:[#allocation96_spill] sm:$0xff]  ;;  %v5854_v28 = vsel %vm5598_vm12, 1, %v15728_v45 }
 0x3df   : > { %vm6806_vm5 = vcmp.eq.s32.totalorder %v6398_v50, 1  ;;  %vm6805_vm4 = vcmp.eq.s32.totalorder %v6395_v43, 1  ;;  %v14959_v5 = vmax.f32 %v7279_v24, %v7007_v29  ;;  %v8927_v53 = vpop.f32.mrb[126].mxu0  ;;  %v14963_v44 = vpop.f32.mrb[99].mxu1  ;;  %v5339_v50 = vld [vmem:[%s15638_s2 + $0x7c8] sm:$0xff]  ;;  %v5849_v40 = vsel %vm5593_vm8, 1, %v15728_v45 }
 0x3e0   : > { %v14966_v57 = vsel %vm6806_vm5, %v16054_v25, -1e+30  ;;  %v14969_v48 = vsel %vm6805_vm4, %v16055_v16, -1e+30  ;;  %v7010_v23 = vsel %vm6754_vm6, %v8927_v53, -1e+30  ;;  %vm5596_vm11 = vcmp.ge.s32.totalorder %v5339_v50, %v11531_v61 }
 0x3e1   : > { %v14976_v37 = vmax.f32 %v7282_v30, %v7010_v23  ;;  %v4566_v51 = vpop.f32.mrb[127].mxu0  ;;  %v5338_v25 = vld [vmem:[%s15638_s2 + $0x7c0] sm:$0xff]  ;;  %6595 = vperm.xlu1 %9546, %v5848_v22   ;;  %v5850_v30 = vsel %vm5594_vm15, 1, %v15728_v45  ;;  %v14993_v23 = vpop.f32.mrb[100].mxu1  ;;  %v5340_v50 = vld [vmem:[%s15638_s2 + $0x7d0] sm:$0xff] }
 0x3e2   : > { %v7008_v43 = vsel %vm6752_vm7, %v4566_v51, -1e+30  ;;  %v6404_v29 = vpop.permute.xlu1 %6403  ;;  %v6401_v53 = vpop.permute.xlu0 %6400  ;;  %6592 = vperm.xlu0 %9545, %v5847_v2   ;;  %16057 = vst [vmem:[#allocation68_spill] sm:$0xff] %v14993_v23  ;;  %v16058_v51 = vld [vmem:[#allocation58_spill] sm:$0xff]  ;;  %vm5595_vm13 = vcmp.ge.s32.totalorder %v5338_v25, %v11531_v61  ;;  %vm5597_vm2 = vcmp.ge.s32.totalorder %v5340_v50, %v11531_v61 }
 0x3e3   : > { %v14988_v16 = vmax.f32 %v7280_v59, %v7008_v43  ;;  %vm6808_vm9 = vcmp.eq.s32.totalorder %v6404_v29, 1  ;;  %vm6807_vm10 = vcmp.eq.s32.totalorder %v6401_v53, 1  ;;  %v15005_v20 = vpop.f32.mrb[101].mxu1  ;;  %v5852_v43 = vsel %vm5596_vm11, 1, %v15728_v45  ;;  %v16063_v53 = vld [vmem:[#allocation30_spill] sm:$0xff] }
 0x3e4   : > { %v14996_v7 = vsel %vm6807_vm10, %v16058_v51, -1e+30  ;;  %v14999_v24 = vsel %vm6808_vm9, %v16059_v17, -1e+30  ;;  %16060 = vst [vmem:[#allocation27_spill] sm:$0xff] %v15005_v20  ;;  %v15015_v2 = vpop.f32.mrb[102].mxu1 }
 0x3e5   : > { %16061 = vst [vmem:[#allocation71_spill] sm:$0xff] %v15015_v2  ;;  %6601 = vperm.xlu1 %9546, %v5850_v30   ;;  %v15021_v29 = vpop.f32.mrb[103].mxu1  ;;  %v16064_v51 = vld [vmem:[#allocation59_spill] sm:$0xff]  ;;  %v5851_v59 = vsel %vm5595_vm13, 1, %v15728_v45  ;;  %v16066_v30 = vld [vmem:[#allocation61_spill] sm:$0xff]  ;;  %v5853_v26 = vsel %vm5597_vm2, 1, %v15728_v45 }
 0x3e6   : > { %v6410_v10 = vpop.permute.xlu1 %6409  ;;  %v6407_v17 = vpop.permute.xlu0 %6406  ;;  %6598 = vperm.xlu0 %9545, %v5849_v40   ;;  %16062 = vst [vmem:[#allocation70_spill] sm:$0xff] %v15021_v29  ;;  %v5343_v40 = vld [vmem:[%s15638_s2 + $0x7e8] sm:$0xff]  ;;  %v16084_v29 = vld [vmem:[#allocation21_spill] sm:$0xff] }
 0x3e7   : > { %vm6810_vm14 = vcmp.eq.s32.totalorder %v6410_v10, 1  ;;  %vm6809_vm1 = vcmp.eq.s32.totalorder %v6407_v17, 1  ;;  %v15043_v10 = vpop.f32.mrb[104].mxu1  ;;  %vm5600_vm5 = vcmp.ge.s32.totalorder %v5343_v40, %v11531_v61  ;;  %v5344_v40 = vld [vmem:[%s15638_s2 + $0x7f0] sm:$0xff] }
 0x3e8   : > { %v15024_v25 = vsel %vm6810_vm14, %v16063_v53, -1e+30  ;;  %v15027_v22 = vsel %vm6809_vm1, %v16064_v51, -1e+30  ;;  %v5342_v51 = vld [vmem:[%s15638_s2 + $0x7e0] sm:$0xff]  ;;  %16065 = vst [vmem:[#allocation22_spill] sm:$0xff] %v15043_v10  ;;  %vm5601_vm9 = vcmp.ge.s32.totalorder %v5344_v40, %v11531_v61 }
 0x3e9   : > { %6607 = vperm.xlu1 %9546, %v5852_v43   ;;  %v15053_v23 = vpop.f32.mrb[105].mxu1  ;;  %vm5599_vm4 = vcmp.ge.s32.totalorder %v5342_v51, %v11531_v61  ;;  %v16070_v51 = vld [vmem:[#allocation60_spill] sm:$0xff] }
 0x3ea   : > { %v6416_v17 = vpop.permute.xlu1 %6415  ;;  %v6413_v53 = vpop.permute.xlu0 %6412  ;;  %6604 = vperm.xlu0 %9545, %v5851_v59   ;;  %16067 = vst [vmem:[#allocation73_spill] sm:$0xff] %v15053_v23  ;;  %v5856_v59 = vsel %vm5600_vm5, 1, %v15728_v45  ;;  %v16071_v23 = vld [vmem:[#allocation57_spill] sm:$0xff] }
 0x3eb   : > { %vm6812_vm3 = vcmp.eq.s32.totalorder %v6416_v17, 1  ;;  %vm6811_vm15 = vcmp.eq.s32.totalorder %v6413_v53, 1 }
 0x3ec   : > { %v15046_v50 = vsel %vm6811_vm15, %v16066_v30, -1e+30  ;;  %v15049_v41 = vsel %vm6812_vm3, %v14267_v47, -1e+30  ;;  %v5345_v30 = vld [vmem:[%s15638_s2 + $0x7f8] sm:$0xff]  ;;  %v15063_v47 = vpop.f32.mrb[106].mxu1 }
 0x3ed   : > { %16068 = vst [vmem:[#allocation33_spill] sm:$0xff] %v15063_v47  ;;  %6613 = vperm.xlu1 %9546, %v5854_v28   ;;  %v15069_v43 = vpop.f32.mrb[107].mxu1  ;;  %v5855_v47 = vsel %vm5599_vm4, 1, %v15728_v45  ;;  %vm5602_vm7 = vcmp.ge.s32.totalorder %v5345_v30, %v11531_v61 }
 0x3ee   : > { %v6422_v17 = vpop.permute.xlu1 %6421  ;;  %v6419_v53 = vpop.permute.xlu0 %6418  ;;  %6610 = vperm.xlu0 %9545, %v5853_v26   ;;  %16069 = vst [vmem:[#allocation32_spill] sm:$0xff] %v15069_v43  ;;  %v5857_v26 = vsel %vm5601_vm9, 1, %v15728_v45 }
 0x3ef   : > { %vm6814_vm6 = vcmp.eq.s32.totalorder %v6422_v17, 1  ;;  %vm6813_vm8 = vcmp.eq.s32.totalorder %v6419_v53, 1 }
 0x3f0   : > { %v15072_v10 = vsel %vm6814_vm6, %v16070_v51, -1e+30  ;;  %v15075_v2 = vsel %vm6813_vm8, %v16071_v23, -1e+30  ;;  %v5858_v23 = vsel %vm5602_vm7, 1, %v15728_v45  ;;  %v15085_v51 = vpop.f32.mrb[108].mxu1 }
 0x3f1   : > { %6619 = vperm.xlu1 %9546, %v5856_v59   ;;  %16072 = vst [vmem:[#allocation72_spill] sm:$0xff] %v15085_v51  ;;  %v15094_v43 = vpop.f32.mrb[109].mxu1  ;;  %v16082_v59 = vmax.f32 %v14805_v9, %v14939_v14  ;;  %v16086_v9 = vmax.f32 %v14765_v12, %v14969_v48  ;;  %v16089_v12 = vmax.f32 %v14869_v18, %v14999_v24 }
 0x3f2   : > { %v6428_v28 = vpop.permute.xlu1 %6427  ;;  %v6425_v53 = vpop.permute.xlu0 %6424  ;;  %6616 = vperm.xlu0 %9545, %v5855_v47   ;;  %16073 = vst [vmem:[#allocation31_spill] sm:$0xff] %v15094_v43  ;;  %v16092_v18 = vmax.f32 %v14834_v32, %v15027_v22  ;;  %v16096_v32 = vmax.f32 %v14927_v13, %v15049_v41  ;;  %v16100_v13 = vmax.f32 %v14896_v36, %v15075_v2 }
 0x3f3   : > { %vm6816_vm10 = vcmp.eq.s32.totalorder %v6428_v28, 1  ;;  %vm6815_vm11 = vcmp.eq.s32.totalorder %v6425_v53, 1  ;;  %v15100_v47 = vpop.f32.mrb[110].mxu1  ;;  %v16077_v53 = vld [vmem:[#allocation78_spill] sm:$0xff] }
 0x3f4   : > { %v15088_v30 = vsel %vm6815_vm11, %v14311_v34, -1e+30  ;;  %v15091_v17 = vsel %vm6816_vm10, %v14347_v15, -1e+30  ;;  %16074 = vst [vmem:[#allocation75_spill] sm:$0xff] %v15100_v47  ;;  %v15102_v34 = vpop.f32.mrb[111].mxu1 }
 0x3f5   : > { %6625 = vperm.xlu1 %9546, %v5858_v23   ;;  %16075 = vst [vmem:[#allocation74_spill] sm:$0xff] %v15102_v34  ;;  %v16076_v15 = vld [vmem:[#allocation46_spill] sm:$0xff]  ;;  %v15114_v23 = vpop.f32.mrb[112].mxu1  ;;  %v16103_v36 = vmax.f32 %v14988_v16, %v15091_v17 }
 0x3f6   : > { %v6434_v40 = vpop.permute.xlu1 %6433  ;;  %v6431_v28 = vpop.permute.xlu0 %6430  ;;  %6622 = vperm.xlu0 %9545, %v5857_v26   ;;  %16078 = vst [vmem:[#allocation26_spill] sm:$0xff] %v15114_v23 }
 0x3f7   : > { %vm6818_vm13 = vcmp.eq.s32.totalorder %v6434_v40, 1  ;;  %vm6817_vm14 = vcmp.eq.s32.totalorder %v6431_v28, 1  ;;  %v16079_v40 = vld [vmem:[#allocation62_spill] sm:$0xff] }
 0x3f8   : > { %v15105_v45 = vsel %vm6818_vm13, %v16076_v15, -1e+30  ;;  %v15108_v51 = vsel %vm6817_vm14, %v16077_v53, -1e+30  ;;  %v15118_v15 = vpop.f32.mrb[113].mxu1  ;;  %v16081_v53 = vmax.f32 %v14772_v46, %v14936_v52  ;;  %v16085_v46 = vmax.f32 %v14783_v54, %v14966_v57 }
 0x3f9   : > { %16080 = vst [vmem:[#allocation77_spill] sm:$0xff] %v15118_v15  ;;  %v16088_v54 = vmax.f32 %v14841_v42, %v14996_v7  ;;  %v16091_v42 = vmax.f32 %v14852_v4, %v15024_v25  ;;  %v16095_v4 = vmax.f32 %v14900_v19, %v15046_v50  ;;  %v16099_v19 = vmax.f32 %v14914_v49, %v15072_v10 }
 0x3fa   : > { %v6440_v47 = vpop.permute.xlu1 %6439  ;;  %v6437_v43 = vpop.permute.xlu0 %6436  ;;  %v16102_v49 = vmax.f32 %v14959_v5, %v15088_v30  ;;  %v16106_v5 = vmax.f32 %v14976_v37, %v15105_v45  ;;  %v16107_v16 = vmax.f32 %v14953_v3, %v15108_v51  ;;  %v16109_v51 = vld [vmem:[#allocation18_spill] sm:$0xff] }
 0x3fb   : > { %vm6820_vm1 = vcmp.eq.s32.totalorder %v6440_v47, 1  ;;  %vm6819_vm12 = vcmp.eq.s32.totalorder %v6437_v43, 1  ;;  %v15130_v47 = vpop.f32.mrb[114].mxu1 }
 0x3fc   : > { %v7075_v26 = vsel %vm6819_vm12, %v14390_v35, -1e+30  ;;  %v7076_v28 = vsel %vm6820_vm1, %v16079_v40, -1e+30  ;;  %v15132_v35 = vpop.f32.mrb[115].mxu1  ;;  %v16083_v40 = vld [vmem:[#allocation20_spill] sm:$0xff] }
 0x3fd   : > { %v15123_v34 = vmax.f32 %v16081_v53, %v7075_v26  ;;  %v15128_v61 = vmax.f32 %v16082_v59, %v7076_v28  ;;  %v16087_v28 = vld [vmem:[#allocation63_spill] sm:$0xff] }
 0x3fe   : > { %v6446_v43 = vpop.permute.xlu1 %6445  ;;  %v6443_v23 = vpop.permute.xlu0 %6442 }
 0x3ff   : > { %vm6822_vm2 = vcmp.eq.s32.totalorder %v6446_v43, 1  ;;  %vm6821_vm3 = vcmp.eq.s32.totalorder %v6443_v23, 1  ;;  %v15146_v23 = vpop.f32.mrb[116].mxu1 }
 0x400   : > { %v7078_v15 = vsel %vm6822_vm2, %v16083_v40, -1e+30  ;;  %v7077_v20 = vsel %vm6821_vm3, %v16084_v29, -1e+30  ;;  %v15150_v43 = vpop.f32.mrb[117].mxu1 }
 0x401   : > { %v15139_v52 = vmax.f32 %v16085_v46, %v7078_v15  ;;  %v15144_v14 = vmax.f32 %v16086_v9, %v7077_v20  ;;  %v15162_v20 = vpop.f32.mrb[118].mxu1  ;;  %v16090_v9 = vld [vmem:[#allocation19_spill] sm:$0xff] }
 0x402   : > { %v6452_v59 = vpop.permute.xlu1 %6451  ;;  %v6449_v26 = vpop.permute.xlu0 %6448 }
 0x403   : > { %vm6824_vm15 = vcmp.eq.s32.totalorder %v6452_v59, 1  ;;  %vm6823_vm5 = vcmp.eq.s32.totalorder %v6449_v26, 1  ;;  %v15164_v46 = vpop.f32.mrb[119].mxu1 }
 0x404   : > { %v7079_v53 = vsel %vm6823_vm5, %v16087_v28, -1e+30  ;;  %v7080_v29 = vsel %vm6824_vm15, %v14495_v38, -1e+30 }
 0x405   : > { %v15155_v57 = vmax.f32 %v16088_v54, %v7079_v53  ;;  %v15160_v48 = vmax.f32 %v16089_v12, %v7080_v29  ;;  %v15178_v53 = vpop.f32.mrb[120].mxu1  ;;  %v16093_v29 = vld [vmem:[#allocation65_spill] sm:$0xff] }
 0x406   : > { %v6458_v15 = vpop.permute.xlu1 %6457  ;;  %v6455_v40 = vpop.permute.xlu0 %6454  ;;  %v16094_v54 = vld [vmem:[#allocation25_spill] sm:$0xff] }
 0x407   : > { %vm6826_vm4 = vcmp.eq.s32.totalorder %v6458_v15, 1  ;;  %vm6825_vm6 = vcmp.eq.s32.totalorder %v6455_v40, 1  ;;  %v15182_v15 = vpop.f32.mrb[121].mxu1 }
 0x408   : > { %v7082_v38 = vsel %vm6826_vm4, %v14479_v1, -1e+30  ;;  %v7081_v59 = vsel %vm6825_vm6, %v16090_v9, -1e+30  ;;  %v15194_v40 = vpop.f32.mrb[122].mxu1 }
 0x409   : > { %v15171_v7 = vmax.f32 %v16091_v42, %v7082_v38  ;;  %v15176_v24 = vmax.f32 %v16092_v18, %v7081_v59  ;;  %v15196_v59 = vpop.f32.mrb[123].mxu1  ;;  %v16097_v42 = vld [vmem:[#allocation64_spill] sm:$0xff] }
 0x40a   : > { %v6464_v26 = vpop.permute.xlu1 %6463  ;;  %v6461_v28 = vpop.permute.xlu0 %6460 }
 0x40b   : > { %vm6828_vm8 = vcmp.eq.s32.totalorder %v6464_v26, 1  ;;  %vm6827_vm7 = vcmp.eq.s32.totalorder %v6461_v28, 1  ;;  %v16098_v26 = vld [vmem:[#allocation54_spill] sm:$0xff] }
 0x40c   : > { %v7083_v1 = vsel %vm6827_vm7, %v16093_v29, -1e+30  ;;  %v7084_v12 = vsel %vm6828_vm8, %v16094_v54, -1e+30  ;;  %v15210_v54 = vpop.f32.mrb[124].mxu1 }
 0x40d   : > { %v15187_v25 = vmax.f32 %v16095_v4, %v7083_v1  ;;  %v15192_v22 = vmax.f32 %v16096_v32, %v7084_v12  ;;  %v16101_v4 = vld [vmem:[#allocation23_spill] sm:$0xff] }
 0x40e   : > { %v6470_v38 = vpop.permute.xlu1 %6469  ;;  %v6467_v9 = vpop.permute.xlu0 %6466 }
 0x40f   : > { %vm6830_vm9 = vcmp.eq.s32.totalorder %v6470_v38, 1  ;;  %vm6829_vm10 = vcmp.eq.s32.totalorder %v6467_v9, 1  ;;  %v15214_v38 = vpop.f32.mrb[125].mxu1 }
 0x410   : > { %v7086_v18 = vsel %vm6830_vm9, %v16097_v42, -1e+30  ;;  %v7085_v28 = vsel %vm6829_vm10, %v16098_v26, -1e+30  ;;  %v15226_v9 = vpop.f32.mrb[126].mxu1  ;;  %v16104_v26 = vld [vmem:[#allocation66_spill] sm:$0xff] }
 0x411   : > { %v15203_v50 = vmax.f32 %v16099_v19, %v7086_v18  ;;  %v15208_v41 = vmax.f32 %v16100_v13, %v7085_v28  ;;  %v16105_v19 = vld [vmem:[#allocation24_spill] sm:$0xff] }
 0x412   : > { %v6476_v29 = vpop.permute.xlu1 %6475  ;;  %v6473_v1 = vpop.permute.xlu0 %6472 }
 0x413   : > { %vm6832_vm11 = vcmp.eq.s32.totalorder %v6476_v29, 1  ;;  %vm6831_vm13 = vcmp.eq.s32.totalorder %v6473_v1, 1 }
 0x414   : > { %v7087_v12 = vsel %vm6831_vm13, %v14614_v11, -1e+30  ;;  %v7088_v32 = vsel %vm6832_vm11, %v16101_v4, -1e+30  ;;  %v15228_v11 = vpop.f32.mrb[127].mxu1  ;;  %v16108_v4 = vld [vmem:[#allocation69_spill] sm:$0xff] }
 0x415   : > { %v15219_v10 = vmax.f32 %v16102_v49, %v7087_v12  ;;  %v15224_v2 = vmax.f32 %v16103_v36, %v7088_v32 }
 0x416   : > { %v6482_v42 = vpop.permute.xlu1 %6481  ;;  %v6479_v18 = vpop.permute.xlu0 %6478 }
 0x417   : > { %vm6834_vm14 = vcmp.eq.s32.totalorder %v6482_v42, 1  ;;  %vm6833_vm1 = vcmp.eq.s32.totalorder %v6479_v18, 1  ;;  %v16110_v42 = vld [vmem:[#allocation67_spill] sm:$0xff] }
 0x418   : > { %v7090_v28 = vsel %vm6834_vm14, %v16104_v26, -1e+30  ;;  %v7089_v13 = vsel %vm6833_vm1, %v16105_v19, -1e+30 }
 0x419   : > { %v15235_v30 = vmax.f32 %v16106_v5, %v7090_v28  ;;  %v15240_v17 = vmax.f32 %v16107_v16, %v7089_v13 }
 0x41a   : > { %v6488_v29 = vpop.permute.xlu1 %6487  ;;  %v6485_v1 = vpop.permute.xlu0 %6484 }
 0x41b   : > { %vm6836_vm12 = vcmp.eq.s32.totalorder %v6488_v29, 1  ;;  %vm6835_vm2 = vcmp.eq.s32.totalorder %v6485_v1, 1 }
 0x41c   : > { %v15243_v12 = vsel %vm6835_vm2, %v14685_v6, -1e+30  ;;  %v15246_v32 = vsel %vm6836_vm12, %v16108_v4, -1e+30 }
 0x41d   : > { %v7331_v37 = vmax.f32 %v15123_v34, %v15243_v12  ;;  %v7332_v45 = vmax.f32 %v15128_v61, %v15246_v32  ;;  %v16113_v32 = vld [vmem:[#allocation27_spill] sm:$0xff] }
 0x41e   : > { %v6494_v49 = vpop.permute.xlu1 %6493  ;;  %v6491_v3 = vpop.permute.xlu0 %6490 }
 0x41f   : > { %vm6838_vm3 = vcmp.eq.s32.totalorder %v6494_v49, 1  ;;  %vm6837_vm15 = vcmp.eq.s32.totalorder %v6491_v3, 1  ;;  %v16111_v49 = vld [vmem:[#allocation28_spill] sm:$0xff] }
 0x420   : > { %v15253_v36 = vsel %vm6838_vm3, %v16109_v51, -1e+30  ;;  %v15256_v18 = vsel %vm6837_vm15, %v16110_v42, -1e+30  ;;  %v16112_v51 = vld [vmem:[#allocation29_spill] sm:$0xff] }
 0x421   : > { %v7334_v6 = vmax.f32 %v15139_v52, %v15253_v36  ;;  %v7333_v26 = vmax.f32 %v15144_v14, %v15256_v18 }
 0x422   : > { %v6500_v28 = vpop.permute.xlu1 %6499  ;;  %v6497_v19 = vpop.permute.xlu0 %6496 }
 0x423   : > { %vm6840_vm5 = vcmp.eq.s32.totalorder %v6500_v28, 1  ;;  %vm6839_vm4 = vcmp.eq.s32.totalorder %v6497_v19, 1 }
 0x424   : > { %v15263_v13 = vsel %vm6839_vm4, %v14756_v27, -1e+30  ;;  %v15266_v5 = vsel %vm6840_vm5, %v14777_v0, -1e+30 }
 0x425   : > { %v7335_v16 = vmax.f32 %v15155_v57, %v15263_v13  ;;  %v16115_v52 = vmax.f32 %v15160_v48, %v15266_v5 }
 0x426   : > { %v6506_v1 = vpop.permute.xlu1 %6505  ;;  %v6503_v4 = vpop.permute.xlu0 %6502 }
 0x427   : > { %vm6842_vm6 = vcmp.eq.s32.totalorder %v6506_v1, 1  ;;  %vm6841_vm8 = vcmp.eq.s32.totalorder %v6503_v4, 1 }
 0x428   : > { %v15273_v3 = vsel %vm6842_vm6, %v16111_v49, -1e+30  ;;  %v15276_v42 = vsel %vm6841_vm8, %v16112_v51, -1e+30 }
 0x429   : > { %v16119_v57 = vmax.f32 %v15176_v24, %v15276_v42 }
 0x42a   : > { %v6512_v28 = vpop.permute.xlu1 %6511  ;;  %v6509_v19 = vpop.permute.xlu0 %6508 }
 0x42b   : > { %vm6844_vm7 = vcmp.eq.s32.totalorder %v6512_v28, 1  ;;  %vm6843_vm9 = vcmp.eq.s32.totalorder %v6509_v19, 1 }
 0x42c   : > { %v15283_v29 = vsel %vm6843_vm9, %v14825_v58, -1e+30  ;;  %v15286_v1 = vsel %vm6844_vm7, %v14846_v63, -1e+30 }
 0x42e   : > { %v6518_v51 = vpop.permute.xlu1 %6517  ;;  %v6515_v27 = vpop.permute.xlu0 %6514 }
 0x42f   : > { %vm6846_vm10 = vcmp.eq.s32.totalorder %v6518_v51, 1  ;;  %vm6845_vm11 = vcmp.eq.s32.totalorder %v6515_v27, 1 }
 0x430   : > { %v15293_v0 = vsel %vm6846_vm10, %v14832_v21, -1e+30  ;;  %v15296_v28 = vsel %vm6845_vm11, %v14816_v39, -1e+30 }
 0x432   : > { %v6524_v19 = vpop.permute.xlu1 %6523  ;;  %v6521_v4 = vpop.permute.xlu0 %6520 }
 0x433   : > { %vm6848_vm13 = vcmp.eq.s32.totalorder %v6524_v19, 1  ;;  %vm6847_vm14 = vcmp.eq.s32.totalorder %v6521_v4, 1 }
 0x434   : > { %v15303_v49 = vsel %vm6847_vm14, %v14887_v62, -1e+30  ;;  %v15306_v27 = vsel %vm6848_vm13, %v14908_v55, -1e+30 }
 0x436   : > { %v6530_v51 = vpop.permute.xlu1 %6529  ;;  %v6527_v58 = vpop.permute.xlu0 %6526 }
 0x437   : > { %vm6850_vm1 = vcmp.eq.s32.totalorder %v6530_v51, 1  ;;  %vm6849_vm12 = vcmp.eq.s32.totalorder %v6527_v58, 1 }
 0x438   : > { %v15313_v63 = vsel %vm6850_vm1, %v14894_v56, -1e+30  ;;  %v15316_v4 = vsel %vm6849_vm12, %v14879_v31, -1e+30 }
 0x439   : > { %v7346_v62 = vmax.f32 %v15235_v30, %v15313_v63 }
 0x43a   : > { %v6536_v19 = vpop.permute.xlu1 %6535  ;;  %v6533_v39 = vpop.permute.xlu0 %6532 }
 0x43b   : > { %vm6852_vm2 = vcmp.eq.s32.totalorder %v6536_v19, 1  ;;  %vm6851_vm3 = vcmp.eq.s32.totalorder %v6533_v39, 1  ;;  %v16118_v19 = vmax.f32 %v15171_v7, %v15273_v3  ;;  %v16123_v7 = vmax.f32 %v15192_v22, %v15286_v1 }
 0x43c   : > { %v7107_v21 = vsel %vm6851_vm3, %v14941_v33, -1e+30  ;;  %v7108_v58 = vsel %vm6852_vm2, %v14963_v44, -1e+30 }
 0x43d   : > { %v15327_v56 = vmax.f32 %v7331_v37, %v7107_v21  ;;  %v15332_v31 = vmax.f32 %v7332_v45, %v7108_v58  ;;  %v16114_v45 = vld [vmem:[#allocation70_spill] sm:$0xff]  ;;  %v16117_v21 = vld [vmem:[#allocation68_spill] sm:$0xff] }
 0x43e   : > { %v6542_v51 = vpop.permute.xlu1 %6541  ;;  %v6539_v55 = vpop.permute.xlu0 %6538 }
 0x43f   : > { %vm6854_vm15 = vcmp.eq.s32.totalorder %v6542_v51, 1  ;;  %vm6853_vm5 = vcmp.eq.s32.totalorder %v6539_v55, 1 }
 0x440   : > { %v7110_v39 = vsel %vm6854_vm15, %v14951_v60, -1e+30  ;;  %v7109_v33 = vsel %vm6853_vm5, %v14933_v8, -1e+30 }
 0x441   : > { %v15339_v44 = vmax.f32 %v7334_v6, %v7110_v39  ;;  %v15344_v34 = vmax.f32 %v7333_v26, %v7109_v33  ;;  %v16116_v6 = vld [vmem:[#allocation71_spill] sm:$0xff]  ;;  %v16121_v39 = vld [vmem:[#allocation32_spill] sm:$0xff] }
 0x442   : > { %v6548_v61 = vpop.permute.xlu1 %6547  ;;  %v6545_v12 = vpop.permute.xlu0 %6544 }
 0x443   : > { %vm6856_vm4 = vcmp.eq.s32.totalorder %v6548_v61, 1  ;;  %vm6855_vm6 = vcmp.eq.s32.totalorder %v6545_v12, 1  ;;  %v16122_v61 = vmax.f32 %v15187_v25, %v15283_v29  ;;  %v16127_v25 = vmax.f32 %v15208_v41, %v15296_v28 }
 0x444   : > { %v7111_v37 = vsel %vm6855_vm6, %v16113_v32, -1e+30  ;;  %v7112_v60 = vsel %vm6856_vm4, %v16114_v45, -1e+30  ;;  %v16124_v32 = vld [vmem:[#allocation33_spill] sm:$0xff]  ;;  %v16125_v45 = vld [vmem:[#allocation22_spill] sm:$0xff] }
 0x445   : > { %v15351_v8 = vmax.f32 %v7335_v16, %v7111_v37  ;;  %v15356_v36 = vmax.f32 %v16115_v52, %v7112_v60  ;;  %v16120_v16 = vld [vmem:[#allocation73_spill] sm:$0xff]  ;;  %v16126_v52 = vmax.f32 %v15203_v50, %v15293_v0  ;;  %v16131_v50 = vmax.f32 %v15224_v2, %v15306_v27 }
 0x446   : > { %v6554_v14 = vpop.permute.xlu1 %6553  ;;  %v6551_v18 = vpop.permute.xlu0 %6550 }
 0x447   : > { %vm6858_vm8 = vcmp.eq.s32.totalorder %v6554_v14, 1  ;;  %vm6857_vm7 = vcmp.eq.s32.totalorder %v6551_v18, 1  ;;  %v16128_v18 = vld [vmem:[#allocation31_spill] sm:$0xff] }
 0x448   : > { %v7114_v26 = vsel %vm6858_vm8, %v16116_v6, -1e+30  ;;  %v7113_v55 = vsel %vm6857_vm7, %v16117_v21, -1e+30 }
 0x449   : > { %v15363_v58 = vmax.f32 %v16118_v19, %v7114_v26  ;;  %v15368_v13 = vmax.f32 %v16119_v57, %v7113_v55  ;;  %v16129_v26 = vld [vmem:[#allocation74_spill] sm:$0xff]  ;;  %v16130_v55 = vmax.f32 %v15219_v10, %v15303_v49  ;;  %v16132_v57 = vld [vmem:[#allocation75_spill] sm:$0xff]  ;;  %v16134_v10 = vmax.f32 %v15240_v17, %v15316_v4 }
 0x44a   : > { %v6560_v48 = vpop.permute.xlu1 %6559  ;;  %v6557_v5 = vpop.permute.xlu0 %6556 }
 0x44b   : > { %vm6860_vm9 = vcmp.eq.s32.totalorder %v6560_v48, 1  ;;  %vm6859_vm10 = vcmp.eq.s32.totalorder %v6557_v5, 1  ;;  %v16133_v5 = vld [vmem:[#allocation72_spill] sm:$0xff] }
 0x44c   : > { %v7115_v51 = vsel %vm6859_vm10, %v16120_v16, -1e+30  ;;  %v7116_v33 = vsel %vm6860_vm9, %v16121_v39, -1e+30  ;;  %v16135_v39 = vld [vmem:[#allocation17_spill] sm:$0xff] }
 0x44d   : > { %v15375_v12 = vmax.f32 %v16122_v61, %v7115_v51  ;;  %v15380_v3 = vmax.f32 %v16123_v7, %v7116_v33  ;;  %v7363_v33 = vmax.f32 %v15327_v56, %v16135_v39  ;;  %v16136_v61 = vld [vmem:[#allocation16_spill] sm:$0xff] }
 0x44e   : > { %v6566_v24 = vpop.permute.xlu1 %6565  ;;  %v6563_v42 = vpop.permute.xlu0 %6562  ;;  %v7364_v7 = vmax.f32 %v15332_v31, %v16136_v61 }
 0x44f   : > { %vm6862_vm11 = vcmp.eq.s32.totalorder %v6566_v24, 1  ;;  %vm6861_vm13 = vcmp.eq.s32.totalorder %v6563_v42, 1  ;;  %v16137_v24 = vld [vmem:[#allocation77_spill] sm:$0xff] }
 0x450   : > { %v7118_v37 = vsel %vm6862_vm11, %v16124_v32, -1e+30  ;;  %v7117_v60 = vsel %vm6861_vm13, %v16125_v45, -1e+30  ;;  %v16140_v45 = vld [vmem:[#allocation14_spill] sm:$0xff] }
 0x451   : > { %v15387_v14 = vmax.f32 %v16126_v52, %v7118_v37  ;;  %v15392_v29 = vmax.f32 %v16127_v25, %v7117_v60  ;;  %v7366_v60 = vmax.f32 %v15339_v44, %v16140_v45  ;;  %v16141_v52 = vld [vmem:[#allocation15_spill] sm:$0xff]  ;;  %v16142_v25 = vld [vmem:[#allocation26_spill] sm:$0xff]  ;;  %v16146_v44 = vld [vmem:[#allocation12_spill] sm:$0xff] }
 0x452   : > { %v6572_v22 = vpop.permute.xlu1 %6571  ;;  %v6569_v1 = vpop.permute.xlu0 %6568  ;;  %v7365_v56 = vmax.f32 %v15344_v34, %v16141_v52 }
 0x453   : > { %vm6864_vm14 = vcmp.eq.s32.totalorder %v6572_v22, 1  ;;  %vm6863_vm1 = vcmp.eq.s32.totalorder %v6569_v1, 1 }
 0x454   : > { %v7119_v6 = vsel %vm6863_vm1, %v16128_v18, -1e+30  ;;  %v7120_v21 = vsel %vm6864_vm14, %v16129_v26, -1e+30 }
 0x455   : > { %v15399_v19 = vmax.f32 %v16130_v55, %v7119_v6  ;;  %v15404_v0 = vmax.f32 %v16131_v50, %v7120_v21  ;;  %v16145_v21 = vld [vmem:[#allocation13_spill] sm:$0xff]  ;;  %v7368_v50 = vmax.f32 %v15356_v36, %v16146_v44  ;;  %v7396_v44 = vld [vmem:[%s15639_s3 + $0x8] sm:$0xff] (%p15499_p1) }
 0x456   : > { %v6578_v41 = vpop.permute.xlu1 %6577  ;;  %v6575_v28 = vpop.permute.xlu0 %6574  ;;  %v7367_v55 = vmax.f32 %v15351_v8, %v16145_v21  ;;  %v16165_v21 = vld [vmem:[#allocation3_spill] sm:$0xff] }
 0x457   : > { %vm6866_vm12 = vcmp.eq.s32.totalorder %v6578_v41, 1  ;;  %vm6865_vm2 = vcmp.eq.s32.totalorder %v6575_v28, 1 }
 0x458   : > { %v7122_v48 = vsel %vm6866_vm12, %v16132_v57, -1e+30  ;;  %v7121_v16 = vsel %vm6865_vm2, %v16133_v5, -1e+30  ;;  %v16149_v57 = vld [vmem:[#allocation10_spill] sm:$0xff] }
 0x459   : > { %v15411_v51 = vmax.f32 %v7346_v62, %v7122_v48  ;;  %v15416_v49 = vmax.f32 %v16134_v10, %v7121_v16  ;;  %v7370_v5 = vmax.f32 %v15363_v58, %v16149_v57  ;;  %v16150_v16 = vld [vmem:[#allocation11_spill] sm:$0xff]  ;;  %v16154_v58 = vld [vmem:[#allocation8_spill] sm:$0xff] }
 0x45a   : > { %v6584_v2 = vpop.permute.xlu1 %6583  ;;  %v6581_v27 = vpop.permute.xlu0 %6580  ;;  %v7369_v8 = vmax.f32 %v15368_v13, %v16150_v16  ;;  %v7406_v16 = vld [vmem:[%s15639_s3 + $0x58] sm:$0xff] (%p15499_p1) }
 0x45b   : > { %vm6868_vm3 = vcmp.eq.s32.totalorder %v6584_v2, 1  ;;  %vm6867_vm15 = vcmp.eq.s32.totalorder %v6581_v27, 1 }
 0x45c   : > { %v7123_v42 = vsel %vm6867_vm15, %v16137_v24, -1e+30  ;;  %v7124_v30 = vsel %vm6868_vm3, %v15132_v35, -1e+30 }
 0x45d   : > { %v15424_v63 = vmax.f32 %v7123_v42, %v7363_v33   ;;  %v15426_v62 = vmax.f32 %v7124_v30, %v7364_v7   ;;  %v16153_v33 = vld [vmem:[#allocation9_spill] sm:$0xff]  ;;  %v7372_v7 = vmax.f32 %v15380_v3, %v16154_v58  ;;  %v16156_v30 = vld [vmem:[#allocation6_spill] sm:$0xff] }
 0x45e   : > { %v6590_v4 = vpop.permute.xlu1 %6589  ;;  %v6587_v37 = vpop.permute.xlu0 %6586  ;;  %v7371_v61 = vmax.f32 %v15375_v12, %v16153_v33  ;;  %v7524_v33 = vld [vmem:[%s15641_s5] sm:$0xff] (%p15499_p1) }
 0x45f   : > { %v16138_v32 = vmov %v15424_v63  ;;  %v16139_v17 = vmov %v15426_v62  ;;  %vm6870_vm5 = vcmp.eq.s32.totalorder %v6590_v4, 1  ;;  %vm6869_vm4 = vcmp.eq.s32.totalorder %v6587_v37, 1 }
 0x460   : > { %v7126_v31 = vsel %vm6870_vm5, %v15130_v47, -1e+30  ;;  %v7125_v22 = vsel %vm6869_vm4, %v16142_v25, -1e+30  ;;  %v7374_v63 = vmax.f32 %v15387_v14, %v16156_v30  ;;  %v16161_v14 = vld [vmem:[#allocation4_spill] sm:$0xff]  ;;  %v16184_v30 = vmov %v16138_v32 }
 0x461   : > { %v15434_v41 = vmax.f32 %v7126_v31, %v7366_v60   ;;  %v15436_v18 = vmax.f32 %v7125_v22, %v7365_v56   ;;  %v7376_v56 = vmax.f32 %v15404_v0, %v16161_v14 }
 0x462   : > { %v6596_v6 = vpop.permute.xlu1 %6595  ;;  %v6593_v26 = vpop.permute.xlu0 %6592 }
 0x463   : > { %v16143_v35 = vmov %v15434_v41  ;;  %v16144_v1 = vmov %v15436_v18  ;;  %vm6872_vm6 = vcmp.eq.s32.totalorder %v6596_v6, 1  ;;  %vm6871_vm8 = vcmp.eq.s32.totalorder %v6593_v26, 1  ;;  %v16164_v6 = vld [vmem:[#allocation2_spill] sm:$0xff] }
 0x464   : > { %v7127_v34 = vsel %vm6871_vm8, %v15150_v43, -1e+30  ;;  %v7128_v47 = vsel %vm6872_vm6, %v15164_v46, -1e+30  ;;  %v7378_v26 = vmax.f32 %v15411_v51, %v16164_v6  ;;  %v9955_v51 = vmov (%p15499_p1), 0  }
 0x465   : > { %v15444_v60 = vmax.f32 %v7127_v34, %v7367_v55   ;;  %v15446_v31 = vmax.f32 %v7128_v47, %v7368_v50   ;;  %v16183_v47 = vmov %v16139_v17  ;;  %9681 = vset.pattern.permute.xlu1 (%p15499_p1), %v9955_v51  ;;  %9680 = vset.pattern.permute.xlu0 (%p15499_p1), %v9955_v51  ;;  %v7399_v34 = vld [vmem:[%s15639_s3 + $0x20] sm:$0xff] (%p15499_p1) }
 0x466   : > { %v6602_v41 = vpop.permute.xlu1 %6601  ;;  %v6599_v18 = vpop.permute.xlu0 %6598  ;;  %v7402_v47 = vld [vmem:[%s15639_s3 + $0x38] sm:$0xff] (%p15499_p1) }
 0x467   : > { %v16147_v28 = vmov %v15444_v60  ;;  %v16148_v48 = vmov %v15446_v31  ;;  %vm6874_vm7 = vcmp.eq.s32.totalorder %v6602_v41, 1  ;;  %vm6873_vm9 = vcmp.eq.s32.totalorder %v6599_v18, 1  ;;  %v16160_v60 = vld [vmem:[#allocation5_spill] sm:$0xff] }
 0x468   : > { %v7130_v36 = vsel %vm6874_vm7, %v15162_v20, -1e+30  ;;  %v7129_v43 = vsel %vm6873_vm9, %v15146_v23, -1e+30  ;;  %v7375_v52 = vmax.f32 %v15399_v19, %v16160_v60  ;;  %v7377_v19 = vmax.f32 %v15416_v49, %v16165_v21  ;;  %v7398_v49 = vld [vmem:[%s15639_s3 + $0x18] sm:$0xff] (%p15499_p1) }
 0x469   : > { %v15454_v46 = vmax.f32 %v7130_v36, %v7370_v5   ;;  %v15456_v62 = vmax.f32 %v7129_v43, %v7369_v8   ;;  %v16180_v60 = vmov %v16147_v28  ;;  %v16181_v41 = vmov %v16143_v35  ;;  %v7403_v5 = vld [vmem:[%s15639_s3 + $0x40] sm:$0xff] (%p15499_p1)  ;;  %v7405_v8 = vld [vmem:[%s15639_s3 + $0x50] sm:$0xff] (%p15499_p1)  ;;  %v7408_v36 = vld [vmem:[%s15639_s3 + $0x68] sm:$0xff] (%p15499_p1) }
 0x46a   : > { %v6608_v27 = vpop.permute.xlu1 %6607  ;;  %v6605_v39 = vpop.permute.xlu0 %6604  ;;  %v16182_v18 = vmov %v16144_v1  ;;  %v7401_v41 = vld [vmem:[%s15639_s3 + $0x30] sm:$0xff] (%p15499_p1) }
 0x46b   : > { %v16151_v10 = vmov %v15454_v46  ;;  %v16152_v2 = vmov %v15456_v62  ;;  %vm6876_vm10 = vcmp.eq.s32.totalorder %v6608_v27, 1  ;;  %vm6875_vm11 = vcmp.eq.s32.totalorder %v6605_v39, 1  ;;  %v16157_v62 = vld [vmem:[#allocation7_spill] sm:$0xff]  ;;  %v7410_v27 = vld [vmem:[%s15639_s3 + $0x78] sm:$0xff] (%p15499_p1)  ;;  %v7409_v39 = vld [vmem:[%s15639_s3 + $0x70] sm:$0xff] (%p15499_p1) }
 0x46c   : > { %v7131_v13 = vsel %vm6875_vm11, %v15182_v15, -1e+30  ;;  %v7132_v20 = vsel %vm6876_vm10, %v15196_v59, -1e+30  ;;  %v7373_v12 = vmax.f32 %v15392_v29, %v16157_v62  ;;  %v16178_v62 = vmov %v16152_v2 }
 0x46d   : > { %v15464_v24 = vmax.f32 %v7131_v13, %v7371_v61   ;;  %v15466_v57 = vmax.f32 %v7132_v20, %v7372_v7   ;;  %v9956_v18 = vmov (%p15499_p1), 0.0|0.0   ;;  %v9958_v61 = vmov (%p15499_p1), 0.0  }
 0x46e   : > { %v6614_v46 = vpop.permute.xlu1 %6613  ;;  %v6611_v42 = vpop.permute.xlu0 %6610  ;;  %9091 = vmatprep.subr.bf16.mxu0 (%p15499_p1), %v9956_v18  ;;  %9088 = vmatprep.mubr.msk.f32.mxu0 (%p15499_p1), %vm9957_vm0, %v9958_v61 }
 0x46f   : > { %v16155_v23 = vmov %v15466_v57  ;;  %vm6878_vm13 = vcmp.eq.s32.totalorder %v6614_v46, 1  ;;  %vm6877_vm14 = vcmp.eq.s32.totalorder %v6611_v42, 1  ;;  %v16176_v20 = vmov %v15464_v24 }
 0x470   : > { %v7134_v3 = vsel %vm6878_vm13, %v15194_v40, -1e+30  ;;  %v7133_v15 = vsel %vm6877_vm14, %v15178_v53, -1e+30  ;;  %v16175_v57 = vmov %v16155_v23  ;;  %v16177_v46 = vmov %v16151_v10 }
 0x471   : > { %v15474_v42 = vmax.f32 %v7134_v3, %v7374_v63   ;;  %v15476_v50 = vmax.f32 %v7133_v15, %v7373_v12   ;;  %v7404_v57 = vld [vmem:[%s15639_s3 + $0x48] sm:$0xff] (%p15499_p1) }
 0x472   : > { %v6620_v37 = vpop.permute.xlu1 %6619  ;;  %v6617_v45 = vpop.permute.xlu0 %6616 }
 0x473   : > { %v16158_v59 = vmov %v15474_v42  ;;  %v16159_v4 = vmov %v15476_v50  ;;  %vm6880_vm1 = vcmp.eq.s32.totalorder %v6620_v37, 1  ;;  %vm6879_vm12 = vcmp.eq.s32.totalorder %v6617_v45, 1 }
 0x474   : > { %v7135_v29 = vsel %vm6879_vm12, %v15214_v38, -1e+30  ;;  %v7136_v40 = vsel %vm6880_vm1, %v15228_v11, -1e+30  ;;  %v16173_v42 = vmov %v16158_v59  ;;  %v16174_v50 = vmov %v16159_v4 }
 0x475   : > { %v15484_v52 = vmax.f32 %v7135_v29, %v7375_v52   ;;  %v15486_v63 = vmax.f32 %v7136_v40, %v7376_v56   ;;  %v7400_v50 = vld [vmem:[%s15639_s3 + $0x28] sm:$0xff] (%p15499_p1) }
 0x476   : > { %v6626_v31 = vpop.permute.xlu1 %6625  ;;  %v6623_v22 = vpop.permute.xlu0 %6622  ;;  %2689 = sbr.rel (!%p15499_p1) target bundleno = 501 (0x1f5), region = 71 }
 0x477   : > { %v16162_v53 = vmov %v15484_v52  ;;  %v16163_v25 = vmov %v15486_v63  ;;  %vm6882_vm2 = vcmp.eq.s32.totalorder %v6626_v31, 1  ;;  %vm6881_vm3 = vcmp.eq.s32.totalorder %v6623_v22, 1 }
 0x478   : > { %v7138_v0 = vsel %vm6882_vm2, %v15226_v9, -1e+30  ;;  %v7137_v38 = vsel %vm6881_vm3, %v15210_v54, -1e+30  ;;  %v16171_v63 = vmov %v16163_v25  ;;  %v16172_v52 = vmov %v16162_v53  ;;  %v7397_v54 = vld [vmem:[%s15639_s3 + $0x10] sm:$0xff] (%p15499_p1)  ;;  %v7395_v9 = vld [vmem:[%s15639_s3] sm:$0xff] (%p15499_p1) }
 0x479   : > { %v15494_v21 = vmax.f32 %v7138_v0, %v7378_v26   ;;  %v15496_v43 = vmax.f32 %v7137_v38, %v7377_v19   ;;  %v16179_v31 = vmov %v16148_v48  ;;  %7423 = vperm.xlu1 (%p15499_p1), %9681, %v7397_v54   ;;  %7413 = vperm.xlu0 (%p15499_p1), %9680, %v7395_v9  }
 0x47b   : > { %v16166_v11 = vmov %v15494_v21  ;;  %v16167_v55 = vmov %v15496_v43 }
 0x47c   : > { %v16169_v21 = vmov %v16166_v11  ;;  %v16170_v43 = vmov %v16167_v55 }
 0x47d   :  { %7428 = vperm.xlu1 %9681, %v7398_v49   ;;  %7418 = vperm.xlu0 %9680, %v7396_v44   ;;  %v7407_v43 = vld [vmem:[%s15639_s3 + $0x60] sm:$0xff] }
 0x481   :  { %7438 = vperm.xlu1 %9681, %v7400_v50   ;;  %7433 = vperm.xlu0 %9680, %v7399_v34  }
 0x485   :  { %7448 = vperm.xlu1 %9681, %v7402_v47   ;;  %7443 = vperm.xlu0 %9680, %v7401_v41  }
 0x489   :  { %7458 = vperm.xlu1 %9681, %v7404_v57   ;;  %7453 = vperm.xlu0 %9680, %v7403_v5  }
 0x48d   :  { %7468 = vperm.xlu1 %9681, %v7406_v16   ;;  %7463 = vperm.xlu0 %9680, %v7405_v8  }
 0x491   :  { %7478 = vperm.xlu1 %9681, %v7408_v36   ;;  %7473 = vperm.xlu0 %9680, %v7407_v43   ;;  %v7523_v43 = vld [vmem:[%s15640_s4] sm:$0xff] }
 0x495   :  { %7488 = vperm.xlu1 %9681, %v7410_v27   ;;  %7483 = vperm.xlu0 %9680, %v7409_v39  }
 0x499   :  { %7527 = vperm.xlu0 %9680, %v7524_v33  }
 0x4f8   :  { %v7424_v58 = vpop.permute.xlu1 %7423  ;;  %v7414_v7 = vpop.permute.xlu0 %7413 }
 0x4f9   :  { %v7491_v13 = vadd.f32 %v7414_v7, %v16138_v32  ;;  %v7493_v20 = vadd.f32 %v7424_v58, %v16144_v1 }
 0x4fb   :  { %v7507_v62 = vmax.f32 %v7491_v13, 0.0  ;;  %v7509_v3 = vmax.f32 %v7493_v20, 0.0 }
 0x4fc   :  { %v7429_v46 = vpop.permute.xlu1 %7428  ;;  %v7419_v42 = vpop.permute.xlu0 %7418 }
 0x4fd   :  { %v7494_v30 = vadd.f32 %v7429_v46, %v16143_v35  ;;  %v7492_v63 = vadd.f32 %v7419_v42, %v16139_v17 }
 0x4ff   :  { %v7508_v12 = vmax.f32 %v7492_v63, 0.0  ;;  %v7510_v15 = vmax.f32 %v7494_v30, 0.0 }
 0x500   :  { %v7439_v37 = vpop.permute.xlu1 %7438  ;;  %v7434_v45 = vpop.permute.xlu0 %7433 }
 0x501   :  { %v7496_v60 = vadd.f32 %v7439_v37, %v16148_v48  ;;  %v7495_v52 = vadd.f32 %v7434_v45, %v16147_v28  ;;  %v9092_v14 = vpack.c.bf16 %v7508_v12, %v7507_v62  ;;  %v9095_v32 = vpack.c.bf16 %v7510_v15, %v7509_v3 }
 0x503   :  { %9093 = vmatpush3.bf16.msra.mxu0 %v9092_v14  ;;  %v7512_v35 = vmax.f32 %v7496_v60, 0.0  ;;  %v7511_v29 = vmax.f32 %v7495_v52, 0.0 }
 0x504   :  { %v7449_v1 = vpop.permute.xlu1 %7448  ;;  %v7444_v56 = vpop.permute.xlu0 %7443  ;;  %9094 = vmatprep.subr.bf16.mxu0 %v9956_v18 }
 0x505   :  { %v7498_v17 = vadd.f32 %v7449_v1, %v16151_v10  ;;  %v7497_v40 = vadd.f32 %v7444_v56, %v16152_v2  ;;  %v9098_v28 = vpack.c.bf16 %v7512_v35, %v7511_v29 }
 0x507   :  { %9096 = vmatpush3.bf16.msra.mxu0 %v9095_v32  ;;  %v7514_v31 = vmax.f32 %v7498_v17, 0.0  ;;  %v7513_v22 = vmax.f32 %v7497_v40, 0.0 }
 0x508   :  { %v7459_v6 = vpop.permute.xlu1 %7458  ;;  %v7454_v48 = vpop.permute.xlu0 %7453  ;;  %9097 = vmatprep.subr.bf16.mxu0 %v9956_v18 }
 0x509   :  { %v7500_v26 = vadd.f32 %v7459_v6, %v16155_v23  ;;  %v7499_v21 = vadd.f32 %v7454_v48, %v15464_v24  ;;  %v9101_v19 = vpack.c.bf16 %v7514_v31, %v7513_v22 }
 0x50b   :  { %9099 = vmatpush3.bf16.msra.mxu0 %v9098_v28  ;;  %v7516_v10 = vmax.f32 %v7500_v26, 0.0  ;;  %v7515_v2 = vmax.f32 %v7499_v21, 0.0 }
 0x50c   :  { %v7469_v0 = vpop.permute.xlu1 %7468  ;;  %v7464_v38 = vpop.permute.xlu0 %7463  ;;  %9100 = vmatprep.subr.bf16.mxu0 %v9956_v18 }
 0x50d   :  { %v7502_v54 = vadd.f32 %v7469_v0, %v16158_v59  ;;  %v7501_v9 = vadd.f32 %v7464_v38, %v16159_v4  ;;  %v9104_v24 = vpack.c.bf16 %v7516_v10, %v7515_v2 }
 0x50f   :  { %9102 = vmatpush3.bf16.msra.mxu0 %v9101_v19  ;;  %v7518_v51 = vmax.f32 %v7502_v54, 0.0  ;;  %v7517_v49 = vmax.f32 %v7501_v9, 0.0 }
 0x510   :  { %v7479_v44 = vpop.permute.xlu1 %7478  ;;  %v7474_v50 = vpop.permute.xlu0 %7473  ;;  %9103 = vmatprep.subr.bf16.mxu0 %v9956_v18 }
 0x511   :  { %v7504_v23 = vadd.f32 %v7479_v44, %v16163_v25  ;;  %v7503_v34 = vadd.f32 %v7474_v50, %v16162_v53  ;;  %v9107_v47 = vpack.c.bf16 %v7518_v51, %v7517_v49 }
 0x513   :  { %9105 = vmatpush3.bf16.msra.mxu0 %v9104_v24  ;;  %v7520_v59 = vmax.f32 %v7504_v23, 0.0  ;;  %v7519_v4 = vmax.f32 %v7503_v34, 0.0 }
 0x514   :  { %v7489_v41 = vpop.permute.xlu1 %7488  ;;  %v7484_v57 = vpop.permute.xlu0 %7483  ;;  %9106 = vmatprep.subr.bf16.mxu0 %v9956_v18 }
 0x515   :  { %v7506_v5 = vadd.f32 %v7489_v41, %v16166_v11  ;;  %v7505_v16 = vadd.f32 %v7484_v57, %v16167_v55  ;;  %v9110_v8 = vpack.c.bf16 %v7520_v59, %v7519_v4 }
 0x517   :  { %9108 = vmatpush3.bf16.msra.mxu0 %v9107_v47  ;;  %v7522_v36 = vmax.f32 %v7506_v5, 0.0  ;;  %v7521_v25 = vmax.f32 %v7505_v16, 0.0 }
 0x518   :  { %9109 = vmatprep.subr.bf16.mxu0 %v9956_v18  ;;  %v7528_v27 = vpop.permute.xlu0 %7527 }
 0x519   :  { %v9113_v53 = vpack.c.bf16 %v7522_v36, %v7521_v25 }
 0x51b   :  { %9111 = vmatpush3.bf16.msra.mxu0 %v9110_v8 }
 0x51c   :  { %9112 = vmatprep.subr.bf16.mxu0 %v9956_v18 }
 0x51f   :  { %9114 = vmatpush3.bf16.msra.mxu0 %v9113_v53 }
 0x522   :  { %9089 = vmatmul.mubr.f32.vlgmr.msra.gmra.mrb[0].mxu0 %v7523_v43 }
 0x5f5   :  { %v7596_v11 = vpop.f32.mrb[0].mxu0 }
 0x5f6   :  { %v7597_v39 = vadd.f32 %v7596_v11, %v7528_v27  ;;  %v9090_v55 = vpop.f32.mrb[1].mxu0 }
 0x5f8   :  { %7600 = vst [vmem:[%s15642_s6] sm:$0xff] %v7597_v39 }

</bundles_post_ra>
